<compile_context>
chip_gen: v6e
topology: v6e:2x2x1
jax: 0.10.0
libtpu: 0.0.40
codegen_flags: <defaults>
</compile_context>

<pallas_src>
import math
from functools import partial

import jax
import jax.numpy as jnp
from jax.experimental import pallas as pl
from jax.experimental.pallas import tpu as pltpu


# Explicit scoped-VMEM budget: safe on v5e/v6e (128 MiB phys) and v7x (64 MiB).
_VMEM_LIMIT = 32 * 1024 * 1024


def _pick_tile(dim, target, align):
    """Largest tile <= target that exactly divides `dim` and is a multiple of
    `align`; falls back to the full dim (full-extent blocks are always legal).
    NOTE: the full-dim fallback can exceed the VMEM budget for adversarial
    (prime-ish) dims; SAM2/Hiera shapes are powers of two so this never fires
    there."""
    if dim <= target:
        return dim
    t = (min(target, dim) // align) * align
    while t >= align:
        if dim % t == 0:
            return t
        t -= align
    return dim


# ----------------------------------------------------------------------------
# Tiled linear:  y = x @ w + b   (bf16 inputs, f32 accumulation)
# ----------------------------------------------------------------------------
def _linear_kernel(x_ref, w_ref, b_ref, o_ref, acc_ref):
    k = pl.program_id(2)

    @pl.when(k == 0)
    def _():
        acc_ref[...] = jnp.zeros(acc_ref.shape, jnp.float32)

    acc_ref[...] += jnp.dot(
        x_ref[...], w_ref[...], preferred_element_type=jnp.float32
    )

    @pl.when(k == pl.num_programs(2) - 1)
    def _():
        # Bias is added once, at the finalize step (not per K block).
        o_ref[...] = (acc_ref[...] + b_ref[...]).astype(o_ref.dtype)


def pallas_linear(x2d, w, b2d, *, out_dtype=jnp.float32, tm=512, tn=512, tk=512):
    """x2d: (M, K) bf16, w: (K, N) bf16 (pre-transposed), b2d: (1, N) f32."""
    M, K = x2d.shape
    N = w.shape[1]
    tm = _pick_tile(M, tm, 16)     # bf16 min sublane tile is 16
    tn = _pick_tile(N, tn, 128)
    tk = _pick_tile(K, tk, 128)
    grid = (M // tm, N // tn, K // tk)
    return pl.pallas_call(
        _linear_kernel,
        out_shape=jax.ShapeDtypeStruct((M, N), out_dtype),
        grid=grid,
        in_specs=[
            pl.BlockSpec((tm, tk), lambda i, j, k: (i, k)),
            pl.BlockSpec((tk, tn), lambda i, j, k: (k, j)),
            pl.BlockSpec((1, tn), lambda i, j, k: (0, j)),
        ],
        out_specs=pl.BlockSpec((tm, tn), lambda i, j, k: (i, j)),
        scratch_shapes=[pltpu.VMEM((tm, tn), jnp.float32)],
        compiler_params=pltpu.CompilerParams(
            dimension_semantics=("parallel", "parallel", "arbitrary"),
            vmem_limit_bytes=_VMEM_LIMIT,
        ),
    )(x2d, w, b2d)


# ----------------------------------------------------------------------------
# Flash-style attention (online softmax over Lk tiles, heads batched per step)
# ----------------------------------------------------------------------------
def _attn_kernel(q_ref, k_ref, v_ref, o_ref, m_ref, l_ref, acc_ref, *,
                 num_heads):
    kv = pl.program_id(2)

    @pl.when(kv == 0)
    def _():
        m_ref[...] = jnp.full(m_ref.shape, -jnp.inf, jnp.float32)
        l_ref[...] = jnp.zeros(l_ref.shape, jnp.float32)
        acc_ref[...] = jnp.zeros(acc_ref.shape, jnp.float32)

    C = q_ref.shape[-1]
    hd = C // num_heads

    # All heads of this batch element run back-to-back inside one grid step
    # (unrolled at trace time); the 1/sqrt(hd) scale is already folded into
    # the qkv weights, so q is used as-is.
    # TODO(synk): for num_heads >= ~4 switch this to a lax.fori_loop over the
    # head axis (bounds live ranges); head_dim that is not 64/128-aligned may
    # also force per-head lane relayouts — pad head_dim in the weights then.
    for h in range(num_heads):
        sl = slice(h * hd, (h + 1) * hd)
        qh = q_ref[:, sl]                  # (tq, hd) bf16
        kh = k_ref[:, sl]
        vh = v_ref[:, sl]

        # q . k^T without materializing a transpose: contract the last dims.
        s = jax.lax.dot_general(
            qh, kh, (((1,), (1,)), ((), ())),
            preferred_element_type=jnp.float32,
        )                                   # (tq, tk) f32

        m_prev = m_ref[h]                                   # (tq, 128) lane-dense
        s_max = jnp.max(s, axis=-1, keepdims=True)          # (tq, 1)
        m_new = jnp.maximum(m_prev, s_max)                  # (tq, 128)
        alpha = jnp.exp(m_prev - m_new)                     # (tq, 128)
        p = jnp.exp(s - m_new[:, :1])                       # (tq, tk)
        # Lane-dense stores to m/l scratch (no masked vst in the hot loop).
        l_ref[h] = alpha * l_ref[h] + jnp.sum(p, axis=-1, keepdims=True)
        acc_ref[h] = alpha[:, :1] * acc_ref[h] + jnp.dot(
            p.astype(vh.dtype), vh, preferred_element_type=jnp.float32
        )
        m_ref[h] = m_new

    @pl.when(kv == pl.num_programs(2) - 1)
    def _():
        outs = []
        for h in range(num_heads):
            inv_l = pl.reciprocal(l_ref[h][:, :1], approx=True)   # EUP, ~free
            outs.append(acc_ref[h] * inv_l)
        # Lane-dense store: heads folded back into the last dim (tq, nh*hd).
        o_ref[...] = jnp.concatenate(outs, axis=-1).astype(o_ref.dtype)


def pallas_attention(q_src, k_src, v_src, *, num_heads, dim_out,
                     q_col=0, k_col=0, v_col=0, tq=256, tk=512):
    """Flash attention where q/k/v are read as dim_out-wide column slabs of
    their source tensors (last-axis *block* indices q_col/k_col/v_col).

    Fused path:   q_src = k_src = v_src = qkv (B, L, 3*dim_out), cols (0,1,2).
    Pooled path:  q_src = pooled q (B, Lq, dim_out), k/v_src = qkv, cols (0,1,2).
    Fallback:     separate q/k/v tensors, cols (0,0,0).
    Returns softmax(q k^T) v per head (scale pre-folded), (B, Lq, dim_out) bf16.
    """
    B, Lq, _ = q_src.shape
    Lk = k_src.shape[1]
    hd = dim_out // num_heads
    tq = _pick_tile(Lq, tq, 16)
    tk = _pick_tile(Lk, tk, 128)
    kernel = partial(_attn_kernel, num_heads=num_heads)
    return pl.pallas_call(
        kernel,
        out_shape=jax.ShapeDtypeStruct((B, Lq, dim_out), jnp.bfloat16),
        grid=(B, Lq // tq, Lk // tk),
        in_specs=[
            pl.BlockSpec((None, tq, dim_out), lambda b, qi, ki: (b, qi, q_col)),
            pl.BlockSpec((None, tk, dim_out), lambda b, qi, ki: (b, ki, k_col)),
            pl.BlockSpec((None, tk, dim_out), lambda b, qi, ki: (b, ki, v_col)),
        ],
        out_specs=pl.BlockSpec((None, tq, dim_out), lambda b, qi, ki: (b, qi, 0)),
        scratch_shapes=[
            pltpu.VMEM((num_heads, tq, 128), jnp.float32),  # running max (lane-dense)
            pltpu.VMEM((num_heads, tq, 128), jnp.float32),  # running denom (lane-dense)
            pltpu.VMEM((num_heads, tq, hd), jnp.float32),   # output accumulator
        ],
        compiler_params=pltpu.CompilerParams(
            dimension_semantics=("parallel", "parallel", "arbitrary"),
            vmem_limit_bytes=_VMEM_LIMIT,
        ),
    )(q_src, k_src, v_src)


# ----------------------------------------------------------------------------
# Parameter prep (ONCE, outside jit): transpose, cast, fold attention scale
# ----------------------------------------------------------------------------
def prepare_params(params, num_heads):
    """params = (w_qkv (3*dim_out, dim), b_qkv (3*dim_out,),
                 w_proj (dim_out, dim_out), b_proj (dim_out,))  [nn.Linear layout].
    Returns pre-transposed bf16 weights and f32 (1,N) biases, with the
    1/sqrt(head_dim) attention scale folded into the q slab of the qkv proj
    (max-pool commutes with a positive scale, so the pooled branch stays exact)."""
    w_qkv, b_qkv, w_proj, b_proj = params
    dim_out = w_proj.shape[0]
    hd = dim_out // num_heads
    scale = 1.0 / math.sqrt(hd)
    sv = jnp.concatenate([
        jnp.full((dim_out,), scale, jnp.float32),
        jnp.ones((2 * dim_out,), jnp.float32),
    ])
    wq = (w_qkv.astype(jnp.float32) * sv[:, None]).T.astype(jnp.bfloat16)  # (dim, 3*dim_out)
    bq = (b_qkv.astype(jnp.float32) * sv).reshape(1, -1)                    # (1, 3*dim_out)
    wp = w_proj.astype(jnp.float32).T.astype(jnp.bfloat16)                  # (dim_out, dim_out)
    bp = b_proj.astype(jnp.float32).reshape(1, -1)                          # (1, dim_out)
    return (wq, bq, wp, bp)


# ----------------------------------------------------------------------------
# MultiScaleAttention forward (glue in plain JAX, hot paths in Pallas)
# ----------------------------------------------------------------------------
def multi_scale_attention(x, prepared, num_heads, use_q_pool):
    """x: (B, H, W, dim) f32 NHWC. Returns (B, H', W', dim_out) f32."""
    B, H, W, dim = x.shape
    wq, bq, wp, bp = prepared
    dim_out = wp.shape[0]

    # qkv projection: nn.Linear(dim, 3*dim_out), bf16 MXU / f32 accumulation.
    xb = x.astype(jnp.bfloat16).reshape(B * H * W, dim)
    qkv = pallas_linear(xb, wq, bq, out_dtype=jnp.bfloat16)
    qkv = qkv.reshape(B, H * W, 3 * dim_out)
    # A qkv row is laid out as [3, num_heads, head_dim] (same as the PyTorch
    # reshape + unbind), so q/k/v are contiguous dim_out-wide column slabs.

    # Fused path needs the dim_out-wide block of the 3*dim_out axis to sit on
    # lane-tile boundaries; otherwise fall back to explicit q/k/v slices.
    fused = (dim_out % 128 == 0)

    Hq, Wq = H, W
    if use_q_pool:
        # do_pool with nn.MaxPool2d(kernel_size=2, stride=2): exact NHWC
        # equivalent via reshape + max over 2x2 windows (assumes even H, W).
        # TODO(synk): fuse the 2x2 max-pool into the qkv kernel epilogue to
        # avoid this extra q round trip through HBM.
        qf = qkv[:, :, :dim_out].reshape(B, H, W, dim_out)
        qf = qf.reshape(B, H // 2, 2, W // 2, 2, dim_out).max(axis=(2, 4))
        Hq, Wq = H // 2, W // 2
        q_src = qf.reshape(B, Hq * Wq, dim_out)
        if fused:
            o = pallas_attention(q_src, qkv, qkv, num_heads=num_heads,
                                 dim_out=dim_out, q_col=0, k_col=1, v_col=2)
        else:
            k = qkv[:, :, dim_out:2 * dim_out]
            v = qkv[:, :, 2 * dim_out:]
            o = pallas_attention(q_src, k, v, num_heads=num_heads,
                                 dim_out=dim_out)
    else:
        if fused:
            # No slice copies at all: q/k/v are read out of qkv by the kernel.
            o = pallas_attention(qkv, qkv, qkv, num_heads=num_heads,
                                 dim_out=dim_out, q_col=0, k_col=1, v_col=2)
        else:
            q = qkv[:, :, :dim_out]
            k = qkv[:, :, dim_out:2 * dim_out]
            v = qkv[:, :, 2 * dim_out:]
            o = pallas_attention(q, k, v, num_heads=num_heads, dim_out=dim_out)

    # output projection: nn.Linear(dim_out, dim_out).
    out = pallas_linear(o.reshape(B * Hq * Wq, dim_out), wp, bp,
                        out_dtype=jnp.float32)
    return out.reshape(B, Hq, Wq, dim_out)


# Pure-JAX f32 reference for a numerical sanity check.
def multi_scale_attention_ref(x, params, num_heads, use_q_pool):
    B, H, W, dim = x.shape
    w_qkv, b_qkv, w_proj, b_proj = params
    dim_out = w_proj.shape[0]
    hd = dim_out // num_heads
    qkv = x.reshape(B * H * W, dim) @ w_qkv.T + b_qkv
    qkv = qkv.reshape(B, H * W, 3, num_heads, hd)
    q, k, v = qkv[:, :, 0], qkv[:, :, 1], qkv[:, :, 2]
    Hq, Wq = H, W
    if use_q_pool:
        qf = q.reshape(B, H, W, dim_out)
        qf = qf.reshape(B, H // 2, 2, W // 2, 2, dim_out).max(axis=(2, 4))
        Hq, Wq = H // 2, W // 2
        q = qf.reshape(B, Hq * Wq, num_heads, hd)
    qt, kt, vt = (t.transpose(0, 2, 1, 3) for t in (q, k, v))
    s = jnp.einsum("bhqd,bhkd->bhqk", qt, kt) / math.sqrt(hd)
    p = jax.nn.softmax(s, axis=-1)
    o = jnp.einsum("bhqk,bhkd->bhqd", p, vt)
    o = o.transpose(0, 2, 1, 3).reshape(B * Hq * Wq, dim_out)
    o = o @ w_proj.T + b_proj
    return o.reshape(B, Hq, Wq, dim_out)


def _make_params(key, dim, dim_out):
    k1, k2, k3, k4 = jax.random.split(key, 4)
    # nn.Linear shapes: weight (out, in), bias (out,)
    w_qkv = jax.random.normal(k1, (3 * dim_out, dim), dtype=jnp.float32) * 0.05
    b_qkv = jax.random.normal(k2, (3 * dim_out,), dtype=jnp.float32) * 0.01
    w_proj = jax.random.normal(k3, (dim_out, dim_out), dtype=jnp.float32) * 0.05
    b_proj = jax.random.normal(k4, (dim_out,), dtype=jnp.float32) * 0.01
    return (w_qkv, b_qkv, w_proj, b_proj)


if __name__ == "__main__":
    key = jax.random.PRNGKey(0)
    kx1, kp1, kx2, kp2 = jax.random.split(key, 4)

    msa = jax.jit(multi_scale_attention, static_argnums=(2, 3))

    # Config A: dim_out multiple of 128 -> fused-qkv attention path
    # (q/k/v never sliced through HBM). Exercise both q_pool branches.
    B, H, W = 2, 16, 16
    dim, dim_out, num_heads = 96, 128, 2
    x = jax.random.normal(kx1, (B, H, W, dim), dtype=jnp.float32)
    params = _make_params(kp1, dim, dim_out)
    prepared = prepare_params(params, num_heads)
    for use_q_pool in (False, True):
        out = jax.block_until_ready(msa(x, prepared, num_heads, use_q_pool))
        ref = multi_scale_attention_ref(x, params, num_heads, use_q_pool)
        if not jnp.allclose(out, ref, atol=2e-2, rtol=2e-2):
            err = float(jnp.max(jnp.abs(out - ref)))
            raise AssertionError(
                f"[fused, pool={use_q_pool}] mismatch (max abs err {err})")

    # Config B: small dim_out (not 128-aligned) -> fallback slice path.
    B, H, W = 2, 8, 8
    dim, dim_out, num_heads = 32, 32, 2
    x = jax.random.normal(kx2, (B, H, W, dim), dtype=jnp.float32)
    params = _make_params(kp2, dim, dim_out)
    prepared = prepare_params(params, num_heads)
    out = jax.block_until_ready(msa(x, prepared, num_heads, False))
    ref = multi_scale_attention_ref(x, params, num_heads, False)
    if not jnp.allclose(out, ref, atol=2e-2, rtol=2e-2):
        err = float(jnp.max(jnp.abs(out - ref)))
        raise AssertionError(f"[fallback] mismatch (max abs err {err})")

    print("KERNEL_OK")
</pallas_src>

<mosaic_0001>
module attributes {stable_mosaic.version = 11 : i64} {
  func.func @_linear_kernel(%arg0: i32, %arg1: i32, %arg2: i32, %arg3: memref<512x128xbf16, #tpu.memory_space<vmem>>, %arg4: memref<128x128xbf16, #tpu.memory_space<vmem>>, %arg5: memref<1x128xf32, #tpu.memory_space<vmem>>, %arg6: memref<512x128xf32, #tpu.memory_space<vmem>>, %arg7: memref<512x128xf32, #tpu.memory_space<vmem>>) attributes {dimension_semantics = [#tpu.dimension_semantics<parallel>, #tpu.dimension_semantics<parallel>, #tpu.dimension_semantics<arbitrary>], iteration_bounds = array<i64: 1, 1, 1>, scalar_prefetch = 0 : i64, scratch_operands = 1 : i64, tpu.core_type = #tpu.core_type<tc>, window_params = [{transform_indices = @transform_0, window_bounds = array<i64: 512, 128>}, {transform_indices = @transform_1, window_bounds = array<i64: 128, 128>}, {transform_indices = @transform_2, window_bounds = array<i64: 1, 128>}, {transform_indices = @transform_3, window_bounds = array<i64: 512, 128>}]} {
    %c0_i32 = arith.constant 0 : i32
    %0 = arith.cmpi eq, %arg2, %c0_i32 : i32
    %1 = arith.extui %0 : i1 to i32
    %c0_i32_0 = arith.constant 0 : i32
    %2 = arith.cmpi ne, %1, %c0_i32_0 : i32
    scf.if %2 {
      %cst_10 = arith.constant 0.000000e+00 : f32
      %12 = vector.broadcast %cst_10 : f32 to vector<512x128xf32>
      %c0_11 = arith.constant 0 : index
      %c0_12 = arith.constant 0 : index
      %13 = vector.load %arg7[%c0_11, %c0_12] : memref<512x128xf32, #tpu.memory_space<vmem>>, vector<512x128xf32>
      tpu.vector_store %arg7[%c0_11, %c0_12], %12 {strides = array<i32>} : memref<512x128xf32, #tpu.memory_space<vmem>>, vector<512x128xf32>,
    } else {
    }
    %c0 = arith.constant 0 : index
    %c0_1 = arith.constant 0 : index
    %3 = vector.load %arg7[%c0, %c0_1] : memref<512x128xf32, #tpu.memory_space<vmem>>, vector<512x128xf32>
    %c0_2 = arith.constant 0 : index
    %c0_3 = arith.constant 0 : index
    %4 = vector.load %arg3[%c0_2, %c0_3] : memref<512x128xbf16, #tpu.memory_space<vmem>>, vector<512x128xbf16>
    %c0_4 = arith.constant 0 : index
    %c0_5 = arith.constant 0 : index
    %5 = vector.load %arg4[%c0_4, %c0_5] : memref<128x128xbf16, #tpu.memory_space<vmem>>, vector<128x128xbf16>
    %cst = arith.constant dense<0.000000e+00> : vector<512x128xf32>
    %6 = tpu.matmul %4, %5, %cst {dimension_numbers = #tpu.dot_dimension_numbers<[1], [0], [0], [1], [0, 0, 1, 1], [], []>} : vector<512x128xbf16>, vector<128x128xbf16>, vector<512x128xf32> -> vector<512x128xf32>
    %7 = arith.addf %3, %6 : vector<512x128xf32>
    %c0_6 = arith.constant 0 : index
    %c0_7 = arith.constant 0 : index
    %8 = vector.load %arg7[%c0_6, %c0_7] : memref<512x128xf32, #tpu.memory_space<vmem>>, vector<512x128xf32>
    tpu.vector_store %arg7[%c0_6, %c0_7], %7 {strides = array<i32>} : memref<512x128xf32, #tpu.memory_space<vmem>>, vector<512x128xf32>,
    %c0_i32_8 = arith.constant 0 : i32
    %9 = arith.cmpi eq, %arg2, %c0_i32_8 : i32
    %10 = arith.extui %9 : i1 to i32
    %c0_i32_9 = arith.constant 0 : i32
    %11 = arith.cmpi ne, %10, %c0_i32_9 : i32
    scf.if %11 {
      %c0_10 = arith.constant 0 : index
      %c0_11 = arith.constant 0 : index
      %12 = vector.load %arg7[%c0_10, %c0_11] : memref<512x128xf32, #tpu.memory_space<vmem>>, vector<512x128xf32>
      %c0_12 = arith.constant 0 : index
      %c0_13 = arith.constant 0 : index
      %13 = vector.load %arg5[%c0_12, %c0_13] : memref<1x128xf32, #tpu.memory_space<vmem>>, vector<1x128xf32>
      %14 = vector.broadcast %13 : vector<1x128xf32> to vector<512x128xf32>
      %15 = arith.addf %12, %14 : vector<512x128xf32>
      %c0_14 = arith.constant 0 : index
      %c0_15 = arith.constant 0 : index
      %16 = vector.load %arg6[%c0_14, %c0_15] : memref<512x128xf32, #tpu.memory_space<vmem>>, vector<512x128xf32>
      tpu.vector_store %arg6[%c0_14, %c0_15], %15 {strides = array<i32>} : memref<512x128xf32, #tpu.memory_space<vmem>>, vector<512x128xf32>,
    } else {
    }
    return
  }
  func.func @transform_0(%arg0: i32, %arg1: i32, %arg2: i32) -> (i32, i32) {
    %c0_i32 = arith.constant 0 : i32
    return %arg0, %arg2 : i32, i32
  }
  func.func @transform_1(%arg0: i32, %arg1: i32, %arg2: i32) -> (i32, i32) {
    %c0_i32 = arith.constant 0 : i32
    return %arg2, %arg1 : i32, i32
  }
  func.func @transform_2(%arg0: i32, %arg1: i32, %arg2: i32) -> (i32, i32) {
    %c0_i32 = arith.constant 0 : i32
    %c0_i32_0 = arith.constant 0 : i32
    return %c0_i32, %arg1 : i32, i32
  }
  func.func @transform_3(%arg0: i32, %arg1: i32, %arg2: i32) -> (i32, i32) {
    %c0_i32 = arith.constant 0 : i32
    return %arg0, %arg1 : i32, i32
  }
}

module attributes {stable_mosaic.version = 11 : i64} {
  func.func @_linear_kernel(%arg0: i32, %arg1: i32, %arg2: i32, %arg3: memref<512x96xbf16, #tpu.memory_space<vmem>>, %arg4: memref<96x384xbf16, #tpu.memory_space<vmem>>, %arg5: memref<1x384xf32, #tpu.memory_space<vmem>>, %arg6: memref<512x384xbf16, #tpu.memory_space<vmem>>, %arg7: memref<512x384xf32, #tpu.memory_space<vmem>>) attributes {dimension_semantics = [#tpu.dimension_semantics<parallel>, #tpu.dimension_semantics<parallel>, #tpu.dimension_semantics<arbitrary>], iteration_bounds = array<i64: 1, 1, 1>, scalar_prefetch = 0 : i64, scratch_operands = 1 : i64, tpu.core_type = #tpu.core_type<tc>, window_params = [{transform_indices = @transform_0, window_bounds = array<i64: 512, 96>}, {transform_indices = @transform_1, window_bounds = array<i64: 96, 384>}, {transform_indices = @transform_2, window_bounds = array<i64: 1, 384>}, {transform_indices = @transform_3, window_bounds = array<i64: 512, 384>}]} {
    %c0_i32 = arith.constant 0 : i32
    %0 = arith.cmpi eq, %arg2, %c0_i32 : i32
    %1 = arith.extui %0 : i1 to i32
    %c0_i32_0 = arith.constant 0 : i32
    %2 = arith.cmpi ne, %1, %c0_i32_0 : i32
    scf.if %2 {
      %cst_10 = arith.constant 0.000000e+00 : f32
      %12 = vector.broadcast %cst_10 : f32 to vector<512x384xf32>
      %c0_11 = arith.constant 0 : index
      %c0_12 = arith.constant 0 : index
      %13 = vector.load %arg7[%c0_11, %c0_12] : memref<512x384xf32, #tpu.memory_space<vmem>>, vector<512x384xf32>
      tpu.vector_store %arg7[%c0_11, %c0_12], %12 {strides = array<i32>} : memref<512x384xf32, #tpu.memory_space<vmem>>, vector<512x384xf32>,
    } else {
    }
    %c0 = arith.constant 0 : index
    %c0_1 = arith.constant 0 : index
    %3 = vector.load %arg7[%c0, %c0_1] : memref<512x384xf32, #tpu.memory_space<vmem>>, vector<512x384xf32>
    %c0_2 = arith.constant 0 : index
    %c0_3 = arith.constant 0 : index
    %4 = vector.load %arg3[%c0_2, %c0_3] : memref<512x96xbf16, #tpu.memory_space<vmem>>, vector<512x96xbf16>
    %c0_4 = arith.constant 0 : index
    %c0_5 = arith.constant 0 : index
    %5 = vector.load %arg4[%c0_4, %c0_5] : memref<96x384xbf16, #tpu.memory_space<vmem>>, vector<96x384xbf16>
    %cst = arith.constant dense<0.000000e+00> : vector<512x384xf32>
    %6 = tpu.matmul %4, %5, %cst {dimension_numbers = #tpu.dot_dimension_numbers<[1], [0], [0], [1], [0, 0, 1, 1], [], []>} : vector<512x96xbf16>, vector<96x384xbf16>, vector<512x384xf32> -> vector<512x384xf32>
    %7 = arith.addf %3, %6 : vector<512x384xf32>
    %c0_6 = arith.constant 0 : index
    %c0_7 = arith.constant 0 : index
    %8 = vector.load %arg7[%c0_6, %c0_7] : memref<512x384xf32, #tpu.memory_space<vmem>>, vector<512x384xf32>
    tpu.vector_store %arg7[%c0_6, %c0_7], %7 {strides = array<i32>} : memref<512x384xf32, #tpu.memory_space<vmem>>, vector<512x384xf32>,
    %c0_i32_8 = arith.constant 0 : i32
    %9 = arith.cmpi eq, %arg2, %c0_i32_8 : i32
    %10 = arith.extui %9 : i1 to i32
    %c0_i32_9 = arith.constant 0 : i32
    %11 = arith.cmpi ne, %10, %c0_i32_9 : i32
    scf.if %11 {
      %c0_10 = arith.constant 0 : index
      %c0_11 = arith.constant 0 : index
      %12 = vector.load %arg7[%c0_10, %c0_11] : memref<512x384xf32, #tpu.memory_space<vmem>>, vector<512x384xf32>
      %c0_12 = arith.constant 0 : index
      %c0_13 = arith.constant 0 : index
      %13 = vector.load %arg5[%c0_12, %c0_13] : memref<1x384xf32, #tpu.memory_space<vmem>>, vector<1x384xf32>
      %14 = vector.broadcast %13 : vector<1x384xf32> to vector<512x384xf32>
      %15 = arith.addf %12, %14 : vector<512x384xf32>
      %16 = arith.truncf %15 : vector<512x384xf32> to vector<512x384xbf16>
      %c0_14 = arith.constant 0 : index
      %c0_15 = arith.constant 0 : index
      %17 = vector.load %arg6[%c0_14, %c0_15] : memref<512x384xbf16, #tpu.memory_space<vmem>>, vector<512x384xbf16>
      tpu.vector_store %arg6[%c0_14, %c0_15], %16 {strides = array<i32>} : memref<512x384xbf16, #tpu.memory_space<vmem>>, vector<512x384xbf16>,
    } else {
    }
    return
  }
  func.func @transform_0(%arg0: i32, %arg1: i32, %arg2: i32) -> (i32, i32) {
    %c0_i32 = arith.constant 0 : i32
    return %arg0, %arg2 : i32, i32
  }
  func.func @transform_1(%arg0: i32, %arg1: i32, %arg2: i32) -> (i32, i32) {
    %c0_i32 = arith.constant 0 : i32
    return %arg2, %arg1 : i32, i32
  }
  func.func @transform_2(%arg0: i32, %arg1: i32, %arg2: i32) -> (i32, i32) {
    %c0_i32 = arith.constant 0 : i32
    %c0_i32_0 = arith.constant 0 : i32
    return %c0_i32, %arg1 : i32, i32
  }
  func.func @transform_3(%arg0: i32, %arg1: i32, %arg2: i32) -> (i32, i32) {
    %c0_i32 = arith.constant 0 : i32
    return %arg0, %arg1 : i32, i32
  }
}

module attributes {stable_mosaic.version = 11 : i64} {
  func.func @_attn_kernel(%arg0: i32, %arg1: i32, %arg2: i32, %arg3: memref<1x256x128xbf16, #tpu.memory_space<vmem>>, %arg4: memref<1x256x128xbf16, #tpu.memory_space<vmem>>, %arg5: memref<1x256x128xbf16, #tpu.memory_space<vmem>>, %arg6: memref<1x256x128xbf16, #tpu.memory_space<vmem>>, %arg7: memref<2x256x128xf32, #tpu.memory_space<vmem>>, %arg8: memref<2x256x128xf32, #tpu.memory_space<vmem>>, %arg9: memref<2x256x64xf32, #tpu.memory_space<vmem>>) attributes {dimension_semantics = [#tpu.dimension_semantics<parallel>, #tpu.dimension_semantics<parallel>, #tpu.dimension_semantics<arbitrary>], iteration_bounds = array<i64: 2, 1, 1>, scalar_prefetch = 0 : i64, scratch_operands = 3 : i64, tpu.core_type = #tpu.core_type<tc>, window_params = [{transform_indices = @transform_0, window_bounds = array<i64: 1, 256, 128>}, {transform_indices = @transform_1, window_bounds = array<i64: 1, 256, 128>}, {transform_indices = @transform_2, window_bounds = array<i64: 1, 256, 128>}, {transform_indices = @transform_3, window_bounds = array<i64: 1, 256, 128>}]} {
    %c0_i32 = arith.constant 0 : i32
    %0 = arith.cmpi eq, %arg2, %c0_i32 : i32
    %1 = arith.extui %0 : i1 to i32
    %c0_i32_0 = arith.constant 0 : i32
    %2 = arith.cmpi ne, %1, %c0_i32_0 : i32
    scf.if %2 {
      %cst_61 = arith.constant 0xFF800000 : f32
      %92 = vector.broadcast %cst_61 : f32 to vector<2x256x128xf32>
      %c0_62 = arith.constant 0 : index
      %c0_63 = arith.constant 0 : index
      %c0_64 = arith.constant 0 : index
      %93 = vector.load %arg7[%c0_62, %c0_63, %c0_64] : memref<2x256x128xf32, #tpu.memory_space<vmem>>, vector<2x256x128xf32>
      tpu.vector_store %arg7[%c0_62, %c0_63, %c0_64], %92 {strides = array<i32>} : memref<2x256x128xf32, #tpu.memory_space<vmem>>, vector<2x256x128xf32>,
      %cst_65 = arith.constant 0.000000e+00 : f32
      %94 = vector.broadcast %cst_65 : f32 to vector<2x256x128xf32>
      %c0_66 = arith.constant 0 : index
      %c0_67 = arith.constant 0 : index
      %c0_68 = arith.constant 0 : index
      %95 = vector.load %arg8[%c0_66, %c0_67, %c0_68] : memref<2x256x128xf32, #tpu.memory_space<vmem>>, vector<2x256x128xf32>
      tpu.vector_store %arg8[%c0_66, %c0_67, %c0_68], %94 {strides = array<i32>} : memref<2x256x128xf32, #tpu.memory_space<vmem>>, vector<2x256x128xf32>,
      %cst_69 = arith.constant 0.000000e+00 : f32
      %96 = vector.broadcast %cst_69 : f32 to vector<2x256x64xf32>
      %c0_70 = arith.constant 0 : index
      %c0_71 = arith.constant 0 : index
      %c0_72 = arith.constant 0 : index
      %97 = vector.load %arg9[%c0_70, %c0_71, %c0_72] : memref<2x256x64xf32, #tpu.memory_space<vmem>>, vector<2x256x64xf32>
      tpu.vector_store %arg9[%c0_70, %c0_71, %c0_72], %96 {strides = array<i32>} : memref<2x256x64xf32, #tpu.memory_space<vmem>>, vector<2x256x64xf32>,
    } else {
    }
    %c0 = arith.constant 0 : index
    %c0_1 = arith.constant 0 : index
    %c0_2 = arith.constant 0 : index
    %3 = vector.load %arg3[%c0, %c0_1, %c0_2] : memref<1x256x128xbf16, #tpu.memory_space<vmem>>, vector<1x256x64xbf16>
    %4 = vector.shape_cast %3 : vector<1x256x64xbf16> to vector<256x64xbf16>
    %c0_3 = arith.constant 0 : index
    %c0_4 = arith.constant 0 : index
    %c0_5 = arith.constant 0 : index
    %5 = vector.load %arg4[%c0_3, %c0_4, %c0_5] : memref<1x256x128xbf16, #tpu.memory_space<vmem>>, vector<1x256x64xbf16>
    %6 = vector.shape_cast %5 : vector<1x256x64xbf16> to vector<256x64xbf16>
    %c0_6 = arith.constant 0 : index
    %c0_7 = arith.constant 0 : index
    %c0_8 = arith.constant 0 : index
    %7 = vector.load %arg5[%c0_6, %c0_7, %c0_8] : memref<1x256x128xbf16, #tpu.memory_space<vmem>>, vector<1x256x64xbf16>
    %8 = vector.shape_cast %7 : vector<1x256x64xbf16> to vector<256x64xbf16>
    %cst = arith.constant dense<0.000000e+00> : vector<256x256xf32>
    %9 = tpu.matmul %4, %6, %cst {dimension_numbers = #tpu.dot_dimension_numbers<[1], [1], [0], [0], [0, 0, 1, 0], [], []>} : vector<256x64xbf16>, vector<256x64xbf16>, vector<256x256xf32> -> vector<256x256xf32>
    %c0_9 = arith.constant 0 : index
    %c0_10 = arith.constant 0 : index
    %c0_11 = arith.constant 0 : index
    %10 = vector.load %arg7[%c0_9, %c0_10, %c0_11] : memref<2x256x128xf32, #tpu.memory_space<vmem>>, vector<1x256x128xf32>
    %11 = vector.shape_cast %10 : vector<1x256x128xf32> to vector<256x128xf32>
    %cst_12 = arith.constant dense<0xFF800000> : vector<256xf32>
    %12 = vector.multi_reduction <maximumf>, %9, %cst_12 [1] : vector<256x256xf32> to vector<256xf32>
    %13 = vector.shape_cast %12 : vector<256xf32> to vector<256x1xf32>
    %14 = vector.broadcast %13 : vector<256x1xf32> to vector<256x128xf32>
    %15 = arith.maximumf %11, %14 : vector<256x128xf32>
    %16 = arith.subf %11, %15 : vector<256x128xf32>
    %17 = math.exp %16 : vector<256x128xf32>
    %18 = vector.extract_strided_slice %15 {offsets = [0, 0], sizes = [256, 1], strides = [1, 1]} : vector<256x128xf32> to vector<256x1xf32>
    %19 = vector.broadcast %18 : vector<256x1xf32> to vector<256x256xf32>
    %20 = arith.subf %9, %19 : vector<256x256xf32>
    %21 = math.exp %20 : vector<256x256xf32>
    %c0_13 = arith.constant 0 : index
    %c0_14 = arith.constant 0 : index
    %c0_15 = arith.constant 0 : index
    %22 = vector.load %arg8[%c0_13, %c0_14, %c0_15] : memref<2x256x128xf32, #tpu.memory_space<vmem>>, vector<1x256x128xf32>
    %23 = vector.shape_cast %22 : vector<1x256x128xf32> to vector<256x128xf32>
    %24 = arith.mulf %17, %23 : vector<256x128xf32>
    %cst_16 = arith.constant dense<0.000000e+00> : vector<256xf32>
    %25 = vector.multi_reduction <add>, %21, %cst_16 [1] : vector<256x256xf32> to vector<256xf32>
    %26 = vector.shape_cast %25 : vector<256xf32> to vector<256x1xf32>
    %27 = vector.broadcast %26 : vector<256x1xf32> to vector<256x128xf32>
    %28 = arith.addf %24, %27 : vector<256x128xf32>
    %c0_17 = arith.constant 0 : index
    %c0_18 = arith.constant 0 : index
    %c0_19 = arith.constant 0 : index
    %29 = vector.load %arg8[%c0_17, %c0_18, %c0_19] : memref<2x256x128xf32, #tpu.memory_space<vmem>>, vector<1x256x128xf32>
    %30 = vector.shape_cast %29 : vector<1x256x128xf32> to vector<256x128xf32>
    %31 = vector.shape_cast %28 : vector<256x128xf32> to vector<1x256x128xf32>
    tpu.vector_store %arg8[%c0_17, %c0_18, %c0_19], %31 {strides = array<i32>} : memref<2x256x128xf32, #tpu.memory_space<vmem>>, vector<1x256x128xf32>,
    %32 = vector.extract_strided_slice %17 {offsets = [0, 0], sizes = [256, 1], strides = [1, 1]} : vector<256x128xf32> to vector<256x1xf32>
    %c0_20 = arith.constant 0 : index
    %c0_21 = arith.constant 0 : index
    %c0_22 = arith.constant 0 : index
    %33 = vector.load %arg9[%c0_20, %c0_21, %c0_22] : memref<2x256x64xf32, #tpu.memory_space<vmem>>, vector<1x256x64xf32>
    %34 = vector.shape_cast %33 : vector<1x256x64xf32> to vector<256x64xf32>
    %35 = vector.broadcast %32 : vector<256x1xf32> to vector<256x64xf32>
    %36 = arith.mulf %35, %34 : vector<256x64xf32>
    %37 = arith.truncf %21 : vector<256x256xf32> to vector<256x256xbf16>
    %cst_23 = arith.constant dense<0.000000e+00> : vector<256x64xf32>
    %38 = tpu.matmul %37, %8, %cst_23 {dimension_numbers = #tpu.dot_dimension_numbers<[1], [0], [0], [1], [0, 0, 1, 1], [], []>} : vector<256x256xbf16>, vector<256x64xbf16>, vector<256x64xf32> -> vector<256x64xf32>
    %39 = arith.addf %36, %38 : vector<256x64xf32>
    %c0_24 = arith.constant 0 : index
    %c0_25 = arith.constant 0 : index
    %c0_26 = arith.constant 0 : index
    %40 = vector.load %arg9[%c0_24, %c0_25, %c0_26] : memref<2x256x64xf32, #tpu.memory_space<vmem>>, vector<1x256x64xf32>
    %41 = vector.shape_cast %40 : vector<1x256x64xf32> to vector<256x64xf32>
    %42 = vector.shape_cast %39 : vector<256x64xf32> to vector<1x256x64xf32>
    tpu.vector_store %arg9[%c0_24, %c0_25, %c0_26], %42 {strides = array<i32>} : memref<2x256x64xf32, #tpu.memory_space<vmem>>, vector<1x256x64xf32>,
    %c0_27 = arith.constant 0 : index
    %c0_28 = arith.constant 0 : index
    %c0_29 = arith.constant 0 : index
    %43 = vector.load %arg7[%c0_27, %c0_28, %c0_29] : memref<2x256x128xf32, #tpu.memory_space<vmem>>, vector<1x256x128xf32>
    %44 = vector.shape_cast %43 : vector<1x256x128xf32> to vector<256x128xf32>
    %45 = vector.shape_cast %15 : vector<256x128xf32> to vector<1x256x128xf32>
    tpu.vector_store %arg7[%c0_27, %c0_28, %c0_29], %45 {strides = array<i32>} : memref<2x256x128xf32, #tpu.memory_space<vmem>>, vector<1x256x128xf32>,
    %c0_30 = arith.constant 0 : index
    %c0_31 = arith.constant 0 : index
    %c64 = arith.constant 64 : index
    %46 = vector.load %arg3[%c0_30, %c0_31, %c64] : memref<1x256x128xbf16, #tpu.memory_space<vmem>>, vector<1x256x64xbf16>
    %47 = vector.shape_cast %46 : vector<1x256x64xbf16> to vector<256x64xbf16>
    %c0_32 = arith.constant 0 : index
    %c0_33 = arith.constant 0 : index
    %c64_34 = arith.constant 64 : index
    %48 = vector.load %arg4[%c0_32, %c0_33, %c64_34] : memref<1x256x128xbf16, #tpu.memory_space<vmem>>, vector<1x256x64xbf16>
    %49 = vector.shape_cast %48 : vector<1x256x64xbf16> to vector<256x64xbf16>
    %c0_35 = arith.constant 0 : index
    %c0_36 = arith.constant 0 : index
    %c64_37 = arith.constant 64 : index
    %50 = vector.load %arg5[%c0_35, %c0_36, %c64_37] : memref<1x256x128xbf16, #tpu.memory_space<vmem>>, vector<1x256x64xbf16>
    %51 = vector.shape_cast %50 : vector<1x256x64xbf16> to vector<256x64xbf16>
    %cst_38 = arith.constant dense<0.000000e+00> : vector<256x256xf32>
    %52 = tpu.matmul %47, %49, %cst_38 {dimension_numbers = #tpu.dot_dimension_numbers<[1], [1], [0], [0], [0, 0, 1, 0], [], []>} : vector<256x64xbf16>, vector<256x64xbf16>, vector<256x256xf32> -> vector<256x256xf32>
    %c1 = arith.constant 1 : index
    %c0_39 = arith.constant 0 : index
    %c0_40 = arith.constant 0 : index
    %53 = vector.load %arg7[%c1, %c0_39, %c0_40] : memref<2x256x128xf32, #tpu.memory_space<vmem>>, vector<1x256x128xf32>
    %54 = vector.shape_cast %53 : vector<1x256x128xf32> to vector<256x128xf32>
    %cst_41 = arith.constant dense<0xFF800000> : vector<256xf32>
    %55 = vector.multi_reduction <maximumf>, %52, %cst_41 [1] : vector<256x256xf32> to vector<256xf32>
    %56 = vector.shape_cast %55 : vector<256xf32> to vector<256x1xf32>
    %57 = vector.broadcast %56 : vector<256x1xf32> to vector<256x128xf32>
    %58 = arith.maximumf %54, %57 : vector<256x128xf32>
    %59 = arith.subf %54, %58 : vector<256x128xf32>
    %60 = math.exp %59 : vector<256x128xf32>
    %61 = vector.extract_strided_slice %58 {offsets = [0, 0], sizes = [256, 1], strides = [1, 1]} : vector<256x128xf32> to vector<256x1xf32>
    %62 = vector.broadcast %61 : vector<256x1xf32> to vector<256x256xf32>
    %63 = arith.subf %52, %62 : vector<256x256xf32>
    %64 = math.exp %63 : vector<256x256xf32>
    %c1_42 = arith.constant 1 : index
    %c0_43 = arith.constant 0 : index
    %c0_44 = arith.constant 0 : index
    %65 = vector.load %arg8[%c1_42, %c0_43, %c0_44] : memref<2x256x128xf32, #tpu.memory_space<vmem>>, vector<1x256x128xf32>
    %66 = vector.shape_cast %65 : vector<1x256x128xf32> to vector<256x128xf32>
    %67 = arith.mulf %60, %66 : vector<256x128xf32>
    %cst_45 = arith.constant dense<0.000000e+00> : vector<256xf32>
    %68 = vector.multi_reduction <add>, %64, %cst_45 [1] : vector<256x256xf32> to vector<256xf32>
    %69 = vector.shape_cast %68 : vector<256xf32> to vector<256x1xf32>
    %70 = vector.broadcast %69 : vector<256x1xf32> to vector<256x128xf32>
    %71 = arith.addf %67, %70 : vector<256x128xf32>
    %c1_46 = arith.constant 1 : index
    %c0_47 = arith.constant 0 : index
    %c0_48 = arith.constant 0 : index
    %72 = vector.load %arg8[%c1_46, %c0_47, %c0_48] : memref<2x256x128xf32, #tpu.memory_space<vmem>>, vector<1x256x128xf32>
    %73 = vector.shape_cast %72 : vector<1x256x128xf32> to vector<256x128xf32>
    %74 = vector.shape_cast %71 : vector<256x128xf32> to vector<1x256x128xf32>
    tpu.vector_store %arg8[%c1_46, %c0_47, %c0_48], %74 {strides = array<i32>} : memref<2x256x128xf32, #tpu.memory_space<vmem>>, vector<1x256x128xf32>,
    %75 = vector.extract_strided_slice %60 {offsets = [0, 0], sizes = [256, 1], strides = [1, 1]} : vector<256x128xf32> to vector<256x1xf32>
    %c1_49 = arith.constant 1 : index
    %c0_50 = arith.constant 0 : index
    %c0_51 = arith.constant 0 : index
    %76 = vector.load %arg9[%c1_49, %c0_50, %c0_51] : memref<2x256x64xf32, #tpu.memory_space<vmem>>, vector<1x256x64xf32>
    %77 = vector.shape_cast %76 : vector<1x256x64xf32> to vector<256x64xf32>
    %78 = vector.broadcast %75 : vector<256x1xf32> to vector<256x64xf32>
    %79 = arith.mulf %78, %77 : vector<256x64xf32>
    %80 = arith.truncf %64 : vector<256x256xf32> to vector<256x256xbf16>
    %cst_52 = arith.constant dense<0.000000e+00> : vector<256x64xf32>
    %81 = tpu.matmul %80, %51, %cst_52 {dimension_numbers = #tpu.dot_dimension_numbers<[1], [0], [0], [1], [0, 0, 1, 1], [], []>} : vector<256x256xbf16>, vector<256x64xbf16>, vector<256x64xf32> -> vector<256x64xf32>
    %82 = arith.addf %79, %81 : vector<256x64xf32>
    %c1_53 = arith.constant 1 : index
    %c0_54 = arith.constant 0 : index
    %c0_55 = arith.constant 0 : index
    %83 = vector.load %arg9[%c1_53, %c0_54, %c0_55] : memref<2x256x64xf32, #tpu.memory_space<vmem>>, vector<1x256x64xf32>
    %84 = vector.shape_cast %83 : vector<1x256x64xf32> to vector<256x64xf32>
    %85 = vector.shape_cast %82 : vector<256x64xf32> to vector<1x256x64xf32>
    tpu.vector_store %arg9[%c1_53, %c0_54, %c0_55], %85 {strides = array<i32>} : memref<2x256x64xf32, #tpu.memory_space<vmem>>, vector<1x256x64xf32>,
    %c1_56 = arith.constant 1 : index
    %c0_57 = arith.constant 0 : index
    %c0_58 = arith.constant 0 : index
    %86 = vector.load %arg7[%c1_56, %c0_57, %c0_58] : memref<2x256x128xf32, #tpu.memory_space<vmem>>, vector<1x256x128xf32>
    %87 = vector.shape_cast %86 : vector<1x256x128xf32> to vector<256x128xf32>
    %88 = vector.shape_cast %58 : vector<256x128xf32> to vector<1x256x128xf32>
    tpu.vector_store %arg7[%c1_56, %c0_57, %c0_58], %88 {strides = array<i32>} : memref<2x256x128xf32, #tpu.memory_space<vmem>>, vector<1x256x128xf32>,
    %c0_i32_59 = arith.constant 0 : i32
    %89 = arith.cmpi eq, %arg2, %c0_i32_59 : i32
    %90 = arith.extui %89 : i1 to i32
    %c0_i32_60 = arith.constant 0 : i32
    %91 = arith.cmpi ne, %90, %c0_i32_60 : i32
    scf.if %91 {
      %c0_61 = arith.constant 0 : index
      %c0_62 = arith.constant 0 : index
      %c0_63 = arith.constant 0 : index
      %92 = vector.load %arg8[%c0_61, %c0_62, %c0_63] : memref<2x256x128xf32, #tpu.memory_space<vmem>>, vector<1x256x128xf32>
      %93 = vector.shape_cast %92 : vector<1x256x128xf32> to vector<256x128xf32>
      %94 = vector.extract_strided_slice %93 {offsets = [0, 0], sizes = [256, 1], strides = [1, 1]} : vector<256x128xf32> to vector<256x1xf32>
      %95 = tpu.reciprocal %94 {approx = true} : vector<256x1xf32> -> vector<256x1xf32>
      %c0_64 = arith.constant 0 : index
      %c0_65 = arith.constant 0 : index
      %c0_66 = arith.constant 0 : index
      %96 = vector.load %arg9[%c0_64, %c0_65, %c0_66] : memref<2x256x64xf32, #tpu.memory_space<vmem>>, vector<1x256x64xf32>
      %97 = vector.shape_cast %96 : vector<1x256x64xf32> to vector<256x64xf32>
      %98 = vector.broadcast %95 : vector<256x1xf32> to vector<256x64xf32>
      %99 = arith.mulf %97, %98 : vector<256x64xf32>
      %c1_67 = arith.constant 1 : index
      %c0_68 = arith.constant 0 : index
      %c0_69 = arith.constant 0 : index
      %100 = vector.load %arg8[%c1_67, %c0_68, %c0_69] : memref<2x256x128xf32, #tpu.memory_space<vmem>>, vector<1x256x128xf32>
      %101 = vector.shape_cast %100 : vector<1x256x128xf32> to vector<256x128xf32>
      %102 = vector.extract_strided_slice %101 {offsets = [0, 0], sizes = [256, 1], strides = [1, 1]} : vector<256x128xf32> to vector<256x1xf32>
      %103 = tpu.reciprocal %102 {approx = true} : vector<256x1xf32> -> vector<256x1xf32>
      %c1_70 = arith.constant 1 : index
      %c0_71 = arith.constant 0 : index
      %c0_72 = arith.constant 0 : index
      %104 = vector.load %arg9[%c1_70, %c0_71, %c0_72] : memref<2x256x64xf32, #tpu.memory_space<vmem>>, vector<1x256x64xf32>
      %105 = vector.shape_cast %104 : vector<1x256x64xf32> to vector<256x64xf32>
      %106 = vector.broadcast %103 : vector<256x1xf32> to vector<256x64xf32>
      %107 = arith.mulf %105, %106 : vector<256x64xf32>
      %108 = tpu.concatenate %99, %107 in 1 : vector<256x64xf32>, vector<256x64xf32> -> vector<256x128xf32>
      %109 = arith.truncf %108 : vector<256x128xf32> to vector<256x128xbf16>
      %c0_73 = arith.constant 0 : index
      %c0_74 = arith.constant 0 : index
      %c0_75 = arith.constant 0 : index
      %110 = vector.load %arg6[%c0_73, %c0_74, %c0_75] : memref<1x256x128xbf16, #tpu.memory_space<vmem>>, vector<1x256x128xbf16>
      %111 = vector.shape_cast %110 : vector<1x256x128xbf16> to vector<256x128xbf16>
      %112 = vector.shape_cast %109 : vector<256x128xbf16> to vector<1x256x128xbf16>
      tpu.vector_store %arg6[%c0_73, %c0_74, %c0_75], %112 {strides = array<i32>} : memref<1x256x128xbf16, #tpu.memory_space<vmem>>, vector<1x256x128xbf16>,
    } else {
    }
    return
  }
  func.func @transform_0(%arg0: i32, %arg1: i32, %arg2: i32) -> (i32, i32, i32) {
    %c0_i32 = arith.constant 0 : i32
    %c0_i32_0 = arith.constant 0 : i32
    return %arg0, %arg1, %c0_i32 : i32, i32, i32
  }
  func.func @transform_1(%arg0: i32, %arg1: i32, %arg2: i32) -> (i32, i32, i32) {
    %c1_i32 = arith.constant 1 : i32
    %c0_i32 = arith.constant 0 : i32
    return %arg0, %arg2, %c1_i32 : i32, i32, i32
  }
  func.func @transform_2(%arg0: i32, %arg1: i32, %arg2: i32) -> (i32, i32, i32) {
    %c2_i32 = arith.constant 2 : i32
    %c0_i32 = arith.constant 0 : i32
    return %arg0, %arg2, %c2_i32 : i32, i32, i32
  }
  func.func @transform_3(%arg0: i32, %arg1: i32, %arg2: i32) -> (i32, i32, i32) {
    %c0_i32 = arith.constant 0 : i32
    %c0_i32_0 = arith.constant 0 : i32
    return %arg0, %arg1, %c0_i32 : i32, i32, i32
  }
}

</mosaic_0001>

<bundles_post_ra>
// kernel: multi_scale_attention.5
= control target key start
LH: loop header
LB: loop body
LE: loop exit
PB: predicated region body
PF: predicated region fallthrough
CT: control target
= control target key end

     0   :  { %s1560_s0 = inlined_call_operand.vmem [shape: bf16[512,128], index: 0, kind: input, shape index: {}]   ;;  %s1561_s1 = inlined_call_operand.vmem [shape: bf16[128,128], index: 1, kind: input, shape index: {}]   ;;  %s1562_s2 = inlined_call_operand.vmem [shape: f32[1,128], index: 2, kind: input, shape index: {}]   ;;  %s1563_s3 = inlined_call_operand.hbm [shape: f32[512,128], index: 3, kind: output, shape index: {}]  }
   0x1   :  { %v1283_v0 = vld [vmem:[%s1561_s1 + $0x38] sm:$0xff]   ;;  %v1284_v1 = vld [vmem:[%s1561_s1 + $0x30] sm:$0xff]   ;;  %v1285_v2 = vld [vmem:[%s1561_s1 + $0x28] sm:$0xff]  }
   0x2   :  { %1184 = vmatprep.subr.bf16.mxu0 %v1283_v0  ;;  %1264 = vmatprep.subr.bf16.mxu1 %v1283_v0  ;;  %v1286_v3 = vld [vmem:[%s1561_s1 + $0x20] sm:$0xff]   ;;  %v1287_v6 = vld [vmem:[%s1561_s1 + $0x18] sm:$0xff]   ;;  %v1288_v7 = vld [vmem:[%s1561_s1 + $0x10] sm:$0xff]  }
   0x3   :  { %1185 = vmatpush3.bf16.msra.mxu0 %v1283_v0  ;;  %1272 = vmatpush3.bf16.msra.mxu1 %v1283_v0  ;;  %v1291_v4 = vld [vmem:[%s1560_s0] sm:$0xff]   ;;  %v1289_v8 = vld [vmem:[%s1561_s1 + $0x8] sm:$0xff]   ;;  %v1295_v12 = vld [vmem:[%s1560_s0 + $0x10] sm:$0xff]  }
   0x4   :  { %1186 = vmatprep.subr.bf16.mxu0 %v1284_v1  ;;  %1265 = vmatprep.subr.bf16.mxu1 %v1284_v1  ;;  %v1292_v5 = vld [vmem:[%s1560_s0 + $0x80] sm:$0xff]   ;;  %v1293_v10 = vld [vmem:[%s1560_s0 + $0x8] sm:$0xff]   ;;  %v1296_v13 = vld [vmem:[%s1560_s0 + $0x90] sm:$0xff]  }
   0x5   :  { %1200 = vmatprep.mubr.bf16.mxu0 %v1291_v4  ;;  %1232 = vmatprep.mubr.bf16.mxu1 %v1292_v5  ;;  %v1290_v9 = vld [vmem:[%s1561_s1] sm:$0xff]   ;;  %v1294_v11 = vld [vmem:[%s1560_s0 + $0x88] sm:$0xff]   ;;  %v1297_v14 = vld [vmem:[%s1560_s0 + $0x18] sm:$0xff]  }
   0x6   :  { %v1298_v15 = vld [vmem:[%s1560_s0 + $0x98] sm:$0xff]   ;;  %v1299_v16 = vld [vmem:[%s1560_s0 + $0x20] sm:$0xff]  }
   0x7   :  { %1187 = vmatpush3.bf16.msra.mxu0 %v1284_v1  ;;  %1273 = vmatpush3.bf16.msra.mxu1 %v1284_v1  ;;  %v1300_v17 = vld [vmem:[%s1560_s0 + $0xa0] sm:$0xff]  }
   0x8   :  { %1188 = vmatprep.subr.bf16.mxu0 %v1285_v2  ;;  %1266 = vmatprep.subr.bf16.mxu1 %v1285_v2 }
   0xb   :  { %1189 = vmatpush3.bf16.msra.mxu0 %v1285_v2  ;;  %1274 = vmatpush3.bf16.msra.mxu1 %v1285_v2 }
   0xc   :  { %1190 = vmatprep.subr.bf16.mxu0 %v1286_v3  ;;  %1267 = vmatprep.subr.bf16.mxu1 %v1286_v3 }
   0xf   :  { %1191 = vmatpush3.bf16.msra.mxu0 %v1286_v3  ;;  %1275 = vmatpush3.bf16.msra.mxu1 %v1286_v3 }
  0x10   :  { %1192 = vmatprep.subr.bf16.mxu0 %v1287_v6  ;;  %1268 = vmatprep.subr.bf16.mxu1 %v1287_v6 }
  0x13   :  { %1193 = vmatpush3.bf16.msra.mxu0 %v1287_v6  ;;  %1276 = vmatpush3.bf16.msra.mxu1 %v1287_v6 }
  0x14   :  { %1194 = vmatprep.subr.bf16.mxu0 %v1288_v7  ;;  %1269 = vmatprep.subr.bf16.mxu1 %v1288_v7 }
  0x17   :  { %1195 = vmatpush3.bf16.msra.mxu0 %v1288_v7  ;;  %1277 = vmatpush3.bf16.msra.mxu1 %v1288_v7 }
  0x18   :  { %1196 = vmatprep.subr.bf16.mxu0 %v1289_v8  ;;  %1270 = vmatprep.subr.bf16.mxu1 %v1289_v8 }
  0x1b   :  { %1197 = vmatpush3.bf16.msra.mxu0 %v1289_v8  ;;  %1278 = vmatpush3.bf16.msra.mxu1 %v1289_v8 }
  0x1c   :  { %1198 = vmatprep.subr.bf16.mxu0 %v1290_v9  ;;  %1271 = vmatprep.subr.bf16.mxu1 %v1290_v9 }
  0x1f   :  { %1199 = vmatpush3.bf16.msra.mxu0 %v1290_v9  ;;  %1279 = vmatpush3.bf16.msra.mxu1 %v1290_v9 }
  0x22   :  { %1201 = vmatmul.mubr.bf16.vlgmr.msra.gmra.mxu0 %v1293_v10  ;;  %1233 = vmatmul.mubr.bf16.vlgmr.msra.gmra.mxu1 %v1294_v11 }
  0x23   :  { %1204 = vmatprep.mubr.bf16.mxu0 %v1295_v12  ;;  %1236 = vmatprep.mubr.bf16.mxu1 %v1296_v13 }
  0x24   :  { %8 = vsyncpa [#allocation4], 0  ;;  %v1301_v18 = vld [vmem:[%s1560_s0 + $0x28] sm:$0xff]   ;;  %v1303_v20 = vld [vmem:[%s1560_s0 + $0x30] sm:$0xff]  }
  0x25   :  { %v1302_v19 = vld [vmem:[%s1560_s0 + $0xa8] sm:$0xff]   ;;  %v1304_v21 = vld [vmem:[%s1560_s0 + $0xb0] sm:$0xff]   ;;  %v1305_v22 = vld [vmem:[%s1560_s0 + $0x38] sm:$0xff]  }
  0x26   :  { %v1306_v23 = vld [vmem:[%s1560_s0 + $0xb8] sm:$0xff]   ;;  %v1307_v24 = vld [vmem:[%s1560_s0 + $0x40] sm:$0xff]   ;;  %v1309_v26 = vld [vmem:[%s1560_s0 + $0x48] sm:$0xff]  }
  0x27   :  { %v1308_v25 = vld [vmem:[%s1560_s0 + $0xc0] sm:$0xff]   ;;  %v1310_v27 = vld [vmem:[%s1560_s0 + $0xc8] sm:$0xff]   ;;  %v1311_v28 = vld [vmem:[%s1560_s0 + $0x50] sm:$0xff]  }
  0x28   :  { %v1312_v29 = vld [vmem:[%s1560_s0 + $0xd0] sm:$0xff]   ;;  %v1313_v30 = vld [vmem:[%s1560_s0 + $0x58] sm:$0xff]   ;;  %v1315_v32 = vld [vmem:[%s1560_s0 + $0x60] sm:$0xff]  }
  0x29   :  { %v1314_v31 = vld [vmem:[%s1560_s0 + $0xd8] sm:$0xff]   ;;  %v1316_v33 = vld [vmem:[%s1560_s0 + $0xe0] sm:$0xff]   ;;  %v1317_v34 = vld [vmem:[%s1560_s0 + $0x68] sm:$0xff]  }
  0x2a   :  { %1205 = vmatmul.mubr.bf16.gmra.mxu0 %v1297_v14  ;;  %1237 = vmatmul.mubr.bf16.gmra.mxu1 %v1298_v15  ;;  %v1318_v35 = vld [vmem:[%s1560_s0 + $0xe8] sm:$0xff]   ;;  %v1319_v36 = vld [vmem:[%s1560_s0 + $0x70] sm:$0xff]   ;;  %v1321_v38 = vld [vmem:[%s1560_s0 + $0x78] sm:$0xff]  }
  0x2b   :  { %1208 = vmatprep.mubr.bf16.mxu0 %v1299_v16  ;;  %1240 = vmatprep.mubr.bf16.mxu1 %v1300_v17  ;;  %v1320_v37 = vld [vmem:[%s1560_s0 + $0xf0] sm:$0xff]   ;;  %v1322_v39 = vld [vmem:[%s1560_s0 + $0xf8] sm:$0xff]   ;;  %v1491_v40 = vld [vmem:[%s1562_s2] ss:$0 sm:$0xff]  ;;  %s1345_s0 = smov [#allocation3]  }
  0x2c   :  { %s1092_s2 = sshll.u32 %s1345_s0, 4  ;;  %s1093_s2 = int_to_ptr.vmem [resolvable:$true] %s1092_s2 }
  0x2d   :  { %s1323_s11 = scalar_lea.vmem %s1093_s2, 8192  ;;  %p1328_p1 = scmp.lt.s32.totalorder %s1093_s2, %s1093_s2 }
  0x2e   :  { %p1324_p0 = scmp.ne.s32.totalorder %s1093_s2, %s1323_s11  ;;  %p1329_p2 = scmp.lt.s32.totalorder %s1323_s11, %s1323_s11 }
  0x30   :  { %p1330_p3 = por %p1329_p2, %p1328_p1 }
  0x32   :  { %1209 = vmatmul.mubr.bf16.gmra.mxu0 %v1301_v18  ;;  %1241 = vmatmul.mubr.bf16.gmra.mxu1 %v1302_v19  ;;  %p1331_p4 = pnand %p1330_p3, %p1324_p0 }
  0x33   :  { %1212 = vmatprep.mubr.bf16.mxu0 %v1303_v20  ;;  %1244 = vmatprep.mubr.bf16.mxu1 %v1304_v21 }
  0x3a   :  { %1213 = vmatmul.mubr.bf16.gmra.mxu0 %v1305_v22  ;;  %1245 = vmatmul.mubr.bf16.gmra.mxu1 %v1306_v23 }
  0x3b   :  { %1216 = vmatprep.mubr.bf16.mxu0 %v1307_v24  ;;  %1248 = vmatprep.mubr.bf16.mxu1 %v1308_v25 }
  0x42   :  { %1217 = vmatmul.mubr.bf16.gmra.mxu0 %v1309_v26  ;;  %1249 = vmatmul.mubr.bf16.gmra.mxu1 %v1310_v27 }
  0x43   :  { %1220 = vmatprep.mubr.bf16.mxu0 %v1311_v28  ;;  %1252 = vmatprep.mubr.bf16.mxu1 %v1312_v29 }
  0x4a   :  { %1221 = vmatmul.mubr.bf16.gmra.mxu0 %v1313_v30  ;;  %1253 = vmatmul.mubr.bf16.gmra.mxu1 %v1314_v31 }
  0x4b   :  { %1224 = vmatprep.mubr.bf16.mxu0 %v1315_v32  ;;  %1256 = vmatprep.mubr.bf16.mxu1 %v1316_v33 }
  0x52   :  { %1225 = vmatmul.mubr.bf16.gmra.mxu0 %v1317_v34  ;;  %1257 = vmatmul.mubr.bf16.gmra.mxu1 %v1318_v35 }
  0x53   :  { %1228 = vmatprep.mubr.bf16.mxu0 %v1319_v36  ;;  %1260 = vmatprep.mubr.bf16.mxu1 %v1320_v37 }
  0x5a   :  { %1229 = vmatmul.mubr.bf16.gmra.mxu0 %v1321_v38  ;;  %1261 = vmatmul.mubr.bf16.gmra.mxu1 %v1322_v39 }
  0xe2   :  { %v1202_v41 = vpop.f32.mrf.mxu0  ;;  %v1234_v42 = vpop.f32.mrf.mxu1 }
  0xe3   :  { %v961_v43 = vadd.f32 %v1202_v41, %v1491_v40  ;;  %v993_v44 = vadd.f32 %v1234_v42, %v1491_v40 }
  0xe4   :  { %v502_v45 = vpop.f32.mrf.mxu0  ;;  %v630_v46 = vpop.f32.mrf.mxu1 }
  0xe5   :  { %1025 = vst [vmem:[#allocation3 + $0x10] sm:$0xff] %v961_v43  ;;  %1057 = vst [vmem:[#allocation3 + $0x110] sm:$0xff] %v993_v44  ;;  %v959_v47 = vadd.f32 %v1491_v40, %v502_v45  ;;  %v991_v48 = vadd.f32 %v1491_v40, %v630_v46 }
  0xe6   :  { %v1203_v49 = vpop.f32.mrf.mxu0  ;;  %v1235_v50 = vpop.f32.mrf.mxu1 }
  0xe7   :  { %1023 = vst [vmem:[#allocation3] sm:$0xff] %v959_v47  ;;  %1055 = vst [vmem:[#allocation3 + $0x100] sm:$0xff] %v991_v48  ;;  %v962_v51 = vadd.f32 %v1203_v49, %v1491_v40  ;;  %v994_v52 = vadd.f32 %v1235_v50, %v1491_v40 }
  0xe8   :  { %v505_v53 = vpop.f32.mrf.mxu0  ;;  %v633_v54 = vpop.f32.mrf.mxu1 }
  0xe9   :  { %1026 = vst [vmem:[#allocation3 + $0x18] sm:$0xff] %v962_v51  ;;  %1058 = vst [vmem:[#allocation3 + $0x118] sm:$0xff] %v994_v52  ;;  %v960_v55 = vadd.f32 %v1491_v40, %v505_v53  ;;  %v992_v56 = vadd.f32 %v1491_v40, %v633_v54 }
  0xea   :  { %v1206_v57 = vpop.f32.mrf.mxu0  ;;  %v1238_v58 = vpop.f32.mrf.mxu1 }
  0xeb   :  { %1024 = vst [vmem:[#allocation3 + $0x8] sm:$0xff] %v960_v55  ;;  %1056 = vst [vmem:[#allocation3 + $0x108] sm:$0xff] %v992_v56  ;;  %v965_v59 = vadd.f32 %v1206_v57, %v1491_v40  ;;  %v997_v60 = vadd.f32 %v1238_v58, %v1491_v40 }
  0xec   :  { %v518_v61 = vpop.f32.mrf.mxu0  ;;  %v646_v62 = vpop.f32.mrf.mxu1 }
  0xed   :  { %1029 = vst [vmem:[#allocation3 + $0x30] sm:$0xff] %v965_v59  ;;  %1061 = vst [vmem:[#allocation3 + $0x130] sm:$0xff] %v997_v60  ;;  %v963_v63 = vadd.f32 %v1491_v40, %v518_v61  ;;  %v995_v0 = vadd.f32 %v1491_v40, %v646_v62 }
  0xee   :  { %v1207_v1 = vpop.f32.mrf.mxu0  ;;  %v1239_v2 = vpop.f32.mrf.mxu1 }
  0xef   :  { %1027 = vst [vmem:[#allocation3 + $0x20] sm:$0xff] %v963_v63  ;;  %1059 = vst [vmem:[#allocation3 + $0x120] sm:$0xff] %v995_v0  ;;  %v966_v3 = vadd.f32 %v1207_v1, %v1491_v40  ;;  %v998_v4 = vadd.f32 %v1239_v2, %v1491_v40 }
  0xf0   :  { %v521_v5 = vpop.f32.mrf.mxu0  ;;  %v649_v6 = vpop.f32.mrf.mxu1 }
  0xf1   :  { %1030 = vst [vmem:[#allocation3 + $0x38] sm:$0xff] %v966_v3  ;;  %1062 = vst [vmem:[#allocation3 + $0x138] sm:$0xff] %v998_v4  ;;  %v964_v7 = vadd.f32 %v1491_v40, %v521_v5  ;;  %v996_v8 = vadd.f32 %v1491_v40, %v649_v6 }
  0xf2   :  { %v1210_v9 = vpop.f32.mrf.mxu0  ;;  %v1242_v10 = vpop.f32.mrf.mxu1 }
  0xf3   :  { %1028 = vst [vmem:[#allocation3 + $0x28] sm:$0xff] %v964_v7  ;;  %1060 = vst [vmem:[#allocation3 + $0x128] sm:$0xff] %v996_v8  ;;  %v969_v11 = vadd.f32 %v1210_v9, %v1491_v40  ;;  %v1001_v12 = vadd.f32 %v1242_v10, %v1491_v40 }
  0xf4   :  { %v534_v13 = vpop.f32.mrf.mxu0  ;;  %v662_v14 = vpop.f32.mrf.mxu1 }
  0xf5   :  { %1033 = vst [vmem:[#allocation3 + $0x50] sm:$0xff] %v969_v11  ;;  %1065 = vst [vmem:[#allocation3 + $0x150] sm:$0xff] %v1001_v12  ;;  %v967_v15 = vadd.f32 %v1491_v40, %v534_v13  ;;  %v999_v16 = vadd.f32 %v1491_v40, %v662_v14 }
  0xf6   :  { %v1211_v17 = vpop.f32.mrf.mxu0  ;;  %v1243_v18 = vpop.f32.mrf.mxu1 }
  0xf7   :  { %1031 = vst [vmem:[#allocation3 + $0x40] sm:$0xff] %v967_v15  ;;  %1063 = vst [vmem:[#allocation3 + $0x140] sm:$0xff] %v999_v16  ;;  %v970_v19 = vadd.f32 %v1211_v17, %v1491_v40  ;;  %v1002_v20 = vadd.f32 %v1243_v18, %v1491_v40 }
  0xf8   :  { %v537_v21 = vpop.f32.mrf.mxu0  ;;  %v665_v22 = vpop.f32.mrf.mxu1 }
  0xf9   :  { %1034 = vst [vmem:[#allocation3 + $0x58] sm:$0xff] %v970_v19  ;;  %1066 = vst [vmem:[#allocation3 + $0x158] sm:$0xff] %v1002_v20  ;;  %v968_v23 = vadd.f32 %v1491_v40, %v537_v21  ;;  %v1000_v24 = vadd.f32 %v1491_v40, %v665_v22 }
  0xfa   :  { %v1214_v25 = vpop.f32.mrf.mxu0  ;;  %v1246_v26 = vpop.f32.mrf.mxu1 }
  0xfb   :  { %1032 = vst [vmem:[#allocation3 + $0x48] sm:$0xff] %v968_v23  ;;  %1064 = vst [vmem:[#allocation3 + $0x148] sm:$0xff] %v1000_v24  ;;  %v973_v27 = vadd.f32 %v1214_v25, %v1491_v40  ;;  %v1005_v28 = vadd.f32 %v1246_v26, %v1491_v40 }
  0xfc   :  { %v550_v29 = vpop.f32.mrf.mxu0  ;;  %v678_v30 = vpop.f32.mrf.mxu1 }
  0xfd   :  { %1037 = vst [vmem:[#allocation3 + $0x70] sm:$0xff] %v973_v27  ;;  %1069 = vst [vmem:[#allocation3 + $0x170] sm:$0xff] %v1005_v28  ;;  %v971_v31 = vadd.f32 %v1491_v40, %v550_v29  ;;  %v1003_v32 = vadd.f32 %v1491_v40, %v678_v30 }
  0xfe   :  { %v1215_v33 = vpop.f32.mrf.mxu0  ;;  %v1247_v34 = vpop.f32.mrf.mxu1 }
  0xff   :  { %1035 = vst [vmem:[#allocation3 + $0x60] sm:$0xff] %v971_v31  ;;  %1067 = vst [vmem:[#allocation3 + $0x160] sm:$0xff] %v1003_v32  ;;  %v974_v35 = vadd.f32 %v1215_v33, %v1491_v40  ;;  %v1006_v36 = vadd.f32 %v1247_v34, %v1491_v40 }
 0x100   :  { %v553_v37 = vpop.f32.mrf.mxu0  ;;  %v681_v38 = vpop.f32.mrf.mxu1 }
 0x101   :  { %1038 = vst [vmem:[#allocation3 + $0x78] sm:$0xff] %v974_v35  ;;  %1070 = vst [vmem:[#allocation3 + $0x178] sm:$0xff] %v1006_v36  ;;  %v972_v39 = vadd.f32 %v1491_v40, %v553_v37  ;;  %v1004_v41 = vadd.f32 %v1491_v40, %v681_v38 }
 0x102   :  { %v1218_v42 = vpop.f32.mrf.mxu0  ;;  %v1250_v43 = vpop.f32.mrf.mxu1 }
 0x103   :  { %1036 = vst [vmem:[#allocation3 + $0x68] sm:$0xff] %v972_v39  ;;  %1068 = vst [vmem:[#allocation3 + $0x168] sm:$0xff] %v1004_v41  ;;  %v977_v44 = vadd.f32 %v1218_v42, %v1491_v40  ;;  %v1009_v45 = vadd.f32 %v1250_v43, %v1491_v40 }
 0x104   :  { %v566_v46 = vpop.f32.mrf.mxu0  ;;  %v694_v47 = vpop.f32.mrf.mxu1 }
 0x105   :  { %1041 = vst [vmem:[#allocation3 + $0x90] sm:$0xff] %v977_v44  ;;  %1073 = vst [vmem:[#allocation3 + $0x190] sm:$0xff] %v1009_v45  ;;  %v975_v48 = vadd.f32 %v1491_v40, %v566_v46  ;;  %v1007_v49 = vadd.f32 %v1491_v40, %v694_v47 }
 0x106   :  { %v1219_v50 = vpop.f32.mrf.mxu0  ;;  %v1251_v51 = vpop.f32.mrf.mxu1 }
 0x107   :  { %1039 = vst [vmem:[#allocation3 + $0x80] sm:$0xff] %v975_v48  ;;  %1071 = vst [vmem:[#allocation3 + $0x180] sm:$0xff] %v1007_v49  ;;  %v978_v52 = vadd.f32 %v1219_v50, %v1491_v40  ;;  %v1010_v53 = vadd.f32 %v1251_v51, %v1491_v40 }
 0x108   :  { %v569_v54 = vpop.f32.mrf.mxu0  ;;  %v697_v55 = vpop.f32.mrf.mxu1 }
 0x109   :  { %1042 = vst [vmem:[#allocation3 + $0x98] sm:$0xff] %v978_v52  ;;  %1074 = vst [vmem:[#allocation3 + $0x198] sm:$0xff] %v1010_v53  ;;  %v976_v56 = vadd.f32 %v1491_v40, %v569_v54  ;;  %v1008_v57 = vadd.f32 %v1491_v40, %v697_v55 }
 0x10a   :  { %v1222_v58 = vpop.f32.mrf.mxu0  ;;  %v1254_v59 = vpop.f32.mrf.mxu1 }
 0x10b   :  { %1040 = vst [vmem:[#allocation3 + $0x88] sm:$0xff] %v976_v56  ;;  %1072 = vst [vmem:[#allocation3 + $0x188] sm:$0xff] %v1008_v57  ;;  %v981_v60 = vadd.f32 %v1222_v58, %v1491_v40  ;;  %v1013_v61 = vadd.f32 %v1254_v59, %v1491_v40 }
 0x10c   :  { %v582_v62 = vpop.f32.mrf.mxu0  ;;  %v710_v63 = vpop.f32.mrf.mxu1 }
 0x10d   :  { %1045 = vst [vmem:[#allocation3 + $0xb0] sm:$0xff] %v981_v60  ;;  %1077 = vst [vmem:[#allocation3 + $0x1b0] sm:$0xff] %v1013_v61  ;;  %v979_v0 = vadd.f32 %v1491_v40, %v582_v62  ;;  %v1011_v1 = vadd.f32 %v1491_v40, %v710_v63 }
 0x10e   :  { %v1223_v2 = vpop.f32.mrf.mxu0  ;;  %v1255_v3 = vpop.f32.mrf.mxu1 }
 0x10f   :  { %1043 = vst [vmem:[#allocation3 + $0xa0] sm:$0xff] %v979_v0  ;;  %1075 = vst [vmem:[#allocation3 + $0x1a0] sm:$0xff] %v1011_v1  ;;  %v982_v4 = vadd.f32 %v1223_v2, %v1491_v40  ;;  %v1014_v5 = vadd.f32 %v1255_v3, %v1491_v40 }
 0x110   :  { %v585_v6 = vpop.f32.mrf.mxu0  ;;  %v713_v7 = vpop.f32.mrf.mxu1 }
 0x111   :  { %1046 = vst [vmem:[#allocation3 + $0xb8] sm:$0xff] %v982_v4  ;;  %1078 = vst [vmem:[#allocation3 + $0x1b8] sm:$0xff] %v1014_v5  ;;  %v980_v8 = vadd.f32 %v1491_v40, %v585_v6  ;;  %v1012_v9 = vadd.f32 %v1491_v40, %v713_v7 }
 0x112   :  { %v1226_v10 = vpop.f32.mrf.mxu0  ;;  %v1258_v11 = vpop.f32.mrf.mxu1 }
 0x113   :  { %1044 = vst [vmem:[#allocation3 + $0xa8] sm:$0xff] %v980_v8  ;;  %1076 = vst [vmem:[#allocation3 + $0x1a8] sm:$0xff] %v1012_v9  ;;  %v985_v12 = vadd.f32 %v1226_v10, %v1491_v40  ;;  %v1017_v13 = vadd.f32 %v1258_v11, %v1491_v40 }
 0x114   :  { %v598_v14 = vpop.f32.mrf.mxu0  ;;  %v726_v15 = vpop.f32.mrf.mxu1 }
 0x115   :  { %1049 = vst [vmem:[#allocation3 + $0xd0] sm:$0xff] %v985_v12  ;;  %1081 = vst [vmem:[#allocation3 + $0x1d0] sm:$0xff] %v1017_v13  ;;  %v983_v16 = vadd.f32 %v1491_v40, %v598_v14  ;;  %v1015_v17 = vadd.f32 %v1491_v40, %v726_v15 }
 0x116   :  { %v1227_v18 = vpop.f32.mrf.mxu0  ;;  %v1259_v19 = vpop.f32.mrf.mxu1 }
 0x117   :  { %1047 = vst [vmem:[#allocation3 + $0xc0] sm:$0xff] %v983_v16  ;;  %1079 = vst [vmem:[#allocation3 + $0x1c0] sm:$0xff] %v1015_v17  ;;  %v986_v20 = vadd.f32 %v1227_v18, %v1491_v40  ;;  %v1018_v21 = vadd.f32 %v1259_v19, %v1491_v40 }
 0x118   :  { %v601_v22 = vpop.f32.mrf.mxu0  ;;  %v729_v23 = vpop.f32.mrf.mxu1 }
 0x119   :  { %1050 = vst [vmem:[#allocation3 + $0xd8] sm:$0xff] %v986_v20  ;;  %1082 = vst [vmem:[#allocation3 + $0x1d8] sm:$0xff] %v1018_v21  ;;  %v984_v24 = vadd.f32 %v1491_v40, %v601_v22  ;;  %v1016_v25 = vadd.f32 %v1491_v40, %v729_v23 }
 0x11a   :  { %v1230_v26 = vpop.f32.mrf.mxu0  ;;  %v1262_v27 = vpop.f32.mrf.mxu1 }
 0x11b   :  { %1048 = vst [vmem:[#allocation3 + $0xc8] sm:$0xff] %v984_v24  ;;  %1080 = vst [vmem:[#allocation3 + $0x1c8] sm:$0xff] %v1016_v25  ;;  %v989_v28 = vadd.f32 %v1230_v26, %v1491_v40  ;;  %v1021_v29 = vadd.f32 %v1262_v27, %v1491_v40 }
 0x11c   :  { %v614_v30 = vpop.f32.mrf.mxu0  ;;  %v742_v31 = vpop.f32.mrf.mxu1 }
 0x11d   :  { %1053 = vst [vmem:[#allocation3 + $0xf0] sm:$0xff] %v989_v28  ;;  %1085 = vst [vmem:[#allocation3 + $0x1f0] sm:$0xff] %v1021_v29  ;;  %v987_v32 = vadd.f32 %v1491_v40, %v614_v30  ;;  %v1019_v33 = vadd.f32 %v1491_v40, %v742_v31 }
 0x11e   :  { %v1231_v34 = vpop.f32.mrf.mxu0  ;;  %v1263_v35 = vpop.f32.mrf.mxu1 }
 0x11f   :  { %1051 = vst [vmem:[#allocation3 + $0xe0] sm:$0xff] %v987_v32  ;;  %1083 = vst [vmem:[#allocation3 + $0x1e0] sm:$0xff] %v1019_v33  ;;  %v990_v36 = vadd.f32 %v1231_v34, %v1491_v40  ;;  %v1022_v37 = vadd.f32 %v1263_v35, %v1491_v40 }
 0x120   :  { %v617_v38 = vpop.f32.mrf.mxu0  ;;  %v745_v39 = vpop.f32.mrf.mxu1 }
 0x121   :  { %1054 = vst [vmem:[#allocation3 + $0xf8] sm:$0xff] %v990_v36  ;;  %1086 = vst [vmem:[#allocation3 + $0x1f8] sm:$0xff] %v1022_v37  ;;  %v988_v41 = vadd.f32 %v1491_v40, %v617_v38  ;;  %v1020_v42 = vadd.f32 %v1491_v40, %v745_v39 }
 0x123   :  { %1052 = vst [vmem:[#allocation3 + $0xe8] sm:$0xff] %v988_v41  ;;  %1084 = vst [vmem:[#allocation3 + $0x1e8] sm:$0xff] %v1020_v42 }
 0x124   :  { %1334 = shalt.err (!%p1331_p4)
}
 0x125   :  { %s1346_s1 = smov 128   ;;  %s1347_s12 = smov 8  }
 0x126   :  { %1098 = dma.vmem_to_hbm [thread:$0]  %s1093_s2, 8192, %s1563_s3, [#allocation4], %s1346_s1, %s1346_s1, %s1347_s12  }
 0x127   :  { %1343 = dma.done.wait [#allocation4], 8192  }
 0x128   :  { %1344 = vsyncadd [#allocation4], 4294959104 }
 0x129   :  { %1102 = vsyncpa [#allocation4], 1 }

// kernel: multi_scale_attention.3
= control target key start
LH: loop header
LB: loop body
LE: loop exit
PB: predicated region body
PF: predicated region fallthrough
CT: control target
= control target key end

     0   :  { %v3599_v1 = vmov 0   ;;  %vm747_vm0 = vcmask 785408   ;;  %v2067_v51 = vlaneseq  ;;  %s4497_s1 = inlined_call_operand.vmem [shape: bf16[96,384], index: 1, kind: input, shape index: {}]   ;;  %s4498_s0 = inlined_call_operand.vmem [shape: bf16[512,96], index: 0, kind: input, shape index: {}]   ;;  %s4499_s2 = inlined_call_operand.vmem [shape: f32[1,384], index: 2, kind: input, shape index: {}]   ;;  %s4500_s3 = inlined_call_operand.vmem [shape: bf16[512,384], index: 3, kind: output, shape index: {}]  }
   0x1   :  { %v3543_v0 = vld [vmem:[%s4497_s1 + $0x7c] ss:$12 sps:$4 sm:$0xff]   ;;  %876 = vmatprep.mubr.bf16.mxu0 %v3599_v1  ;;  %1116 = vmatprep.mubr.bf16.mxu1 %v3599_v1  ;;  %v3545_v2 = vld [vmem:[%s4497_s1 + $0x78] ss:$12 sps:$4 sm:$0xff]   ;;  %v3548_v4 = vld [vmem:[%s4497_s1 + $0x60] ss:$12 sps:$4 sm:$0xff]  }
   0x2   :  { %848 = vmatprep.subr.bf16.mxu0 %v3543_v0  ;;  %3530 = vmatprep.subr.bf16.mxu1 %v3543_v0  ;;  %v3546_v3 = vld [vmem:[%s4497_s1 + $0x64] ss:$12 sps:$4 sm:$0xff]   ;;  %v3549_v5 = vld [vmem:[%s4497_s1 + $0x4c] ss:$12 sps:$4 sm:$0xff]   ;;  %v3551_v6 = vld [vmem:[%s4497_s1 + $0x48] ss:$12 sps:$4 sm:$0xff]  }
   0x3   :  { %849 = vmatpush1.bf16.msra.mxu0 %v3545_v2  ;;  %3536 = vmatpush1.bf16.msra.mxu1 %v3545_v2  ;;  %v3552_v7 = vld [vmem:[%s4497_s1 + $0x34] ss:$12 sps:$4 sm:$0xff]   ;;  %v3554_v8 = vld [vmem:[%s4497_s1 + $0x30] ss:$12 sps:$4 sm:$0xff]   ;;  %v3557_v10 = vld [vmem:[%s4497_s1 + $0x18] ss:$12 sps:$4 sm:$0xff]  }
   0x4   :  { %850 = vmatprep.subr.bf16.mxu0 %v3546_v3  ;;  %3531 = vmatprep.subr.bf16.mxu1 %v3546_v3  ;;  %v3555_v9 = vld [vmem:[%s4497_s1 + $0x1c] ss:$12 sps:$4 sm:$0xff]   ;;  %v3558_v11 = vld [vmem:[%s4497_s1 + $0x4] ss:$12 sps:$4 sm:$0xff]   ;;  %v3560_v12 = vld [vmem:[%s4497_s1] ss:$12 sps:$4 sm:$0xff]  }
   0x5   :  { %v3563_v13 = vld [vmem:[%s4497_s1 + $0x80] ss:$12 sps:$4 sm:$0xff]   ;;  %v3566_v16 = vld [vmem:[%s4497_s1 + $0x68] ss:$12 sps:$4 sm:$0xff]   ;;  %v3569_v17 = vld [vmem:[%s4497_s1 + $0x50] ss:$12 sps:$4 sm:$0xff]  }
   0x6   :  { %v3664_v14 = vld [vmem:[%s4498_s0] sm:$0xff]   ;;  %v3564_v18 = vld [vmem:[%s4498_s0 + $0x8] sm:$0xff]   ;;  %v3567_v21 = vld [vmem:[%s4498_s0 + $0x10] sm:$0xff]   ;;  %v3899_v52 = vshrl.u32 %v2067_v51, 7 }
   0x7   :  { %851 = vmatpush1.bf16.msra.mxu0 %v3548_v4  ;;  %3537 = vmatpush1.bf16.msra.mxu1 %v3548_v4  ;;  %v3669_v15 = vld [vmem:[%s4498_s0 + $0xc0] sm:$0xff]   ;;  %v3689_v19 = vld [vmem:[%s4498_s0 + $0xc8] sm:$0xff]   ;;  %v3708_v23 = vld [vmem:[%s4498_s0 + $0xd0] sm:$0xff]  }
   0x8   :  { %852 = vmatprep.subr.bf16.mxu0 %v3549_v5  ;;  %3532 = vmatprep.subr.bf16.mxu1 %v3549_v5  ;;  %v3574_v20 = vld [vmem:[%s4497_s1 + $0x38] ss:$12 sps:$4 sm:$0xff]   ;;  %v3577_v22 = vld [vmem:[%s4497_s1 + $0x20] ss:$12 sps:$4 sm:$0xff]   ;;  %v3580_v24 = vld [vmem:[%s4497_s1 + $0x8] ss:$12 sps:$4 sm:$0xff]  }
   0x9   :  { %v3570_v25 = vld [vmem:[%s4498_s0 + $0x18] sm:$0xff]   ;;  %v3572_v27 = vld [vmem:[%s4498_s0 + $0x20] sm:$0xff]   ;;  %v3575_v29 = vld [vmem:[%s4498_s0 + $0x28] sm:$0xff]   ;;  %v2069_v53 = vsub.s32 0, %v3899_v52  ;;  %v2073_v54 = vsub.s32 1, %v3899_v52 }
   0xa   :  { %v3724_v26 = vld [vmem:[%s4498_s0 + $0xd8] sm:$0xff]   ;;  %v3737_v28 = vld [vmem:[%s4498_s0 + $0xe0] sm:$0xff]   ;;  %v3750_v30 = vld [vmem:[%s4498_s0 + $0xe8] sm:$0xff]  }
   0xb   :  { %853 = vmatpush1.bf16.msra.mxu0 %v3551_v6  ;;  %3538 = vmatpush1.bf16.msra.mxu1 %v3551_v6  ;;  %v3578_v31 = vld [vmem:[%s4498_s0 + $0x30] sm:$0xff]   ;;  %v3581_v33 = vld [vmem:[%s4498_s0 + $0x38] sm:$0xff]   ;;  %v3583_v35 = vld [vmem:[%s4498_s0 + $0x40] sm:$0xff]  }
   0xc   :  { %854 = vmatprep.subr.bf16.mxu0 %v3552_v7  ;;  %3533 = vmatprep.subr.bf16.mxu1 %v3552_v7  ;;  %v3763_v32 = vld [vmem:[%s4498_s0 + $0xf0] sm:$0xff]   ;;  %v3776_v34 = vld [vmem:[%s4498_s0 + $0xf8] sm:$0xff]   ;;  %v3584_v36 = vld [vmem:[%s4498_s0 + $0x48] sm:$0xff]  }
   0xd   :  { %v3585_v37 = vld [vmem:[%s4498_s0 + $0x50] sm:$0xff]   ;;  %v3586_v38 = vld [vmem:[%s4498_s0 + $0x58] sm:$0xff]   ;;  %v3587_v39 = vld [vmem:[%s4498_s0 + $0x60] sm:$0xff]  }
   0xe   :  { %v3588_v40 = vld [vmem:[%s4498_s0 + $0x68] sm:$0xff]   ;;  %v3589_v41 = vld [vmem:[%s4498_s0 + $0x70] sm:$0xff]   ;;  %v3590_v42 = vld [vmem:[%s4498_s0 + $0x78] sm:$0xff]  }
   0xf   :  { %855 = vmatpush1.bf16.msra.mxu0 %v3554_v8  ;;  %3539 = vmatpush1.bf16.msra.mxu1 %v3554_v8  ;;  %v3591_v43 = vld [vmem:[%s4498_s0 + $0x80] sm:$0xff]   ;;  %v3592_v44 = vld [vmem:[%s4498_s0 + $0x88] sm:$0xff]   ;;  %v3593_v45 = vld [vmem:[%s4498_s0 + $0x90] sm:$0xff]  }
  0x10   :  { %856 = vmatprep.subr.bf16.mxu0 %v3555_v9  ;;  %3534 = vmatprep.subr.bf16.mxu1 %v3555_v9  ;;  %v3594_v46 = vld [vmem:[%s4498_s0 + $0x98] sm:$0xff]   ;;  %v3595_v47 = vld [vmem:[%s4498_s0 + $0xa0] sm:$0xff]   ;;  %v3596_v48 = vld [vmem:[%s4498_s0 + $0xa8] sm:$0xff]  }
  0x11   :  { %v3597_v49 = vld [vmem:[%s4498_s0 + $0xb0] sm:$0xff]   ;;  %v3598_v50 = vld [vmem:[%s4498_s0 + $0xb8] sm:$0xff]   ;;  %v3909_v55 = vld [vmem:[%s4499_s2] sm:$0x7] }
  0x12   :  { %v3912_v56 = vrot.slane %v3909_v55, %v2069_v53  ;;  %v3915_v57 = vrot.slane %v3909_v55, %v2073_v54 }
  0x13   :  { %857 = vmatpush1.bf16.msra.mxu0 %v3557_v10  ;;  %3540 = vmatpush1.bf16.msra.mxu1 %v3557_v10 }
  0x14   :  { %858 = vmatprep.subr.bf16.mxu0 %v3558_v11  ;;  %3535 = vmatprep.subr.bf16.mxu1 %v3558_v11 }
  0x17   :  { %859 = vmatpush1.bf16.msra.mxu0 %v3560_v12  ;;  %3541 = vmatpush1.bf16.msra.mxu1 %v3560_v12 }
  0x18   :  { %3454 = vmatprep.subr.bf16.mxu1 %v3563_v13 }
  0x1a   :  { %3096 = vmatmul.mubr.msk.bf16.vlgmr.msra.gmra.mxu0 %vm747_vm0, %v3664_v14  ;;  %3120 = vmatmul.mubr.msk.bf16.vlgmr.msra.gmra.mxu1 %vm747_vm0, %v3669_v15 }
  0x1b   :  { %3455 = vmatpush3.bf16.msra.mxu1 %v3563_v13  ;;  %886 = vmatprep.mubr.bf16.mxu0 %v3599_v1 }
  0x1c   :  { %1126 = vmatprep.mubr.bf16.mxu1 %v3599_v1  ;;  %3456 = vmatprep.subr.bf16.mxu1 %v3566_v16 }
  0x1f   :  { %3457 = vmatpush3.bf16.msra.mxu1 %v3566_v16 }
  0x20   :  { %3458 = vmatprep.subr.bf16.mxu1 %v3569_v17 }
  0x22   :  { %3097 = vmatmul.mubr.msk.bf16.gmra.mxu0 %vm747_vm0, %v3564_v18  ;;  %3121 = vmatmul.mubr.msk.bf16.gmra.mxu1 %vm747_vm0, %v3689_v19 }
  0x23   :  { %896 = vmatprep.mubr.bf16.mxu0 %v3599_v1  ;;  %1136 = vmatprep.mubr.bf16.mxu1 %v3599_v1 }
  0x24   :  { %3459 = vmatpush3.bf16.msra.mxu1 %v3569_v17 }
  0x25   :  { %3460 = vmatprep.subr.bf16.mxu1 %v3574_v20 }
  0x28   :  { %3461 = vmatpush3.bf16.msra.mxu1 %v3574_v20 }
  0x29   :  { %3462 = vmatprep.subr.bf16.mxu1 %v3577_v22 }
  0x2a   :  { %3098 = vmatmul.mubr.msk.bf16.gmra.mxu0 %vm747_vm0, %v3567_v21  ;;  %3122 = vmatmul.mubr.msk.bf16.gmra.mxu1 %vm747_vm0, %v3708_v23 }
  0x2b   :  { %906 = vmatprep.mubr.bf16.mxu0 %v3599_v1  ;;  %1146 = vmatprep.mubr.bf16.mxu1 %v3599_v1 }
  0x2c   :  { %3463 = vmatpush3.bf16.msra.mxu1 %v3577_v22 }
  0x2d   :  { %3464 = vmatprep.subr.bf16.mxu1 %v3580_v24 }
  0x30   :  { %3465 = vmatpush3.bf16.msra.mxu1 %v3580_v24 }
  0x32   :  { %3099 = vmatmul.mubr.msk.bf16.gmra.mxu0 %vm747_vm0, %v3570_v25  ;;  %3123 = vmatmul.mubr.msk.bf16.gmra.mxu1 %vm747_vm0, %v3724_v26 }
  0x33   :  { %916 = vmatprep.mubr.bf16.mxu0 %v3599_v1  ;;  %1156 = vmatprep.mubr.bf16.mxu1 %v3599_v1 }
  0x3a   :  { %3100 = vmatmul.mubr.msk.bf16.gmra.mxu0 %vm747_vm0, %v3572_v27  ;;  %3124 = vmatmul.mubr.msk.bf16.gmra.mxu1 %vm747_vm0, %v3737_v28 }
  0x3b   :  { %926 = vmatprep.mubr.bf16.mxu0 %v3599_v1  ;;  %1166 = vmatprep.mubr.bf16.mxu1 %v3599_v1 }
  0x42   :  { %3101 = vmatmul.mubr.msk.bf16.gmra.mxu0 %vm747_vm0, %v3575_v29  ;;  %3125 = vmatmul.mubr.msk.bf16.gmra.mxu1 %vm747_vm0, %v3750_v30 }
  0x43   :  { %936 = vmatprep.mubr.bf16.mxu0 %v3599_v1  ;;  %1176 = vmatprep.mubr.bf16.mxu1 %v3599_v1 }
  0x4a   :  { %3102 = vmatmul.mubr.msk.bf16.gmra.mxu0 %vm747_vm0, %v3578_v31  ;;  %3126 = vmatmul.mubr.msk.bf16.gmra.mxu1 %vm747_vm0, %v3763_v32 }
  0x4b   :  { %946 = vmatprep.mubr.bf16.mxu0 %v3599_v1  ;;  %1186 = vmatprep.mubr.bf16.mxu1 %v3599_v1 }
  0x52   :  { %3103 = vmatmul.mubr.msk.bf16.gmra.mxu0 %vm747_vm0, %v3581_v33  ;;  %3127 = vmatmul.mubr.msk.bf16.gmra.mxu1 %vm747_vm0, %v3776_v34 }
  0x53   :  { %956 = vmatprep.mubr.bf16.mxu0 %v3599_v1  ;;  %3466 = vmatprep.mubr.msk.bf16.mxu1 %vm747_vm0, %v3664_v14 }
  0x5a   :  { %3104 = vmatmul.mubr.msk.bf16.gmra.mxu0 %vm747_vm0, %v3583_v35  ;;  %3467 = vmatmul.mubr.msk.bf16.vlgmr.msra.gmra.mxu1 %vm747_vm0, %v3564_v18 }
  0x5b   :  { %966 = vmatprep.mubr.bf16.mxu0 %v3599_v1  ;;  %3470 = vmatprep.mubr.msk.bf16.mxu1 %vm747_vm0, %v3567_v21 }
  0x62   :  { %3105 = vmatmul.mubr.msk.bf16.gmra.mxu0 %vm747_vm0, %v3584_v36  ;;  %3471 = vmatmul.mubr.msk.bf16.gmra.mxu1 %vm747_vm0, %v3570_v25 }
  0x63   :  { %976 = vmatprep.mubr.bf16.mxu0 %v3599_v1  ;;  %3474 = vmatprep.mubr.msk.bf16.mxu1 %vm747_vm0, %v3572_v27 }
  0x6a   :  { %3106 = vmatmul.mubr.msk.bf16.gmra.mxu0 %vm747_vm0, %v3585_v37  ;;  %3475 = vmatmul.mubr.msk.bf16.gmra.mxu1 %vm747_vm0, %v3575_v29 }
  0x6b   :  { %986 = vmatprep.mubr.bf16.mxu0 %v3599_v1  ;;  %3478 = vmatprep.mubr.msk.bf16.mxu1 %vm747_vm0, %v3578_v31 }
  0x72   :  { %3107 = vmatmul.mubr.msk.bf16.gmra.mxu0 %vm747_vm0, %v3586_v38  ;;  %3479 = vmatmul.mubr.msk.bf16.gmra.mxu1 %vm747_vm0, %v3581_v33 }
  0x73   :  { %996 = vmatprep.mubr.bf16.mxu0 %v3599_v1  ;;  %3482 = vmatprep.mubr.msk.bf16.mxu1 %vm747_vm0, %v3583_v35 }
  0x7a   :  { %3108 = vmatmul.mubr.msk.bf16.gmra.mxu0 %vm747_vm0, %v3587_v39  ;;  %3483 = vmatmul.mubr.msk.bf16.gmra.mxu1 %vm747_vm0, %v3584_v36 }
  0x7b   :  { %1006 = vmatprep.mubr.bf16.mxu0 %v3599_v1  ;;  %3486 = vmatprep.mubr.msk.bf16.mxu1 %vm747_vm0, %v3585_v37 }
  0x82   :  { %3109 = vmatmul.mubr.msk.bf16.gmra.mxu0 %vm747_vm0, %v3588_v40  ;;  %3487 = vmatmul.mubr.msk.bf16.gmra.mxu1 %vm747_vm0, %v3586_v38 }
  0x83   :  { %1016 = vmatprep.mubr.bf16.mxu0 %v3599_v1  ;;  %3490 = vmatprep.mubr.msk.bf16.mxu1 %vm747_vm0, %v3587_v39 }
  0x8a   :  { %3110 = vmatmul.mubr.msk.bf16.gmra.mxu0 %vm747_vm0, %v3589_v41  ;;  %3491 = vmatmul.mubr.msk.bf16.gmra.mxu1 %vm747_vm0, %v3588_v40 }
  0x8b   :  { %1026 = vmatprep.mubr.bf16.mxu0 %v3599_v1  ;;  %3494 = vmatprep.mubr.msk.bf16.mxu1 %vm747_vm0, %v3589_v41 }
  0x92   :  { %3111 = vmatmul.mubr.msk.bf16.gmra.mxu0 %vm747_vm0, %v3590_v42  ;;  %3495 = vmatmul.mubr.msk.bf16.gmra.mxu1 %vm747_vm0, %v3590_v42 }
  0x93   :  { %1036 = vmatprep.mubr.bf16.mxu0 %v3599_v1  ;;  %3498 = vmatprep.mubr.msk.bf16.mxu1 %vm747_vm0, %v3591_v43 }
  0x9a   :  { %3112 = vmatmul.mubr.msk.bf16.gmra.mxu0 %vm747_vm0, %v3591_v43  ;;  %3499 = vmatmul.mubr.msk.bf16.gmra.mxu1 %vm747_vm0, %v3592_v44 }
  0x9b   :  { %1046 = vmatprep.mubr.bf16.mxu0 %v3599_v1  ;;  %3502 = vmatprep.mubr.msk.bf16.mxu1 %vm747_vm0, %v3593_v45 }
  0xa2   :  { %3113 = vmatmul.mubr.msk.bf16.gmra.mxu0 %vm747_vm0, %v3592_v44  ;;  %3503 = vmatmul.mubr.msk.bf16.gmra.mxu1 %vm747_vm0, %v3594_v46 }
  0xa3   :  { %1056 = vmatprep.mubr.bf16.mxu0 %v3599_v1  ;;  %3506 = vmatprep.mubr.msk.bf16.mxu1 %vm747_vm0, %v3595_v47 }
  0xaa   :  { %3114 = vmatmul.mubr.msk.bf16.gmra.mxu0 %vm747_vm0, %v3593_v45  ;;  %3507 = vmatmul.mubr.msk.bf16.gmra.mxu1 %vm747_vm0, %v3596_v48 }
  0xab   :  { %1066 = vmatprep.mubr.bf16.mxu0 %v3599_v1  ;;  %3510 = vmatprep.mubr.msk.bf16.mxu1 %vm747_vm0, %v3597_v49 }
  0xb2   :  { %3115 = vmatmul.mubr.msk.bf16.gmra.mxu0 %vm747_vm0, %v3594_v46  ;;  %3511 = vmatmul.mubr.msk.bf16.gmra.mxu1 %vm747_vm0, %v3598_v50 }
  0xb3   :  { %1076 = vmatprep.mubr.bf16.mxu0 %v3599_v1  ;;  %3514 = vmatprep.mubr.msk.bf16.mxu1 %vm747_vm0, %v3669_v15 }
  0xba   :  { %3116 = vmatmul.mubr.msk.bf16.gmra.mxu0 %vm747_vm0, %v3595_v47  ;;  %3515 = vmatmul.mubr.msk.bf16.gmra.mxu1 %vm747_vm0, %v3689_v19 }
  0xbb   :  { %1086 = vmatprep.mubr.bf16.mxu0 %v3599_v1  ;;  %3518 = vmatprep.mubr.msk.bf16.mxu1 %vm747_vm0, %v3708_v23 }
  0xc2   :  { %3117 = vmatmul.mubr.msk.bf16.gmra.mxu0 %vm747_vm0, %v3596_v48  ;;  %3519 = vmatmul.mubr.msk.bf16.gmra.mxu1 %vm747_vm0, %v3724_v26 }
  0xc3   :  { %1096 = vmatprep.mubr.bf16.mxu0 %v3599_v1  ;;  %3522 = vmatprep.mubr.msk.bf16.mxu1 %vm747_vm0, %v3737_v28 }
  0xca   :  { %3118 = vmatmul.mubr.msk.bf16.gmra.mxu0 %vm747_vm0, %v3597_v49  ;;  %3523 = vmatmul.mubr.msk.bf16.gmra.mxu1 %vm747_vm0, %v3750_v30 }
  0xcb   :  { %1106 = vmatprep.mubr.bf16.mxu0 %v3599_v1  ;;  %3526 = vmatprep.mubr.msk.bf16.mxu1 %vm747_vm0, %v3763_v32 }
  0xd2   :  { %3119 = vmatmul.mubr.msk.bf16.gmra.mxu0 %vm747_vm0, %v3598_v50  ;;  %3527 = vmatmul.mubr.msk.bf16.gmra.mxu1 %vm747_vm0, %v3776_v34 }
  0xda   :  { %v878_v58 = vpop.f32.mrf.mxu0  ;;  %v1118_v59 = vpop.f32.mrf.mxu1 }
  0xdb   :  { %v2082_v62 = vadd.f32 %v3912_v56, %v878_v58  ;;  %v2226_v63 = vadd.f32 %v3912_v56, %v1118_v59 }
  0xdc   :  { %v880_v60 = vpop.f32.mrf.mxu0  ;;  %v1120_v61 = vpop.f32.mrf.mxu1 }
  0xdd   :  { %v2083_v0 = vadd.f32 %v3915_v57, %v880_v60  ;;  %v2227_v1 = vadd.f32 %v3915_v57, %v1120_v61 }
  0xde   :  { %v882_v2 = vpop.f32.mrf.mxu0  ;;  %v1122_v3 = vpop.f32.mrf.mxu1 }
  0xdf   :  { %v3288_v4 = vpack.c.bf16 %v2083_v0, %v2082_v62  ;;  %v3384_v5 = vpack.c.bf16 %v2227_v1, %v2226_v63  ;;  %v2085_v8 = vadd.f32 %v3912_v56, %v882_v2  ;;  %v2229_v9 = vadd.f32 %v3912_v56, %v1122_v3 }
  0xe0   :  { %v884_v6 = vpop.f32.mrf.mxu0  ;;  %v1124_v7 = vpop.f32.mrf.mxu1 }
  0xe1   :  { %2914 = vst [vmem:[%s4500_s3] sm:$0xff] %v3288_v4  ;;  %3010 = vst [vmem:[%s4500_s3 + $0x240] sm:$0xff] %v3384_v5  ;;  %v2086_v10 = vadd.f32 %v3915_v57, %v884_v6  ;;  %v2230_v11 = vadd.f32 %v3915_v57, %v1124_v7 }
  0xe2   :  { %v888_v12 = vpop.f32.mrf.mxu0  ;;  %v1128_v13 = vpop.f32.mrf.mxu1 }
  0xe3   :  { %v3290_v14 = vpack.c.bf16 %v2086_v10, %v2085_v8  ;;  %v3386_v15 = vpack.c.bf16 %v2230_v11, %v2229_v9  ;;  %v2088_v18 = vadd.f32 %v3912_v56, %v888_v12  ;;  %v2232_v19 = vadd.f32 %v3912_v56, %v1128_v13 }
  0xe4   :  { %v890_v16 = vpop.f32.mrf.mxu0  ;;  %v1130_v17 = vpop.f32.mrf.mxu1 }
  0xe5   :  { %2916 = vst [vmem:[%s4500_s3 + $0xc] sm:$0xff] %v3290_v14  ;;  %3012 = vst [vmem:[%s4500_s3 + $0x24c] sm:$0xff] %v3386_v15  ;;  %v2089_v20 = vadd.f32 %v3915_v57, %v890_v16  ;;  %v2233_v21 = vadd.f32 %v3915_v57, %v1130_v17 }
  0xe6   :  { %v892_v22 = vpop.f32.mrf.mxu0  ;;  %v1132_v23 = vpop.f32.mrf.mxu1 }
  0xe7   :  { %v3292_v24 = vpack.c.bf16 %v2089_v20, %v2088_v18  ;;  %v3388_v25 = vpack.c.bf16 %v2233_v21, %v2232_v19  ;;  %v2091_v28 = vadd.f32 %v3912_v56, %v892_v22  ;;  %v2235_v29 = vadd.f32 %v3912_v56, %v1132_v23 }
  0xe8   :  { %v894_v26 = vpop.f32.mrf.mxu0  ;;  %v1134_v27 = vpop.f32.mrf.mxu1 }
  0xe9   :  { %2918 = vst [vmem:[%s4500_s3 + $0x18] sm:$0xff] %v3292_v24  ;;  %3014 = vst [vmem:[%s4500_s3 + $0x258] sm:$0xff] %v3388_v25  ;;  %v2092_v30 = vadd.f32 %v3915_v57, %v894_v26  ;;  %v2236_v31 = vadd.f32 %v3915_v57, %v1134_v27 }
  0xea   :  { %v898_v32 = vpop.f32.mrf.mxu0  ;;  %v1138_v33 = vpop.f32.mrf.mxu1 }
  0xeb   :  { %v3294_v34 = vpack.c.bf16 %v2092_v30, %v2091_v28  ;;  %v3390_v35 = vpack.c.bf16 %v2236_v31, %v2235_v29  ;;  %v2094_v38 = vadd.f32 %v3912_v56, %v898_v32  ;;  %v2238_v39 = vadd.f32 %v3912_v56, %v1138_v33 }
  0xec   :  { %v900_v36 = vpop.f32.mrf.mxu0  ;;  %v1140_v37 = vpop.f32.mrf.mxu1 }
  0xed   :  { %2920 = vst [vmem:[%s4500_s3 + $0x24] sm:$0xff] %v3294_v34  ;;  %3016 = vst [vmem:[%s4500_s3 + $0x264] sm:$0xff] %v3390_v35  ;;  %v2095_v40 = vadd.f32 %v3915_v57, %v900_v36  ;;  %v2239_v41 = vadd.f32 %v3915_v57, %v1140_v37 }
  0xee   :  { %v902_v42 = vpop.f32.mrf.mxu0  ;;  %v1142_v43 = vpop.f32.mrf.mxu1 }
  0xef   :  { %v3296_v44 = vpack.c.bf16 %v2095_v40, %v2094_v38  ;;  %v3392_v45 = vpack.c.bf16 %v2239_v41, %v2238_v39  ;;  %v2097_v48 = vadd.f32 %v3912_v56, %v902_v42  ;;  %v2241_v49 = vadd.f32 %v3912_v56, %v1142_v43 }
  0xf0   :  { %v904_v46 = vpop.f32.mrf.mxu0  ;;  %v1144_v47 = vpop.f32.mrf.mxu1 }
  0xf1   :  { %2922 = vst [vmem:[%s4500_s3 + $0x30] sm:$0xff] %v3296_v44  ;;  %3018 = vst [vmem:[%s4500_s3 + $0x270] sm:$0xff] %v3392_v45  ;;  %v2098_v50 = vadd.f32 %v3915_v57, %v904_v46  ;;  %v2242_v51 = vadd.f32 %v3915_v57, %v1144_v47 }
  0xf2   :  { %v908_v53 = vpop.f32.mrf.mxu0  ;;  %v1148_v54 = vpop.f32.mrf.mxu1 }
  0xf3   :  { %v3298_v58 = vpack.c.bf16 %v2098_v50, %v2097_v48  ;;  %v3394_v59 = vpack.c.bf16 %v2242_v51, %v2241_v49  ;;  %v2100_v62 = vadd.f32 %v3912_v56, %v908_v53  ;;  %v2244_v63 = vadd.f32 %v3912_v56, %v1148_v54 }
  0xf4   :  { %v910_v60 = vpop.f32.mrf.mxu0  ;;  %v1150_v61 = vpop.f32.mrf.mxu1 }
  0xf5   :  { %2924 = vst [vmem:[%s4500_s3 + $0x3c] sm:$0xff] %v3298_v58  ;;  %3020 = vst [vmem:[%s4500_s3 + $0x27c] sm:$0xff] %v3394_v59  ;;  %v2101_v0 = vadd.f32 %v3915_v57, %v910_v60  ;;  %v2245_v1 = vadd.f32 %v3915_v57, %v1150_v61 }
  0xf6   :  { %v912_v2 = vpop.f32.mrf.mxu0  ;;  %v1152_v3 = vpop.f32.mrf.mxu1 }
  0xf7   :  { %v3300_v4 = vpack.c.bf16 %v2101_v0, %v2100_v62  ;;  %v3396_v5 = vpack.c.bf16 %v2245_v1, %v2244_v63  ;;  %v2103_v8 = vadd.f32 %v3912_v56, %v912_v2  ;;  %v2247_v9 = vadd.f32 %v3912_v56, %v1152_v3 }
  0xf8   :  { %v914_v6 = vpop.f32.mrf.mxu0  ;;  %v1154_v7 = vpop.f32.mrf.mxu1 }
  0xf9   :  { %2926 = vst [vmem:[%s4500_s3 + $0x48] sm:$0xff] %v3300_v4  ;;  %3022 = vst [vmem:[%s4500_s3 + $0x288] sm:$0xff] %v3396_v5  ;;  %v2104_v10 = vadd.f32 %v3915_v57, %v914_v6  ;;  %v2248_v11 = vadd.f32 %v3915_v57, %v1154_v7 }
  0xfa   :  { %v918_v12 = vpop.f32.mrf.mxu0  ;;  %v1158_v13 = vpop.f32.mrf.mxu1 }
  0xfb   :  { %v3302_v14 = vpack.c.bf16 %v2104_v10, %v2103_v8  ;;  %v3398_v15 = vpack.c.bf16 %v2248_v11, %v2247_v9  ;;  %v2106_v18 = vadd.f32 %v3912_v56, %v918_v12  ;;  %v2250_v19 = vadd.f32 %v3912_v56, %v1158_v13 }
  0xfc   :  { %v920_v16 = vpop.f32.mrf.mxu0  ;;  %v1160_v17 = vpop.f32.mrf.mxu1 }
  0xfd   :  { %2928 = vst [vmem:[%s4500_s3 + $0x54] sm:$0xff] %v3302_v14  ;;  %3024 = vst [vmem:[%s4500_s3 + $0x294] sm:$0xff] %v3398_v15  ;;  %v2107_v20 = vadd.f32 %v3915_v57, %v920_v16  ;;  %v2251_v21 = vadd.f32 %v3915_v57, %v1160_v17  ;;  %v2077_v16 = vsub.s32 2, %v3899_v52 }
  0xfe   :  { %v922_v22 = vpop.f32.mrf.mxu0  ;;  %v1162_v23 = vpop.f32.mrf.mxu1 }
  0xff   :  { %v3304_v24 = vpack.c.bf16 %v2107_v20, %v2106_v18  ;;  %v3400_v25 = vpack.c.bf16 %v2251_v21, %v2250_v19  ;;  %v2109_v28 = vadd.f32 %v3912_v56, %v922_v22  ;;  %v2253_v29 = vadd.f32 %v3912_v56, %v1162_v23 }
 0x100   :  { %v924_v26 = vpop.f32.mrf.mxu0  ;;  %v1164_v27 = vpop.f32.mrf.mxu1 }
 0x101   :  { %2930 = vst [vmem:[%s4500_s3 + $0x60] sm:$0xff] %v3304_v24  ;;  %3026 = vst [vmem:[%s4500_s3 + $0x2a0] sm:$0xff] %v3400_v25  ;;  %v2110_v30 = vadd.f32 %v3915_v57, %v924_v26  ;;  %v2254_v31 = vadd.f32 %v3915_v57, %v1164_v27  ;;  %v4063_v26 = vrot.slane %v3909_v55, %v2077_v16 }
 0x102   :  { %v928_v32 = vpop.f32.mrf.mxu0  ;;  %v1168_v33 = vpop.f32.mrf.mxu1 }
 0x103   :  { %v3306_v34 = vpack.c.bf16 %v2110_v30, %v2109_v28  ;;  %v3402_v35 = vpack.c.bf16 %v2254_v31, %v2253_v29  ;;  %v2112_v38 = vadd.f32 %v3912_v56, %v928_v32  ;;  %v2256_v39 = vadd.f32 %v3912_v56, %v1168_v33 }
 0x104   :  { %v930_v36 = vpop.f32.mrf.mxu0  ;;  %v1170_v37 = vpop.f32.mrf.mxu1 }
 0x105   :  { %2932 = vst [vmem:[%s4500_s3 + $0x6c] sm:$0xff] %v3306_v34  ;;  %3028 = vst [vmem:[%s4500_s3 + $0x2ac] sm:$0xff] %v3402_v35  ;;  %v2113_v40 = vadd.f32 %v3915_v57, %v930_v36  ;;  %v2257_v41 = vadd.f32 %v3915_v57, %v1170_v37 }
 0x106   :  { %v932_v42 = vpop.f32.mrf.mxu0  ;;  %v1172_v43 = vpop.f32.mrf.mxu1 }
 0x107   :  { %v3308_v44 = vpack.c.bf16 %v2113_v40, %v2112_v38  ;;  %v3404_v45 = vpack.c.bf16 %v2257_v41, %v2256_v39  ;;  %v2115_v48 = vadd.f32 %v3912_v56, %v932_v42  ;;  %v2259_v49 = vadd.f32 %v3912_v56, %v1172_v43 }
 0x108   :  { %v934_v46 = vpop.f32.mrf.mxu0  ;;  %v1174_v47 = vpop.f32.mrf.mxu1 }
 0x109   :  { %2934 = vst [vmem:[%s4500_s3 + $0x78] sm:$0xff] %v3308_v44  ;;  %3030 = vst [vmem:[%s4500_s3 + $0x2b8] sm:$0xff] %v3404_v45  ;;  %v2116_v50 = vadd.f32 %v3915_v57, %v934_v46  ;;  %v2260_v51 = vadd.f32 %v3915_v57, %v1174_v47 }
 0x10a   :  { %v938_v53 = vpop.f32.mrf.mxu0  ;;  %v1178_v54 = vpop.f32.mrf.mxu1 }
 0x10b   :  { %v3310_v58 = vpack.c.bf16 %v2116_v50, %v2115_v48  ;;  %v3406_v59 = vpack.c.bf16 %v2260_v51, %v2259_v49  ;;  %v2118_v62 = vadd.f32 %v3912_v56, %v938_v53  ;;  %v2262_v63 = vadd.f32 %v3912_v56, %v1178_v54 }
 0x10c   :  { %v940_v60 = vpop.f32.mrf.mxu0  ;;  %v1180_v61 = vpop.f32.mrf.mxu1 }
 0x10d   :  { %2936 = vst [vmem:[%s4500_s3 + $0x84] sm:$0xff] %v3310_v58  ;;  %3032 = vst [vmem:[%s4500_s3 + $0x2c4] sm:$0xff] %v3406_v59  ;;  %v2119_v0 = vadd.f32 %v3915_v57, %v940_v60  ;;  %v2263_v1 = vadd.f32 %v3915_v57, %v1180_v61 }
 0x10e   :  { %v942_v2 = vpop.f32.mrf.mxu0  ;;  %v1182_v3 = vpop.f32.mrf.mxu1 }
 0x10f   :  { %v3312_v4 = vpack.c.bf16 %v2119_v0, %v2118_v62  ;;  %v3408_v5 = vpack.c.bf16 %v2263_v1, %v2262_v63  ;;  %v2121_v8 = vadd.f32 %v3912_v56, %v942_v2  ;;  %v2265_v9 = vadd.f32 %v3912_v56, %v1182_v3 }
 0x110   :  { %v944_v6 = vpop.f32.mrf.mxu0  ;;  %v1184_v7 = vpop.f32.mrf.mxu1 }
 0x111   :  { %2938 = vst [vmem:[%s4500_s3 + $0x90] sm:$0xff] %v3312_v4  ;;  %3034 = vst [vmem:[%s4500_s3 + $0x2d0] sm:$0xff] %v3408_v5  ;;  %v2122_v10 = vadd.f32 %v3915_v57, %v944_v6  ;;  %v2266_v11 = vadd.f32 %v3915_v57, %v1184_v7 }
 0x112   :  { %v948_v12 = vpop.f32.mrf.mxu0  ;;  %v1188_v13 = vpop.f32.mrf.mxu1 }
 0x113   :  { %v3314_v14 = vpack.c.bf16 %v2122_v10, %v2121_v8  ;;  %v3410_v15 = vpack.c.bf16 %v2266_v11, %v2265_v9  ;;  %v2124_v19 = vadd.f32 %v3912_v56, %v948_v12  ;;  %v2268_v20 = vadd.f32 %v3912_v56, %v1188_v13 }
 0x114   :  { %v950_v17 = vpop.f32.mrf.mxu0  ;;  %v1190_v18 = vpop.f32.mrf.mxu1 }
 0x115   :  { %2940 = vst [vmem:[%s4500_s3 + $0x9c] sm:$0xff] %v3314_v14  ;;  %3036 = vst [vmem:[%s4500_s3 + $0x2dc] sm:$0xff] %v3410_v15  ;;  %v2125_v21 = vadd.f32 %v3915_v57, %v950_v17  ;;  %v2269_v22 = vadd.f32 %v3915_v57, %v1190_v18 }
 0x116   :  { %v952_v23 = vpop.f32.mrf.mxu0  ;;  %v1192_v52 = vpop.f32.mrf.mxu1 }
 0x117   :  { %v3316_v24 = vpack.c.bf16 %v2125_v21, %v2124_v19  ;;  %v3412_v25 = vpack.c.bf16 %v2269_v22, %v2268_v20  ;;  %v2127_v29 = vadd.f32 %v3912_v56, %v952_v23  ;;  %v2271_v30 = vadd.f32 %v3912_v56, %v1192_v52 }
 0x118   :  { %v954_v27 = vpop.f32.mrf.mxu0  ;;  %v1194_v28 = vpop.f32.mrf.mxu1 }
 0x119   :  { %2942 = vst [vmem:[%s4500_s3 + $0xa8] sm:$0xff] %v3316_v24  ;;  %3038 = vst [vmem:[%s4500_s3 + $0x2e8] sm:$0xff] %v3412_v25  ;;  %v2128_v31 = vadd.f32 %v3915_v57, %v954_v27  ;;  %v2272_v32 = vadd.f32 %v3915_v57, %v1194_v28 }
 0x11a   :  { %v958_v55 = vpop.f32.mrf.mxu0  ;;  %v3468_v33 = vpop.f32.mrf.mxu1 }
 0x11b   :  { %v3318_v34 = vpack.c.bf16 %v2128_v31, %v2127_v29  ;;  %v3414_v35 = vpack.c.bf16 %v2272_v32, %v2271_v30  ;;  %v2090_v36 = vadd.f32 %v3468_v33, %v4063_v26  ;;  %v2130_v39 = vadd.f32 %v3912_v56, %v958_v55 }
 0x11c   :  { %v960_v37 = vpop.f32.mrf.mxu0  ;;  %v1231_v38 = vpop.f32.mrf.mxu1 }
 0x11d   :  { %2944 = vst [vmem:[%s4500_s3 + $0xb4] sm:$0xff] %v3318_v34  ;;  %3040 = vst [vmem:[%s4500_s3 + $0x2f4] sm:$0xff] %v3414_v35  ;;  %v3293_v40 = vpack.c.bf16 %v2090_v36, %v2090_v36  ;;  %v2131_v41 = vadd.f32 %v3915_v57, %v960_v37  ;;  %v2084_v42 = vadd.f32 %v4063_v26, %v1231_v38 }
 0x11e   :  { %v962_v43 = vpop.f32.mrf.mxu0  ;;  %v3469_v44 = vpop.f32.mrf.mxu1 }
 0x11f   :  { %2919 = vst [vmem:[%s4500_s3 + $0x20] sm:$0xf] %v3293_v40  ;;  %v3320_v45 = vpack.c.bf16 %v2131_v41, %v2130_v39  ;;  %v3289_v46 = vpack.c.bf16 %v2084_v42, %v2084_v42  ;;  %v2093_v47 = vadd.f32 %v3469_v44, %v4063_v26  ;;  %v2133_v50 = vadd.f32 %v3912_v56, %v962_v43 }
 0x120   :  { %v964_v48 = vpop.f32.mrf.mxu0  ;;  %v1234_v49 = vpop.f32.mrf.mxu1 }
 0x121   :  { %2946 = vst [vmem:[%s4500_s3 + $0xc0] sm:$0xff] %v3320_v45  ;;  %2915 = vst [vmem:[%s4500_s3 + $0x8] sm:$0xf] %v3289_v46  ;;  %v3295_v51 = vpack.c.bf16 %v2093_v47, %v2093_v47  ;;  %v2134_v53 = vadd.f32 %v3915_v57, %v964_v48  ;;  %v2087_v54 = vadd.f32 %v4063_v26, %v1234_v49 }
 0x122   :  { %v968_v58 = vpop.f32.mrf.mxu0  ;;  %v3472_v59 = vpop.f32.mrf.mxu1 }
 0x123   :  { %2921 = vst [vmem:[%s4500_s3 + $0x2c] sm:$0xf] %v3295_v51  ;;  %v3322_v60 = vpack.c.bf16 %v2134_v53, %v2133_v50  ;;  %v3291_v61 = vpack.c.bf16 %v2087_v54, %v2087_v54  ;;  %v2102_v62 = vadd.f32 %v3472_v59, %v4063_v26  ;;  %v2136_v1 = vadd.f32 %v3912_v56, %v968_v58 }
 0x124   :  { %v970_v63 = vpop.f32.mrf.mxu0  ;;  %v1247_v0 = vpop.f32.mrf.mxu1 }
 0x125   :  { %2948 = vst [vmem:[%s4500_s3 + $0xcc] sm:$0xff] %v3322_v60  ;;  %2917 = vst [vmem:[%s4500_s3 + $0x14] sm:$0xf] %v3291_v61  ;;  %v3301_v2 = vpack.c.bf16 %v2102_v62, %v2102_v62  ;;  %v2137_v3 = vadd.f32 %v3915_v57, %v970_v63  ;;  %v2096_v4 = vadd.f32 %v4063_v26, %v1247_v0 }
 0x126   :  { %v972_v5 = vpop.f32.mrf.mxu0  ;;  %v3473_v6 = vpop.f32.mrf.mxu1 }
 0x127   :  { %2927 = vst [vmem:[%s4500_s3 + $0x50] sm:$0xf] %v3301_v2  ;;  %v3324_v7 = vpack.c.bf16 %v2137_v3, %v2136_v1  ;;  %v3297_v8 = vpack.c.bf16 %v2096_v4, %v2096_v4  ;;  %v2105_v9 = vadd.f32 %v3473_v6, %v4063_v26  ;;  %v2139_v12 = vadd.f32 %v3912_v56, %v972_v5 }
 0x128   :  { %v974_v10 = vpop.f32.mrf.mxu0  ;;  %v1250_v11 = vpop.f32.mrf.mxu1 }
 0x129   :  { %2950 = vst [vmem:[%s4500_s3 + $0xd8] sm:$0xff] %v3324_v7  ;;  %2923 = vst [vmem:[%s4500_s3 + $0x38] sm:$0xf] %v3297_v8  ;;  %v3303_v13 = vpack.c.bf16 %v2105_v9, %v2105_v9  ;;  %v2140_v14 = vadd.f32 %v3915_v57, %v974_v10  ;;  %v2099_v15 = vadd.f32 %v4063_v26, %v1250_v11 }
 0x12a   :  { %v978_v16 = vpop.f32.mrf.mxu0  ;;  %v3476_v17 = vpop.f32.mrf.mxu1 }
 0x12b   :  { %2929 = vst [vmem:[%s4500_s3 + $0x5c] sm:$0xf] %v3303_v13  ;;  %v3326_v18 = vpack.c.bf16 %v2140_v14, %v2139_v12  ;;  %v3299_v19 = vpack.c.bf16 %v2099_v15, %v2099_v15  ;;  %v2114_v20 = vadd.f32 %v3476_v17, %v4063_v26  ;;  %v2142_v23 = vadd.f32 %v3912_v56, %v978_v16 }
 0x12c   :  { %v980_v21 = vpop.f32.mrf.mxu0  ;;  %v1263_v22 = vpop.f32.mrf.mxu1 }
 0x12d   :  { %2952 = vst [vmem:[%s4500_s3 + $0xe4] sm:$0xff] %v3326_v18  ;;  %2925 = vst [vmem:[%s4500_s3 + $0x44] sm:$0xf] %v3299_v19  ;;  %v3309_v52 = vpack.c.bf16 %v2114_v20, %v2114_v20  ;;  %v2143_v24 = vadd.f32 %v3915_v57, %v980_v21  ;;  %v2108_v25 = vadd.f32 %v4063_v26, %v1263_v22 }
 0x12e   :  { %v982_v27 = vpop.f32.mrf.mxu0  ;;  %v3477_v28 = vpop.f32.mrf.mxu1 }
 0x12f   :  { %2935 = vst [vmem:[%s4500_s3 + $0x80] sm:$0xf] %v3309_v52  ;;  %v3328_v29 = vpack.c.bf16 %v2143_v24, %v2142_v23  ;;  %v3305_v30 = vpack.c.bf16 %v2108_v25, %v2108_v25  ;;  %v2117_v31 = vadd.f32 %v3477_v28, %v4063_v26  ;;  %v2145_v33 = vadd.f32 %v3912_v56, %v982_v27 }
 0x130   :  { %v984_v32 = vpop.f32.mrf.mxu0  ;;  %v1266_v55 = vpop.f32.mrf.mxu1 }
 0x131   :  { %2954 = vst [vmem:[%s4500_s3 + $0xf0] sm:$0xff] %v3328_v29  ;;  %2931 = vst [vmem:[%s4500_s3 + $0x68] sm:$0xf] %v3305_v30  ;;  %v3311_v34 = vpack.c.bf16 %v2117_v31, %v2117_v31  ;;  %v2146_v35 = vadd.f32 %v3915_v57, %v984_v32  ;;  %v2111_v36 = vadd.f32 %v4063_v26, %v1266_v55 }
 0x132   :  { %v988_v37 = vpop.f32.mrf.mxu0  ;;  %v3480_v38 = vpop.f32.mrf.mxu1 }
 0x133   :  { %2937 = vst [vmem:[%s4500_s3 + $0x8c] sm:$0xf] %v3311_v34  ;;  %v3330_v39 = vpack.c.bf16 %v2146_v35, %v2145_v33  ;;  %v3307_v40 = vpack.c.bf16 %v2111_v36, %v2111_v36  ;;  %v2126_v41 = vadd.f32 %v3480_v38, %v4063_v26  ;;  %v2148_v44 = vadd.f32 %v3912_v56, %v988_v37 }
 0x134   :  { %v990_v42 = vpop.f32.mrf.mxu0  ;;  %v1279_v43 = vpop.f32.mrf.mxu1 }
 0x135   :  { %2956 = vst [vmem:[%s4500_s3 + $0xfc] sm:$0xff] %v3330_v39  ;;  %2933 = vst [vmem:[%s4500_s3 + $0x74] sm:$0xf] %v3307_v40  ;;  %v3317_v45 = vpack.c.bf16 %v2126_v41, %v2126_v41  ;;  %v2149_v46 = vadd.f32 %v3915_v57, %v990_v42  ;;  %v2120_v47 = vadd.f32 %v4063_v26, %v1279_v43 }
 0x136   :  { %v992_v48 = vpop.f32.mrf.mxu0  ;;  %v3481_v49 = vpop.f32.mrf.mxu1 }
 0x137   :  { %2943 = vst [vmem:[%s4500_s3 + $0xb0] sm:$0xf] %v3317_v45  ;;  %v3332_v50 = vpack.c.bf16 %v2149_v46, %v2148_v44  ;;  %v3313_v51 = vpack.c.bf16 %v2120_v47, %v2120_v47  ;;  %v2129_v53 = vadd.f32 %v3481_v49, %v4063_v26  ;;  %v2151_v59 = vadd.f32 %v3912_v56, %v992_v48 }
 0x138   :  { %v994_v54 = vpop.f32.mrf.mxu0  ;;  %v1282_v58 = vpop.f32.mrf.mxu1 }
 0x139   :  { %2958 = vst [vmem:[%s4500_s3 + $0x108] sm:$0xff] %v3332_v50  ;;  %2939 = vst [vmem:[%s4500_s3 + $0x98] sm:$0xf] %v3313_v51  ;;  %v3319_v60 = vpack.c.bf16 %v2129_v53, %v2129_v53  ;;  %v2152_v61 = vadd.f32 %v3915_v57, %v994_v54  ;;  %v2123_v62 = vadd.f32 %v4063_v26, %v1282_v58 }
 0x13a   :  { %v998_v63 = vpop.f32.mrf.mxu0  ;;  %v3484_v0 = vpop.f32.mrf.mxu1 }
 0x13b   :  { %2945 = vst [vmem:[%s4500_s3 + $0xbc] sm:$0xf] %v3319_v60  ;;  %v3334_v1 = vpack.c.bf16 %v2152_v61, %v2151_v59  ;;  %v3315_v2 = vpack.c.bf16 %v2123_v62, %v2123_v62  ;;  %v2138_v3 = vadd.f32 %v3484_v0, %v4063_v26  ;;  %v2154_v6 = vadd.f32 %v3912_v56, %v998_v63 }
 0x13c   :  { %v1000_v4 = vpop.f32.mrf.mxu0  ;;  %v1295_v5 = vpop.f32.mrf.mxu1 }
 0x13d   :  { %2960 = vst [vmem:[%s4500_s3 + $0x114] sm:$0xff] %v3334_v1  ;;  %2941 = vst [vmem:[%s4500_s3 + $0xa4] sm:$0xf] %v3315_v2  ;;  %v3325_v7 = vpack.c.bf16 %v2138_v3, %v2138_v3  ;;  %v2155_v8 = vadd.f32 %v3915_v57, %v1000_v4  ;;  %v2132_v9 = vadd.f32 %v4063_v26, %v1295_v5 }
 0x13e   :  { %v1002_v10 = vpop.f32.mrf.mxu0  ;;  %v3485_v11 = vpop.f32.mrf.mxu1 }
 0x13f   :  { %2951 = vst [vmem:[%s4500_s3 + $0xe0] sm:$0xf] %v3325_v7  ;;  %v3336_v12 = vpack.c.bf16 %v2155_v8, %v2154_v6  ;;  %v3321_v13 = vpack.c.bf16 %v2132_v9, %v2132_v9  ;;  %v2141_v14 = vadd.f32 %v3485_v11, %v4063_v26  ;;  %v2157_v17 = vadd.f32 %v3912_v56, %v1002_v10 }
 0x140   :  { %v1004_v15 = vpop.f32.mrf.mxu0  ;;  %v1298_v16 = vpop.f32.mrf.mxu1 }
 0x141   :  { %2962 = vst [vmem:[%s4500_s3 + $0x120] sm:$0xff] %v3336_v12  ;;  %2947 = vst [vmem:[%s4500_s3 + $0xc8] sm:$0xf] %v3321_v13  ;;  %v3327_v18 = vpack.c.bf16 %v2141_v14, %v2141_v14  ;;  %v2158_v19 = vadd.f32 %v3915_v57, %v1004_v15  ;;  %v2135_v20 = vadd.f32 %v4063_v26, %v1298_v16 }
 0x142   :  { %v1008_v21 = vpop.f32.mrf.mxu0  ;;  %v3488_v22 = vpop.f32.mrf.mxu1 }
 0x143   :  { %2953 = vst [vmem:[%s4500_s3 + $0xec] sm:$0xf] %v3327_v18  ;;  %v3338_v23 = vpack.c.bf16 %v2158_v19, %v2157_v17  ;;  %v3323_v52 = vpack.c.bf16 %v2135_v20, %v2135_v20  ;;  %v2150_v24 = vadd.f32 %v3488_v22, %v4063_v26  ;;  %v2160_v28 = vadd.f32 %v3912_v56, %v1008_v21 }
 0x144   :  { %v1010_v25 = vpop.f32.mrf.mxu0  ;;  %v1311_v27 = vpop.f32.mrf.mxu1 }
 0x145   :  { %2964 = vst [vmem:[%s4500_s3 + $0x12c] sm:$0xff] %v3338_v23  ;;  %2949 = vst [vmem:[%s4500_s3 + $0xd4] sm:$0xf] %v3323_v52  ;;  %v3333_v29 = vpack.c.bf16 %v2150_v24, %v2150_v24  ;;  %v2161_v30 = vadd.f32 %v3915_v57, %v1010_v25  ;;  %v2144_v31 = vadd.f32 %v4063_v26, %v1311_v27 }
 0x146   :  { %v1012_v32 = vpop.f32.mrf.mxu0  ;;  %v3489_v55 = vpop.f32.mrf.mxu1 }
 0x147   :  { %2959 = vst [vmem:[%s4500_s3 + $0x110] sm:$0xf] %v3333_v29  ;;  %v3340_v33 = vpack.c.bf16 %v2161_v30, %v2160_v28  ;;  %v3329_v34 = vpack.c.bf16 %v2144_v31, %v2144_v31  ;;  %v2153_v35 = vadd.f32 %v3489_v55, %v4063_v26  ;;  %v2163_v38 = vadd.f32 %v3912_v56, %v1012_v32 }
 0x148   :  { %v1014_v36 = vpop.f32.mrf.mxu0  ;;  %v1314_v37 = vpop.f32.mrf.mxu1 }
 0x149   :  { %2966 = vst [vmem:[%s4500_s3 + $0x138] sm:$0xff] %v3340_v33  ;;  %2955 = vst [vmem:[%s4500_s3 + $0xf8] sm:$0xf] %v3329_v34  ;;  %v3335_v39 = vpack.c.bf16 %v2153_v35, %v2153_v35  ;;  %v2164_v40 = vadd.f32 %v3915_v57, %v1014_v36  ;;  %v2147_v41 = vadd.f32 %v4063_v26, %v1314_v37 }
 0x14a   :  { %v1018_v42 = vpop.f32.mrf.mxu0  ;;  %v3492_v43 = vpop.f32.mrf.mxu1 }
 0x14b   :  { %2961 = vst [vmem:[%s4500_s3 + $0x11c] sm:$0xf] %v3335_v39  ;;  %v3342_v44 = vpack.c.bf16 %v2164_v40, %v2163_v38  ;;  %v3331_v45 = vpack.c.bf16 %v2147_v41, %v2147_v41  ;;  %v2162_v46 = vadd.f32 %v3492_v43, %v4063_v26  ;;  %v2166_v49 = vadd.f32 %v3912_v56, %v1018_v42 }
 0x14c   :  { %v1020_v47 = vpop.f32.mrf.mxu0  ;;  %v1327_v48 = vpop.f32.mrf.mxu1 }
 0x14d   :  { %2968 = vst [vmem:[%s4500_s3 + $0x144] sm:$0xff] %v3342_v44  ;;  %2957 = vst [vmem:[%s4500_s3 + $0x104] sm:$0xf] %v3331_v45  ;;  %v3341_v50 = vpack.c.bf16 %v2162_v46, %v2162_v46  ;;  %v2167_v51 = vadd.f32 %v3915_v57, %v1020_v47  ;;  %v2156_v53 = vadd.f32 %v4063_v26, %v1327_v48 }
 0x14e   :  { %v1022_v54 = vpop.f32.mrf.mxu0  ;;  %v3493_v58 = vpop.f32.mrf.mxu1 }
 0x14f   :  { %2967 = vst [vmem:[%s4500_s3 + $0x140] sm:$0xf] %v3341_v50  ;;  %v3344_v59 = vpack.c.bf16 %v2167_v51, %v2166_v49  ;;  %v3337_v60 = vpack.c.bf16 %v2156_v53, %v2156_v53  ;;  %v2165_v61 = vadd.f32 %v3493_v58, %v4063_v26  ;;  %v2169_v0 = vadd.f32 %v3912_v56, %v1022_v54 }
 0x150   :  { %v1024_v62 = vpop.f32.mrf.mxu0  ;;  %v1330_v63 = vpop.f32.mrf.mxu1 }
 0x151   :  { %2970 = vst [vmem:[%s4500_s3 + $0x150] sm:$0xff] %v3344_v59  ;;  %2963 = vst [vmem:[%s4500_s3 + $0x128] sm:$0xf] %v3337_v60  ;;  %v3343_v1 = vpack.c.bf16 %v2165_v61, %v2165_v61  ;;  %v2170_v2 = vadd.f32 %v3915_v57, %v1024_v62  ;;  %v2159_v3 = vadd.f32 %v4063_v26, %v1330_v63 }
 0x152   :  { %v1028_v4 = vpop.f32.mrf.mxu0  ;;  %v3496_v5 = vpop.f32.mrf.mxu1 }
 0x153   :  { %2969 = vst [vmem:[%s4500_s3 + $0x14c] sm:$0xf] %v3343_v1  ;;  %v3346_v6 = vpack.c.bf16 %v2170_v2, %v2169_v0  ;;  %v3339_v7 = vpack.c.bf16 %v2159_v3, %v2159_v3  ;;  %v2174_v8 = vadd.f32 %v3496_v5, %v4063_v26  ;;  %v2172_v11 = vadd.f32 %v3912_v56, %v1028_v4 }
 0x154   :  { %v1030_v9 = vpop.f32.mrf.mxu0  ;;  %v1343_v10 = vpop.f32.mrf.mxu1 }
 0x155   :  { %2972 = vst [vmem:[%s4500_s3 + $0x15c] sm:$0xff] %v3346_v6  ;;  %2965 = vst [vmem:[%s4500_s3 + $0x134] sm:$0xf] %v3339_v7  ;;  %v3349_v12 = vpack.c.bf16 %v2174_v8, %v2174_v8  ;;  %v2173_v13 = vadd.f32 %v3915_v57, %v1030_v9  ;;  %v2168_v14 = vadd.f32 %v4063_v26, %v1343_v10 }
 0x156   :  { %v1032_v15 = vpop.f32.mrf.mxu0  ;;  %v3497_v16 = vpop.f32.mrf.mxu1 }
 0x157   :  { %2975 = vst [vmem:[%s4500_s3 + $0x170] sm:$0xf] %v3349_v12  ;;  %v3348_v17 = vpack.c.bf16 %v2173_v13, %v2172_v11  ;;  %v3345_v18 = vpack.c.bf16 %v2168_v14, %v2168_v14  ;;  %v2177_v19 = vadd.f32 %v3497_v16, %v4063_v26  ;;  %v2175_v22 = vadd.f32 %v3912_v56, %v1032_v15 }
 0x158   :  { %v1034_v20 = vpop.f32.mrf.mxu0  ;;  %v1346_v21 = vpop.f32.mrf.mxu1 }
 0x159   :  { %2974 = vst [vmem:[%s4500_s3 + $0x168] sm:$0xff] %v3348_v17  ;;  %2971 = vst [vmem:[%s4500_s3 + $0x158] sm:$0xf] %v3345_v18  ;;  %v3351_v23 = vpack.c.bf16 %v2177_v19, %v2177_v19  ;;  %v2176_v52 = vadd.f32 %v3915_v57, %v1034_v20  ;;  %v2171_v24 = vadd.f32 %v4063_v26, %v1346_v21 }
 0x15a   :  { %v1038_v25 = vpop.f32.mrf.mxu0  ;;  %v3500_v27 = vpop.f32.mrf.mxu1 }
 0x15b   :  { %2977 = vst [vmem:[%s4500_s3 + $0x17c] sm:$0xf] %v3351_v23  ;;  %v3350_v28 = vpack.c.bf16 %v2176_v52, %v2175_v22  ;;  %v3347_v29 = vpack.c.bf16 %v2171_v24, %v2171_v24  ;;  %v2186_v30 = vadd.f32 %v3500_v27, %v4063_v26  ;;  %v2178_v55 = vadd.f32 %v3912_v56, %v1038_v25 }
 0x15c   :  { %v1040_v31 = vpop.f32.mrf.mxu0  ;;  %v1359_v32 = vpop.f32.mrf.mxu1 }
 0x15d   :  { %2976 = vst [vmem:[%s4500_s3 + $0x174] sm:$0xff] %v3350_v28  ;;  %2973 = vst [vmem:[%s4500_s3 + $0x164] sm:$0xf] %v3347_v29  ;;  %v3357_v33 = vpack.c.bf16 %v2186_v30, %v2186_v30  ;;  %v2179_v34 = vadd.f32 %v3915_v57, %v1040_v31  ;;  %v2180_v35 = vadd.f32 %v4063_v26, %v1359_v32 }
 0x15e   :  { %v1042_v36 = vpop.f32.mrf.mxu0  ;;  %v3501_v37 = vpop.f32.mrf.mxu1 }
 0x15f   :  { %2983 = vst [vmem:[%s4500_s3 + $0x1a0] sm:$0xf] %v3357_v33  ;;  %v3352_v38 = vpack.c.bf16 %v2179_v34, %v2178_v55  ;;  %v3353_v39 = vpack.c.bf16 %v2180_v35, %v2180_v35  ;;  %v2189_v40 = vadd.f32 %v3501_v37, %v4063_v26  ;;  %v2181_v43 = vadd.f32 %v3912_v56, %v1042_v36 }
 0x160   :  { %v1044_v41 = vpop.f32.mrf.mxu0  ;;  %v1362_v42 = vpop.f32.mrf.mxu1 }
 0x161   :  { %2978 = vst [vmem:[%s4500_s3 + $0x180] sm:$0xff] %v3352_v38  ;;  %2979 = vst [vmem:[%s4500_s3 + $0x188] sm:$0xf] %v3353_v39  ;;  %v3359_v44 = vpack.c.bf16 %v2189_v40, %v2189_v40  ;;  %v2182_v45 = vadd.f32 %v3915_v57, %v1044_v41  ;;  %v2183_v46 = vadd.f32 %v4063_v26, %v1362_v42 }
 0x162   :  { %v1048_v47 = vpop.f32.mrf.mxu0  ;;  %v3504_v48 = vpop.f32.mrf.mxu1 }
 0x163   :  { %2985 = vst [vmem:[%s4500_s3 + $0x1ac] sm:$0xf] %v3359_v44  ;;  %v3354_v49 = vpack.c.bf16 %v2182_v45, %v2181_v43  ;;  %v3355_v50 = vpack.c.bf16 %v2183_v46, %v2183_v46  ;;  %v2198_v51 = vadd.f32 %v3504_v48, %v4063_v26  ;;  %v2184_v58 = vadd.f32 %v3912_v56, %v1048_v47 }
 0x164   :  { %v1050_v53 = vpop.f32.mrf.mxu0  ;;  %v1375_v54 = vpop.f32.mrf.mxu1 }
 0x165   :  { %2980 = vst [vmem:[%s4500_s3 + $0x18c] sm:$0xff] %v3354_v49  ;;  %2981 = vst [vmem:[%s4500_s3 + $0x194] sm:$0xf] %v3355_v50  ;;  %v3365_v59 = vpack.c.bf16 %v2198_v51, %v2198_v51  ;;  %v2185_v60 = vadd.f32 %v3915_v57, %v1050_v53  ;;  %v2192_v61 = vadd.f32 %v4063_v26, %v1375_v54 }
 0x166   :  { %v1052_v62 = vpop.f32.mrf.mxu0  ;;  %v3505_v63 = vpop.f32.mrf.mxu1 }
 0x167   :  { %2991 = vst [vmem:[%s4500_s3 + $0x1d0] sm:$0xf] %v3365_v59  ;;  %v3356_v0 = vpack.c.bf16 %v2185_v60, %v2184_v58  ;;  %v3361_v1 = vpack.c.bf16 %v2192_v61, %v2192_v61  ;;  %v2201_v2 = vadd.f32 %v3505_v63, %v4063_v26  ;;  %v2187_v5 = vadd.f32 %v3912_v56, %v1052_v62 }
 0x168   :  { %v1054_v3 = vpop.f32.mrf.mxu0  ;;  %v1378_v4 = vpop.f32.mrf.mxu1 }
 0x169   :  { %2982 = vst [vmem:[%s4500_s3 + $0x198] sm:$0xff] %v3356_v0  ;;  %2987 = vst [vmem:[%s4500_s3 + $0x1b8] sm:$0xf] %v3361_v1  ;;  %v3367_v6 = vpack.c.bf16 %v2201_v2, %v2201_v2  ;;  %v2188_v7 = vadd.f32 %v3915_v57, %v1054_v3  ;;  %v2195_v8 = vadd.f32 %v4063_v26, %v1378_v4 }
 0x16a   :  { %v1058_v9 = vpop.f32.mrf.mxu0  ;;  %v3508_v10 = vpop.f32.mrf.mxu1 }
 0x16b   :  { %2993 = vst [vmem:[%s4500_s3 + $0x1dc] sm:$0xf] %v3367_v6  ;;  %v3358_v11 = vpack.c.bf16 %v2188_v7, %v2187_v5  ;;  %v3363_v12 = vpack.c.bf16 %v2195_v8, %v2195_v8  ;;  %v2210_v13 = vadd.f32 %v3508_v10, %v4063_v26  ;;  %v2190_v16 = vadd.f32 %v3912_v56, %v1058_v9 }
 0x16c   :  { %v1060_v14 = vpop.f32.mrf.mxu0  ;;  %v1391_v15 = vpop.f32.mrf.mxu1 }
 0x16d   :  { %2984 = vst [vmem:[%s4500_s3 + $0x1a4] sm:$0xff] %v3358_v11  ;;  %2989 = vst [vmem:[%s4500_s3 + $0x1c4] sm:$0xf] %v3363_v12  ;;  %v3373_v17 = vpack.c.bf16 %v2210_v13, %v2210_v13  ;;  %v2191_v18 = vadd.f32 %v3915_v57, %v1060_v14  ;;  %v2204_v19 = vadd.f32 %v4063_v26, %v1391_v15 }
 0x16e   :  { %v1062_v20 = vpop.f32.mrf.mxu0  ;;  %v3509_v21 = vpop.f32.mrf.mxu1 }
 0x16f   :  { %2999 = vst [vmem:[%s4500_s3 + $0x200] sm:$0xf] %v3373_v17  ;;  %v3360_v22 = vpack.c.bf16 %v2191_v18, %v2190_v16  ;;  %v3369_v23 = vpack.c.bf16 %v2204_v19, %v2204_v19  ;;  %v2213_v52 = vadd.f32 %v3509_v21, %v4063_v26  ;;  %v2193_v27 = vadd.f32 %v3912_v56, %v1062_v20 }
 0x170   :  { %v1064_v24 = vpop.f32.mrf.mxu0  ;;  %v1394_v25 = vpop.f32.mrf.mxu1 }
 0x171   :  { %2986 = vst [vmem:[%s4500_s3 + $0x1b0] sm:$0xff] %v3360_v22  ;;  %2995 = vst [vmem:[%s4500_s3 + $0x1e8] sm:$0xf] %v3369_v23  ;;  %v3375_v28 = vpack.c.bf16 %v2213_v52, %v2213_v52  ;;  %v2194_v29 = vadd.f32 %v3915_v57, %v1064_v24  ;;  %v2207_v30 = vadd.f32 %v4063_v26, %v1394_v25 }
 0x172   :  { %v1068_v31 = vpop.f32.mrf.mxu0  ;;  %v3512_v32 = vpop.f32.mrf.mxu1 }
 0x173   :  { %3001 = vst [vmem:[%s4500_s3 + $0x20c] sm:$0xf] %v3375_v28  ;;  %v3362_v55 = vpack.c.bf16 %v2194_v29, %v2193_v27  ;;  %v3371_v33 = vpack.c.bf16 %v2207_v30, %v2207_v30  ;;  %v2222_v34 = vadd.f32 %v3512_v32, %v4063_v26  ;;  %v2196_v37 = vadd.f32 %v3912_v56, %v1068_v31 }
 0x174   :  { %v1070_v35 = vpop.f32.mrf.mxu0  ;;  %v1407_v36 = vpop.f32.mrf.mxu1 }
 0x175   :  { %2988 = vst [vmem:[%s4500_s3 + $0x1bc] sm:$0xff] %v3362_v55  ;;  %2997 = vst [vmem:[%s4500_s3 + $0x1f4] sm:$0xf] %v3371_v33  ;;  %v3381_v38 = vpack.c.bf16 %v2222_v34, %v2222_v34  ;;  %v2197_v39 = vadd.f32 %v3915_v57, %v1070_v35  ;;  %v2216_v40 = vadd.f32 %v4063_v26, %v1407_v36 }
 0x176   :  { %v1072_v41 = vpop.f32.mrf.mxu0  ;;  %v3513_v42 = vpop.f32.mrf.mxu1 }
 0x177   :  { %3007 = vst [vmem:[%s4500_s3 + $0x230] sm:$0xf] %v3381_v38  ;;  %v3364_v43 = vpack.c.bf16 %v2197_v39, %v2196_v37  ;;  %v3377_v44 = vpack.c.bf16 %v2216_v40, %v2216_v40  ;;  %v2225_v45 = vadd.f32 %v3513_v42, %v4063_v26  ;;  %v2199_v48 = vadd.f32 %v3912_v56, %v1072_v41 }
 0x178   :  { %v1074_v46 = vpop.f32.mrf.mxu0  ;;  %v1410_v47 = vpop.f32.mrf.mxu1 }
 0x179   :  { %2990 = vst [vmem:[%s4500_s3 + $0x1c8] sm:$0xff] %v3364_v43  ;;  %3003 = vst [vmem:[%s4500_s3 + $0x218] sm:$0xf] %v3377_v44  ;;  %v3383_v49 = vpack.c.bf16 %v2225_v45, %v2225_v45  ;;  %v2200_v50 = vadd.f32 %v3915_v57, %v1074_v46  ;;  %v2219_v51 = vadd.f32 %v4063_v26, %v1410_v47 }
 0x17a   :  { %v1078_v53 = vpop.f32.mrf.mxu0  ;;  %v3516_v54 = vpop.f32.mrf.mxu1 }
 0x17b   :  { %3009 = vst [vmem:[%s4500_s3 + $0x23c] sm:$0xf] %v3383_v49  ;;  %v3366_v58 = vpack.c.bf16 %v2200_v50, %v2199_v48  ;;  %v3379_v59 = vpack.c.bf16 %v2219_v51, %v2219_v51  ;;  %v2234_v60 = vadd.f32 %v3516_v54, %v4063_v26  ;;  %v2202_v63 = vadd.f32 %v3912_v56, %v1078_v53 }
 0x17c   :  { %v1080_v61 = vpop.f32.mrf.mxu0  ;;  %v1423_v62 = vpop.f32.mrf.mxu1 }
 0x17d   :  { %2992 = vst [vmem:[%s4500_s3 + $0x1d4] sm:$0xff] %v3366_v58  ;;  %3005 = vst [vmem:[%s4500_s3 + $0x224] sm:$0xf] %v3379_v59  ;;  %v3389_v0 = vpack.c.bf16 %v2234_v60, %v2234_v60  ;;  %v2203_v1 = vadd.f32 %v3915_v57, %v1080_v61  ;;  %v2228_v2 = vadd.f32 %v4063_v26, %v1423_v62 }
 0x17e   :  { %v1082_v3 = vpop.f32.mrf.mxu0  ;;  %v3517_v4 = vpop.f32.mrf.mxu1 }
 0x17f   :  { %3015 = vst [vmem:[%s4500_s3 + $0x260] sm:$0xf] %v3389_v0  ;;  %v3368_v5 = vpack.c.bf16 %v2203_v1, %v2202_v63  ;;  %v3385_v6 = vpack.c.bf16 %v2228_v2, %v2228_v2  ;;  %v2237_v7 = vadd.f32 %v3517_v4, %v4063_v26  ;;  %v2205_v10 = vadd.f32 %v3912_v56, %v1082_v3 }
 0x180   :  { %v1084_v8 = vpop.f32.mrf.mxu0  ;;  %v1426_v9 = vpop.f32.mrf.mxu1 }
 0x181   :  { %2994 = vst [vmem:[%s4500_s3 + $0x1e0] sm:$0xff] %v3368_v5  ;;  %3011 = vst [vmem:[%s4500_s3 + $0x248] sm:$0xf] %v3385_v6  ;;  %v3391_v11 = vpack.c.bf16 %v2237_v7, %v2237_v7  ;;  %v2206_v12 = vadd.f32 %v3915_v57, %v1084_v8  ;;  %v2231_v13 = vadd.f32 %v4063_v26, %v1426_v9 }
 0x182   :  { %v1088_v14 = vpop.f32.mrf.mxu0  ;;  %v3520_v15 = vpop.f32.mrf.mxu1 }
 0x183   :  { %3017 = vst [vmem:[%s4500_s3 + $0x26c] sm:$0xf] %v3391_v11  ;;  %v3370_v16 = vpack.c.bf16 %v2206_v12, %v2205_v10  ;;  %v3387_v17 = vpack.c.bf16 %v2231_v13, %v2231_v13  ;;  %v2246_v18 = vadd.f32 %v3520_v15, %v4063_v26  ;;  %v2208_v21 = vadd.f32 %v3912_v56, %v1088_v14 }
 0x184   :  { %v1090_v19 = vpop.f32.mrf.mxu0  ;;  %v1439_v20 = vpop.f32.mrf.mxu1 }
 0x185   :  { %2996 = vst [vmem:[%s4500_s3 + $0x1ec] sm:$0xff] %v3370_v16  ;;  %3013 = vst [vmem:[%s4500_s3 + $0x254] sm:$0xf] %v3387_v17  ;;  %v3397_v22 = vpack.c.bf16 %v2246_v18, %v2246_v18  ;;  %v2209_v23 = vadd.f32 %v3915_v57, %v1090_v19  ;;  %v2240_v52 = vadd.f32 %v4063_v26, %v1439_v20 }
 0x186   :  { %v1092_v24 = vpop.f32.mrf.mxu0  ;;  %v3521_v25 = vpop.f32.mrf.mxu1 }
 0x187   :  { %3023 = vst [vmem:[%s4500_s3 + $0x290] sm:$0xf] %v3397_v22  ;;  %v3372_v27 = vpack.c.bf16 %v2209_v23, %v2208_v21  ;;  %v3393_v28 = vpack.c.bf16 %v2240_v52, %v2240_v52  ;;  %v2249_v29 = vadd.f32 %v3521_v25, %v4063_v26  ;;  %v2211_v32 = vadd.f32 %v3912_v56, %v1092_v24 }
 0x188   :  { %v1094_v30 = vpop.f32.mrf.mxu0  ;;  %v1442_v31 = vpop.f32.mrf.mxu1 }
 0x189   :  { %2998 = vst [vmem:[%s4500_s3 + $0x1f8] sm:$0xff] %v3372_v27  ;;  %3019 = vst [vmem:[%s4500_s3 + $0x278] sm:$0xf] %v3393_v28  ;;  %v3399_v55 = vpack.c.bf16 %v2249_v29, %v2249_v29  ;;  %v2212_v33 = vadd.f32 %v3915_v57, %v1094_v30  ;;  %v2243_v34 = vadd.f32 %v4063_v26, %v1442_v31 }
 0x18a   :  { %v1098_v35 = vpop.f32.mrf.mxu0  ;;  %v3524_v36 = vpop.f32.mrf.mxu1 }
 0x18b   :  { %3025 = vst [vmem:[%s4500_s3 + $0x29c] sm:$0xf] %v3399_v55  ;;  %v3374_v37 = vpack.c.bf16 %v2212_v33, %v2211_v32  ;;  %v3395_v38 = vpack.c.bf16 %v2243_v34, %v2243_v34  ;;  %v2258_v39 = vadd.f32 %v3524_v36, %v4063_v26  ;;  %v2214_v42 = vadd.f32 %v3912_v56, %v1098_v35 }
 0x18c   :  { %v1100_v40 = vpop.f32.mrf.mxu0  ;;  %v1455_v41 = vpop.f32.mrf.mxu1 }
 0x18d   :  { %3000 = vst [vmem:[%s4500_s3 + $0x204] sm:$0xff] %v3374_v37  ;;  %3021 = vst [vmem:[%s4500_s3 + $0x284] sm:$0xf] %v3395_v38  ;;  %v3405_v43 = vpack.c.bf16 %v2258_v39, %v2258_v39  ;;  %v2215_v44 = vadd.f32 %v3915_v57, %v1100_v40  ;;  %v2252_v45 = vadd.f32 %v4063_v26, %v1455_v41 }
 0x18e   :  { %v1102_v46 = vpop.f32.mrf.mxu0  ;;  %v3525_v47 = vpop.f32.mrf.mxu1 }
 0x18f   :  { %3031 = vst [vmem:[%s4500_s3 + $0x2c0] sm:$0xf] %v3405_v43  ;;  %v3376_v48 = vpack.c.bf16 %v2215_v44, %v2214_v42  ;;  %v3401_v49 = vpack.c.bf16 %v2252_v45, %v2252_v45  ;;  %v2261_v50 = vadd.f32 %v3525_v47, %v4063_v26  ;;  %v2217_v54 = vadd.f32 %v3912_v56, %v1102_v46 }
 0x190   :  { %v1104_v51 = vpop.f32.mrf.mxu0  ;;  %v1458_v53 = vpop.f32.mrf.mxu1 }
 0x191   :  { %3002 = vst [vmem:[%s4500_s3 + $0x210] sm:$0xff] %v3376_v48  ;;  %3027 = vst [vmem:[%s4500_s3 + $0x2a8] sm:$0xf] %v3401_v49  ;;  %v3407_v58 = vpack.c.bf16 %v2261_v50, %v2261_v50  ;;  %v2218_v59 = vadd.f32 %v3915_v57, %v1104_v51  ;;  %v2255_v60 = vadd.f32 %v4063_v26, %v1458_v53 }
 0x192   :  { %v1108_v61 = vpop.f32.mrf.mxu0  ;;  %v3528_v62 = vpop.f32.mrf.mxu1 }
 0x193   :  { %3033 = vst [vmem:[%s4500_s3 + $0x2cc] sm:$0xf] %v3407_v58  ;;  %v3378_v63 = vpack.c.bf16 %v2218_v59, %v2217_v54  ;;  %v3403_v0 = vpack.c.bf16 %v2255_v60, %v2255_v60  ;;  %v2270_v1 = vadd.f32 %v3528_v62, %v4063_v26  ;;  %v2220_v4 = vadd.f32 %v3912_v56, %v1108_v61 }
 0x194   :  { %v1110_v2 = vpop.f32.mrf.mxu0  ;;  %v1471_v3 = vpop.f32.mrf.mxu1 }
 0x195   :  { %3004 = vst [vmem:[%s4500_s3 + $0x21c] sm:$0xff] %v3378_v63  ;;  %3029 = vst [vmem:[%s4500_s3 + $0x2b4] sm:$0xf] %v3403_v0  ;;  %v3413_v5 = vpack.c.bf16 %v2270_v1, %v2270_v1  ;;  %v2221_v6 = vadd.f32 %v3915_v57, %v1110_v2  ;;  %v2264_v7 = vadd.f32 %v4063_v26, %v1471_v3 }
 0x196   :  { %v1112_v8 = vpop.f32.mrf.mxu0  ;;  %v3529_v9 = vpop.f32.mrf.mxu1 }
 0x197   :  { %3039 = vst [vmem:[%s4500_s3 + $0x2f0] sm:$0xf] %v3413_v5  ;;  %v3380_v10 = vpack.c.bf16 %v2221_v6, %v2220_v4  ;;  %v3409_v11 = vpack.c.bf16 %v2264_v7, %v2264_v7  ;;  %v2273_v12 = vadd.f32 %v3529_v9, %v4063_v26  ;;  %v2223_v15 = vadd.f32 %v3912_v56, %v1112_v8 }
 0x198   :  { %v1114_v13 = vpop.f32.mrf.mxu0  ;;  %v1474_v14 = vpop.f32.mrf.mxu1 }
 0x199   :  { %3006 = vst [vmem:[%s4500_s3 + $0x228] sm:$0xff] %v3380_v10  ;;  %3035 = vst [vmem:[%s4500_s3 + $0x2d8] sm:$0xf] %v3409_v11  ;;  %v3415_v16 = vpack.c.bf16 %v2273_v12, %v2273_v12  ;;  %v2224_v17 = vadd.f32 %v3915_v57, %v1114_v13  ;;  %v2267_v18 = vadd.f32 %v4063_v26, %v1474_v14 }
 0x19b   :  { %3041 = vst [vmem:[%s4500_s3 + $0x2fc] sm:$0xf] %v3415_v16  ;;  %v3382_v19 = vpack.c.bf16 %v2224_v17, %v2223_v15  ;;  %v3411_v20 = vpack.c.bf16 %v2267_v18, %v2267_v18 }
 0x19d   :  { %3008 = vst [vmem:[%s4500_s3 + $0x234] sm:$0xff] %v3382_v19  ;;  %3037 = vst [vmem:[%s4500_s3 + $0x2e4] sm:$0xf] %v3411_v20 }

// kernel: multi_scale_attention.4
= control target key start
LH: loop header
LB: loop body
LE: loop exit
PB: predicated region body
PF: predicated region fallthrough
CT: control target
= control target key end

     0   :  { %s7590_s12 = smov 0   ;;  %s7592_s13 = smov 0   ;;  %s10070_s0 = inlined_call_operand.vmem [shape: bf16[2,256,384], index: 0, kind: input, shape index: {}, may-alias: {0,1,2}]   ;;  %s10071_s1 = inlined_call_operand.vmem [shape: bf16[2,256,384], index: 1, kind: input, shape index: {}, may-alias: {0,1,2}]   ;;  %s10072_s2 = inlined_call_operand.vmem [shape: bf16[2,256,384], index: 2, kind: input, shape index: {}, may-alias: {0,1,2}]   ;;  %s10073_s3 = inlined_call_operand.vmem [shape: bf16[2,256,128], index: 3, kind: output, shape index: {}]  }
   0x1   :  { %s7594_s14 = smov 0   ;;  %s7596_s15 = smov 0  }
   0x2   :  { %s7598_s16 = smov 0  }
   0x3 LB: > { %s32_s17 = sadd.s32 1, %s7561_s15  ;;  %p48_p1 = scmp.ne.s32.totalorder %s7553_s13, %s7549_s12  ;;  %s7565_s16 = sphi %s7598_s16, %s13_s16   ;;  %s7561_s15 = sphi %s7596_s15, %s10522_s15   ;;  %s7557_s14 = sphi %s7594_s14, %s10521_s14   ;;  %s7553_s13 = sphi %s7592_s13, %s10520_s13   ;;  %s7549_s12 = sphi %s7590_s12, %s10519_s12  }
   0x4   : > { %p34_p0 = scmp.ge.s32.totalorder %s32_s17, 2  ;;  %p49_p2 = scmp.eq.s32.totalorder %s7565_s16, 0 }
   0x5   : > { %s41_s20 = sadd.s32 1, %s7553_s13  ;;  %p6074_p5 = scmp.ge.s32.totalorder %s7565_s16, 2 }
   0x6   : > { %s10524_s17 = smov (%p34_p0, %s32_s17), 0  ;;  %p7621_p3 = por %p49_p2, %p48_p1 }
   0x7   : > { %s36_s19 = ssub.s32 %s7561_s15, %s10524_s17  ;;  %158 = sbr.rel (%p6074_p5) target bundleno = 90 (0x5a), region = 16 }
   0x8   : > { %p39_p4 = scmp.eq.s32.totalorder %s36_s19, 0 }
   0xa   : > { %s7629_s21 = scalar_select %p39_p4, %s7553_s13, %s41_s20  }
   0xc   : > { %161 = sbr.rel (!%p7621_p3) target bundleno = 38 (0x26), region = 20  ;;  %s163_s22 = sand.u32 (%p7621_p3), 1, %s7553_s13  }
   0xd   : > { %s6793_s23 = smul.u32 (%p7621_p3), 384, %s7561_s15  ;;  %s6075_s24 = sshll.u32 (%p7621_p3), %s163_s22, 7 }
   0xe   : > { %s7644_s28 = scalar_lea.vmem (%p7621_p3), [#allocation5], %s6075_s24 }
   0xf   : > { %s7639_s27 = scalar_lea.vmem (%p7621_p3), %s10070_s0, %s6793_s23 }
  0x10   : > { %v188_v0 = vld [vmem:[%s7639_s27] sm:$0xf] (%p7621_p3)  ;;  %v190_v1 = vld [vmem:[%s7639_s27 + $0xc] sm:$0xf] (%p7621_p3)  ;;  %v192_v2 = vld [vmem:[%s7639_s27 + $0x18] sm:$0xf] (%p7621_p3) }
  0x11   : > { %189 = vst [vmem:[%s7644_s28] sm:$0xf] %v188_v0  ;;  %191 = vst [vmem:[%s7644_s28 + $0x4] sm:$0xf] %v190_v1  ;;  %v194_v3 = vld [vmem:[%s7639_s27 + $0x24] sm:$0xf] }
  0x12   : > { %193 = vst [vmem:[%s7644_s28 + $0x8] sm:$0xf] %v192_v2  ;;  %v196_v4 = vld [vmem:[%s7639_s27 + $0x30] sm:$0xf]  ;;  %v198_v5 = vld [vmem:[%s7639_s27 + $0x3c] sm:$0xf] }
  0x13   : > { %195 = vst [vmem:[%s7644_s28 + $0xc] sm:$0xf] %v194_v3  ;;  %197 = vst [vmem:[%s7644_s28 + $0x10] sm:$0xf] %v196_v4  ;;  %v200_v6 = vld [vmem:[%s7639_s27 + $0x48] sm:$0xf] }
  0x14   : > { %199 = vst [vmem:[%s7644_s28 + $0x14] sm:$0xf] %v198_v5  ;;  %v202_v7 = vld [vmem:[%s7639_s27 + $0x54] sm:$0xf]  ;;  %v204_v8 = vld [vmem:[%s7639_s27 + $0x60] sm:$0xf] }
  0x15   : > { %201 = vst [vmem:[%s7644_s28 + $0x18] sm:$0xf] %v200_v6  ;;  %203 = vst [vmem:[%s7644_s28 + $0x1c] sm:$0xf] %v202_v7  ;;  %v206_v9 = vld [vmem:[%s7639_s27 + $0x6c] sm:$0xf] }
  0x16   : > { %205 = vst [vmem:[%s7644_s28 + $0x20] sm:$0xf] %v204_v8  ;;  %v208_v10 = vld [vmem:[%s7639_s27 + $0x78] sm:$0xf]  ;;  %v210_v11 = vld [vmem:[%s7639_s27 + $0x84] sm:$0xf] }
  0x17   : > { %207 = vst [vmem:[%s7644_s28 + $0x24] sm:$0xf] %v206_v9  ;;  %209 = vst [vmem:[%s7644_s28 + $0x28] sm:$0xf] %v208_v10  ;;  %v212_v12 = vld [vmem:[%s7639_s27 + $0x90] sm:$0xf] }
  0x18   : > { %211 = vst [vmem:[%s7644_s28 + $0x2c] sm:$0xf] %v210_v11  ;;  %v214_v13 = vld [vmem:[%s7639_s27 + $0x9c] sm:$0xf]  ;;  %v216_v14 = vld [vmem:[%s7639_s27 + $0xa8] sm:$0xf] }
  0x19   : > { %213 = vst [vmem:[%s7644_s28 + $0x30] sm:$0xf] %v212_v12  ;;  %215 = vst [vmem:[%s7644_s28 + $0x34] sm:$0xf] %v214_v13  ;;  %v218_v15 = vld [vmem:[%s7639_s27 + $0xb4] sm:$0xf] }
  0x1a   : > { %217 = vst [vmem:[%s7644_s28 + $0x38] sm:$0xf] %v216_v14  ;;  %v220_v16 = vld [vmem:[%s7639_s27 + $0xc0] sm:$0xf]  ;;  %v222_v17 = vld [vmem:[%s7639_s27 + $0xcc] sm:$0xf] }
  0x1b   : > { %219 = vst [vmem:[%s7644_s28 + $0x3c] sm:$0xf] %v218_v15  ;;  %221 = vst [vmem:[%s7644_s28 + $0x40] sm:$0xf] %v220_v16  ;;  %v224_v18 = vld [vmem:[%s7639_s27 + $0xd8] sm:$0xf] }
  0x1c   : > { %223 = vst [vmem:[%s7644_s28 + $0x44] sm:$0xf] %v222_v17  ;;  %v226_v19 = vld [vmem:[%s7639_s27 + $0xe4] sm:$0xf]  ;;  %v228_v20 = vld [vmem:[%s7639_s27 + $0xf0] sm:$0xf] }
  0x1d   : > { %225 = vst [vmem:[%s7644_s28 + $0x48] sm:$0xf] %v224_v18  ;;  %227 = vst [vmem:[%s7644_s28 + $0x4c] sm:$0xf] %v226_v19  ;;  %v230_v21 = vld [vmem:[%s7639_s27 + $0xfc] sm:$0xf] }
  0x1e   : > { %229 = vst [vmem:[%s7644_s28 + $0x50] sm:$0xf] %v228_v20  ;;  %v232_v22 = vld [vmem:[%s7639_s27 + $0x108] sm:$0xf]  ;;  %v234_v23 = vld [vmem:[%s7639_s27 + $0x114] sm:$0xf] }
  0x1f   : > { %231 = vst [vmem:[%s7644_s28 + $0x54] sm:$0xf] %v230_v21  ;;  %233 = vst [vmem:[%s7644_s28 + $0x58] sm:$0xf] %v232_v22  ;;  %v236_v24 = vld [vmem:[%s7639_s27 + $0x120] sm:$0xf] }
  0x20   : > { %235 = vst [vmem:[%s7644_s28 + $0x5c] sm:$0xf] %v234_v23  ;;  %v238_v25 = vld [vmem:[%s7639_s27 + $0x12c] sm:$0xf]  ;;  %v240_v26 = vld [vmem:[%s7639_s27 + $0x138] sm:$0xf] }
  0x21   : > { %237 = vst [vmem:[%s7644_s28 + $0x60] sm:$0xf] %v236_v24  ;;  %239 = vst [vmem:[%s7644_s28 + $0x64] sm:$0xf] %v238_v25  ;;  %v242_v27 = vld [vmem:[%s7639_s27 + $0x144] sm:$0xf] }
  0x22   : > { %241 = vst [vmem:[%s7644_s28 + $0x68] sm:$0xf] %v240_v26  ;;  %v244_v28 = vld [vmem:[%s7639_s27 + $0x150] sm:$0xf]  ;;  %v246_v29 = vld [vmem:[%s7639_s27 + $0x15c] sm:$0xf] }
  0x23   : > { %243 = vst [vmem:[%s7644_s28 + $0x6c] sm:$0xf] %v242_v27  ;;  %245 = vst [vmem:[%s7644_s28 + $0x70] sm:$0xf] %v244_v28  ;;  %v248_v30 = vld [vmem:[%s7639_s27 + $0x168] sm:$0xf] }
  0x24   : > { %247 = vst [vmem:[%s7644_s28 + $0x74] sm:$0xf] %v246_v29  ;;  %v250_v31 = vld [vmem:[%s7639_s27 + $0x174] sm:$0xf]  ;;  %249 = vst [vmem:[%s7644_s28 + $0x78] sm:$0xf] %v248_v30 }
  0x25   : > { %251 = vst [vmem:[%s7644_s28 + $0x7c] sm:$0xf] %v250_v31 }
  0x26 PF: > { %339 = sbr.rel (!%p7621_p3) target bundleno = 64 (0x40), region = 61  ;;  %s341_s29 = sand.u32 (%p7621_p3), 1, %s7553_s13  }
  0x27   : > { %s6078_s30 = smul.u32 (%p7621_p3), 384, %s7561_s15  ;;  %s6077_s4 = sshll.u32 (%p7621_p3), %s341_s29, 7 }
  0x28   : > { %s7719_s8 = scalar_lea.vmem (%p7621_p3), [#allocation6], %s6077_s4 }
  0x29   : > { %s7714_s7 = scalar_lea.vmem (%p7621_p3), %s10071_s1, %s6078_s30 }
  0x2a   : > { %v6079_v32 = vld [vmem:[%s7714_s7 + $0x4] sm:$0xf] (%p7621_p3)  ;;  %v6080_v33 = vld [vmem:[%s7714_s7 + $0x10] sm:$0xf] (%p7621_p3)  ;;  %v6081_v34 = vld [vmem:[%s7714_s7 + $0x1c] sm:$0xf] (%p7621_p3) }
  0x2b   : > { %368 = vst [vmem:[%s7719_s8] sm:$0xf] %v6079_v32  ;;  %370 = vst [vmem:[%s7719_s8 + $0x4] sm:$0xf] %v6080_v33  ;;  %v6082_v35 = vld [vmem:[%s7714_s7 + $0x28] sm:$0xf] }
  0x2c   : > { %372 = vst [vmem:[%s7719_s8 + $0x8] sm:$0xf] %v6081_v34  ;;  %v6083_v36 = vld [vmem:[%s7714_s7 + $0x34] sm:$0xf]  ;;  %v6084_v37 = vld [vmem:[%s7714_s7 + $0x40] sm:$0xf] }
  0x2d   : > { %374 = vst [vmem:[%s7719_s8 + $0xc] sm:$0xf] %v6082_v35  ;;  %376 = vst [vmem:[%s7719_s8 + $0x10] sm:$0xf] %v6083_v36  ;;  %v6085_v38 = vld [vmem:[%s7714_s7 + $0x4c] sm:$0xf] }
  0x2e   : > { %378 = vst [vmem:[%s7719_s8 + $0x14] sm:$0xf] %v6084_v37  ;;  %v6086_v39 = vld [vmem:[%s7714_s7 + $0x58] sm:$0xf]  ;;  %v6087_v40 = vld [vmem:[%s7714_s7 + $0x64] sm:$0xf] }
  0x2f   : > { %380 = vst [vmem:[%s7719_s8 + $0x18] sm:$0xf] %v6085_v38  ;;  %382 = vst [vmem:[%s7719_s8 + $0x1c] sm:$0xf] %v6086_v39  ;;  %v6088_v41 = vld [vmem:[%s7714_s7 + $0x70] sm:$0xf] }
  0x30   : > { %384 = vst [vmem:[%s7719_s8 + $0x20] sm:$0xf] %v6087_v40  ;;  %v6089_v42 = vld [vmem:[%s7714_s7 + $0x7c] sm:$0xf]  ;;  %v6090_v43 = vld [vmem:[%s7714_s7 + $0x88] sm:$0xf] }
  0x31   : > { %386 = vst [vmem:[%s7719_s8 + $0x24] sm:$0xf] %v6088_v41  ;;  %388 = vst [vmem:[%s7719_s8 + $0x28] sm:$0xf] %v6089_v42  ;;  %v6091_v44 = vld [vmem:[%s7714_s7 + $0x94] sm:$0xf] }
  0x32   : > { %390 = vst [vmem:[%s7719_s8 + $0x2c] sm:$0xf] %v6090_v43  ;;  %v6092_v45 = vld [vmem:[%s7714_s7 + $0xa0] sm:$0xf]  ;;  %v6093_v46 = vld [vmem:[%s7714_s7 + $0xac] sm:$0xf] }
  0x33   : > { %392 = vst [vmem:[%s7719_s8 + $0x30] sm:$0xf] %v6091_v44  ;;  %394 = vst [vmem:[%s7719_s8 + $0x34] sm:$0xf] %v6092_v45  ;;  %v6094_v47 = vld [vmem:[%s7714_s7 + $0xb8] sm:$0xf] }
  0x34   : > { %396 = vst [vmem:[%s7719_s8 + $0x38] sm:$0xf] %v6093_v46  ;;  %v6095_v48 = vld [vmem:[%s7714_s7 + $0xc4] sm:$0xf]  ;;  %v6096_v49 = vld [vmem:[%s7714_s7 + $0xd0] sm:$0xf] }
  0x35   : > { %398 = vst [vmem:[%s7719_s8 + $0x3c] sm:$0xf] %v6094_v47  ;;  %400 = vst [vmem:[%s7719_s8 + $0x40] sm:$0xf] %v6095_v48  ;;  %v6097_v50 = vld [vmem:[%s7714_s7 + $0xdc] sm:$0xf] }
  0x36   : > { %402 = vst [vmem:[%s7719_s8 + $0x44] sm:$0xf] %v6096_v49  ;;  %v6098_v51 = vld [vmem:[%s7714_s7 + $0xe8] sm:$0xf]  ;;  %v6099_v52 = vld [vmem:[%s7714_s7 + $0xf4] sm:$0xf] }
  0x37   : > { %404 = vst [vmem:[%s7719_s8 + $0x48] sm:$0xf] %v6097_v50  ;;  %406 = vst [vmem:[%s7719_s8 + $0x4c] sm:$0xf] %v6098_v51  ;;  %v6100_v53 = vld [vmem:[%s7714_s7 + $0x100] sm:$0xf] }
  0x38   : > { %408 = vst [vmem:[%s7719_s8 + $0x50] sm:$0xf] %v6099_v52  ;;  %v6101_v54 = vld [vmem:[%s7714_s7 + $0x10c] sm:$0xf]  ;;  %v6102_v55 = vld [vmem:[%s7714_s7 + $0x118] sm:$0xf] }
  0x39   : > { %410 = vst [vmem:[%s7719_s8 + $0x54] sm:$0xf] %v6100_v53  ;;  %412 = vst [vmem:[%s7719_s8 + $0x58] sm:$0xf] %v6101_v54  ;;  %v6103_v56 = vld [vmem:[%s7714_s7 + $0x124] sm:$0xf] }
  0x3a   : > { %414 = vst [vmem:[%s7719_s8 + $0x5c] sm:$0xf] %v6102_v55  ;;  %v6104_v57 = vld [vmem:[%s7714_s7 + $0x130] sm:$0xf]  ;;  %v6105_v58 = vld [vmem:[%s7714_s7 + $0x13c] sm:$0xf] }
  0x3b   : > { %416 = vst [vmem:[%s7719_s8 + $0x60] sm:$0xf] %v6103_v56  ;;  %418 = vst [vmem:[%s7719_s8 + $0x64] sm:$0xf] %v6104_v57  ;;  %v6106_v59 = vld [vmem:[%s7714_s7 + $0x148] sm:$0xf] }
  0x3c   : > { %420 = vst [vmem:[%s7719_s8 + $0x68] sm:$0xf] %v6105_v58  ;;  %v6107_v60 = vld [vmem:[%s7714_s7 + $0x154] sm:$0xf]  ;;  %v6108_v61 = vld [vmem:[%s7714_s7 + $0x160] sm:$0xf] }
  0x3d   : > { %422 = vst [vmem:[%s7719_s8 + $0x6c] sm:$0xf] %v6106_v59  ;;  %424 = vst [vmem:[%s7719_s8 + $0x70] sm:$0xf] %v6107_v60  ;;  %v6109_v62 = vld [vmem:[%s7714_s7 + $0x16c] sm:$0xf] }
  0x3e   : > { %426 = vst [vmem:[%s7719_s8 + $0x74] sm:$0xf] %v6108_v61  ;;  %v6110_v63 = vld [vmem:[%s7714_s7 + $0x178] sm:$0xf]  ;;  %428 = vst [vmem:[%s7719_s8 + $0x78] sm:$0xf] %v6109_v62 }
  0x3f   : > { %430 = vst [vmem:[%s7719_s8 + $0x7c] sm:$0xf] %v6110_v63 }
  0x40 PF: > { %518 = sbr.rel (!%p7621_p3) target bundleno = 90 (0x5a), region = 102  ;;  %s520_s9 = sand.u32 (%p7621_p3), 1, %s7553_s13  }
  0x41   : > { %s6112_s10 = smul.u32 (%p7621_p3), 384, %s7561_s15  ;;  %s6111_s11 = sshll.u32 (%p7621_p3), %s520_s9, 7 }
  0x42   : > { %s7794_s18 = scalar_lea.vmem (%p7621_p3), [#allocation7], %s6111_s11 }
  0x43   : > { %s7789_s22 = scalar_lea.vmem (%p7621_p3), %s10072_s2, %s6112_s10 }
  0x44   : > { %v6113_v0 = vld [vmem:[%s7789_s22 + $0x8] sm:$0xf] (%p7621_p3)  ;;  %v6114_v1 = vld [vmem:[%s7789_s22 + $0x14] sm:$0xf] (%p7621_p3)  ;;  %v6115_v2 = vld [vmem:[%s7789_s22 + $0x20] sm:$0xf] (%p7621_p3) }
  0x45   : > { %547 = vst [vmem:[%s7794_s18] sm:$0xf] %v6113_v0  ;;  %549 = vst [vmem:[%s7794_s18 + $0x4] sm:$0xf] %v6114_v1  ;;  %v6116_v3 = vld [vmem:[%s7789_s22 + $0x2c] sm:$0xf] }
  0x46   : > { %551 = vst [vmem:[%s7794_s18 + $0x8] sm:$0xf] %v6115_v2  ;;  %v6117_v4 = vld [vmem:[%s7789_s22 + $0x38] sm:$0xf]  ;;  %v6118_v5 = vld [vmem:[%s7789_s22 + $0x44] sm:$0xf] }
  0x47   : > { %553 = vst [vmem:[%s7794_s18 + $0xc] sm:$0xf] %v6116_v3  ;;  %555 = vst [vmem:[%s7794_s18 + $0x10] sm:$0xf] %v6117_v4  ;;  %v6119_v6 = vld [vmem:[%s7789_s22 + $0x50] sm:$0xf] }
  0x48   : > { %557 = vst [vmem:[%s7794_s18 + $0x14] sm:$0xf] %v6118_v5  ;;  %v6120_v7 = vld [vmem:[%s7789_s22 + $0x5c] sm:$0xf]  ;;  %v6121_v8 = vld [vmem:[%s7789_s22 + $0x68] sm:$0xf] }
  0x49   : > { %559 = vst [vmem:[%s7794_s18 + $0x18] sm:$0xf] %v6119_v6  ;;  %561 = vst [vmem:[%s7794_s18 + $0x1c] sm:$0xf] %v6120_v7  ;;  %v6122_v9 = vld [vmem:[%s7789_s22 + $0x74] sm:$0xf] }
  0x4a   : > { %563 = vst [vmem:[%s7794_s18 + $0x20] sm:$0xf] %v6121_v8  ;;  %v6123_v10 = vld [vmem:[%s7789_s22 + $0x80] sm:$0xf]  ;;  %v6124_v11 = vld [vmem:[%s7789_s22 + $0x8c] sm:$0xf] }
  0x4b   : > { %565 = vst [vmem:[%s7794_s18 + $0x24] sm:$0xf] %v6122_v9  ;;  %567 = vst [vmem:[%s7794_s18 + $0x28] sm:$0xf] %v6123_v10  ;;  %v6125_v12 = vld [vmem:[%s7789_s22 + $0x98] sm:$0xf] }
  0x4c   : > { %569 = vst [vmem:[%s7794_s18 + $0x2c] sm:$0xf] %v6124_v11  ;;  %v6126_v13 = vld [vmem:[%s7789_s22 + $0xa4] sm:$0xf]  ;;  %v6127_v14 = vld [vmem:[%s7789_s22 + $0xb0] sm:$0xf] }
  0x4d   : > { %571 = vst [vmem:[%s7794_s18 + $0x30] sm:$0xf] %v6125_v12  ;;  %573 = vst [vmem:[%s7794_s18 + $0x34] sm:$0xf] %v6126_v13  ;;  %v6128_v15 = vld [vmem:[%s7789_s22 + $0xbc] sm:$0xf] }
  0x4e   : > { %575 = vst [vmem:[%s7794_s18 + $0x38] sm:$0xf] %v6127_v14  ;;  %v6129_v16 = vld [vmem:[%s7789_s22 + $0xc8] sm:$0xf]  ;;  %v6130_v17 = vld [vmem:[%s7789_s22 + $0xd4] sm:$0xf] }
  0x4f   : > { %577 = vst [vmem:[%s7794_s18 + $0x3c] sm:$0xf] %v6128_v15  ;;  %579 = vst [vmem:[%s7794_s18 + $0x40] sm:$0xf] %v6129_v16  ;;  %v6131_v18 = vld [vmem:[%s7789_s22 + $0xe0] sm:$0xf] }
  0x50   : > { %581 = vst [vmem:[%s7794_s18 + $0x44] sm:$0xf] %v6130_v17  ;;  %v6132_v19 = vld [vmem:[%s7789_s22 + $0xec] sm:$0xf]  ;;  %v6133_v20 = vld [vmem:[%s7789_s22 + $0xf8] sm:$0xf] }
  0x51   : > { %583 = vst [vmem:[%s7794_s18 + $0x48] sm:$0xf] %v6131_v18  ;;  %585 = vst [vmem:[%s7794_s18 + $0x4c] sm:$0xf] %v6132_v19  ;;  %v6134_v21 = vld [vmem:[%s7789_s22 + $0x104] sm:$0xf] }
  0x52   : > { %587 = vst [vmem:[%s7794_s18 + $0x50] sm:$0xf] %v6133_v20  ;;  %v6135_v22 = vld [vmem:[%s7789_s22 + $0x110] sm:$0xf]  ;;  %v6136_v23 = vld [vmem:[%s7789_s22 + $0x11c] sm:$0xf] }
  0x53   : > { %589 = vst [vmem:[%s7794_s18 + $0x54] sm:$0xf] %v6134_v21  ;;  %591 = vst [vmem:[%s7794_s18 + $0x58] sm:$0xf] %v6135_v22  ;;  %v6137_v24 = vld [vmem:[%s7789_s22 + $0x128] sm:$0xf] }
  0x54   : > { %593 = vst [vmem:[%s7794_s18 + $0x5c] sm:$0xf] %v6136_v23  ;;  %v6138_v25 = vld [vmem:[%s7789_s22 + $0x134] sm:$0xf]  ;;  %v6139_v26 = vld [vmem:[%s7789_s22 + $0x140] sm:$0xf] }
  0x55   : > { %595 = vst [vmem:[%s7794_s18 + $0x60] sm:$0xf] %v6137_v24  ;;  %597 = vst [vmem:[%s7794_s18 + $0x64] sm:$0xf] %v6138_v25  ;;  %v6140_v27 = vld [vmem:[%s7789_s22 + $0x14c] sm:$0xf] }
  0x56   : > { %599 = vst [vmem:[%s7794_s18 + $0x68] sm:$0xf] %v6139_v26  ;;  %v6141_v28 = vld [vmem:[%s7789_s22 + $0x158] sm:$0xf]  ;;  %v6142_v29 = vld [vmem:[%s7789_s22 + $0x164] sm:$0xf] }
  0x57   : > { %601 = vst [vmem:[%s7794_s18 + $0x6c] sm:$0xf] %v6140_v27  ;;  %603 = vst [vmem:[%s7794_s18 + $0x70] sm:$0xf] %v6141_v28  ;;  %v6143_v30 = vld [vmem:[%s7789_s22 + $0x170] sm:$0xf] }
  0x58   : > { %605 = vst [vmem:[%s7794_s18 + $0x74] sm:$0xf] %v6142_v29  ;;  %v6144_v31 = vld [vmem:[%s7789_s22 + $0x17c] sm:$0xf]  ;;  %607 = vst [vmem:[%s7794_s18 + $0x78] sm:$0xf] %v6143_v30 }
  0x59   : > { %609 = vst [vmem:[%s7794_s18 + $0x7c] sm:$0xf] %v6144_v31 }
  0x5a PF: > { %p6145_p6 = scmp.ge.s32.totalorder %s7565_s16, 1  ;;  %p696_p7 = scmp.lt.s32.totalorder %s7565_s16, 3 }
  0x5c   : > { %p697_p8 = pnand %p6145_p6, %p696_p7 }
  0x5e   : > { %700 = sbr.rel (%p697_p8) target bundleno = 1841 (0x731), region = 143 }
  0x63   : > { %s703_s23 = sand.u32 1, %s7549_s12   ;;  %vm898_vm0 = vcmask 523264   ;;  %s7567_s26 = smov 64  }
  0x64   : > { %s7860_s24 = sshll.u32 %s703_s23, 7  ;;  %p756_p9 = scmp.lt.s32.totalorder %s7557_s14, 1 }
  0x65   : > { %s7863_s25 = scalar_lea.vmem [#allocation6], %s7860_s24  ;;  %s7877_s12 = scalar_lea.vmem [#allocation5], %s7860_s24 }
  0x66   : > { %v6919_v32 = vld [vmem:[%s7863_s25 + $0x78] sm:$0xff]   ;;  %v6921_v34 = vld [vmem:[%s7863_s25 + $0x70] sm:$0xff]   ;;  %v6923_v38 = vld [vmem:[%s7863_s25 + $0x68] sm:$0xff]   ;;  %s7955_s27 = scalar_lea.vmem [#allocation7], %s7860_s24  ;;  %s10526_s14 = smov (!%p756_p9, %s7557_s14), 1 }
  0x67   : > { %v6920_v33 = vld [vmem:[%s7863_s25 + $0x38] sm:$0xff]   ;;  %6777 = vmatprep.subr.msk.bf16.mxu0 %vm898_vm0, %v6919_v32  ;;  %v6922_v36 = vld [vmem:[%s7863_s25 + $0x30] sm:$0xff]   ;;  %v6924_v39 = vld [vmem:[%s7863_s25 + $0x28] sm:$0xff]   ;;  %s6313_s28 = sshll.u32 %s10526_s14, 7 }
  0x68   : > { %v1290_v35 = vsel %vm898_vm0, %v6920_v33, 0  ;;  %v1287_v37 = vsel %vm898_vm0, %v6922_v36, 0  ;;  %v6935_v40 = vld [vmem:[%s7877_s12] sm:$0xff]   ;;  %v1284_v41 = vsel %vm898_vm0, %v6924_v39, 0  ;;  %v6928_v44 = vld [vmem:[%s7863_s25 + $0x18] sm:$0xff]   ;;  %v6930_v48 = vld [vmem:[%s7863_s25 + $0x10] sm:$0xff]   ;;  %s9975_s4 = scalar_lea.vmem %s10073_s3, %s6313_s28 }
  0x69   : > { %6442 = vmatpush3.bf16.xpose.msra.mxu0 %v1290_v35  ;;  %v6925_v42 = vld [vmem:[%s7863_s25 + $0x60] sm:$0xff]   ;;  %6457 = vmatprep.mubr.msk.bf16.mxu0 %vm898_vm0, %v6935_v40  ;;  %v6927_v46 = vld [vmem:[%s7863_s25 + $0x58] sm:$0xff]   ;;  %v1278_v47 = vsel %vm898_vm0, %v6928_v44, 0  ;;  %v6929_v49 = vld [vmem:[%s7863_s25 + $0x50] sm:$0xff]   ;;  %v1275_v50 = vsel %vm898_vm0, %v6930_v48, 0 }
  0x6a   : > { %6778 = vmatprep.subr.msk.bf16.mxu0 %vm898_vm0, %v6921_v34  ;;  %v6926_v43 = vld [vmem:[%s7863_s25 + $0x20] sm:$0xff]   ;;  %v6932_v51 = vld [vmem:[%s7863_s25 + $0x8] sm:$0xff]   ;;  %v6951_v57 = vld [vmem:[%s7863_s25 + $0x78] sm:$0xff]  }
  0x6b   : > { %v1281_v45 = vsel %vm898_vm0, %v6926_v43, 0  ;;  %v6931_v52 = vld [vmem:[%s7863_s25 + $0x48] sm:$0xff]   ;;  %v1272_v53 = vsel %vm898_vm0, %v6932_v51, 0  ;;  %v6933_v54 = vld [vmem:[%s7863_s25 + $0x40] sm:$0xff]   ;;  %v6952_v58 = vld [vmem:[%s7863_s25 + $0x38] sm:$0xff]   ;;  %3268 = vrot.lane.b32.xlu1 %v6951_v57, %s7567_s26 }
  0x6c   : > { %v6934_v55 = vld [vmem:[%s7863_s25] sm:$0xff]   ;;  %3252 = vrot.lane.b32.xlu0 %v6952_v58, %s7567_s26  ;;  %v6953_v59 = vld [vmem:[%s7863_s25 + $0x30] sm:$0xff]   ;;  %v6936_v60 = vld [vmem:[%s7877_s12 + $0x8] sm:$0xff]  }
  0x6d   : > { %v1269_v56 = vsel %vm898_vm0, %v6934_v55, 0  ;;  %v6937_v61 = vld [vmem:[%s7877_s12 + $0x10] sm:$0xff]   ;;  %v6938_v62 = vld [vmem:[%s7877_s12 + $0x18] sm:$0xff]   ;;  %v6939_v63 = vld [vmem:[%s7877_s12 + $0x20] sm:$0xff]  }
  0x6e   : > { %v6940_v0 = vld [vmem:[%s7877_s12 + $0x28] sm:$0xff]   ;;  %v6941_v1 = vld [vmem:[%s7877_s12 + $0x30] sm:$0xff]   ;;  %v6942_v2 = vld [vmem:[%s7877_s12 + $0x38] sm:$0xff]  }
  0x6f   : > { %3250 = vrot.lane.b32.xlu1 %v6953_v59, %s7567_s26  ;;  %v6943_v3 = vld [vmem:[%s7877_s12 + $0x40] sm:$0xff]   ;;  %v6944_v4 = vld [vmem:[%s7877_s12 + $0x48] sm:$0xff]   ;;  %v6945_v5 = vld [vmem:[%s7877_s12 + $0x50] sm:$0xff]  }
  0x70   : > { %v6946_v6 = vld [vmem:[%s7877_s12 + $0x58] sm:$0xff]   ;;  %v6947_v7 = vld [vmem:[%s7877_s12 + $0x60] sm:$0xff]   ;;  %v6948_v8 = vld [vmem:[%s7877_s12 + $0x68] sm:$0xff]  }
  0x71   : > { %6444 = vmatpush3.bf16.xpose.msra.mxu0 %v1287_v37  ;;  %v6949_v9 = vld [vmem:[%s7877_s12 + $0x70] sm:$0xff]   ;;  %v6950_v10 = vld [vmem:[%s7877_s12 + $0x78] sm:$0xff]   ;;  %v6958_v15 = vld [vmem:[%s7955_s27 + $0x68] sm:$0xff]  }
  0x72   : > { %6779 = vmatprep.subr.msk.bf16.mxu0 %vm898_vm0, %v6923_v38  ;;  %v6954_v11 = vld [vmem:[%s7955_s27 + $0x78] sm:$0xff]   ;;  %v6956_v13 = vld [vmem:[%s7955_s27 + $0x70] sm:$0xff]   ;;  %v6959_v16 = vld [vmem:[%s7955_s27 + $0x28] sm:$0xff]  }
  0x73   : > { %v6955_v12 = vld [vmem:[%s7955_s27 + $0x38] sm:$0xff]   ;;  %6489 = vmatprep.subr.bf16.mxu1 %v6954_v11  ;;  %v6957_v14 = vld [vmem:[%s7955_s27 + $0x30] sm:$0xff]   ;;  %v6960_v17 = vld [vmem:[%s7955_s27 + $0x60] sm:$0xff]  }
  0x74   : > { %6490 = vmatpush3.bf16.msra.mxu1 %v6955_v12  ;;  %v6961_v18 = vld [vmem:[%s7955_s27 + $0x20] sm:$0xff]   ;;  %v6962_v19 = vld [vmem:[%s7955_s27 + $0x58] sm:$0xff]   ;;  %v6964_v21 = vld [vmem:[%s7955_s27 + $0x50] sm:$0xff]  }
  0x75   : > { %6491 = vmatprep.subr.bf16.mxu1 %v6956_v13  ;;  %v6963_v20 = vld [vmem:[%s7955_s27 + $0x18] sm:$0xff]   ;;  %v6965_v22 = vld [vmem:[%s7955_s27 + $0x10] sm:$0xff]   ;;  %v6966_v23 = vld [vmem:[%s7955_s27 + $0x48] sm:$0xff]  }
  0x76   : > { %v6967_v24 = vld [vmem:[%s7955_s27 + $0x8] sm:$0xff]   ;;  %v6968_v25 = vld [vmem:[%s7955_s27 + $0x40] sm:$0xff]  }
  0x77   : > { %v6969_v26 = vld [vmem:[%s7955_s27] sm:$0xff]  }
  0x78   : > { %6492 = vmatpush3.bf16.msra.mxu1 %v6957_v14 }
  0x79   : > { %6446 = vmatpush3.bf16.xpose.msra.mxu0 %v1284_v41  ;;  %6493 = vmatprep.subr.bf16.mxu1 %v6958_v15 }
  0x7a   : > { %6780 = vmatprep.subr.msk.bf16.mxu0 %vm898_vm0, %v6925_v42  ;;  %v7568_v42 = vmov 0  }
  0x7b   : > { %6837 = vset.pattern.permute.xlu0 %v7568_v42  ;;  %6838 = vset.pattern.permute.xlu1 %v7568_v42 }
  0x7c   : > { %6494 = vmatpush3.bf16.msra.mxu1 %v6959_v16 }
  0x7d   : > { %6495 = vmatprep.subr.bf16.mxu1 %v6960_v17 }
  0x80   : > { %6496 = vmatpush3.bf16.msra.mxu1 %v6961_v18 }
  0x81   : > { %6448 = vmatpush3.bf16.xpose.msra.mxu0 %v1281_v45  ;;  %6497 = vmatprep.subr.bf16.mxu1 %v6962_v19 }
  0x82   : > { %6781 = vmatprep.subr.msk.bf16.mxu0 %vm898_vm0, %v6927_v46 }
  0x84   : > { %6498 = vmatpush3.bf16.msra.mxu1 %v6963_v20 }
  0x85   : > { %6499 = vmatprep.subr.bf16.mxu1 %v6964_v21 }
  0x88   : > { %6500 = vmatpush3.bf16.msra.mxu1 %v6965_v22 }
  0x89   : > { %6450 = vmatpush3.bf16.xpose.msra.mxu0 %v1278_v47  ;;  %6501 = vmatprep.subr.bf16.mxu1 %v6966_v23 }
  0x8a   : > { %6782 = vmatprep.subr.msk.bf16.mxu0 %vm898_vm0, %v6929_v49 }
  0x8c   : > { %6502 = vmatpush3.bf16.msra.mxu1 %v6967_v24 }
  0x8d   : > { %6503 = vmatprep.subr.bf16.mxu1 %v6968_v25 }
  0x90   : > { %6504 = vmatpush3.bf16.msra.mxu1 %v6969_v26 }
  0x91   : > { %6452 = vmatpush3.bf16.xpose.msra.mxu0 %v1275_v50 }
  0x92   : > { %6783 = vmatprep.subr.msk.bf16.mxu0 %vm898_vm0, %v6931_v52 }
  0x99   : > { %6454 = vmatpush3.bf16.xpose.msra.mxu0 %v1272_v53 }
  0x9a   : > { %6784 = vmatprep.subr.msk.bf16.mxu0 %vm898_vm0, %v6933_v54 }
  0xa1   : > { %6456 = vmatpush3.bf16.xpose.msra.mxu0 %v1269_v56 }
  0xa8   : > { %6458 = vmatmul.mubr.msk.bf16.vlgmr.msra.gmra.mxu0 %vm898_vm0, %v6935_v40 }
  0xa9   : > { %6459 = vmatprep.mubr.msk.bf16.mxu0 %vm898_vm0, %v6936_v60 }
  0xb0   : > { %6460 = vmatmul.mubr.msk.bf16.gmra.mxu0 %vm898_vm0, %v6936_v60 }
  0xb1   : > { %6461 = vmatprep.mubr.msk.bf16.mxu0 %vm898_vm0, %v6937_v61 }
  0xb8   : > { %6462 = vmatmul.mubr.msk.bf16.gmra.mxu0 %vm898_vm0, %v6937_v61 }
  0xb9   : > { %6463 = vmatprep.mubr.msk.bf16.mxu0 %vm898_vm0, %v6938_v62 }
  0xc0   : > { %6464 = vmatmul.mubr.msk.bf16.gmra.mxu0 %vm898_vm0, %v6938_v62 }
  0xc1   : > { %6465 = vmatprep.mubr.msk.bf16.mxu0 %vm898_vm0, %v6939_v63 }
  0xc8   : > { %6466 = vmatmul.mubr.msk.bf16.gmra.mxu0 %vm898_vm0, %v6939_v63 }
  0xc9   : > { %6467 = vmatprep.mubr.msk.bf16.mxu0 %vm898_vm0, %v6940_v0 }
  0xd0   : > { %6468 = vmatmul.mubr.msk.bf16.gmra.mxu0 %vm898_vm0, %v6940_v0 }
  0xd1   : > { %6469 = vmatprep.mubr.msk.bf16.mxu0 %vm898_vm0, %v6941_v1 }
  0xd8   : > { %6470 = vmatmul.mubr.msk.bf16.gmra.mxu0 %vm898_vm0, %v6941_v1 }
  0xd9   : > { %6471 = vmatprep.mubr.msk.bf16.mxu0 %vm898_vm0, %v6942_v2 }
  0xdd   : > { %v3269_v27 = vpop.permute.xlu1 %3268 }
  0xde   : > { %6785 = vmatprep.subr.msk.bf16.mxu1 %vm898_vm0, %v3269_v27 }
  0xe0   : > { %6472 = vmatmul.mubr.msk.bf16.gmra.mxu0 %vm898_vm0, %v6942_v2 }
  0xe1   : > { %6473 = vmatprep.mubr.msk.bf16.mxu0 %vm898_vm0, %v6943_v3 }
  0xe8   : > { %6474 = vmatmul.mubr.msk.bf16.gmra.mxu0 %vm898_vm0, %v6943_v3 }
  0xe9   : > { %6475 = vmatprep.mubr.msk.bf16.mxu0 %vm898_vm0, %v6944_v4 }
  0xf0   : > { %6476 = vmatmul.mubr.msk.bf16.gmra.mxu0 %vm898_vm0, %v6944_v4 }
  0xf1   : > { %6477 = vmatprep.mubr.msk.bf16.mxu0 %vm898_vm0, %v6945_v5 }
  0xf8   : > { %6478 = vmatmul.mubr.msk.bf16.gmra.mxu0 %vm898_vm0, %v6945_v5 }
  0xf9   : > { %6479 = vmatprep.mubr.msk.bf16.mxu0 %vm898_vm0, %v6946_v6 }
 0x100   : > { %6480 = vmatmul.mubr.msk.bf16.gmra.mxu0 %vm898_vm0, %v6946_v6 }
 0x101   : > { %6481 = vmatprep.mubr.msk.bf16.mxu0 %vm898_vm0, %v6947_v7 }
 0x108   : > { %6482 = vmatmul.mubr.msk.bf16.gmra.mxu0 %vm898_vm0, %v6947_v7 }
 0x109   : > { %6483 = vmatprep.mubr.msk.bf16.mxu0 %vm898_vm0, %v6948_v8 }
 0x110   : > { %6484 = vmatmul.mubr.msk.bf16.gmra.mxu0 %vm898_vm0, %v6948_v8 }
 0x111   : > { %6485 = vmatprep.mubr.msk.bf16.mxu0 %vm898_vm0, %v6949_v9 }
 0x118   : > { %6486 = vmatmul.mubr.msk.bf16.gmra.mxu0 %vm898_vm0, %v6949_v9 }
 0x119   : > { %6487 = vmatprep.mubr.msk.bf16.mxu0 %vm898_vm0, %v6950_v10 }
 0x120   : > { %6488 = vmatmul.mubr.msk.bf16.gmra.mxu0 %vm898_vm0, %v6950_v10 }
 0x168   : > { %v7974_v28 = vpop.f32.mrf.mxu0 }
 0x16a   : > { %v7976_v29 = vpop.f32.mrf.mxu0 }
 0x16b   : > { %v1541_v30 = vmax.f32 %v7974_v28, %v7976_v29 }
 0x16c   : > { %v7980_v31 = vpop.f32.mrf.mxu0 }
 0x16d   : > { %1542 = vmax.xlane.f32.xlu0 %v1541_v30 }
 0x16e   : > { %v7982_v32 = vpop.f32.mrf.mxu0 }
 0x16f   : > { %v1544_v33 = vmax.f32 %v7980_v31, %v7982_v32 }
 0x170   : > { %v7986_v34 = vpop.f32.mrf.mxu0 }
 0x171   : > { %1545 = vmax.xlane.f32.xlu0 %v1544_v33 }
 0x172   : > { %v7988_v35 = vpop.f32.mrf.mxu0 }
 0x173   : > { %v1547_v36 = vmax.f32 %v7986_v34, %v7988_v35 }
 0x174   : > { %v7992_v37 = vpop.f32.mrf.mxu0 }
 0x175   : > { %1548 = vmax.xlane.f32.xlu1 %v1547_v36 }
 0x176   : > { %v7994_v38 = vpop.f32.mrf.mxu0 }
 0x177   : > { %v1550_v39 = vmax.f32 %v7992_v37, %v7994_v38 }
 0x178   : > { %v7998_v40 = vpop.f32.mrf.mxu0 }
 0x179   : > { %1551 = vmax.xlane.f32.xlu1 %v1550_v39 }
 0x17a   : > { %v8000_v41 = vpop.f32.mrf.mxu0 }
 0x17b   : > { %v1553_v43 = vmax.f32 %v7998_v40, %v8000_v41 }
 0x17c   : > { %v8004_v44 = vpop.f32.mrf.mxu0 }
 0x17d   : > { %1554 = vmax.xlane.f32.xlu0 %v1553_v43 }
 0x17e   : > { %v8006_v45 = vpop.f32.mrf.mxu0 }
 0x17f   : > { %v1556_v46 = vmax.f32 %v8004_v44, %v8006_v45 }
 0x180   : > { %v8010_v47 = vpop.f32.mrf.mxu0 }
 0x181   : > { %1557 = vmax.xlane.f32.xlu1 %v1556_v46 }
 0x182   : > { %v8012_v48 = vpop.f32.mrf.mxu0 }
 0x183   : > { %v1559_v49 = vmax.f32 %v8010_v47, %v8012_v48 }
 0x184   : > { %v8016_v50 = vpop.f32.mrf.mxu0 }
 0x185   : > { %1560 = vmax.xlane.f32.xlu0 %v1559_v49 }
 0x186   : > { %v8018_v51 = vpop.f32.mrf.mxu0 }
 0x187   : > { %v1562_v52 = vmax.f32 %v8016_v50, %v8018_v51 }
 0x188   : > { %v8022_v53 = vpop.f32.mrf.mxu0 }
 0x189   : > { %1563 = vmax.xlane.f32.xlu1 %v1562_v52 }
 0x18a   : > { %v8024_v54 = vpop.f32.mrf.mxu0 }
 0x18b   : > { %v1565_v55 = vmax.f32 %v8022_v53, %v8024_v54 }
 0x18c   : > { %v8028_v56 = vpop.f32.mrf.mxu0 }
 0x18d   : > { %1566 = vmax.xlane.f32.xlu0 %v1565_v55 }
 0x18e   : > { %v8030_v57 = vpop.f32.mrf.mxu0 }
 0x18f   : > { %v1568_v58 = vmax.f32 %v8028_v56, %v8030_v57 }
 0x190   : > { %v8034_v59 = vpop.f32.mrf.mxu0 }
 0x191   : > { %1569 = vmax.xlane.f32.xlu1 %v1568_v58 }
 0x192   : > { %v8036_v60 = vpop.f32.mrf.mxu0 }
 0x193   : > { %v1571_v61 = vmax.f32 %v8034_v59, %v8036_v60 }
 0x194   : > { %v8040_v62 = vpop.f32.mrf.mxu0 }
 0x195   : > { %1572 = vmax.xlane.f32.xlu0 %v1571_v61 }
 0x196   : > { %v8042_v63 = vpop.f32.mrf.mxu0 }
 0x197   : > { %v1574_v0 = vmax.f32 %v8040_v62, %v8042_v63 }
 0x198   : > { %v8046_v1 = vpop.f32.mrf.mxu0 }
 0x199   : > { %1575 = vmax.xlane.f32.xlu1 %v1574_v0 }
 0x19a   : > { %v8048_v2 = vpop.f32.mrf.mxu0 }
 0x19b   : > { %v1577_v3 = vmax.f32 %v8046_v1, %v8048_v2 }
 0x19c   : > { %v8052_v4 = vpop.f32.mrf.mxu0 }
 0x19d   : > { %1578 = vmax.xlane.f32.xlu0 %v1577_v3 }
 0x19e   : > { %v8054_v5 = vpop.f32.mrf.mxu0 }
 0x19f   : > { %v1580_v6 = vmax.f32 %v8052_v4, %v8054_v5 }
 0x1a0   : > { %v8058_v7 = vpop.f32.mrf.mxu0 }
 0x1a1   : > { %1581 = vmax.xlane.f32.xlu1 %v1580_v6 }
 0x1a2   : > { %v8060_v8 = vpop.f32.mrf.mxu0 }
 0x1a3   : > { %v1583_v9 = vmax.f32 %v8058_v7, %v8060_v8 }
 0x1a4   : > { %v8064_v10 = vpop.f32.mrf.mxu0 }
 0x1a5   : > { %1584 = vmax.xlane.f32.xlu0 %v1583_v9 }
 0x1a6   : > { %v8066_v11 = vpop.f32.mrf.mxu0 }
 0x1a7   : > { %v1586_v12 = vmax.f32 %v8064_v10, %v8066_v11 }
 0x1a8   : > { %v8070_v13 = vpop.f32.mrf.mxu0 }
 0x1a9   : > { %1587 = vmax.xlane.f32.xlu1 %v1586_v12 }
 0x1aa   : > { %v8072_v14 = vpop.f32.mrf.mxu0 }
 0x1ab   : > { %v1589_v15 = vmax.f32 %v8070_v13, %v8072_v14 }
 0x1ac   : > { %v8076_v16 = vpop.f32.mrf.mxu0 }
 0x1ad   : > { %1590 = vmax.xlane.f32.xlu0 %v1589_v15 }
 0x1ae   : > { %v8078_v17 = vpop.f32.mrf.mxu0 }
 0x1af   : > { %v1592_v18 = vmax.f32 %v8076_v16, %v8078_v17 }
 0x1b0   : > { %v8082_v19 = vpop.f32.mrf.mxu0 }
 0x1b1   : > { %1593 = vmax.xlane.f32.xlu1 %v1592_v18 }
 0x1b2   : > { %v8084_v20 = vpop.f32.mrf.mxu0 }
 0x1b3   : > { %v1595_v21 = vmax.f32 %v8082_v19, %v8084_v20 }
 0x1b4   : > { %v8088_v22 = vpop.f32.mrf.mxu0 }
 0x1b5   : > { %1596 = vmax.xlane.f32.xlu0 %v1595_v21 }
 0x1b6   : > { %v8090_v23 = vpop.f32.mrf.mxu0 }
 0x1b7   : > { %v1598_v24 = vmax.f32 %v8088_v22, %v8090_v23 }
 0x1b8   : > { %v8094_v25 = vpop.f32.mrf.mxu0 }
 0x1b9   : > { %10203 = vst [vmem:[#allocation8_spill] sm:$0xff] %v8094_v25  ;;  %1599 = vmax.xlane.f32.xlu1 %v1598_v24 }
 0x1ba   : > { %v8096_v26 = vpop.f32.mrf.mxu0 }
 0x1bb   : > { %10204 = vst [vmem:[#allocation9_spill] sm:$0xff] %v8096_v26  ;;  %v1601_v27 = vmax.f32 %v8094_v25, %v8096_v26 }
 0x1bc   : > { %v8100_v30 = vpop.f32.mrf.mxu0 }
 0x1bd   : > { %10205 = vst [vmem:[#allocation10_spill] sm:$0xff] %v8100_v30  ;;  %1602 = vmax.xlane.f32.xlu0 %v1601_v27 }
 0x1be   : > { %v8102_v33 = vpop.f32.mrf.mxu0 }
 0x1bf   : > { %10206 = vst [vmem:[#allocation11_spill] sm:$0xff] %v8102_v33  ;;  %v1604_v36 = vmax.f32 %v8100_v30, %v8102_v33  ;;  %v6987_v33 = vld [vmem:[%s7863_s25 + $0x58] sm:$0xff]  }
 0x1c0   : > { %v8106_v39 = vpop.f32.mrf.mxu0 }
 0x1c1   : > { %10207 = vst [vmem:[#allocation12_spill] sm:$0xff] %v8106_v39  ;;  %1605 = vmax.xlane.f32.xlu1 %v1604_v36 }
 0x1c2   : > { %v8108_v42 = vpop.f32.mrf.mxu0 }
 0x1c3   : > { %10208 = vst [vmem:[#allocation13_spill] sm:$0xff] %v8108_v42  ;;  %v1607_v43 = vmax.f32 %v8106_v39, %v8108_v42 }
 0x1c4   : > { %v8112_v46 = vpop.f32.mrf.mxu0 }
 0x1c5   : > { %10209 = vst [vmem:[#allocation14_spill] sm:$0xff] %v8112_v46  ;;  %1608 = vmax.xlane.f32.xlu0 %v1607_v43 }
 0x1c6   : > { %v8114_v49 = vpop.f32.mrf.mxu0 }
 0x1c7   : > { %10210 = vst [vmem:[#allocation15_spill] sm:$0xff] %v8114_v49  ;;  %v1610_v52 = vmax.f32 %v8112_v46, %v8114_v49 }
 0x1c8   : > { %v8118_v55 = vpop.f32.mrf.mxu0 }
 0x1c9   : > { %10211 = vst [vmem:[#allocation16_spill] sm:$0xff] %v8118_v55  ;;  %1611 = vmax.xlane.f32.xlu1 %v1610_v52 }
 0x1ca   : > { %v8120_v58 = vpop.f32.mrf.mxu0 }
 0x1cb   : > { %10212 = vst [vmem:[#allocation17_spill] sm:$0xff] %v8120_v58  ;;  %v1613_v61 = vmax.f32 %v8118_v55, %v8120_v58 }
 0x1cc   : > { %v8124_v0 = vpop.f32.mrf.mxu0 }
 0x1cd   : > { %10213 = vst [vmem:[#allocation18_spill] sm:$0xff] %v8124_v0  ;;  %1614 = vmax.xlane.f32.xlu0 %v1613_v61 }
 0x1ce   : > { %v8126_v3 = vpop.f32.mrf.mxu0 }
 0x1cf   : > { %10214 = vst [vmem:[#allocation19_spill] sm:$0xff] %v8126_v3  ;;  %v1616_v6 = vmax.f32 %v8124_v0, %v8126_v3 }
 0x1d0   : > { %v8130_v9 = vpop.f32.mrf.mxu0 }
 0x1d1   : > { %10215 = vst [vmem:[#allocation20_spill] sm:$0xff] %v8130_v9  ;;  %1617 = vmax.xlane.f32.xlu1 %v1616_v6 }
 0x1d2   : > { %v8132_v12 = vpop.f32.mrf.mxu0 }
 0x1d3   : > { %10216 = vst [vmem:[#allocation21_spill] sm:$0xff] %v8132_v12  ;;  %v1619_v15 = vmax.f32 %v8130_v9, %v8132_v12 }
 0x1d4   : > { %v8136_v18 = vpop.f32.mrf.mxu0 }
 0x1d5   : > { %10217 = vst [vmem:[#allocation22_spill] sm:$0xff] %v8136_v18  ;;  %1620 = vmax.xlane.f32.xlu0 %v1619_v15 }
 0x1d6   : > { %v8138_v21 = vpop.f32.mrf.mxu0 }
 0x1d7   : > { %10218 = vst [vmem:[#allocation23_spill] sm:$0xff] %v8138_v21  ;;  %v1622_v24 = vmax.f32 %v8136_v18, %v8138_v21 }
 0x1d8   : > { %v8142_v27 = vpop.f32.mrf.mxu0 }
 0x1d9   : > { %10219 = vst [vmem:[#allocation24_spill] sm:$0xff] %v8142_v27  ;;  %1623 = vmax.xlane.f32.xlu1 %v1622_v24 }
 0x1da   : > { %v8144_v36 = vpop.f32.mrf.mxu0 }
 0x1db   : > { %10220 = vst [vmem:[#allocation25_spill] sm:$0xff] %v8144_v36  ;;  %v1625_v43 = vmax.f32 %v8142_v27, %v8144_v36  ;;  %v6970_v27 = vld [vmem:[%s7877_s12] sm:$0xff]  }
 0x1dc   : > { %v8148_v52 = vpop.f32.mrf.mxu0 }
 0x1dd   : > { %10221 = vst [vmem:[#allocation26_spill] sm:$0xff] %v8148_v52  ;;  %1626 = vmax.xlane.f32.xlu0 %v1625_v43 }
 0x1de   : > { %v8150_v61 = vpop.f32.mrf.mxu0 }
 0x1df   : > { %10222 = vst [vmem:[#allocation27_spill] sm:$0xff] %v8150_v61  ;;  %v1628_v6 = vmax.f32 %v8148_v52, %v8150_v61  ;;  %v8166_v52 = vpop.permute.xlu0 %3252 }
 0x1e0   : > { %v8154_v15 = vpop.f32.mrf.mxu0 }
 0x1e1   : > { %10223 = vst [vmem:[#allocation28_spill] sm:$0xff] %v8154_v15  ;;  %1629 = vmax.xlane.f32.xlu1 %v1628_v6  ;;  %v8169_v6 = vpop.permute.xlu1 %3250 }
 0x1e2   : > { %v8156_v24 = vpop.f32.mrf.mxu0 }
 0x1e3   : > { %10224 = vst [vmem:[#allocation29_spill] sm:$0xff] %v8156_v24  ;;  %v1631_v18 = vmax.f32 %v8154_v15, %v8156_v24  ;;  %v6971_v24 = vld [vmem:[%s7863_s25 + $0x68] sm:$0xff]  }
 0x1e4   : > { %v8160_v12 = vpop.f32.mrf.mxu0 }
 0x1e5   : > { %10225 = vst [vmem:[#allocation30_spill] sm:$0xff] %v8160_v12  ;;  %1632 = vmax.xlane.f32.xlu0 %v1631_v18  ;;  %v6972_v18 = vld [vmem:[%s7863_s25 + $0x70] sm:$0xff]  }
 0x1e6   : > { %v8162_v43 = vpop.f32.mrf.mxu0 }
 0x1e7   : > { %10226 = vst [vmem:[#allocation31_spill] sm:$0xff] %v8162_v43  ;;  %v1634_v36 = vmax.f32 %v8160_v12, %v8162_v43  ;;  %v6974_v12 = vld [vmem:[%s7863_s25 + $0x28] sm:$0xff]  }
 0x1e9   : > { %1635 = vmax.xlane.f32.xlu1 %v1634_v36  ;;  %v6973_v36 = vld [vmem:[%s7877_s12 + $0x10] sm:$0xff]  }
 0x1f6   : > { %v1543_v61 = vpop.xlane.xlu0 %1542 }
 0x1f7   : > { %v1669_v15 = vsub.f32 -inf, %v1543_v61 }
 0x1f9   : > { %v1701_v43 = vmul.f32 1.442695, %v1669_v15  ;;  %v8195_v15 = vld [vmem:[%s7863_s25 + $0x20] sm:$0xff]  }
 0x1fa   : > { %3126 = vrot.lane.b32.xlu1 %v6970_v27, %s7567_s26  ;;  %v6975_v27 = vld [vmem:[%s7863_s25 + $0x60] sm:$0xff]  }
 0x1fb   : > { %1767 = vperm.xlu0 %6837, %v1543_v61   ;;  %v6976_v61 = vld [vmem:[%s7877_s12 + $0x8] sm:$0xff]   ;;  %7015 = vpow2.f32 %v1701_v43 }
 0x1fe   : > { %v8174_v9 = vpop.xlane.xlu1 %1548  ;;  %3264 = vrot.lane.b32.xlu1 %v6971_v24, %s7567_s26  ;;  %v8191_v24 = vld [vmem:[%s7877_s12 + $0x20] sm:$0xff]  }
 0x1ff   : > { %3266 = vrot.lane.b32.xlu0 %v6972_v18, %s7567_s26  ;;  %v7569_v18 = vmov 0.0  }
 0x200   : > { %899 = vst.msk [vmem:[#allocation4] sm:$0xff] %vm898_vm0, %v7569_v18  ;;  %900 = vst.msk [vmem:[#allocation4 + $0x8] sm:$0xff] %vm898_vm0, %v7569_v18 }
 0x201   : > { %901 = vst.msk [vmem:[#allocation4 + $0x10] sm:$0xff] %vm898_vm0, %v7569_v18  ;;  %902 = vst.msk [vmem:[#allocation4 + $0x18] sm:$0xff] %vm898_vm0, %v7569_v18 }
 0x202   : > { %v8180_v21 = vpop.xlane.xlu1 %1551  ;;  %3130 = vrot.lane.b32.xlu1 %v6973_v36, %s7567_s26  ;;  %903 = vst.msk [vmem:[#allocation4 + $0x20] sm:$0xff] %vm898_vm0, %v7569_v18  ;;  %904 = vst.msk [vmem:[#allocation4 + $0x28] sm:$0xff] %vm898_vm0, %v7569_v18  ;;  %v6979_v36 = vld [vmem:[%s7877_s12 + $0x18] sm:$0xff]  }
 0x203   : > { %v1672_v0 = vsub.f32 -inf, %v8180_v21  ;;  %3248 = vrot.lane.b32.xlu0 %v6974_v12, %s7567_s26  ;;  %905 = vst.msk [vmem:[#allocation4 + $0x30] sm:$0xff] %vm898_vm0, %v7569_v18  ;;  %906 = vst.msk [vmem:[#allocation4 + $0x38] sm:$0xff] %vm898_vm0, %v7569_v18 }
 0x204   : > { %907 = vst.msk [vmem:[#allocation4 + $0x40] sm:$0xff] %vm898_vm0, %v7569_v18  ;;  %908 = vst.msk [vmem:[#allocation4 + $0x48] sm:$0xff] %vm898_vm0, %v7569_v18 }
 0x205   : > { %v8187_v58 = vmul.f32 1.442695, %v1672_v0  ;;  %909 = vst.msk [vmem:[#allocation4 + $0x50] sm:$0xff] %vm898_vm0, %v7569_v18  ;;  %910 = vst.msk [vmem:[#allocation4 + $0x58] sm:$0xff] %vm898_vm0, %v7569_v18  ;;  %v1546_v0 = vpop.xlane.xlu0 %1545 }
 0x206   : > { %3262 = vrot.lane.b32.xlu1 %v6975_v27, %s7567_s26  ;;  %911 = vst.msk [vmem:[#allocation4 + $0x60] sm:$0xff] %vm898_vm0, %v7569_v18  ;;  %912 = vst.msk [vmem:[#allocation4 + $0x68] sm:$0xff] %vm898_vm0, %v7569_v18  ;;  %v1670_v27 = vsub.f32 -inf, %v1546_v0 }
 0x207   : > { %3128 = vrot.lane.b32.xlu0 %v6976_v61, %s7567_s26  ;;  %913 = vst.msk [vmem:[#allocation4 + $0x70] sm:$0xff] %vm898_vm0, %v7569_v18  ;;  %914 = vst.msk [vmem:[#allocation4 + $0x78] sm:$0xff] %vm898_vm0, %v7569_v18  ;;  %7017 = vpow2.f32 %v8187_v58 }
 0x208   : > { %915 = vst.msk [vmem:[#allocation4 + $0x80] sm:$0xff] %vm898_vm0, %v7569_v18  ;;  %916 = vst.msk [vmem:[#allocation4 + $0x88] sm:$0xff] %vm898_vm0, %v7569_v18  ;;  %v1703_v55 = vmul.f32 1.442695, %v1670_v27 }
 0x209   : > { %917 = vst.msk [vmem:[#allocation4 + $0x90] sm:$0xff] %vm898_vm0, %v7569_v18  ;;  %918 = vst.msk [vmem:[#allocation4 + $0x98] sm:$0xff] %vm898_vm0, %v7569_v18 }
 0x20a   : > { %919 = vst.msk [vmem:[#allocation4 + $0xa0] sm:$0xff] %vm898_vm0, %v7569_v18  ;;  %920 = vst.msk [vmem:[#allocation4 + $0xa8] sm:$0xff] %vm898_vm0, %v7569_v18  ;;  %v1558_v12 = vpop.xlane.xlu1 %1557  ;;  %3134 = vrot.lane.b32.xlu1 %v8191_v24, %s7567_s26  ;;  %v1671_v24 = vsub.f32 -inf, %v8174_v9 }
 0x20b   : > { %921 = vst.msk [vmem:[#allocation4 + $0xb0] sm:$0xff] %vm898_vm0, %v7569_v18  ;;  %922 = vst.msk [vmem:[#allocation4 + $0xb8] sm:$0xff] %vm898_vm0, %v7569_v18  ;;  %v1674_v43 = vsub.f32 -inf, %v1558_v12  ;;  %3246 = vrot.lane.b32.xlu0 %v8195_v15, %s7567_s26 }
 0x20c   : > { %923 = vst.msk [vmem:[#allocation4 + $0xc0] sm:$0xff] %vm898_vm0, %v7569_v18  ;;  %924 = vst.msk [vmem:[#allocation4 + $0xc8] sm:$0xff] %vm898_vm0, %v7569_v18 }
 0x20d   : > { %925 = vst.msk [vmem:[#allocation4 + $0xd0] sm:$0xff] %vm898_vm0, %v7569_v18  ;;  %926 = vst.msk [vmem:[#allocation4 + $0xd8] sm:$0xff] %vm898_vm0, %v7569_v18  ;;  %v1711_v61 = vmul.f32 1.442695, %v1674_v43  ;;  %v1555_v43 = vpop.xlane.xlu0 %1554 }
 0x20e   : > { %927 = vst.msk [vmem:[#allocation4 + $0xe0] sm:$0xff] %vm898_vm0, %v7569_v18  ;;  %928 = vst.msk [vmem:[#allocation4 + $0xe8] sm:$0xff] %vm898_vm0, %v7569_v18  ;;  %1772 = vperm.xlu1 %6838, %v1546_v0   ;;  %v1705_v0 = vmul.f32 1.442695, %v1671_v24 }
 0x20f   : > { %929 = vst.msk [vmem:[#allocation4 + $0xf0] sm:$0xff] %vm898_vm0, %v7569_v18  ;;  %930 = vst.msk [vmem:[#allocation4 + $0xf8] sm:$0xff] %vm898_vm0, %v7569_v18  ;;  %3132 = vrot.lane.b32.xlu0 %v6979_v36, %s7567_s26  ;;  %7019 = vpow2.f32 %v1711_v61 }
 0x210   : > { %931 = vst.msk [vmem:[#allocation4 + $0x100] sm:$0xff] %vm898_vm0, %v7569_v18  ;;  %932 = vst.msk [vmem:[#allocation4 + $0x108] sm:$0xff] %vm898_vm0, %v7569_v18  ;;  %7021 = vpow2.f32 %v1703_v55  ;;  %v1673_v55 = vsub.f32 -inf, %v1555_v43 }
 0x211   : > { %933 = vst.msk [vmem:[#allocation4 + $0x110] sm:$0xff] %vm898_vm0, %v7569_v18  ;;  %934 = vst.msk [vmem:[#allocation4 + $0x118] sm:$0xff] %vm898_vm0, %v7569_v18 }
 0x212   : > { %935 = vst.msk [vmem:[#allocation4 + $0x120] sm:$0xff] %vm898_vm0, %v7569_v18  ;;  %936 = vst.msk [vmem:[#allocation4 + $0x128] sm:$0xff] %vm898_vm0, %v7569_v18  ;;  %v1564_v3 = vpop.xlane.xlu1 %1563  ;;  %1777 = vperm.xlu1 %6838, %v8174_v9   ;;  %v1709_v24 = vmul.f32 1.442695, %v1673_v55 }
 0x213   : > { %937 = vst.msk [vmem:[#allocation4 + $0x130] sm:$0xff] %vm898_vm0, %v7569_v18  ;;  %938 = vst.msk [vmem:[#allocation4 + $0x138] sm:$0xff] %vm898_vm0, %v7569_v18  ;;  %v1676_v58 = vsub.f32 -inf, %v1564_v3 }
 0x214   : > { %939 = vst.msk [vmem:[#allocation4 + $0x140] sm:$0xff] %vm898_vm0, %v7569_v18  ;;  %940 = vst.msk [vmem:[#allocation4 + $0x148] sm:$0xff] %vm898_vm0, %v7569_v18 }
 0x215   : > { %941 = vst.msk [vmem:[#allocation4 + $0x150] sm:$0xff] %vm898_vm0, %v7569_v18  ;;  %942 = vst.msk [vmem:[#allocation4 + $0x158] sm:$0xff] %vm898_vm0, %v7569_v18  ;;  %v1715_v15 = vmul.f32 1.442695, %v1676_v58 }
 0x216   : > { %943 = vst.msk [vmem:[#allocation4 + $0x160] sm:$0xff] %vm898_vm0, %v7569_v18  ;;  %944 = vst.msk [vmem:[#allocation4 + $0x168] sm:$0xff] %vm898_vm0, %v7569_v18  ;;  %1782 = vperm.xlu1 %6838, %v8180_v21  }
 0x217   : > { %945 = vst.msk [vmem:[#allocation4 + $0x170] sm:$0xff] %vm898_vm0, %v7569_v18  ;;  %946 = vst.msk [vmem:[#allocation4 + $0x178] sm:$0xff] %vm898_vm0, %v7569_v18  ;;  %7023 = vpow2.f32 %v1715_v15  ;;  %v1561_v15 = vpop.xlane.xlu0 %1560 }
 0x218   : > { %947 = vst.msk [vmem:[#allocation4 + $0x180] sm:$0xff] %vm898_vm0, %v7569_v18  ;;  %948 = vst.msk [vmem:[#allocation4 + $0x188] sm:$0xff] %vm898_vm0, %v7569_v18  ;;  %7025 = vpow2.f32 %v1705_v0 }
 0x219   : > { %949 = vst.msk [vmem:[#allocation4 + $0x190] sm:$0xff] %vm898_vm0, %v7569_v18  ;;  %950 = vst.msk [vmem:[#allocation4 + $0x198] sm:$0xff] %vm898_vm0, %v7569_v18 }
 0x21a   : > { %951 = vst.msk [vmem:[#allocation4 + $0x1a0] sm:$0xff] %vm898_vm0, %v7569_v18  ;;  %952 = vst.msk [vmem:[#allocation4 + $0x1a8] sm:$0xff] %vm898_vm0, %v7569_v18  ;;  %v1570_v36 = vpop.xlane.xlu1 %1569  ;;  %1787 = vperm.xlu1 %6838, %v1555_v43  }
 0x21b   : > { %953 = vst.msk [vmem:[#allocation4 + $0x1b0] sm:$0xff] %vm898_vm0, %v7569_v18  ;;  %954 = vst.msk [vmem:[#allocation4 + $0x1b8] sm:$0xff] %vm898_vm0, %v7569_v18  ;;  %v1678_v27 = vsub.f32 -inf, %v1570_v36 }
 0x21c   : > { %955 = vst.msk [vmem:[#allocation4 + $0x1c0] sm:$0xff] %vm898_vm0, %v7569_v18  ;;  %956 = vst.msk [vmem:[#allocation4 + $0x1c8] sm:$0xff] %vm898_vm0, %v7569_v18 }
 0x21d   : > { %957 = vst.msk [vmem:[#allocation4 + $0x1d0] sm:$0xff] %vm898_vm0, %v7569_v18  ;;  %958 = vst.msk [vmem:[#allocation4 + $0x1d8] sm:$0xff] %vm898_vm0, %v7569_v18  ;;  %v1719_v61 = vmul.f32 1.442695, %v1678_v27 }
 0x21e   : > { %959 = vst.msk [vmem:[#allocation4 + $0x1e0] sm:$0xff] %vm898_vm0, %v7569_v18  ;;  %960 = vst.msk [vmem:[#allocation4 + $0x1e8] sm:$0xff] %vm898_vm0, %v7569_v18  ;;  %1792 = vperm.xlu1 %6838, %v1558_v12   ;;  %v1675_v12 = vsub.f32 -inf, %v1561_v15 }
 0x21f   : > { %961 = vst.msk [vmem:[#allocation4 + $0x1f0] sm:$0xff] %vm898_vm0, %v7569_v18  ;;  %962 = vst.msk [vmem:[#allocation4 + $0x1f8] sm:$0xff] %vm898_vm0, %v7569_v18  ;;  %v8332_v18 = vpop.eup %7015  ;;  %7027 = vpow2.f32 %v1719_v61 }
 0x220   : > { %10227 = vst [vmem:[#allocation32_spill] sm:$0xff] %v8332_v18  ;;  %2375 = vperm.xlu0 %6837, %v8332_v18   ;;  %v8337_v46 = vpop.eup %7017  ;;  %7029 = vpow2.f32 %v1709_v24  ;;  %v1713_v61 = vmul.f32 1.442695, %v1675_v12 }
 0x221   : > { %10228 = vst [vmem:[#allocation33_spill] sm:$0xff] %v8337_v46  ;;  %v8341_v18 = vpop.eup %7019 }
 0x222   : > { %10229 = vst [vmem:[#allocation34_spill] sm:$0xff] %v8341_v18  ;;  %v8344_v9 = vpop.eup %7021  ;;  %v1576_v21 = vpop.xlane.xlu1 %1575 }
 0x223   : > { %10230 = vst [vmem:[#allocation35_spill] sm:$0xff] %v8344_v9  ;;  %2380 = vperm.xlu1 %6838, %v8344_v9   ;;  %v1680_v58 = vsub.f32 -inf, %v1576_v21 }
 0x224   : > { %2390 = vperm.xlu0 %6837, %v8337_v46  }
 0x225   : > { %v1723_v46 = vmul.f32 1.442695, %v1680_v58 }
 0x227   : > { %1797 = vperm.xlu1 %6838, %v1561_v15   ;;  %7031 = vpow2.f32 %v1723_v46 }
 0x228   : > { %1812 = vperm.xlu0 %6837, %v1570_v36   ;;  %v8347_v36 = vpop.eup %7023  ;;  %7033 = vpow2.f32 %v1713_v61 }
 0x229   : > { %10231 = vst [vmem:[#allocation36_spill] sm:$0xff] %v8347_v36  ;;  %v8350_v0 = vpop.eup %7025 }
 0x22a   : > { %10232 = vst [vmem:[#allocation37_spill] sm:$0xff] %v8350_v0  ;;  %v1582_v43 = vpop.xlane.xlu1 %1581 }
 0x22b   : > { %2385 = vperm.xlu1 %6838, %v8350_v0   ;;  %v1682_v27 = vsub.f32 -inf, %v1582_v43 }
 0x22c   : > { %2400 = vperm.xlu0 %6837, %v8341_v18   ;;  %v8353_v18 = vpop.eup %7027 }
 0x22d   : > { %v1727_v55 = vmul.f32 1.442695, %v1682_v27  ;;  %10233 = vst [vmem:[#allocation38_spill] sm:$0xff] %v8353_v18 }
 0x22f   : > { %1802 = vperm.xlu1 %6838, %v1564_v3   ;;  %7035 = vpow2.f32 %v1727_v55 }
 0x230   : > { %1822 = vperm.xlu0 %6837, %v1576_v21   ;;  %v1567_v21 = vpop.xlane.xlu0 %1566 }
 0x231   : > { %v1677_v58 = vsub.f32 -inf, %v1567_v21 }
 0x232   : > { %v1588_v24 = vpop.xlane.xlu1 %1587 }
 0x233   : > { %1807 = vperm.xlu1 %6838, %v1567_v21   ;;  %v1684_v15 = vsub.f32 -inf, %v1588_v24  ;;  %v1717_v46 = vmul.f32 1.442695, %v1677_v58 }
 0x234   : > { %2410 = vperm.xlu0 %6837, %v8347_v36   ;;  %v8356_v36 = vpop.eup %7029  ;;  %v1573_v0 = vpop.xlane.xlu0 %1572 }
 0x235   : > { %10234 = vst [vmem:[#allocation39_spill] sm:$0xff] %v8356_v36  ;;  %v8358_v12 = vpop.eup %7031  ;;  %7037 = vpow2.f32 %v1717_v46  ;;  %v1679_v3 = vsub.f32 -inf, %v1573_v0 }
 0x236   : > { %10235 = vst [vmem:[#allocation40_spill] sm:$0xff] %v8358_v12  ;;  %v8362_v55 = vpop.eup %7033 }
 0x237   : > { %2395 = vperm.xlu1 %6838, %v8356_v36   ;;  %v1721_v21 = vmul.f32 1.442695, %v1679_v3  ;;  %10236 = vst [vmem:[#allocation41_spill] sm:$0xff] %v8362_v55 }
 0x238   : > { %1832 = vperm.xlu0 %6837, %v1582_v43   ;;  %v1731_v43 = vmul.f32 1.442695, %v1684_v15  ;;  %v1579_v58 = vpop.xlane.xlu0 %1578 }
 0x239   : > { %v1681_v15 = vsub.f32 -inf, %v1579_v58 }
 0x23a   : > { %7039 = vpow2.f32 %v1731_v43  ;;  %v1594_v27 = vpop.xlane.xlu1 %1593 }
 0x23b   : > { %1817 = vperm.xlu1 %6838, %v1573_v0   ;;  %v1686_v61 = vsub.f32 -inf, %v1594_v27  ;;  %7041 = vpow2.f32 %v1721_v21  ;;  %v1725_v0 = vmul.f32 1.442695, %v1681_v15 }
 0x23c   : > { %2420 = vperm.xlu0 %6837, %v8353_v18   ;;  %v8364_v18 = vpop.eup %7035  ;;  %v1585_v3 = vpop.xlane.xlu0 %1584 }
 0x23d   : > { %10237 = vst [vmem:[#allocation42_spill] sm:$0xff] %v8364_v18 }
 0x23f   : > { %2405 = vperm.xlu1 %6838, %v8362_v55  }
 0x240   : > { %1842 = vperm.xlu0 %6837, %v1588_v24   ;;  %v1735_v24 = vmul.f32 1.442695, %v1686_v61  ;;  %v1683_v61 = vsub.f32 -inf, %v1585_v3  ;;  %v1591_v15 = vpop.xlane.xlu0 %1590 }
 0x242   : > { %7043 = vpow2.f32 %v1735_v24  ;;  %v1600_v46 = vpop.xlane.xlu1 %1599 }
 0x243   : > { %1827 = vperm.xlu1 %6838, %v1579_v58   ;;  %v1688_v43 = vsub.f32 -inf, %v1600_v46  ;;  %7045 = vpow2.f32 %v1725_v0  ;;  %v1729_v58 = vmul.f32 1.442695, %v1683_v61 }
 0x244   : > { %2430 = vperm.xlu0 %6837, %v8358_v12   ;;  %v1597_v61 = vpop.xlane.xlu0 %1596 }
 0x245   : > { %v1739_v12 = vmul.f32 1.442695, %v1688_v43  ;;  %v1685_v43 = vsub.f32 -inf, %v1591_v15 }
 0x247   : > { %7047 = vpow2.f32 %v1739_v12 }
 0x248   : > { %1852 = vperm.xlu0 %6837, %v1594_v27   ;;  %v8368_v27 = vpop.eup %7037  ;;  %7049 = vpow2.f32 %v1729_v58 }
 0x249   : > { %10238 = vst [vmem:[#allocation43_spill] sm:$0xff] %v8368_v27  ;;  %v8370_v36 = vpop.eup %7039  ;;  %2415 = vperm.xlu1 %6838, %v8368_v27  }
 0x24a   : > { %10239 = vst [vmem:[#allocation44_spill] sm:$0xff] %v8370_v36  ;;  %v1606_v21 = vpop.xlane.xlu1 %1605 }
 0x24b   : > { %v1690_v24 = vsub.f32 -inf, %v1606_v21 }
 0x24c   : > { %2440 = vperm.xlu0 %6837, %v8364_v18  }
 0x24d   : > { %1837 = vperm.xlu1 %6838, %v1585_v3   ;;  %v1743_v18 = vmul.f32 1.442695, %v1690_v24  ;;  %v1733_v3 = vmul.f32 1.442695, %v1685_v43  ;;  %v1687_v24 = vsub.f32 -inf, %v1597_v61  ;;  %v1603_v43 = vpop.xlane.xlu0 %1602 }
 0x24f   : > { %7051 = vpow2.f32 %v1743_v18 }
 0x250   : > { %1862 = vperm.xlu0 %6837, %v1600_v46   ;;  %v8374_v46 = vpop.eup %7041  ;;  %7053 = vpow2.f32 %v1733_v3 }
 0x251   : > { %10240 = vst [vmem:[#allocation45_spill] sm:$0xff] %v8374_v46  ;;  %v8376_v55 = vpop.eup %7043  ;;  %2425 = vperm.xlu1 %6838, %v8374_v46   ;;  %v1609_v3 = vpop.xlane.xlu0 %1608 }
 0x252   : > { %10241 = vst [vmem:[#allocation46_spill] sm:$0xff] %v8376_v55  ;;  %v1612_v0 = vpop.xlane.xlu1 %1611 }
 0x253   : > { %v1692_v12 = vsub.f32 -inf, %v1612_v0 }
 0x254   : > { %2450 = vperm.xlu0 %6837, %v8370_v36  }
 0x255   : > { %1847 = vperm.xlu1 %6838, %v1591_v15   ;;  %v1747_v36 = vmul.f32 1.442695, %v1692_v12  ;;  %v1737_v15 = vmul.f32 1.442695, %v1687_v24  ;;  %v1689_v12 = vsub.f32 -inf, %v1603_v43 }
 0x257   : > { %7055 = vpow2.f32 %v1747_v36 }
 0x258   : > { %1872 = vperm.xlu0 %6837, %v1606_v21   ;;  %v8380_v21 = vpop.eup %7045  ;;  %7057 = vpow2.f32 %v1737_v15  ;;  %v1691_v15 = vsub.f32 -inf, %v1609_v3 }
 0x259   : > { %10242 = vst [vmem:[#allocation47_spill] sm:$0xff] %v8380_v21  ;;  %v8382_v27 = vpop.eup %7047  ;;  %2435 = vperm.xlu1 %6838, %v8380_v21  }
 0x25a   : > { %10243 = vst [vmem:[#allocation48_spill] sm:$0xff] %v8382_v27  ;;  %v1618_v58 = vpop.xlane.xlu1 %1617 }
 0x25b   : > { %v1694_v18 = vsub.f32 -inf, %v1618_v58 }
 0x25c   : > { %2460 = vperm.xlu0 %6837, %v8376_v55  }
 0x25d   : > { %1857 = vperm.xlu1 %6838, %v1597_v61   ;;  %v1751_v55 = vmul.f32 1.442695, %v1694_v18  ;;  %v1741_v61 = vmul.f32 1.442695, %v1689_v12  ;;  %v1615_v18 = vpop.xlane.xlu0 %1614 }
 0x25f   : > { %7059 = vpow2.f32 %v1751_v55 }
 0x260   : > { %1882 = vperm.xlu0 %6837, %v1612_v0   ;;  %v8386_v0 = vpop.eup %7049  ;;  %7061 = vpow2.f32 %v1741_v61  ;;  %v1693_v61 = vsub.f32 -inf, %v1615_v18 }
 0x261   : > { %10244 = vst [vmem:[#allocation49_spill] sm:$0xff] %v8386_v0  ;;  %v8388_v46 = vpop.eup %7051  ;;  %2445 = vperm.xlu1 %6838, %v8386_v0  }
 0x262   : > { %10245 = vst [vmem:[#allocation50_spill] sm:$0xff] %v8388_v46  ;;  %v8392_v36 = vpop.xlane.xlu1 %1623  ;;  %v8395_v24 = vpop.eup %7053 }
 0x263   : > { %10246 = vst [vmem:[#allocation51_spill] sm:$0xff] %v8395_v24 }
 0x264   : > { %2470 = vperm.xlu0 %6837, %v8382_v27  }
 0x265   : > { %1867 = vperm.xlu1 %6838, %v1603_v43   ;;  %v1745_v43 = vmul.f32 1.442695, %v1691_v15  ;;  %v6980_v15 = vld [vmem:[%s7863_s25 + $0x18] sm:$0xff]  }
 0x267   : > { %7063 = vpow2.f32 %v1745_v43 }
 0x268   : > { %1892 = vperm.xlu0 %6837, %v1618_v58   ;;  %v8397_v58 = vpop.eup %7055 }
 0x269   : > { %10247 = vst [vmem:[#allocation52_spill] sm:$0xff] %v8397_v58  ;;  %2455 = vperm.xlu1 %6838, %v8395_v24   ;;  %v8404_v12 = vpop.eup %7057  ;;  %v1749_v24 = vmul.f32 1.442695, %v1693_v61 }
 0x26a   : > { %v8401_v55 = vpop.xlane.xlu1 %1629  ;;  %10248 = vst [vmem:[#allocation53_spill] sm:$0xff] %v8404_v12 }
 0x26b   : > { %7065 = vpow2.f32 %v1749_v24 }
 0x26c   : > { %2480 = vperm.xlu0 %6837, %v8388_v46   ;;  %v1621_v46 = vpop.xlane.xlu0 %1620  ;;  %v8406_v27 = vpop.eup %7059 }
 0x26d   : > { %1877 = vperm.xlu1 %6838, %v1609_v3   ;;  %10249 = vst [vmem:[#allocation54_spill] sm:$0xff] %v8406_v27  ;;  %v8418_v21 = vpop.eup %7061  ;;  %v1695_v42 = vsub.f32 -inf, %v1621_v46 }
 0x26e   : > { %10250 = vst [vmem:[#allocation55_spill] sm:$0xff] %v8418_v21 }
 0x270   : > { %1902 = vperm.xlu0 %6837, %v8392_v36   ;;  %v8408_v0 = vpop.xlane.xlu0 %1626 }
 0x271   : > { %2465 = vperm.xlu1 %6838, %v8404_v12  }
 0x272   : > { %v8414_v3 = vpop.xlane.xlu1 %1635 }
 0x274   : > { %2490 = vperm.xlu0 %6837, %v8397_v58   ;;  %v8412_v58 = vpop.xlane.xlu0 %1632 }
 0x275   : > { %1887 = vperm.xlu1 %6838, %v1615_v18   ;;  %v6981_v18 = vld [vmem:[%s7877_s12 + $0x28] sm:$0xff]  }
 0x276   : > { %v8421_v12 = vpop.permute.xlu1 %3126 }
 0x277   : > { %10251 = vst [vmem:[#allocation56_spill] sm:$0xff] %v8421_v12 }
 0x278   : > { %1912 = vperm.xlu0 %6837, %v8401_v55   ;;  %v1768_v9 = vpop.permute.xlu0 %1767 }
 0x279   : > { %2475 = vperm.xlu1 %6838, %v8418_v21   ;;  %v1925_v43 = vsub.f32 %v7974_v28, %v1768_v9  ;;  %v6982_v28 = vld [vmem:[%s7863_s25 + $0x10] sm:$0xff]   ;;  %v1753_v21 = vmul.f32 1.442695, %v1695_v42  ;;  %v6984_v42 = vld [vmem:[%s7863_s25 + $0x8] sm:$0xff]  }
 0x27a   : > { %v8429_v30 = vpop.permute.xlu1 %3264 }
 0x27b   : > { %v1989_v39 = vmul.f32 1.442695, %v1925_v43 }
 0x27c   : > { %2500 = vperm.xlu0 %6837, %v8406_v27   ;;  %v1926_v27 = vsub.f32 %v7976_v29, %v1768_v9  ;;  %v8427_v49 = vpop.permute.xlu0 %3266  ;;  %v8433_v29 = vpop.eup %7063 }
 0x27d   : > { %1897 = vperm.xlu1 %6838, %v1621_v46   ;;  %7067 = vpow2.f32 %v1989_v39  ;;  %10252 = vst [vmem:[#allocation57_spill] sm:$0xff] %v8433_v29  ;;  %v6983_v46 = vld [vmem:[%s7877_s12 + $0x38] sm:$0xff]  }
 0x27e   : > { %v1991_v61 = vmul.f32 1.442695, %v1926_v27  ;;  %v8438_v27 = vpop.permute.xlu1 %3130 }
 0x27f   : > { %10253 = vst [vmem:[#allocation58_spill] sm:$0xff] %v8438_v27 }
 0x280   : > { %1922 = vperm.xlu0 %6837, %v8414_v3   ;;  %7069 = vpow2.f32 %v1991_v61  ;;  %v8435_v9 = vpop.permute.xlu0 %3248 }
 0x281   : > { %2485 = vperm.xlu1 %6838, %v8433_v29   ;;  %7071 = vpow2.f32 %v1753_v21  ;;  %v6985_v21 = vld [vmem:[%s7877_s12 + $0x48] sm:$0xff]  }
 0x282   : > { %v8445_v24 = vpop.permute.xlu1 %3262 }
 0x284   : > { %3244 = vrot.lane.b32.xlu0 %v6980_v15, %s7567_s26  ;;  %v8442_v39 = vpop.permute.xlu0 %3128  ;;  %v8449_v15 = vpop.eup %7065 }
 0x285   : > { %10254 = vst [vmem:[#allocation59_spill] sm:$0xff] %v8442_v39  ;;  %1907 = vperm.xlu1 %6838, %v8408_v0   ;;  %10255 = vst [vmem:[#allocation60_spill] sm:$0xff] %v8449_v15 }
 0x288   : > { %3136 = vrot.lane.b32.xlu0 %v6981_v18, %s7567_s26  ;;  %v8451_v43 = vpop.permute.xlu0 %3246  ;;  %v8454_v18 = vpop.permute.xlu1 %3134 }
 0x289   : > { %2495 = vperm.xlu1 %6838, %v8449_v15   ;;  %10256 = vst [vmem:[#allocation61_spill] sm:$0xff] %v8454_v18  ;;  %v6986_v18 = vld [vmem:[%s7863_s25] sm:$0xff]  }
 0x28a   : > { %v8458_v61 = vpop.eup %7067 }
 0x28c   : > { %3242 = vrot.lane.b32.xlu0 %v6982_v28, %s7567_s26  ;;  %v8462_v29 = vpop.permute.xlu0 %3132 }
 0x28d   : > { %v8460_v28 = vpop.eup %7069  ;;  %10257 = vst [vmem:[#allocation62_spill] sm:$0xff] %v8462_v29  ;;  %1917 = vperm.xlu1 %6838, %v8412_v58  }
 0x28e   : > { %v8467_v27 = vadd.f32 %v8460_v28, %v8458_v61  ;;  %v8473_v39 = vpop.eup %7071 }
 0x28f   : > { %10258 = vst [vmem:[#allocation63_spill] sm:$0xff] %v8473_v39 }
 0x290   : > { %3140 = vrot.lane.b32.xlu0 %v6983_v46, %s7567_s26  ;;  %v1773_v46 = vpop.permute.xlu1 %1772 }
 0x291   : > { %v1927_v15 = vsub.f32 %v7980_v31, %v1773_v46  ;;  %2505 = vperm.xlu1 %6838, %v8473_v39  }
 0x293   : > { %v1993_v12 = vmul.f32 1.442695, %v1927_v15 }
 0x294   : > { %3240 = vrot.lane.b32.xlu0 %v6984_v42, %s7567_s26  ;;  %v1928_v42 = vsub.f32 %v7982_v32, %v1773_v46  ;;  %v1778_v25 = vpop.permute.xlu1 %1777 }
 0x295   : > { %7073 = vpow2.f32 %v1993_v12  ;;  %v1929_v31 = vsub.f32 %v7986_v34, %v1778_v25  ;;  %v1930_v32 = vsub.f32 %v7988_v35, %v1778_v25  ;;  %3260 = vrot.lane.b32.xlu1 %v6987_v33, %s7567_s26  ;;  %v6990_v35 = vld [vmem:[%s7877_s12 + $0x68] sm:$0xff]  }
 0x296   : > { %v1995_v26 = vmul.f32 1.442695, %v1928_v42 }
 0x297   : > { %v1997_v46 = vmul.f32 1.442695, %v1929_v31  ;;  %v1999_v15 = vmul.f32 1.442695, %v1930_v32  ;;  %v6991_v32 = vld [vmem:[%s7863_s25 + $0x50] sm:$0xff]  }
 0x298   : > { %3144 = vrot.lane.b32.xlu0 %v6985_v21, %s7567_s26  ;;  %v6988_v21 = vld [vmem:[%s7877_s12 + $0x58] sm:$0xff]   ;;  %7075 = vpow2.f32 %v1995_v26  ;;  %v1783_v39 = vpop.permute.xlu1 %1782 }
 0x299   : > { %7077 = vpow2.f32 %v1997_v46  ;;  %v1931_v12 = vsub.f32 %v7992_v37, %v1783_v39  ;;  %v1932_v34 = vsub.f32 %v7994_v38, %v1783_v39  ;;  %v6992_v38 = vld [vmem:[%s7877_s12 + $0x78] sm:$0xff]  }
 0x29a   : > { %7079 = vpow2.f32 %v1999_v15 }
 0x29b   : > { %v8475_v29 = vpop.permute.xlu0 %2375  ;;  %v2001_v25 = vmul.f32 1.442695, %v1931_v12  ;;  %v2003_v26 = vmul.f32 1.442695, %v1932_v34 }
 0x29c   : > { %10259 = vst [vmem:[#allocation64_spill] sm:$0xff] %v8475_v29  ;;  %3238 = vrot.lane.b32.xlu0 %v6986_v18, %s7567_s26  ;;  %v6989_v29 = vld [vmem:[%s7877_s12 + $0x30] sm:$0xff]   ;;  %v1788_v31 = vpop.permute.xlu1 %1787 }
 0x29d   : > { %3138 = vrot.lane.b32.xlu1 %v6989_v29, %s7567_s26  ;;  %7081 = vpow2.f32 %v2001_v25  ;;  %v1933_v46 = vsub.f32 %v7998_v40, %v1788_v31  ;;  %v1934_v39 = vsub.f32 %v8000_v41, %v1788_v31  ;;  %v6993_v25 = vld [vmem:[%s7877_s12 + $0x40] sm:$0xff]  }
 0x29e   : > { %7083 = vpow2.f32 %v2003_v26 }
 0x29f   : > { %v8483_v42 = vpop.permute.xlu0 %2390  ;;  %v2005_v29 = vmul.f32 1.442695, %v1933_v46  ;;  %v2007_v12 = vmul.f32 1.442695, %v1934_v39 }
 0x2a0   : > { %3148 = vrot.lane.b32.xlu0 %v6988_v21, %s7567_s26 }
 0x2a1   : > { %3258 = vrot.lane.b32.xlu1 %v6991_v32, %s7567_s26 }
 0x2a2   : > { %v7074_v41 = vpop.eup %7073 }
 0x2a3   : > { %v1813_v18 = vpop.permute.xlu0 %1812  ;;  %v2565_v32 = vpack.c.bf16 %v7074_v41, %v8458_v61  ;;  %v6996_v61 = vld [vmem:[%s7955_s27 + $0x70] sm:$0xff]  }
 0x2a4   : > { %v1943_v33 = vsub.f32 %v8028_v56, %v1813_v18  ;;  %v1944_v37 = vsub.f32 %v8030_v57, %v1813_v18  ;;  %3152 = vrot.lane.b32.xlu0 %v6990_v35, %s7567_s26  ;;  %v1793_v56 = vpop.permute.xlu1 %1792  ;;  %v6994_v35 = vld [vmem:[%s7955_s27 + $0x78] sm:$0xff]  }
 0x2a5   : > { %v1935_v40 = vsub.f32 %v8004_v44, %v1793_v56  ;;  %v1936_v57 = vsub.f32 %v8006_v45, %v1793_v56  ;;  %v7076_v26 = vpop.eup %7075  ;;  %3142 = vrot.lane.b32.xlu1 %v6993_v25, %s7567_s26 }
 0x2a6   : > { %v2025_v21 = vmul.f32 1.442695, %v1943_v33  ;;  %v2027_v15 = vmul.f32 1.442695, %v1944_v37  ;;  %v2566_v45 = vpack.c.bf16 %v7076_v26, %v8460_v28  ;;  %v6995_v37 = vld [vmem:[%s7863_s25 + $0x48] sm:$0xff]   ;;  %v8513_v46 = vadd.f32 %v7076_v26, %v7074_v41 }
 0x2a7   : > { %v8499_v34 = vpop.permute.xlu0 %2400  ;;  %v2009_v18 = vmul.f32 1.442695, %v1935_v40  ;;  %v2011_v31 = vmul.f32 1.442695, %v1936_v57  ;;  %v3340_v28 = vsel %vm898_vm0, %v8166_v52, 0  ;;  %v6998_v52 = vld [vmem:[%s7955_s27 + $0x68] sm:$0xff]  }
 0x2a8   : > { %7085 = vpow2.f32 %v2025_v21  ;;  %3156 = vrot.lane.b32.xlu0 %v6992_v38, %s7567_s26  ;;  %v8509_v44 = vpop.permute.xlu1 %2380  ;;  %v7078_v21 = vpop.eup %7077  ;;  %2725 = vmatprep.mubr.bf16.mxu1 %v2566_v45 }
 0x2a9   : > { %7087 = vpow2.f32 %v2027_v15  ;;  %v7080_v15 = vpop.eup %7079  ;;  %2726 = vmatmul.mubr.bf16.vlgmr.msra.gmra.mxu1 %v2565_v32  ;;  %3256 = vrot.lane.b32.xlu1 %v6995_v37, %s7567_s26 }
 0x2aa   : > { %7089 = vpow2.f32 %v2005_v29  ;;  %6602 = vmatpush3.bf16.xpose.msra.mxu1 %v3340_v28  ;;  %v8525_v25 = vadd.f32 %v7080_v15, %v7078_v21  ;;  %v7082_v40 = vpop.eup %7081 }
 0x2ab   : > { %7091 = vpow2.f32 %v2007_v12  ;;  %v1823_v33 = vpop.permute.xlu0 %1822  ;;  %6786 = vmatprep.subr.msk.bf16.mxu1 %vm898_vm0, %v8427_v49  ;;  %v7084_v57 = vpop.eup %7083  ;;  %v2567_v41 = vpack.c.bf16 %v7082_v40, %v7078_v21 }
 0x2ac   : > { %7093 = vpow2.f32 %v2009_v18  ;;  %v1947_v38 = vsub.f32 %v8040_v62, %v1823_v33  ;;  %v1948_v39 = vsub.f32 %v8042_v63, %v1823_v33  ;;  %4760 = vrot.lane.b32.xlu0 %v6994_v35, %s7567_s26  ;;  %v1798_v62 = vpop.permute.xlu1 %1797  ;;  %v6997_v63 = vld [vmem:[%s7877_s12 + $0x50] sm:$0xff]   ;;  %v2568_v32 = vpack.c.bf16 %v7084_v57, %v7080_v15  ;;  %v6999_v33 = vld [vmem:[%s7863_s25 + $0x40] sm:$0xff]  }
 0x2ad   : > { %7095 = vpow2.f32 %v2011_v31  ;;  %v1937_v35 = vsub.f32 %v8010_v47, %v1798_v62  ;;  %v1938_v26 = vsub.f32 %v8012_v48, %v1798_v62  ;;  %3146 = vrot.lane.b32.xlu1 %v6997_v63, %s7567_s26  ;;  %v8537_v49 = vadd.f32 %v7084_v57, %v7082_v40  ;;  %v7001_v62 = vld [vmem:[%s7877_s12 + $0x60] sm:$0xff]   ;;  %v7002_v40 = vld [vmem:[%s7955_s27 + $0x58] sm:$0xff]  }
 0x2ae   : > { %v2033_v29 = vmul.f32 1.442695, %v1947_v38  ;;  %v2035_v12 = vmul.f32 1.442695, %v1948_v39  ;;  %v7000_v38 = vld [vmem:[%s7955_s27 + $0x60] sm:$0xff]   ;;  %v3337_v48 = vsel %vm898_vm0, %v8169_v6, 0  ;;  %2733 = vmatprep.mubr.bf16.mxu1 %v2568_v32 }
 0x2af   : > { %v8521_v56 = vpop.permute.xlu0 %2410  ;;  %v1696_v39 = vsub.f32 -inf, %v8392_v36  ;;  %v2013_v21 = vmul.f32 1.442695, %v1937_v35 }
 0x2b0   : > { %7097 = vpow2.f32 %v2033_v29  ;;  %4758 = vrot.lane.b32.xlu0 %v6996_v61, %s7567_s26  ;;  %v8534_v31 = vpop.permute.xlu1 %2385  ;;  %v2015_v29 = vmul.f32 1.442695, %v1938_v26 }
 0x2b1   : > { %7099 = vpow2.f32 %v2035_v12  ;;  %2734 = vmatmul.mubr.bf16.gmra.mxu1 %v2567_v41  ;;  %3254 = vrot.lane.b32.xlu1 %v6999_v33, %s7567_s26  ;;  %v1755_v35 = vmul.f32 1.442695, %v1696_v39 }
 0x2b2   : > { %6604 = vmatpush3.bf16.xpose.msra.mxu1 %v3337_v48 }
 0x2b3   : > { %v1833_v18 = vpop.permute.xlu0 %1832  ;;  %6787 = vmatprep.subr.msk.bf16.mxu1 %vm898_vm0, %v8429_v30 }
 0x2b4   : > { %v1951_v45 = vsub.f32 %v8052_v4, %v1833_v18  ;;  %v1952_v37 = vsub.f32 %v8054_v5, %v1833_v18  ;;  %4756 = vrot.lane.b32.xlu0 %v6998_v52, %s7567_s26  ;;  %v1698_v5 = vsub.f32 -inf, %v8401_v55  ;;  %v1803_v6 = vpop.permute.xlu1 %1802 }
 0x2b5   : > { %v8543_v47 = vpop.eup %7085  ;;  %v1939_v52 = vsub.f32 %v8016_v50, %v1803_v6  ;;  %v1940_v55 = vsub.f32 %v8018_v51, %v1803_v6  ;;  %3150 = vrot.lane.b32.xlu1 %v7001_v62, %s7567_s26 }
 0x2b6   : > { %v8548_v61 = vpop.eup %7087  ;;  %v2041_v15 = vmul.f32 1.442695, %v1951_v45  ;;  %v2043_v28 = vmul.f32 1.442695, %v1952_v37  ;;  %v1759_v30 = vmul.f32 1.442695, %v1698_v5 }
 0x2b7   : > { %v7090_v4 = vpop.eup %7089  ;;  %v8551_v12 = vpop.permute.xlu0 %2420  ;;  %v8557_v36 = vadd.f32 %v8548_v61, %v8543_v47  ;;  %v2017_v18 = vmul.f32 1.442695, %v1939_v52  ;;  %v2019_v32 = vmul.f32 1.442695, %v1940_v55  ;;  %v7003_v37 = vld [vmem:[%s7877_s12 + $0x70] sm:$0xff]   ;;  %v3334_v5 = vsel %vm898_vm0, %v8435_v9, 0 }
 0x2b8   : > { %v7092_v63 = vpop.eup %7091  ;;  %7101 = vpow2.f32 %v2041_v15  ;;  %4754 = vrot.lane.b32.xlu0 %v7000_v38, %s7567_s26  ;;  %v1808_v51 = vpop.permute.xlu1 %1807  ;;  %v7004_v15 = vld [vmem:[%s7955_s27 + $0x50] sm:$0xff]   ;;  %v7006_v52 = vld [vmem:[%s7955_s27 + $0x48] sm:$0xff]  }
 0x2b9   : > { %v7094_v57 = vpop.eup %7093  ;;  %7103 = vpow2.f32 %v2043_v28  ;;  %v8565_v41 = vadd.f32 %v7092_v63, %v7090_v4  ;;  %3154 = vrot.lane.b32.xlu1 %v7003_v37, %s7567_s26 }
 0x2ba   : > { %v7096_v26 = vpop.eup %7095  ;;  %7105 = vpow2.f32 %v2013_v21  ;;  %v2569_v33 = vpack.c.bf16 %v7094_v57, %v7090_v4  ;;  %v1941_v21 = vsub.f32 %v8022_v53, %v1808_v51  ;;  %v1700_v4 = vsub.f32 -inf, %v8414_v3  ;;  %6606 = vmatpush3.bf16.xpose.msra.mxu1 %v3334_v5 }
 0x2bb   : > { %7107 = vpow2.f32 %v2015_v29  ;;  %v1843_v50 = vpop.permute.xlu0 %1842  ;;  %v2570_v45 = vpack.c.bf16 %v7096_v26, %v7092_v63  ;;  %v8569_v38 = vadd.f32 %v7096_v26, %v7094_v57  ;;  %v1942_v29 = vsub.f32 %v8024_v54, %v1808_v51  ;;  %v7005_v54 = vld [vmem:[%s7955_s27 + $0x38] sm:$0xff]   ;;  %6788 = vmatprep.subr.msk.bf16.mxu1 %vm898_vm0, %v8445_v24 }
 0x2bc   : > { %7109 = vpow2.f32 %v2017_v18  ;;  %v1955_v48 = vsub.f32 %v8064_v10, %v1843_v50  ;;  %v1956_v39 = vsub.f32 %v8066_v11, %v1843_v50  ;;  %4752 = vrot.lane.b32.xlu0 %v7002_v40, %s7567_s26  ;;  %v2021_v6 = vmul.f32 1.442695, %v1941_v21  ;;  %v8587_v9 = vpop.permute.xlu1 %2395 }
 0x2bd   : > { %v8576_v28 = vpop.eup %7097  ;;  %7111 = vpow2.f32 %v2019_v32  ;;  %2741 = vmatprep.mubr.bf16.mxu1 %v2570_v45  ;;  %v2023_v62 = vmul.f32 1.442695, %v1942_v29  ;;  %v1763_v55 = vmul.f32 1.442695, %v1700_v4  ;;  %4744 = vrot.lane.b32.xlu1 %v7005_v54, %s7567_s26  ;;  %v3331_v51 = vsel %vm898_vm0, %v8451_v43, 0 }
 0x2be   : > { %v8582_v10 = vpop.eup %7099  ;;  %7113 = vpow2.f32 %v1755_v35  ;;  %v2049_v53 = vmul.f32 1.442695, %v1955_v48  ;;  %v2051_v11 = vmul.f32 1.442695, %v1956_v39  ;;  %2742 = vmatmul.mubr.bf16.gmra.mxu1 %v2569_v33  ;;  %v7007_v35 = vld [vmem:[%s7955_s27 + $0x30] sm:$0xff]   ;;  %v7008_v33 = vld [vmem:[%s7955_s27 + $0x40] sm:$0xff]  }
 0x2bf   : > { %7115 = vpow2.f32 %v1759_v30  ;;  %v8584_v3 = vpop.permute.xlu0 %2430  ;;  %v8592_v63 = vadd.f32 %v8582_v10, %v8576_v28  ;;  %v7009_v48 = vld [vmem:[%s7955_s27 + $0x28] sm:$0xff]  }
 0x2c0   : > { %7117 = vpow2.f32 %v2049_v53  ;;  %4750 = vrot.lane.b32.xlu0 %v7004_v15, %s7567_s26  ;;  %v1818_v57 = vpop.permute.xlu1 %1817 }
 0x2c1   : > { %7119 = vpow2.f32 %v2051_v11  ;;  %v1945_v32 = vsub.f32 %v8034_v59, %v1818_v57  ;;  %v1946_v24 = vsub.f32 %v8036_v60, %v1818_v57  ;;  %4742 = vrot.lane.b32.xlu1 %v7007_v35, %s7567_s26  ;;  %v1697_v35 = vsub.f32 -inf, %v8408_v0 }
 0x2c2   : > { %7121 = vpow2.f32 %v2021_v6  ;;  %6608 = vmatpush3.bf16.xpose.msra.mxu1 %v3331_v51 }
 0x2c3   : > { %7123 = vpow2.f32 %v2023_v62  ;;  %v1853_v40 = vpop.permute.xlu0 %1852  ;;  %v2029_v43 = vmul.f32 1.442695, %v1945_v32  ;;  %v7010_v62 = vld [vmem:[%s7955_s27 + $0x20] sm:$0xff]  }
 0x2c4   : > { %v1959_v26 = vsub.f32 %v8076_v16, %v1853_v40  ;;  %v1960_v18 = vsub.f32 %v8078_v17, %v1853_v40  ;;  %4748 = vrot.lane.b32.xlu0 %v7006_v52, %s7567_s26  ;;  %7125 = vpow2.f32 %v1763_v55  ;;  %v2031_v17 = vmul.f32 1.442695, %v1946_v24  ;;  %v8617_v60 = vpop.permute.xlu1 %2405 }
 0x2c5   : > { %v8606_v30 = vpop.eup %7101  ;;  %4740 = vrot.lane.b32.xlu1 %v7009_v48, %s7567_s26 }
 0x2c6   : > { %v8608_v50 = vpop.eup %7103  ;;  %v2057_v45 = vmul.f32 1.442695, %v1959_v26  ;;  %v2059_v16 = vmul.f32 1.442695, %v1960_v18 }
 0x2c7   : > { %v8612_v37 = vpop.eup %7105  ;;  %v8614_v59 = vpop.permute.xlu0 %2440  ;;  %v8622_v39 = vadd.f32 %v8608_v50, %v8606_v30 }
 0x2c8   : > { %v8624_v21 = vpop.eup %7107  ;;  %7127 = vpow2.f32 %v2057_v45  ;;  %4746 = vrot.lane.b32.xlu0 %v7008_v33, %s7567_s26  ;;  %v1828_v11 = vpop.permute.xlu1 %1827  ;;  %v1757_v45 = vmul.f32 1.442695, %v1697_v35 }
 0x2c9   : > { %v7110_v15 = vpop.eup %7109  ;;  %7129 = vpow2.f32 %v2059_v16  ;;  %v1949_v55 = vsub.f32 %v8046_v1, %v1828_v11  ;;  %v1950_v40 = vsub.f32 %v8048_v2, %v1828_v11  ;;  %4738 = vrot.lane.b32.xlu1 %v7010_v62, %s7567_s26  ;;  %v7011_v2 = vld [vmem:[%s7955_s27 + $0x18] sm:$0xff]   ;;  %v1699_v16 = vsub.f32 -inf, %v8412_v58 }
 0x2ca   : > { %v7112_v4 = vpop.eup %7111  ;;  %v2571_v5 = vpack.c.bf16 %v7110_v15, %v8612_v37  ;;  %7131 = vpow2.f32 %v2031_v17 }
 0x2cb   : > { %v8628_v29 = vpop.eup %7113  ;;  %v8630_v53 = vpop.permute.xlu0 %1862  ;;  %v2572_v6 = vpack.c.bf16 %v7112_v4, %v8624_v21  ;;  %v8635_v54 = vadd.f32 %v7112_v4, %v7110_v15  ;;  %7133 = vpow2.f32 %v2029_v43  ;;  %v2039_v32 = vmul.f32 1.442695, %v1950_v40  ;;  %v7012_v4 = vld [vmem:[%s7955_s27 + $0x10] sm:$0xff]  }
 0x2cc   : > { %10260 = vst [vmem:[#allocation65_spill] sm:$0xff] %v8628_v29  ;;  %v8637_v52 = vpop.eup %7115  ;;  %2510 = vperm.xlu0 %6837, %v8628_v29   ;;  %v8652_v1 = vpop.permute.xlu1 %2415  ;;  %v2037_v51 = vmul.f32 1.442695, %v1949_v55 }
 0x2cd   : > { %10261 = vst [vmem:[#allocation66_spill] sm:$0xff] %v8637_v52  ;;  %v8642_v57 = vpop.eup %7117  ;;  %2749 = vmatprep.mubr.bf16.mxu1 %v2572_v6  ;;  %7135 = vpow2.f32 %v2039_v32  ;;  %4736 = vrot.lane.b32.xlu1 %v7011_v2, %s7567_s26  ;;  %v1761_v6 = vmul.f32 1.442695, %v1699_v16 }
 0x2ce   : > { %v8645_v26 = vpop.eup %7119  ;;  %2750 = vmatmul.mubr.bf16.gmra.mxu1 %v2571_v5  ;;  %7137 = vpow2.f32 %v2037_v51 }
 0x2cf   : > { %v8647_v18 = vpop.eup %7121  ;;  %v8649_v24 = vpop.permute.xlu0 %2450  ;;  %v8657_v33 = vadd.f32 %v8645_v26, %v8642_v57  ;;  %7139 = vpow2.f32 %v1757_v45 }
 0x2d0   : > { %v8659_v0 = vpop.eup %7123  ;;  %2520 = vperm.xlu0 %6837, %v8637_v52   ;;  %v1838_v15 = vpop.permute.xlu1 %1837  ;;  %v2573_v58 = vpack.c.bf16 %v8543_v47, %v8647_v18  ;;  %7141 = vpow2.f32 %v1761_v6 }
 0x2d1   : > { %v2574_v17 = vpack.c.bf16 %v8548_v61, %v8659_v0  ;;  %v8665_v48 = vpop.eup %7125  ;;  %v1953_v5 = vsub.f32 %v8058_v7, %v1838_v15  ;;  %v1954_v11 = vsub.f32 %v8060_v8, %v1838_v15  ;;  %4734 = vrot.lane.b32.xlu1 %v7012_v4, %s7567_s26  ;;  %v7013_v8 = vld [vmem:[%s7955_s27 + $0x8] sm:$0xff]  }
 0x2d2   : > { %10262 = vst [vmem:[#allocation67_spill] sm:$0xff] %v8665_v48 }
 0x2d3   : > { %2757 = vmatprep.mubr.bf16.mxu1 %v2574_v17  ;;  %v8667_v43 = vpop.permute.xlu0 %1872  ;;  %v2047_v55 = vmul.f32 1.442695, %v1954_v11  ;;  %v2045_v32 = vmul.f32 1.442695, %v1953_v5  ;;  %v7014_v17 = vld [vmem:[%s7955_s27] sm:$0xff]  }
 0x2d4   : > { %2530 = vperm.xlu0 %6837, %v8665_v48   ;;  %v8683_v7 = vpop.permute.xlu1 %2425 }
 0x2d5   : > { %v8676_v61 = vpop.eup %7127  ;;  %7143 = vpow2.f32 %v2047_v55  ;;  %4732 = vrot.lane.b32.xlu1 %v7013_v8, %s7567_s26 }
 0x2d6   : > { %v8678_v62 = vpop.eup %7129  ;;  %2758 = vmatmul.mubr.bf16.gmra.mxu1 %v2573_v58  ;;  %7145 = vpow2.f32 %v2045_v32 }
 0x2d7   : > { %v8680_v40 = vpop.permute.xlu0 %2460  ;;  %v8688_v35 = vadd.f32 %v8678_v62, %v8676_v61  ;;  %v8690_v47 = vpop.eup %7131 }
 0x2d8   : > { %v8692_v2 = vpop.eup %7133  ;;  %v2576_v51 = vpack.c.bf16 %v8582_v10, %v8690_v47  ;;  %v1848_v16 = vpop.permute.xlu1 %1847 }
 0x2d9   : > { %v1957_v15 = vsub.f32 %v8070_v13, %v1848_v16  ;;  %v1958_v4 = vsub.f32 %v8072_v14, %v1848_v16  ;;  %v2575_v5 = vpack.c.bf16 %v8576_v28, %v8692_v2  ;;  %4730 = vrot.lane.b32.xlu1 %v7014_v17, %s7567_s26  ;;  %v1964_v28 = vsub.f32 %v8090_v23, %v8630_v53 }
 0x2da   : > { %2765 = vmatprep.mubr.bf16.mxu1 %v2576_v51  ;;  %v8709_v6 = vpop.eup %7135  ;;  %v1963_v23 = vsub.f32 %v8088_v22, %v8630_v53  ;;  %v10267_v22 = vld [vmem:[#allocation11_spill] sm:$0xff] }
 0x2db   : > { %v8696_v45 = vpop.permute.xlu0 %1882  ;;  %v2055_v11 = vmul.f32 1.442695, %v1958_v4  ;;  %v2053_v55 = vmul.f32 1.442695, %v1957_v15  ;;  %v8711_v8 = vpop.eup %7137  ;;  %v2578_v13 = vpack.c.bf16 %v8608_v50, %v8709_v6  ;;  %v2067_v4 = vmul.f32 1.442695, %v1964_v28 }
 0x2dc   : > { %v8707_v10 = vpop.permute.xlu1 %2435  ;;  %v8715_v14 = vpop.eup %7139  ;;  %v2577_v50 = vpack.c.bf16 %v8606_v30, %v8711_v8  ;;  %v1968_v53 = vsub.f32 %v10267_v22, %v8667_v43 }
 0x2dd   : > { %10264 = vst [vmem:[#allocation69_spill] sm:$0xff] %v8715_v14  ;;  %7147 = vpow2.f32 %v2055_v11  ;;  %2515 = vperm.xlu1 %6838, %v8715_v14   ;;  %v8726_v15 = vpop.eup %7141 }
 0x2de   : > { %2766 = vmatmul.mubr.bf16.gmra.mxu1 %v2575_v5  ;;  %7149 = vpow2.f32 %v2053_v55  ;;  %10265 = vst [vmem:[#allocation70_spill] sm:$0xff] %v8726_v15 }
 0x2df   : > { %v8704_v58 = vpop.permute.xlu0 %2470  ;;  %2773 = vmatprep.mubr.bf16.mxu1 %v2578_v13  ;;  %7151 = vpow2.f32 %v2067_v4  ;;  %v2075_v4 = vmul.f32 1.442695, %v1968_v53 }
 0x2e0   : > { %10263 = vst [vmem:[#allocation68_spill] sm:$0xff] %v8704_v58  ;;  %v1858_v51 = vpop.permute.xlu1 %1857 }
 0x2e1   : > { %v1961_v16 = vsub.f32 %v8082_v19, %v1858_v51  ;;  %v1962_v17 = vsub.f32 %v8084_v20, %v1858_v51  ;;  %2525 = vperm.xlu1 %6838, %v8726_v15   ;;  %v2065_v51 = vmul.f32 1.442695, %v1963_v23  ;;  %v10269_v15 = vld [vmem:[#allocation9_spill] sm:$0xff] }
 0x2e2   : > { %v8735_v19 = vpop.eup %7143 }
 0x2e3   : > { %v8719_v32 = vpop.permute.xlu0 %1892  ;;  %v2063_v5 = vmul.f32 1.442695, %v1962_v17  ;;  %v2061_v20 = vmul.f32 1.442695, %v1961_v16  ;;  %v8737_v13 = vpop.eup %7145  ;;  %v2580_v30 = vpack.c.bf16 %v8645_v26, %v8735_v19  ;;  %v10270_v26 = vld [vmem:[#allocation10_spill] sm:$0xff] }
 0x2e4   : > { %v8733_v55 = vpop.permute.xlu1 %2445  ;;  %v2579_v52 = vpack.c.bf16 %v8642_v57, %v8737_v13  ;;  %v1967_v23 = vsub.f32 %v10270_v26, %v8667_v43 }
 0x2e5   : > { %7153 = vpow2.f32 %v2063_v5 }
 0x2e6   : > { %2774 = vmatmul.mubr.bf16.gmra.mxu1 %v2577_v50  ;;  %7155 = vpow2.f32 %v2061_v20  ;;  %v10268_v50 = vld [vmem:[#allocation8_spill] sm:$0xff]  ;;  %v2073_v57 = vmul.f32 1.442695, %v1967_v23  ;;  %v10275_v23 = vld [vmem:[#allocation14_spill] sm:$0xff] }
 0x2e7   : > { %v8730_v11 = vpop.permute.xlu0 %2480  ;;  %2781 = vmatprep.mubr.bf16.mxu1 %v2580_v30  ;;  %7157 = vpow2.f32 %v2065_v51  ;;  %v10272_v51 = vld [vmem:[#allocation15_spill] sm:$0xff] }
 0x2e8   : > { %10266 = vst [vmem:[#allocation71_spill] sm:$0xff] %v8730_v11  ;;  %v1868_v17 = vpop.permute.xlu1 %1867  ;;  %7159 = vpow2.f32 %v2075_v4  ;;  %v1972_v43 = vsub.f32 %v10272_v51, %v8696_v45  ;;  %v1971_v4 = vsub.f32 %v10275_v23, %v8696_v45  ;;  %v10280_v23 = vld [vmem:[#allocation17_spill] sm:$0xff] }
 0x2e9   : > { %v1965_v48 = vsub.f32 %v10268_v50, %v1868_v17  ;;  %v1966_v16 = vsub.f32 %v10269_v15, %v1868_v17  ;;  %v10273_v17 = vld [vmem:[#allocation12_spill] sm:$0xff] }
 0x2ea   : > { %v8755_v29 = vpop.eup %7147  ;;  %v2083_v51 = vmul.f32 1.442695, %v1972_v43  ;;  %v2081_v45 = vmul.f32 1.442695, %v1971_v4 }
 0x2eb   : > { %v8743_v28 = vpop.permute.xlu0 %1902  ;;  %v2071_v22 = vmul.f32 1.442695, %v1966_v16  ;;  %v2069_v20 = vmul.f32 1.442695, %v1965_v48  ;;  %v8757_v50 = vpop.eup %7149  ;;  %v2582_v15 = vpack.c.bf16 %v8678_v62, %v8755_v29  ;;  %v10274_v16 = vld [vmem:[#allocation13_spill] sm:$0xff] }
 0x2ec   : > { %v8753_v30 = vpop.permute.xlu1 %2455  ;;  %v2581_v62 = vpack.c.bf16 %v8676_v61, %v8757_v50 }
 0x2ed   : > { %7161 = vpow2.f32 %v2071_v22  ;;  %v8772_v22 = vpop.eup %7151 }
 0x2ee   : > { %2782 = vmatmul.mubr.bf16.gmra.mxu1 %v2579_v52  ;;  %7163 = vpow2.f32 %v2069_v20 }
 0x2ef   : > { %v8751_v5 = vpop.permute.xlu0 %2490  ;;  %2789 = vmatprep.mubr.bf16.mxu1 %v2582_v15  ;;  %7165 = vpow2.f32 %v2073_v57  ;;  %v10278_v57 = vld [vmem:[#allocation19_spill] sm:$0xff] }
 0x2f0   : > { %10271 = vst [vmem:[#allocation11_spill] sm:$0xff] %v8751_v5  ;;  %v1878_v53 = vpop.permute.xlu1 %1877  ;;  %7167 = vpow2.f32 %v2083_v51  ;;  %v1976_v43 = vsub.f32 %v10278_v57, %v8719_v32  ;;  %v2199_v51 = vadd.f32 %v8624_v21, %v8612_v37 }
 0x2f1   : > { %v1969_v48 = vsub.f32 %v10273_v17, %v1878_v53  ;;  %v1970_v26 = vsub.f32 %v10274_v16, %v1878_v53 }
 0x2f2   : > { %v8779_v20 = vpop.eup %7153  ;;  %v2091_v57 = vmul.f32 1.442695, %v1976_v43 }
 0x2f3   : > { %v8763_v52 = vpop.permute.xlu0 %1912  ;;  %2185 = vadd.xlane.f32.xlu0 %v8513_v46  ;;  %v2079_v15 = vmul.f32 1.442695, %v1970_v26  ;;  %v2077_v53 = vmul.f32 1.442695, %v1969_v48  ;;  %v8781_v17 = vpop.eup %7155  ;;  %v2584_v61 = vpack.c.bf16 %v8772_v22, %v8779_v20  ;;  %v10279_v48 = vld [vmem:[#allocation16_spill] sm:$0xff] }
 0x2f4   : > { %v8777_v46 = vpop.permute.xlu1 %2465  ;;  %v8787_v16 = vpop.eup %7157 }
 0x2f5   : > { %10277 = vst [vmem:[#allocation9_spill] sm:$0xff] %v8777_v46  ;;  %7169 = vpow2.f32 %v2079_v15  ;;  %v2583_v4 = vpack.c.bf16 %v8787_v16, %v8781_v17  ;;  %v10281_v15 = vld [vmem:[#allocation18_spill] sm:$0xff]  ;;  %v8800_v5 = vpop.eup %7159 }
 0x2f6   : > { %2790 = vmatmul.mubr.bf16.gmra.mxu1 %v2581_v62  ;;  %7171 = vpow2.f32 %v2077_v53 }
 0x2f7   : > { %v8774_v14 = vpop.permute.xlu0 %2500  ;;  %2188 = vadd.xlane.f32.xlu0 %v8525_v25  ;;  %2797 = vmatprep.mubr.bf16.mxu1 %v2584_v61  ;;  %7173 = vpow2.f32 %v2081_v45  ;;  %v1975_v61 = vsub.f32 %v10281_v15, %v8719_v32  ;;  %v2205_v45 = vadd.f32 %v8659_v0, %v8647_v18  ;;  %v2211_v18 = vadd.f32 %v8692_v2, %v8690_v47  ;;  %v10286_v0 = vld [vmem:[#allocation22_spill] sm:$0xff] }
 0x2f8   : > { %10276 = vst [vmem:[#allocation8_spill] sm:$0xff] %v8774_v14  ;;  %v1888_v26 = vpop.permute.xlu1 %1887  ;;  %7175 = vpow2.f32 %v2091_v57 }
 0x2f9   : > { %v1973_v62 = vsub.f32 %v10279_v48, %v1888_v26  ;;  %v1974_v14 = vsub.f32 %v10280_v23, %v1888_v26  ;;  %v2089_v43 = vmul.f32 1.442695, %v1975_v61  ;;  %v1979_v61 = vsub.f32 %v10286_v0, %v8743_v28  ;;  %v10289_v0 = vld [vmem:[#allocation25_spill] sm:$0xff] }
 0x2fa   : > { %v8808_v23 = vpop.eup %7161 }
 0x2fb   : > { %v8789_v25 = vpop.permute.xlu0 %1922  ;;  %2194 = vadd.xlane.f32.xlu0 %v8565_v41  ;;  %v10282_v41 = vld [vmem:[#allocation23_spill] sm:$0xff]  ;;  %v2087_v48 = vmul.f32 1.442695, %v1974_v14  ;;  %v2085_v37 = vmul.f32 1.442695, %v1973_v62  ;;  %v8810_v21 = vpop.eup %7163  ;;  %v2586_v32 = vpack.c.bf16 %v8800_v5, %v8808_v23  ;;  %v10284_v62 = vld [vmem:[#allocation20_spill] sm:$0xff] }
 0x2fc   : > { %v1980_v53 = vsub.f32 %v10282_v41, %v8743_v28  ;;  %v8806_v26 = vpop.permute.xlu1 %2475  ;;  %v2097_v28 = vmul.f32 1.442695, %v1979_v61 }
 0x2fd   : > { %10283 = vst [vmem:[#allocation10_spill] sm:$0xff] %v8806_v26  ;;  %7177 = vpow2.f32 %v2087_v48  ;;  %v10285_v26 = vld [vmem:[#allocation21_spill] sm:$0xff]  ;;  %v10287_v48 = vld [vmem:[#allocation27_spill] sm:$0xff] }
 0x2fe   : > { %2798 = vmatmul.mubr.bf16.gmra.mxu1 %v2583_v4  ;;  %v8816_v4 = vpop.eup %7165  ;;  %v2099_v14 = vmul.f32 1.442695, %v1980_v53  ;;  %7179 = vpow2.f32 %v2085_v37  ;;  %v1984_v37 = vsub.f32 %v10287_v48, %v8763_v52 }
 0x2ff   : > { %v8804_v11 = vpop.permute.xlu0 %3244  ;;  %2200 = vadd.xlane.f32.xlu0 %v2199_v51  ;;  %2805 = vmatprep.mubr.bf16.mxu1 %v2586_v32  ;;  %v2585_v46 = vpack.c.bf16 %v8816_v4, %v8810_v21  ;;  %7181 = vpow2.f32 %v2089_v43  ;;  %v8828_v53 = vpop.eup %7167 }
 0x300   : > { %v1898_v15 = vpop.permute.xlu1 %1897  ;;  %7183 = vpow2.f32 %v2099_v14 }
 0x301   : > { %v1977_v41 = vsub.f32 %v10284_v62, %v1898_v15  ;;  %v1978_v58 = vsub.f32 %v10285_v26, %v1898_v15  ;;  %v2107_v15 = vmul.f32 1.442695, %v1984_v37  ;;  %v2223_v37 = vadd.f32 %v8737_v13, %v8735_v19 }
 0x302   : > { %v2229_v13 = vadd.f32 %v8757_v50, %v8755_v29  ;;  %v10294_v50 = vld [vmem:[#allocation30_spill] sm:$0xff] }
 0x303   : > { %v8818_v51 = vpop.permute.xlu0 %3136  ;;  %2206 = vadd.xlane.f32.xlu0 %v2205_v45  ;;  %v2095_v57 = vmul.f32 1.442695, %v1978_v58  ;;  %v8836_v45 = vpop.eup %7169  ;;  %v2093_v47 = vmul.f32 1.442695, %v1977_v41  ;;  %v10288_v41 = vld [vmem:[#allocation24_spill] sm:$0xff] }
 0x304   : > { %v8834_v26 = vpop.permute.xlu1 %2485  ;;  %v8838_v2 = vpop.eup %7171  ;;  %v2588_v58 = vpack.c.bf16 %v8828_v53, %v8836_v45 }
 0x305   : > { %7185 = vpow2.f32 %v2095_v57  ;;  %v8844_v43 = vpop.eup %7173  ;;  %2182 = vadd.xlane.f32.xlu1 %v8467_v27 }
 0x306   : > { %2806 = vmatmul.mubr.bf16.gmra.mxu1 %v2585_v46  ;;  %v2217_v46 = vadd.f32 %v8711_v8, %v8709_v6  ;;  %7187 = vpow2.f32 %v2093_v47  ;;  %v2587_v61 = vpack.c.bf16 %v8844_v43, %v8838_v2  ;;  %v10290_v6 = vld [vmem:[#allocation26_spill] sm:$0xff]  ;;  %v8857_v27 = vpop.eup %7175  ;;  %v10291_v47 = vld [vmem:[#allocation31_spill] sm:$0xff] }
 0x307   : > { %v8832_v32 = vpop.permute.xlu0 %3242  ;;  %2212 = vadd.xlane.f32.xlu0 %v2211_v18  ;;  %2813 = vmatprep.mubr.bf16.mxu1 %v2588_v58  ;;  %7189 = vpow2.f32 %v2097_v28  ;;  %v1983_v8 = vsub.f32 %v10290_v6, %v8763_v52  ;;  %v1988_v58 = vsub.f32 %v10291_v47, %v8789_v25 }
 0x308   : > { %v1908_v14 = vpop.permute.xlu1 %1907  ;;  %7191 = vpow2.f32 %v2107_v15  ;;  %v10292_v15 = vld [vmem:[#allocation28_spill] sm:$0xff] }
 0x309   : > { %v1981_v18 = vsub.f32 %v10288_v41, %v1908_v14  ;;  %v1982_v57 = vsub.f32 %v10289_v0, %v1908_v14  ;;  %2191 = vadd.xlane.f32.xlu1 %v8537_v49  ;;  %v2105_v19 = vmul.f32 1.442695, %v1983_v8 }
 0x30a   : > { %v7178_v28 = vpop.eup %7177 }
 0x30b   : > { %v8846_v62 = vpop.permute.xlu0 %3140  ;;  %2218 = vadd.xlane.f32.xlu0 %v2217_v46  ;;  %v2103_v48 = vmul.f32 1.442695, %v1982_v57  ;;  %v2101_v41 = vmul.f32 1.442695, %v1981_v18  ;;  %v7180_v52 = vpop.eup %7179  ;;  %v2590_v0 = vpack.c.bf16 %v8857_v27, %v7178_v28 }
 0x30c   : > { %v8864_v14 = vpop.permute.xlu1 %2495  ;;  %v8869_v57 = vpop.eup %7181 }
 0x30d   : > { %7193 = vpow2.f32 %v2103_v48  ;;  %2197 = vadd.xlane.f32.xlu1 %v8569_v38  ;;  %v10293_v48 = vld [vmem:[#allocation29_spill] sm:$0xff]  ;;  %v2589_v8 = vpack.c.bf16 %v8869_v57, %v7180_v52  ;;  %v8877_v47 = vpop.eup %7183  ;;  %v2235_v38 = vadd.f32 %v8781_v17, %v8779_v20  ;;  %v2241_v20 = vadd.f32 %v8810_v21, %v8808_v23 }
 0x30e   : > { %2814 = vmatmul.mubr.bf16.gmra.mxu1 %v2587_v61  ;;  %v2115_v61 = vmul.f32 1.442695, %v1988_v58  ;;  %7195 = vpow2.f32 %v2101_v41  ;;  %v1987_v58 = vsub.f32 %v10294_v50, %v8789_v25  ;;  %v2247_v23 = vadd.f32 %v8838_v2, %v8836_v45 }
 0x30f   : > { %v8861_v46 = vpop.permute.xlu0 %3240  ;;  %2224 = vadd.xlane.f32.xlu0 %v2223_v37  ;;  %2821 = vmatprep.mubr.bf16.mxu1 %v2590_v0  ;;  %7197 = vpow2.f32 %v2105_v19 }
 0x310   : > { %v1918_v49 = vpop.permute.xlu1 %1917  ;;  %7199 = vpow2.f32 %v2115_v61  ;;  %v2113_v25 = vmul.f32 1.442695, %v1987_v58  ;;  %v3325_v58 = vsel %vm898_vm0, %v8832_v32, 0 }
 0x311   : > { %v1985_v18 = vsub.f32 %v10292_v15, %v1918_v49  ;;  %v1986_v37 = vsub.f32 %v10293_v48, %v1918_v49  ;;  %2203 = vadd.xlane.f32.xlu1 %v8635_v54  ;;  %v3328_v48 = vsel %vm898_vm0, %v8804_v11, 0 }
 0x312   : > { %v7186_v29 = vpop.eup %7185 }
 0x313   : > { %v8871_v6 = vpop.permute.xlu0 %3144  ;;  %2230 = vadd.xlane.f32.xlu0 %v2229_v13  ;;  %v2111_v0 = vmul.f32 1.442695, %v1986_v37  ;;  %v2592_v49 = vpack.c.bf16 %v8877_v47, %v7186_v29  ;;  %v2109_v15 = vmul.f32 1.442695, %v1985_v18  ;;  %v7188_v19 = vpop.eup %7187 }
 0x314   : > { %v8886_v13 = vpop.permute.xlu1 %2505  ;;  %v8893_v17 = vpop.eup %7189 }
 0x315   : > { %7201 = vpow2.f32 %v2111_v0  ;;  %2209 = vadd.xlane.f32.xlu1 %v8557_v36  ;;  %v2591_v61 = vpack.c.bf16 %v8893_v17, %v7188_v19  ;;  %v8900_v18 = vpop.eup %7191  ;;  %v2253_v0 = vadd.f32 %v7180_v52, %v7178_v28 }
 0x316   : > { %2822 = vmatmul.mubr.bf16.gmra.mxu1 %v2589_v8  ;;  %7203 = vpow2.f32 %v2109_v15 }
 0x317   : > { %v8883_v41 = vpop.permute.xlu0 %3238  ;;  %2236 = vadd.xlane.f32.xlu0 %v2235_v38  ;;  %2829 = vmatprep.mubr.bf16.mxu1 %v2592_v49  ;;  %7205 = vpow2.f32 %v2113_v25  ;;  %v2259_v25 = vadd.f32 %v7188_v19, %v7186_v29 }
 0x318   : > { %v3261_v37 = vpop.permute.xlu1 %3260 }
 0x319   : > { %6789 = vmatprep.subr.msk.bf16.mxu1 %vm898_vm0, %v3261_v37  ;;  %2215 = vadd.xlane.f32.xlu1 %v8592_v63 }
 0x31a   : > { %6610 = vmatpush3.bf16.xpose.msra.mxu1 %v3328_v48  ;;  %v7194_v11 = vpop.eup %7193 }
 0x31b   : > { %v8895_v54 = vpop.permute.xlu0 %3148  ;;  %2242 = vadd.xlane.f32.xlu0 %v2241_v20  ;;  %v2594_v8 = vpack.c.bf16 %v8900_v18, %v7194_v11  ;;  %v7196_v50 = vpop.eup %7195 }
 0x31c   : > { %v8907_v36 = vpop.permute.xlu1 %3138  ;;  %v7198_v38 = vpop.eup %7197  ;;  %v2265_v20 = vadd.f32 %v7196_v50, %v7194_v11  ;;  %v3319_v11 = vsel %vm898_vm0, %v8883_v41, 0  ;;  %v10296_v41 = vld [vmem:[#allocation59_spill] sm:$0xff] }
 0x31d   : > { %2221 = vadd.xlane.f32.xlu1 %v8622_v39  ;;  %v2593_v63 = vpack.c.bf16 %v7198_v38, %v7196_v50  ;;  %v7200_v2 = vpop.eup %7199  ;;  %v3322_v39 = vsel %vm898_vm0, %v8861_v46, 0 }
 0x31e   : > { %2830 = vmatmul.mubr.bf16.gmra.mxu1 %v2591_v61 }
 0x31f   : > { %v8904_v21 = vpop.permute.xlu0 %3152  ;;  %2248 = vadd.xlane.f32.xlu0 %v2247_v23  ;;  %2837 = vmatprep.mubr.bf16.mxu1 %v2594_v8  ;;  %v10295_v23 = vld [vmem:[#allocation56_spill] sm:$0xff] }
 0x320   : > { %v3259_v45 = vpop.permute.xlu1 %3258 }
 0x321   : > { %6790 = vmatprep.subr.msk.bf16.mxu1 %vm898_vm0, %v3259_v45  ;;  %2227 = vadd.xlane.f32.xlu1 %v8657_v33  ;;  %v2238_v33 = vadd.f32 %v8787_v16, %v8772_v22  ;;  %v2250_v22 = vadd.f32 %v8844_v43, %v8828_v53  ;;  %v2262_v53 = vadd.f32 %v8893_v17, %v8877_v47  ;;  %v10297_v45 = vld [vmem:[#allocation58_spill] sm:$0xff] }
 0x322   : > { %6612 = vmatpush3.bf16.xpose.msra.mxu1 %v3325_v58  ;;  %v7202_v15 = vpop.eup %7201  ;;  %v2256_v58 = vadd.f32 %v8869_v57, %v8857_v27  ;;  %v2268_v27 = vadd.f32 %v7198_v38, %v8900_v18 }
 0x323   : > { %v8912_v49 = vpop.permute.xlu0 %3156  ;;  %2254 = vadd.xlane.f32.xlu0 %v2253_v0  ;;  %v2596_v28 = vpack.c.bf16 %v7200_v2, %v7202_v15  ;;  %v7204_v52 = vpop.eup %7203 }
 0x324   : > { %v8917_v32 = vpop.permute.xlu1 %3142  ;;  %v7206_v37 = vpop.eup %7205  ;;  %v2271_v19 = vadd.f32 %v7204_v52, %v7202_v15  ;;  %v10298_v15 = vld [vmem:[#allocation62_spill] sm:$0xff] }
 0x325   : > { %2233 = vadd.xlane.f32.xlu1 %v8688_v35  ;;  %v2595_v29 = vpack.c.bf16 %v7206_v37, %v7204_v52  ;;  %v2244_v35 = vadd.f32 %v8816_v4, %v8800_v5 }
 0x326   : > { %2838 = vmatmul.mubr.bf16.gmra.mxu1 %v2593_v63  ;;  %v2274_v63 = vadd.f32 %v7206_v37, %v7200_v2 }
 0x327   : > { %v4761_v48 = vpop.permute.xlu0 %4760  ;;  %2260 = vadd.xlane.f32.xlu0 %v2259_v25  ;;  %2845 = vmatprep.mubr.bf16.mxu1 %v2596_v28  ;;  %v10299_v28 = vld [vmem:[#allocation61_spill] sm:$0xff] }
 0x328   : > { %6649 = vmatprep.subr.bf16.mxu0 %v4761_v48  ;;  %v3257_v61 = vpop.permute.xlu1 %3256 }
 0x329   : > { %6791 = vmatprep.subr.msk.bf16.mxu1 %vm898_vm0, %v3257_v61  ;;  %2239 = vadd.xlane.f32.xlu1 %v2238_v33  ;;  %v2341_v61 = vld [vmem:[#allocation4] sm:$0xff] }
 0x32a   : > { %6614 = vmatpush3.bf16.xpose.msra.mxu1 %v3322_v39 }
 0x32b   : > { %2266 = vadd.xlane.f32.xlu0 %v2265_v20  ;;  %v4759_v50 = vpop.permute.xlu0 %4758 }
 0x32c   : > { %v8927_v46 = vpop.permute.xlu1 %3146 }
 0x32d   : > { %2245 = vadd.xlane.f32.xlu1 %v2244_v35 }
 0x32e   : > { %2846 = vmatmul.mubr.bf16.gmra.mxu1 %v2595_v29 }
 0x32f   : > { %6617 = vmatprep.mubr.msk.bf16.mxu1 %vm898_vm0, %v10295_v23  ;;  %2272 = vadd.xlane.f32.xlu0 %v2271_v19  ;;  %v4757_v5 = vpop.permute.xlu0 %4756  ;;  %v10300_v19 = vld [vmem:[#allocation64_spill] sm:$0xff] }
 0x330   : > { %v3255_v8 = vpop.permute.xlu1 %3254 }
 0x331   : > { %6792 = vmatprep.subr.msk.bf16.mxu1 %vm898_vm0, %v3255_v8  ;;  %2251 = vadd.xlane.f32.xlu1 %v2250_v22 }
 0x332   : > { %6616 = vmatpush3.bf16.xpose.msra.mxu1 %v3319_v11  ;;  %v2342_v11 = vld [vmem:[#allocation4 + $0x8] sm:$0xff] }
 0x333   : > { %6761 = vmatprep.subr.bf16.mxu1 %v4761_v48  ;;  %v4755_v0 = vpop.permute.xlu0 %4754 }
 0x334   : > { %v8936_v16 = vpop.permute.xlu1 %3150 }
 0x335   : > { %2257 = vadd.xlane.f32.xlu1 %v2256_v58 }
 0x337   : > { %v4753_v47 = vpop.permute.xlu0 %4752 }
 0x338   : > { %v8940_v4 = vpop.permute.xlu1 %3154 }
 0x339   : > { %6618 = vmatmul.mubr.msk.bf16.vlgmr.msra.gmra.mxu1 %vm898_vm0, %v10295_v23  ;;  %2263 = vadd.xlane.f32.xlu1 %v2262_v53  ;;  %v2533_v23 = vmul.f32 %v10300_v19, %v2341_v61 }
 0x33a   : > { %6619 = vmatprep.mubr.msk.bf16.mxu1 %vm898_vm0, %v10296_v41 }
 0x33b   : > { %v4751_v38 = vpop.permute.xlu0 %4750 }
 0x33c   : > { %v4745_v43 = vpop.permute.xlu1 %4744 }
 0x33d   : > { %6650 = vmatpush3.bf16.msra.mxu0 %v4745_v43  ;;  %6769 = vmatpush3.bf16.msra.mxu1 %v4745_v43 }
 0x33e   : > { %6651 = vmatprep.subr.bf16.mxu0 %v4759_v50  ;;  %6762 = vmatprep.subr.bf16.mxu1 %v4759_v50 }
 0x33f   : > { %2269 = vadd.xlane.f32.xlu1 %v2268_v27  ;;  %v4749_v25 = vpop.permute.xlu0 %4748 }
 0x340   : > { %v4743_v57 = vpop.permute.xlu1 %4742 }
 0x341   : > { %6620 = vmatmul.mubr.msk.bf16.gmra.mxu1 %vm898_vm0, %v10296_v41  ;;  %6652 = vmatpush3.bf16.msra.mxu0 %v4743_v57 }
 0x342   : > { %6621 = vmatprep.mubr.msk.bf16.mxu1 %vm898_vm0, %v10297_v45  ;;  %6770 = vmatpush3.bf16.msra.mxu1 %v4743_v57 }
 0x343   : > { %6653 = vmatprep.subr.bf16.mxu0 %v4757_v5  ;;  %6763 = vmatprep.subr.bf16.mxu1 %v4757_v5  ;;  %v4747_v39 = vpop.permute.xlu0 %4746  ;;  %v2343_v5 = vld [vmem:[#allocation4 + $0x10] sm:$0xff] }
 0x344   : > { %2275 = vadd.xlane.f32.xlu1 %v2274_v63  ;;  %v4741_v17 = vpop.permute.xlu1 %4740  ;;  %v2535_v27 = vmul.f32 %v8534_v31, %v2343_v5  ;;  %v10301_v63 = vld [vmem:[#allocation35_spill] sm:$0xff]  ;;  %v2345_v31 = vld [vmem:[#allocation4 + $0x20] sm:$0xff] }
 0x345   : > { %6654 = vmatpush3.bf16.msra.mxu0 %v4741_v17 }
 0x346   : > { %6771 = vmatpush3.bf16.msra.mxu1 %v4741_v17  ;;  %6655 = vmatprep.subr.bf16.mxu0 %v4755_v0 }
 0x347   : > { %6764 = vmatprep.subr.bf16.mxu1 %v4755_v0  ;;  %v8969_v37 = vpop.permute.xlu0 %2510 }
 0x348   : > { %v4739_v18 = vpop.permute.xlu1 %4738 }
 0x349   : > { %6622 = vmatmul.mubr.msk.bf16.gmra.mxu1 %vm898_vm0, %v10297_v45  ;;  %6656 = vmatpush3.bf16.msra.mxu0 %v4739_v18 }
 0x34a   : > { %6623 = vmatprep.mubr.msk.bf16.mxu1 %vm898_vm0, %v10298_v15  ;;  %6772 = vmatpush3.bf16.msra.mxu1 %v4739_v18 }
 0x34b   : > { %6657 = vmatprep.subr.bf16.mxu0 %v4753_v47  ;;  %6765 = vmatprep.subr.bf16.mxu1 %v4753_v47  ;;  %v8976_v8 = vpop.permute.xlu0 %2520  ;;  %v2150_v47 = vmul.f32 0.0, %v10301_v63  ;;  %v2349_v63 = vld [vmem:[#allocation4 + $0x40] sm:$0xff] }
 0x34c   : > { %v4737_v2 = vpop.permute.xlu1 %4736 }
 0x34d   : > { %6658 = vmatpush3.bf16.msra.mxu0 %v4737_v2 }
 0x34e   : > { %6773 = vmatpush3.bf16.msra.mxu1 %v4737_v2  ;;  %6659 = vmatprep.subr.bf16.mxu0 %v4751_v38 }
 0x34f   : > { %6766 = vmatprep.subr.bf16.mxu1 %v4751_v38  ;;  %v8984_v43 = vpop.permute.xlu0 %2530 }
 0x350   : > { %v4735_v48 = vpop.permute.xlu1 %4734 }
 0x351   : > { %6624 = vmatmul.mubr.msk.bf16.gmra.mxu1 %vm898_vm0, %v10298_v15  ;;  %6660 = vmatpush3.bf16.msra.mxu0 %v4735_v48 }
 0x352   : > { %6625 = vmatprep.mubr.msk.bf16.mxu1 %vm898_vm0, %v10299_v28  ;;  %6774 = vmatpush3.bf16.msra.mxu1 %v4735_v48 }
 0x353   : > { %6661 = vmatprep.subr.bf16.mxu0 %v4749_v25  ;;  %6767 = vmatprep.subr.bf16.mxu1 %v4749_v25 }
 0x354   : > { %v4733_v52 = vpop.permute.xlu1 %4732 }
 0x355   : > { %6662 = vmatpush3.bf16.msra.mxu0 %v4733_v52 }
 0x356   : > { %6775 = vmatpush3.bf16.msra.mxu1 %v4733_v52  ;;  %6663 = vmatprep.subr.bf16.mxu0 %v4747_v39  ;;  %v2537_v52 = vmul.f32 %v8587_v9, %v2345_v31 }
 0x357   : > { %6768 = vmatprep.subr.bf16.mxu1 %v4747_v39 }
 0x358   : > { %v4731_v20 = vpop.permute.xlu1 %4730 }
 0x359   : > { %6626 = vmatmul.mubr.msk.bf16.gmra.mxu1 %vm898_vm0, %v10299_v28  ;;  %6664 = vmatpush3.bf16.msra.mxu0 %v4731_v20 }
 0x35a   : > { %6627 = vmatprep.mubr.msk.bf16.mxu1 %vm898_vm0, %v8818_v51  ;;  %6776 = vmatpush3.bf16.msra.mxu1 %v4731_v20 }
 0x35c   : > { %v9004_v9 = vpop.permute.xlu1 %2515 }
 0x361   : > { %6628 = vmatmul.mubr.msk.bf16.gmra.mxu1 %vm898_vm0, %v8818_v51 }
 0x362   : > { %6629 = vmatprep.mubr.msk.bf16.mxu1 %vm898_vm0, %v8907_v36 }
 0x369   : > { %6630 = vmatmul.mubr.msk.bf16.gmra.mxu1 %vm898_vm0, %v8907_v36  ;;  %v6505_v29 = vpop.f32.mrf.mxu1  ;;  %v2534_v36 = vmul.f32 %v8509_v44, %v2342_v11  ;;  %v9010_v11 = vpop.permute.xlu1 %2525 }
 0x36a   : > { %6631 = vmatprep.mubr.msk.bf16.mxu1 %vm898_vm0, %v8846_v62 }
 0x36b   : > { %v6506_v33 = vpop.f32.mrf.mxu1 }
 0x36c   : > { %v6507_v35 = vadd.f32 %v6506_v33, %v6505_v29 }
 0x36d   : > { %v6508_v51 = vpop.f32.mrf.mxu1 }
 0x36e   : > { %v2854_v50 = vadd.f32 %v6507_v35, %v2533_v23 }
 0x36f   : > { %v6509_v22 = vpop.f32.mrf.mxu1 }
 0x370   : > { %2886 = vst.msk [vmem:[#allocation4] sm:$0xff] %vm898_vm0, %v2854_v50  ;;  %v6510_v58 = vadd.f32 %v6509_v22, %v6508_v51 }
 0x371   : > { %6632 = vmatmul.mubr.msk.bf16.gmra.mxu1 %vm898_vm0, %v8846_v62  ;;  %v6511_v41 = vpop.f32.mrf.mxu1  ;;  %v2344_v62 = vld [vmem:[#allocation4 + $0x18] sm:$0xff] }
 0x372   : > { %6633 = vmatprep.mubr.msk.bf16.mxu1 %vm898_vm0, %v8917_v32  ;;  %v2855_v53 = vadd.f32 %v6510_v58, %v2534_v36  ;;  %v2536_v38 = vmul.f32 %v8483_v42, %v2344_v62  ;;  %v2348_v36 = vld [vmem:[#allocation4 + $0x38] sm:$0xff] }
 0x373   : > { %v6512_v0 = vpop.f32.mrf.mxu1  ;;  %v2540_v62 = vmul.f32 %v8521_v56, %v2348_v36  ;;  %v2541_v56 = vmul.f32 %v8652_v1, %v2349_v63 }
 0x374   : > { %2887 = vst.msk [vmem:[#allocation4 + $0x8] sm:$0xff] %vm898_vm0, %v2855_v53  ;;  %v6513_v57 = vadd.f32 %v6512_v0, %v6511_v41  ;;  %v10302_v41 = vld [vmem:[#allocation32_spill] sm:$0xff]  ;;  %v10303_v0 = vld [vmem:[#allocation37_spill] sm:$0xff] }
 0x375   : > { %v6514_v45 = vpop.f32.mrf.mxu1  ;;  %v2149_v53 = vmul.f32 0.0, %v10302_v41 }
 0x376   : > { %v2856_v44 = vadd.f32 %v6513_v57, %v2535_v27 }
 0x377   : > { %v6515_v17 = vpop.f32.mrf.mxu1 }
 0x378   : > { %2888 = vst.msk [vmem:[#allocation4 + $0x10] sm:$0xff] %vm898_vm0, %v2856_v44  ;;  %v6516_v15 = vadd.f32 %v6515_v17, %v6514_v45 }
 0x379   : > { %6634 = vmatmul.mubr.msk.bf16.gmra.mxu1 %vm898_vm0, %v8917_v32  ;;  %v2346_v32 = vld [vmem:[#allocation4 + $0x28] sm:$0xff] }
 0x37a   : > { %6635 = vmatprep.mubr.msk.bf16.mxu1 %vm898_vm0, %v8871_v6  ;;  %v2857_v48 = vadd.f32 %v6516_v15, %v2536_v38  ;;  %v2538_v29 = vmul.f32 %v8499_v34, %v2346_v32  ;;  %v2347_v34 = vld [vmem:[#allocation4 + $0x30] sm:$0xff]  ;;  %v10304_v38 = vld [vmem:[#allocation33_spill] sm:$0xff] }
 0x37b   : > { %v2539_v50 = vmul.f32 %v8617_v60, %v2347_v34  ;;  %v2152_v15 = vmul.f32 0.0, %v10304_v38 }
 0x37c   : > { %v2186_v18 = vpop.xlane.xlu0 %2185  ;;  %2889 = vst.msk [vmem:[#allocation4 + $0x18] sm:$0xff] %vm898_vm0, %v2857_v48 }
 0x37d   : > { %v2278_v2 = vadd.f32 %v2186_v18, %v2150_v47 }
 0x37e   : > { %v6517_v25 = vpop.f32.mrf.mxu1 }
 0x37f   : > { %7207 = vrcp.f32 %v2278_v2  ;;  %v10305_v2 = vld [vmem:[#allocation39_spill] sm:$0xff] }
 0x380   : > { %v6518_v28 = vpop.f32.mrf.mxu1  ;;  %v2189_v35 = vpop.xlane.xlu0 %2188 }
 0x381   : > { %v6519_v39 = vadd.f32 %v6518_v28, %v6517_v25  ;;  %6636 = vmatmul.mubr.msk.bf16.gmra.mxu1 %vm898_vm0, %v8871_v6 }
 0x382   : > { %v6520_v20 = vpop.f32.mrf.mxu1  ;;  %6637 = vmatprep.mubr.msk.bf16.mxu1 %vm898_vm0, %v8927_v46 }
 0x383   : > { %v2858_v42 = vadd.f32 %v6519_v39, %v2537_v52  ;;  %v2350_v52 = vld [vmem:[#allocation4 + $0x48] sm:$0xff] }
 0x384   : > { %v6521_v61 = vpop.f32.mrf.mxu1  ;;  %v2195_v45 = vpop.xlane.xlu0 %2194  ;;  %v2542_v34 = vmul.f32 %v8551_v12, %v2350_v52 }
 0x385   : > { %2890 = vst.msk [vmem:[#allocation4 + $0x20] sm:$0xff] %vm898_vm0, %v2858_v42  ;;  %v6522_v33 = vadd.f32 %v6521_v61, %v6520_v20  ;;  %v10306_v61 = vld [vmem:[#allocation34_spill] sm:$0xff] }
 0x387   : > { %v2859_v19 = vadd.f32 %v6522_v33, %v2538_v29  ;;  %v2154_v29 = vmul.f32 0.0, %v10306_v61  ;;  %v10307_v33 = vld [vmem:[#allocation41_spill] sm:$0xff] }
 0x388   : > { %v2201_v20 = vpop.xlane.xlu0 %2200 }
 0x389   : > { %2891 = vst.msk [vmem:[#allocation4 + $0x28] sm:$0xff] %vm898_vm0, %v2859_v19  ;;  %6638 = vmatmul.mubr.msk.bf16.gmra.mxu1 %vm898_vm0, %v8927_v46  ;;  %v2151_v46 = vmul.f32 0.0, %v10303_v0  ;;  %v2155_v19 = vmul.f32 0.0, %v10307_v33 }
 0x38a   : > { %6639 = vmatprep.mubr.msk.bf16.mxu1 %vm898_vm0, %v8895_v54 }
 0x38b   : > { %v2279_v47 = vadd.f32 %v2189_v35, %v2151_v46  ;;  %v2352_v46 = vld [vmem:[#allocation4 + $0x58] sm:$0xff] }
 0x38c   : > { %v7208_v23 = vpop.eup %7207 }
 0x38d   : > { %5141 = vperm.xlu0 %6837, %v7208_v23  }
 0x38e   : > { %v6523_v6 = vpop.f32.mrf.mxu1  ;;  %v2183_v57 = vpop.xlane.xlu1 %2182 }
 0x38f   : > { %v2277_v60 = vadd.f32 %v2183_v57, %v2149_v53 }
 0x390   : > { %v6524_v51 = vpop.f32.mrf.mxu1 }
 0x391   : > { %v6525_v22 = vadd.f32 %v6524_v51, %v6523_v6  ;;  %6640 = vmatmul.mubr.msk.bf16.gmra.mxu1 %vm898_vm0, %v8895_v54  ;;  %7209 = vrcp.f32 %v2277_v60  ;;  %v2153_v54 = vmul.f32 0.0, %v10305_v2  ;;  %v2351_v51 = vld [vmem:[#allocation4 + $0x50] sm:$0xff] }
 0x392   : > { %v6526_v58 = vpop.f32.mrf.mxu1  ;;  %6641 = vmatprep.mubr.msk.bf16.mxu1 %vm898_vm0, %v8936_v16  ;;  %v2192_v25 = vpop.xlane.xlu1 %2191  ;;  %7211 = vrcp.f32 %v2279_v47  ;;  %v2543_v53 = vmul.f32 %v8683_v7, %v2351_v51  ;;  %v2353_v7 = vld [vmem:[#allocation4 + $0x60] sm:$0xff] }
 0x393   : > { %v2860_v5 = vadd.f32 %v6525_v22, %v2539_v50  ;;  %v2280_v28 = vadd.f32 %v2192_v25, %v2152_v15  ;;  %v2281_v39 = vadd.f32 %v2195_v45, %v2153_v54  ;;  %v2283_v50 = vadd.f32 %v2201_v20, %v2155_v19 }
 0x394   : > { %v6527_v27 = vpop.f32.mrf.mxu1  ;;  %v2545_v15 = vmul.f32 %v8707_v10, %v2353_v7  ;;  %v2355_v10 = vld [vmem:[#allocation4 + $0x70] sm:$0xff]  ;;  %v2361_v7 = vld [vmem:[#allocation4 + $0xa0] sm:$0xff] }
 0x395   : > { %2892 = vst.msk [vmem:[#allocation4 + $0x30] sm:$0xff] %vm898_vm0, %v2860_v5  ;;  %v6528_v44 = vadd.f32 %v6527_v27, %v6526_v58  ;;  %7213 = vrcp.f32 %v2280_v28  ;;  %v10308_v58 = vld [vmem:[#allocation36_spill] sm:$0xff]  ;;  %v2547_v61 = vmul.f32 %v8733_v55, %v2355_v10 }
 0x396   : > { %v6529_v17 = vpop.f32.mrf.mxu1  ;;  %v2198_v1 = vpop.xlane.xlu1 %2197  ;;  %7215 = vrcp.f32 %v2281_v39  ;;  %v2156_v5 = vmul.f32 0.0, %v10308_v58 }
 0x397   : > { %v2861_v18 = vadd.f32 %v6528_v44, %v2540_v62  ;;  %v2282_v35 = vadd.f32 %v2198_v1, %v2154_v29  ;;  %v2544_v44 = vmul.f32 %v8584_v3, %v2352_v46  ;;  %v2354_v3 = vld [vmem:[#allocation4 + $0x68] sm:$0xff] }
 0x398   : > { %v6530_v31 = vpop.f32.mrf.mxu1 }
 0x399   : > { %2893 = vst.msk [vmem:[#allocation4 + $0x38] sm:$0xff] %vm898_vm0, %v2861_v18  ;;  %v6531_v48 = vadd.f32 %v6530_v31, %v6529_v17  ;;  %6642 = vmatmul.mubr.msk.bf16.gmra.mxu1 %vm898_vm0, %v8936_v16  ;;  %7217 = vrcp.f32 %v2282_v35 }
 0x39a   : > { %v6532_v32 = vpop.f32.mrf.mxu1  ;;  %6643 = vmatprep.mubr.msk.bf16.mxu1 %vm898_vm0, %v8904_v21  ;;  %v2204_v16 = vpop.xlane.xlu1 %2203  ;;  %7219 = vrcp.f32 %v2283_v50 }
 0x39b   : > { %v2862_v42 = vadd.f32 %v6531_v48, %v2541_v56  ;;  %v2284_v0 = vadd.f32 %v2204_v16, %v2156_v5  ;;  %v2546_v48 = vmul.f32 %v8614_v59, %v2354_v3  ;;  %v2356_v59 = vld [vmem:[#allocation4 + $0x78] sm:$0xff] }
 0x39c   : > { %v6533_v23 = vpop.f32.mrf.mxu1 }
 0x39d   : > { %2894 = vst.msk [vmem:[#allocation4 + $0x40] sm:$0xff] %vm898_vm0, %v2862_v42  ;;  %v6534_v6 = vadd.f32 %v6533_v23, %v6532_v32  ;;  %7221 = vrcp.f32 %v2284_v0  ;;  %v2548_v23 = vmul.f32 %v8649_v24, %v2356_v59  ;;  %v10309_v0 = vld [vmem:[#allocation9_spill] sm:$0xff]  ;;  %v10313_v59 = vld [vmem:[#allocation11_spill] sm:$0xff] }
 0x39e   : > { %v6535_v22 = vpop.f32.mrf.mxu1  ;;  %v7210_v62 = vpop.eup %7209 }
 0x39f   : > { %v2863_v36 = vadd.f32 %v6534_v6, %v2542_v34  ;;  %5136 = vperm.xlu1 %6838, %v7210_v62   ;;  %v7212_v47 = vpop.eup %7211  ;;  %v2357_v34 = vld [vmem:[#allocation4 + $0x80] sm:$0xff] }
 0x3a0   : > { %v6536_v41 = vpop.f32.mrf.mxu1  ;;  %v2549_v51 = vmul.f32 %v8753_v30, %v2357_v34 }
 0x3a1   : > { %2895 = vst.msk [vmem:[#allocation4 + $0x48] sm:$0xff] %vm898_vm0, %v2863_v36  ;;  %v6537_v12 = vadd.f32 %v6536_v41, %v6535_v22  ;;  %6644 = vmatmul.mubr.msk.bf16.gmra.mxu1 %vm898_vm0, %v8904_v21  ;;  %v2358_v22 = vld [vmem:[#allocation4 + $0x88] sm:$0xff]  ;;  %v2359_v41 = vld [vmem:[#allocation4 + $0x90] sm:$0xff] }
 0x3a2   : > { %v6538_v27 = vpop.f32.mrf.mxu1  ;;  %6645 = vmatprep.mubr.msk.bf16.mxu1 %vm898_vm0, %v8940_v4  ;;  %v7214_v18 = vpop.eup %7213  ;;  %v2551_v46 = vmul.f32 %v10309_v0, %v2359_v41 }
 0x3a3   : > { %v2864_v57 = vadd.f32 %v6537_v12, %v2543_v53  ;;  %5146 = vperm.xlu1 %6838, %v7212_v47   ;;  %5151 = vperm.xlu0 %6837, %v7214_v18   ;;  %v7216_v54 = vpop.eup %7215  ;;  %v10311_v18 = vld [vmem:[#allocation10_spill] sm:$0xff] }
 0x3a4   : > { %v6539_v45 = vpop.f32.mrf.mxu1 }
 0x3a5   : > { %2896 = vst.msk [vmem:[#allocation4 + $0x50] sm:$0xff] %vm898_vm0, %v2864_v57  ;;  %v6540_v60 = vadd.f32 %v6539_v45, %v6538_v27  ;;  %v2360_v27 = vld [vmem:[#allocation4 + $0x98] sm:$0xff] }
 0x3a6   : > { %v6541_v63 = vpop.f32.mrf.mxu1  ;;  %v7218_v25 = vpop.eup %7217 }
 0x3a7   : > { %v2865_v17 = vadd.f32 %v6540_v60, %v2544_v44  ;;  %5156 = vperm.xlu1 %6838, %v7216_v54   ;;  %5161 = vperm.xlu0 %6837, %v7218_v25   ;;  %v7220_v39 = vpop.eup %7219  ;;  %v10310_v44 = vld [vmem:[#allocation68_spill] sm:$0xff] }
 0x3a8   : > { %v6542_v38 = vpop.f32.mrf.mxu1  ;;  %v2552_v60 = vmul.f32 %v10310_v44, %v2360_v27 }
 0x3a9   : > { %2897 = vst.msk [vmem:[#allocation4 + $0x58] sm:$0xff] %vm898_vm0, %v2865_v17  ;;  %v6543_v21 = vadd.f32 %v6542_v38, %v6541_v63  ;;  %6646 = vmatmul.mubr.msk.bf16.gmra.mxu1 %vm898_vm0, %v8940_v4  ;;  %v2553_v38 = vmul.f32 %v10311_v18, %v2361_v7  ;;  %v2371_v18 = vld [vmem:[#allocation4 + $0xf0] sm:$0xff] }
 0x3aa   : > { %v6544_v2 = vpop.f32.mrf.mxu1  ;;  %6647 = vmatprep.mubr.msk.bf16.mxu1 %vm898_vm0, %v8912_v49  ;;  %v7222_v20 = vpop.eup %7221 }
 0x3ab   : > { %v2866_v31 = vadd.f32 %v6543_v21, %v2545_v15  ;;  %5166 = vperm.xlu1 %6838, %v7220_v39   ;;  %5171 = vperm.xlu0 %6837, %v7222_v20   ;;  %v2362_v21 = vld [vmem:[#allocation4 + $0xa8] sm:$0xff]  ;;  %v2364_v20 = vld [vmem:[#allocation4 + $0xb8] sm:$0xff] }
 0x3ac   : > { %v6545_v56 = vpop.f32.mrf.mxu1 }
 0x3ad   : > { %2898 = vst.msk [vmem:[#allocation4 + $0x60] sm:$0xff] %vm898_vm0, %v2866_v31  ;;  %v6546_v28 = vadd.f32 %v6545_v56, %v6544_v2  ;;  %v10312_v31 = vld [vmem:[#allocation71_spill] sm:$0xff] }
 0x3ae   : > { %v6547_v52 = vpop.f32.mrf.mxu1  ;;  %v2554_v25 = vmul.f32 %v10312_v31, %v2362_v21 }
 0x3af   : > { %v2867_v32 = vadd.f32 %v6546_v28, %v2546_v48  ;;  %v2363_v48 = vld [vmem:[#allocation4 + $0xb0] sm:$0xff] }
 0x3b0   : > { %v6548_v42 = vpop.f32.mrf.mxu1  ;;  %v2555_v39 = vmul.f32 %v8834_v26, %v2363_v48 }
 0x3b1   : > { %2899 = vst.msk [vmem:[#allocation4 + $0x68] sm:$0xff] %vm898_vm0, %v2867_v32  ;;  %v6549_v4 = vadd.f32 %v6548_v42, %v6547_v52  ;;  %6648 = vmatmul.mubr.msk.bf16.gmra.mxu1 %vm898_vm0, %v8912_v49  ;;  %v2550_v49 = vmul.f32 %v8680_v40, %v2358_v22  ;;  %v10314_v22 = vld [vmem:[#allocation8_spill] sm:$0xff] }
 0x3b2   : > { %v6550_v29 = vpop.f32.mrf.mxu1 }
 0x3b3   : > { %v2868_v33 = vadd.f32 %v6549_v4, %v2547_v61 }
 0x3b4   : > { %v6551_v19 = vpop.f32.mrf.mxu1 }
 0x3b5   : > { %2900 = vst.msk [vmem:[#allocation4 + $0x70] sm:$0xff] %vm898_vm0, %v2868_v33  ;;  %v6552_v1 = vadd.f32 %v6551_v19, %v6550_v29  ;;  %v2556_v29 = vmul.f32 %v10313_v59, %v2364_v20  ;;  %v2365_v19 = vld [vmem:[#allocation4 + $0xc0] sm:$0xff] }
 0x3b6   : > { %v6553_v6 = vpop.f32.mrf.mxu1 }
 0x3b7   : > { %v2869_v55 = vadd.f32 %v6552_v1, %v2548_v23 }
 0x3b8   : > { %v6554_v35 = vpop.f32.mrf.mxu1 }
 0x3b9   : > { %2901 = vst.msk [vmem:[#allocation4 + $0x78] sm:$0xff] %vm898_vm0, %v2869_v55  ;;  %v6555_v50 = vadd.f32 %v6554_v35, %v6553_v6  ;;  %v2557_v6 = vmul.f32 %v8864_v14, %v2365_v19  ;;  %v2366_v55 = vld [vmem:[#allocation4 + $0xc8] sm:$0xff] }
 0x3ba   : > { %v6556_v36 = vpop.f32.mrf.mxu1 }
 0x3bb   : > { %v2870_v58 = vadd.f32 %v6555_v50, %v2549_v51 }
 0x3bc   : > { %v6557_v5 = vpop.f32.mrf.mxu1 }
 0x3bd   : > { %2902 = vst.msk [vmem:[#allocation4 + $0x80] sm:$0xff] %vm898_vm0, %v2870_v58  ;;  %v6558_v24 = vadd.f32 %v6557_v5, %v6556_v36  ;;  %v2558_v36 = vmul.f32 %v10314_v22, %v2366_v55  ;;  %v2367_v5 = vld [vmem:[#allocation4 + $0xd0] sm:$0xff] }
 0x3be   : > { %v6559_v16 = vpop.f32.mrf.mxu1 }
 0x3bf   : > { %v2871_v53 = vadd.f32 %v6558_v24, %v2550_v49 }
 0x3c0   : > { %v6560_v12 = vpop.f32.mrf.mxu1 }
 0x3c1   : > { %2903 = vst.msk [vmem:[#allocation4 + $0x88] sm:$0xff] %vm898_vm0, %v2871_v53  ;;  %v6561_v30 = vadd.f32 %v6560_v12, %v6559_v16  ;;  %v2559_v16 = vmul.f32 %v8886_v13, %v2367_v5  ;;  %v2368_v53 = vld [vmem:[#allocation4 + $0xd8] sm:$0xff] }
 0x3c2   : > { %v6562_v57 = vpop.f32.mrf.mxu1 }
 0x3c3   : > { %v2872_v62 = vadd.f32 %v6561_v30, %v2551_v46  ;;  %v2560_v30 = vmul.f32 %v8969_v37, %v2368_v53 }
 0x3c4   : > { %v6563_v45 = vpop.f32.mrf.mxu1 }
 0x3c5   : > { %2904 = vst.msk [vmem:[#allocation4 + $0x90] sm:$0xff] %vm898_vm0, %v2872_v62  ;;  %v6564_v40 = vadd.f32 %v6563_v45, %v6562_v57  ;;  %v2369_v57 = vld [vmem:[#allocation4 + $0xe0] sm:$0xff] }
 0x3c6   : > { %v6565_v63 = vpop.f32.mrf.mxu1 }
 0x3c7   : > { %v2873_v47 = vadd.f32 %v6564_v40, %v2552_v60  ;;  %v2561_v60 = vmul.f32 %v9004_v9, %v2369_v57  ;;  %v2370_v40 = vld [vmem:[#allocation4 + $0xe8] sm:$0xff] }
 0x3c8   : > { %v6566_v17 = vpop.f32.mrf.mxu1 }
 0x3c9   : > { %2905 = vst.msk [vmem:[#allocation4 + $0x98] sm:$0xff] %vm898_vm0, %v2873_v47  ;;  %v6567_v15 = vadd.f32 %v6566_v17, %v6565_v63  ;;  %v2562_v17 = vmul.f32 %v8976_v8, %v2370_v40 }
 0x3ca   : > { %v6568_v3 = vpop.f32.mrf.mxu1 }
 0x3cb   : > { %v2874_v2 = vadd.f32 %v6567_v15, %v2553_v38 }
 0x3cc   : > { %v6569_v54 = vpop.f32.mrf.mxu1 }
 0x3cd   : > { %2906 = vst.msk [vmem:[#allocation4 + $0xa0] sm:$0xff] %vm898_vm0, %v2874_v2  ;;  %v6570_v56 = vadd.f32 %v6569_v54, %v6568_v3  ;;  %v2563_v3 = vmul.f32 %v9010_v11, %v2371_v18  ;;  %v2372_v2 = vld [vmem:[#allocation4 + $0xf8] sm:$0xff] }
 0x3ce   : > { %v6571_v28 = vpop.f32.mrf.mxu1 }
 0x3cf   : > { %v2875_v10 = vadd.f32 %v6570_v56, %v2554_v25  ;;  %v2564_v56 = vmul.f32 %v8984_v43, %v2372_v2 }
 0x3d0   : > { %v6572_v52 = vpop.f32.mrf.mxu1 }
 0x3d1   : > { %2907 = vst.msk [vmem:[#allocation4 + $0xa8] sm:$0xff] %vm898_vm0, %v2875_v10  ;;  %v6573_v32 = vadd.f32 %v6572_v52, %v6571_v28 }
 0x3d2   : > { %v6574_v42 = vpop.f32.mrf.mxu1 }
 0x3d3   : > { %v2876_v61 = vadd.f32 %v6573_v32, %v2555_v39 }
 0x3d4   : > { %v6575_v4 = vpop.f32.mrf.mxu1 }
 0x3d5   : > { %2908 = vst.msk [vmem:[#allocation4 + $0xb0] sm:$0xff] %vm898_vm0, %v2876_v61  ;;  %v6576_v33 = vadd.f32 %v6575_v4, %v6574_v42 }
 0x3d6   : > { %v6577_v23 = vpop.f32.mrf.mxu1 }
 0x3d7   : > { %v2877_v1 = vadd.f32 %v6576_v33, %v2556_v29 }
 0x3d8   : > { %v6578_v34 = vpop.f32.mrf.mxu1 }
 0x3d9   : > { %2909 = vst.msk [vmem:[#allocation4 + $0xb8] sm:$0xff] %vm898_vm0, %v2877_v1  ;;  %v6579_v26 = vadd.f32 %v6578_v34, %v6577_v23 }
 0x3da   : > { %v6580_v35 = vpop.f32.mrf.mxu1 }
 0x3db   : > { %v2878_v51 = vadd.f32 %v6579_v26, %v2557_v6 }
 0x3dc   : > { %v6581_v50 = vpop.f32.mrf.mxu1 }
 0x3dd   : > { %2910 = vst.msk [vmem:[#allocation4 + $0xc0] sm:$0xff] %vm898_vm0, %v2878_v51  ;;  %v6582_v58 = vadd.f32 %v6581_v50, %v6580_v35 }
 0x3de   : > { %v6583_v49 = vpop.f32.mrf.mxu1 }
 0x3df   : > { %v2879_v24 = vadd.f32 %v6582_v58, %v2558_v36 }
 0x3e0   : > { %v6584_v41 = vpop.f32.mrf.mxu1 }
 0x3e1   : > { %2911 = vst.msk [vmem:[#allocation4 + $0xc8] sm:$0xff] %vm898_vm0, %v2879_v24  ;;  %v6585_v14 = vadd.f32 %v6584_v41, %v6583_v49 }
 0x3e2   : > { %v6586_v12 = vpop.f32.mrf.mxu1 }
 0x3e3   : > { %v2880_v0 = vadd.f32 %v6585_v14, %v2559_v16 }
 0x3e4   : > { %v6587_v46 = vpop.f32.mrf.mxu1 }
 0x3e5   : > { %2912 = vst.msk [vmem:[#allocation4 + $0xd0] sm:$0xff] %vm898_vm0, %v2880_v0  ;;  %v6588_v27 = vadd.f32 %v6587_v46, %v6586_v12 }
 0x3e6   : > { %v6589_v62 = vpop.f32.mrf.mxu1 }
 0x3e7   : > { %v2881_v45 = vadd.f32 %v6588_v27, %v2560_v30  ;;  %v9163_v30 = vpop.xlane.xlu1 %2209 }
 0x3e8   : > { %v6590_v44 = vpop.f32.mrf.mxu1 }
 0x3e9   : > { %2913 = vst.msk [vmem:[#allocation4 + $0xd8] sm:$0xff] %vm898_vm0, %v2881_v45  ;;  %v6591_v13 = vadd.f32 %v6590_v44, %v6589_v62  ;;  %v9173_v44 = vpop.xlane.xlu0 %2206 }
 0x3ea   : > { %v6592_v7 = vpop.f32.mrf.mxu1 }
 0x3eb   : > { %v2882_v63 = vadd.f32 %v6591_v13, %v2561_v60  ;;  %v9177_v13 = vpop.xlane.xlu1 %2215 }
 0x3ec   : > { %v6593_v47 = vpop.f32.mrf.mxu1 }
 0x3ed   : > { %2914 = vst.msk [vmem:[#allocation4 + $0xe0] sm:$0xff] %vm898_vm0, %v2882_v63  ;;  %v6594_v37 = vadd.f32 %v6593_v47, %v6592_v7 }
 0x3ee   : > { %v6595_v38 = vpop.f32.mrf.mxu1 }
 0x3ef   : > { %v2883_v15 = vadd.f32 %v6594_v37, %v2562_v17  ;;  %v9187_v17 = vpop.xlane.xlu0 %2212  ;;  %v9189_v37 = vpop.xlane.xlu1 %2221 }
 0x3f0   : > { %v6596_v21 = vpop.f32.mrf.mxu1 }
 0x3f1   : > { %2915 = vst.msk [vmem:[#allocation4 + $0xe8] sm:$0xff] %vm898_vm0, %v2883_v15  ;;  %v6597_v9 = vadd.f32 %v6596_v21, %v6595_v38 }
 0x3f2   : > { %v6598_v54 = vpop.f32.mrf.mxu1 }
 0x3f3   : > { %v2884_v31 = vadd.f32 %v6597_v9, %v2563_v3  ;;  %v9199_v3 = vpop.xlane.xlu0 %2218  ;;  %v9203_v2 = vpop.xlane.xlu1 %2227 }
 0x3f4   : > { %v6599_v25 = vpop.f32.mrf.mxu1 }
 0x3f5   : > { %2916 = vst.msk [vmem:[#allocation4 + $0xf0] sm:$0xff] %vm898_vm0, %v2884_v31  ;;  %v6600_v8 = vadd.f32 %v6599_v25, %v6598_v54 }
 0x3f7   : > { %v2885_v48 = vadd.f32 %v6600_v8, %v2564_v56  ;;  %v9213_v8 = vpop.xlane.xlu0 %2224 }
 0x3f9   : > { %2917 = vst.msk [vmem:[#allocation4 + $0xf8] sm:$0xff] %vm898_vm0, %v2885_v48  ;;  %v9089_v28 = vpop.f32.mrf.mxu1  ;;  %v9215_v48 = vpop.xlane.xlu1 %2233 }
 0x3fb   : > { %v9091_v10 = vpop.f32.mrf.mxu1 }
 0x3fc   : > { %v3592_v11 = vmax.f32 %v9089_v28, %v9091_v10 }
 0x3fd   : > { %v9095_v52 = vpop.f32.mrf.mxu1 }
 0x3fe   : > { %3593 = vmax.xlane.f32.xlu1 %v3592_v11 }
 0x3ff   : > { %v9097_v39 = vpop.f32.mrf.mxu1 }
 0x400   : > { %v3595_v43 = vmax.f32 %v9095_v52, %v9097_v39 }
 0x401   : > { %v9101_v32 = vpop.f32.mrf.mxu1 }
 0x402   : > { %3596 = vmax.xlane.f32.xlu0 %v3595_v43 }
 0x403   : > { %v9103_v20 = vpop.f32.mrf.mxu1 }
 0x404   : > { %v3598_v42 = vmax.f32 %v9101_v32, %v9103_v20 }
 0x405   : > { %v9107_v61 = vpop.f32.mrf.mxu1 }
 0x406   : > { %3599 = vmax.xlane.f32.xlu0 %v3598_v42 }
 0x407   : > { %v9109_v4 = vpop.f32.mrf.mxu1 }
 0x408   : > { %v3601_v59 = vmax.f32 %v9107_v61, %v9109_v4 }
 0x409   : > { %v9113_v29 = vpop.f32.mrf.mxu1 }
 0x40a   : > { %3602 = vmax.xlane.f32.xlu1 %v3601_v59 }
 0x40b   : > { %v9115_v33 = vpop.f32.mrf.mxu1 }
 0x40c   : > { %v3604_v19 = vmax.f32 %v9113_v29, %v9115_v33 }
 0x40d   : > { %v9119_v23 = vpop.f32.mrf.mxu1 }
 0x40e   : > { %3605 = vmax.xlane.f32.xlu0 %v3604_v19  ;;  %v9225_v19 = vpop.xlane.xlu0 %2230 }
 0x40f   : > { %v9121_v1 = vpop.f32.mrf.mxu1 }
 0x410   : > { %v3607_v34 = vmax.f32 %v9119_v23, %v9121_v1 }
 0x411   : > { %v9125_v6 = vpop.f32.mrf.mxu1 }
 0x412   : > { %3608 = vmax.xlane.f32.xlu1 %v3607_v34 }
 0x413   : > { %v9127_v26 = vpop.f32.mrf.mxu1 }
 0x414   : > { %v3610_v55 = vmax.f32 %v9125_v6, %v9127_v26 }
 0x415   : > { %v9131_v35 = vpop.f32.mrf.mxu1 }
 0x416   : > { %3611 = vmax.xlane.f32.xlu0 %v3610_v55  ;;  %v9229_v55 = vpop.xlane.xlu1 %2239 }
 0x417   : > { %v9133_v51 = vpop.f32.mrf.mxu1 }
 0x418   : > { %v3613_v50 = vmax.f32 %v9131_v35, %v9133_v51 }
 0x419   : > { %v9137_v22 = vpop.f32.mrf.mxu1 }
 0x41a   : > { %3614 = vmax.xlane.f32.xlu1 %v3613_v50 }
 0x41b   : > { %v9139_v36 = vpop.f32.mrf.mxu1 }
 0x41c   : > { %v3616_v58 = vmax.f32 %v9137_v22, %v9139_v36 }
 0x41d   : > { %v9143_v5 = vpop.f32.mrf.mxu1 }
 0x41e   : > { %3617 = vmax.xlane.f32.xlu0 %v3616_v58 }
 0x41f   : > { %v9145_v49 = vpop.f32.mrf.mxu1 }
 0x420   : > { %v3619_v24 = vmax.f32 %v9143_v5, %v9145_v49 }
 0x421   : > { %v9149_v41 = vpop.f32.mrf.mxu1 }
 0x422   : > { %3620 = vmax.xlane.f32.xlu1 %v3619_v24 }
 0x423   : > { %v9151_v16 = vpop.f32.mrf.mxu1 }
 0x424   : > { %v3622_v14 = vmax.f32 %v9149_v41, %v9151_v16 }
 0x425   : > { %v9155_v53 = vpop.f32.mrf.mxu1 }
 0x426   : > { %3623 = vmax.xlane.f32.xlu0 %v3622_v14 }
 0x427   : > { %v9157_v12 = vpop.f32.mrf.mxu1 }
 0x428   : > { %v3625_v0 = vmax.f32 %v9155_v53, %v9157_v12 }
 0x429   : > { %v9161_v46 = vpop.f32.mrf.mxu1 }
 0x42a   : > { %3626 = vmax.xlane.f32.xlu1 %v3625_v0  ;;  %v9239_v0 = vpop.xlane.xlu0 %2236 }
 0x42b   : > { %v9165_v27 = vpop.f32.mrf.mxu1 }
 0x42c   : > { %v3628_v57 = vmax.f32 %v9161_v46, %v9165_v27 }
 0x42d   : > { %v9169_v62 = vpop.f32.mrf.mxu1 }
 0x42e   : > { %10315 = vst [vmem:[#allocation15_spill] sm:$0xff] %v9169_v62  ;;  %3629 = vmax.xlane.f32.xlu0 %v3628_v57  ;;  %v9241_v57 = vpop.xlane.xlu1 %2245 }
 0x42f   : > { %v9171_v45 = vpop.f32.mrf.mxu1 }
 0x430   : > { %10316 = vst [vmem:[#allocation12_spill] sm:$0xff] %v9171_v45  ;;  %v3631_v60 = vmax.f32 %v9169_v62, %v9171_v45 }
 0x431   : > { %v9179_v40 = vpop.f32.mrf.mxu1 }
 0x432   : > { %10317 = vst [vmem:[#allocation13_spill] sm:$0xff] %v9179_v40  ;;  %3632 = vmax.xlane.f32.xlu1 %v3631_v60 }
 0x433   : > { %v9181_v7 = vpop.f32.mrf.mxu1 }
 0x434   : > { %10318 = vst [vmem:[#allocation14_spill] sm:$0xff] %v9181_v7  ;;  %v3634_v63 = vmax.f32 %v9179_v40, %v9181_v7 }
 0x435   : > { %v9185_v47 = vpop.f32.mrf.mxu1 }
 0x436   : > { %10319 = vst [vmem:[#allocation19_spill] sm:$0xff] %v9185_v47  ;;  %3635 = vmax.xlane.f32.xlu0 %v3634_v63 }
 0x437   : > { %v9191_v18 = vpop.f32.mrf.mxu1 }
 0x438   : > { %10320 = vst [vmem:[#allocation16_spill] sm:$0xff] %v9191_v18  ;;  %v3637_v38 = vmax.f32 %v9185_v47, %v9191_v18 }
 0x439   : > { %v9195_v15 = vpop.f32.mrf.mxu1 }
 0x43a   : > { %10321 = vst [vmem:[#allocation17_spill] sm:$0xff] %v9195_v15  ;;  %3638 = vmax.xlane.f32.xlu1 %v3637_v38 }
 0x43b   : > { %v9197_v21 = vpop.f32.mrf.mxu1 }
 0x43c   : > { %10322 = vst [vmem:[#allocation18_spill] sm:$0xff] %v9197_v21  ;;  %v3640_v9 = vmax.f32 %v9195_v15, %v9197_v21 }
 0x43d   : > { %v9205_v54 = vpop.f32.mrf.mxu1 }
 0x43e   : > { %10323 = vst [vmem:[#allocation23_spill] sm:$0xff] %v9205_v54  ;;  %3641 = vmax.xlane.f32.xlu0 %v3640_v9 }
 0x43f   : > { %v9207_v31 = vpop.f32.mrf.mxu1 }
 0x440   : > { %10324 = vst [vmem:[#allocation20_spill] sm:$0xff] %v9207_v31  ;;  %v3643_v25 = vmax.f32 %v9205_v54, %v9207_v31 }
 0x441   : > { %v9211_v56 = vpop.f32.mrf.mxu1 }
 0x442   : > { %10325 = vst [vmem:[#allocation21_spill] sm:$0xff] %v9211_v56  ;;  %3644 = vmax.xlane.f32.xlu1 %v3643_v25  ;;  %v9251_v25 = vpop.xlane.xlu0 %2242 }
 0x443   : > { %v9217_v11 = vpop.f32.mrf.mxu1 }
 0x444   : > { %10326 = vst [vmem:[#allocation22_spill] sm:$0xff] %v9217_v11  ;;  %v3646_v43 = vmax.f32 %v9211_v56, %v9217_v11 }
 0x445   : > { %v9221_v42 = vpop.f32.mrf.mxu1 }
 0x446   : > { %10327 = vst [vmem:[#allocation27_spill] sm:$0xff] %v9221_v42  ;;  %3647 = vmax.xlane.f32.xlu0 %v3646_v43 }
 0x447   : > { %v9223_v59 = vpop.f32.mrf.mxu1 }
 0x448   : > { %10328 = vst [vmem:[#allocation24_spill] sm:$0xff] %v9223_v59  ;;  %v3649_v34 = vmax.f32 %v9221_v42, %v9223_v59 }
 0x449   : > { %v9231_v50 = vpop.f32.mrf.mxu1 }
 0x44a   : > { %10329 = vst [vmem:[#allocation25_spill] sm:$0xff] %v9231_v50  ;;  %3650 = vmax.xlane.f32.xlu1 %v3649_v34  ;;  %v9255_v34 = vpop.xlane.xlu1 %2251 }
 0x44b   : > { %v9233_v58 = vpop.f32.mrf.mxu1 }
 0x44c   : > { %10330 = vst [vmem:[#allocation26_spill] sm:$0xff] %v9233_v58  ;;  %v3652_v24 = vmax.f32 %v9231_v50, %v9233_v58 }
 0x44d   : > { %v9237_v14 = vpop.f32.mrf.mxu1 }
 0x44e   : > { %10331 = vst [vmem:[#allocation31_spill] sm:$0xff] %v9237_v14  ;;  %3653 = vmax.xlane.f32.xlu0 %v3652_v24  ;;  %v9267_v58 = vpop.xlane.xlu1 %2257 }
 0x44f   : > { %v9243_v60 = vpop.f32.mrf.mxu1 }
 0x450   : > { %10332 = vst [vmem:[#allocation28_spill] sm:$0xff] %v9243_v60  ;;  %v3655_v63 = vmax.f32 %v9237_v14, %v9243_v60 }
 0x451   : > { %v9247_v38 = vpop.f32.mrf.mxu1 }
 0x452   : > { %10333 = vst [vmem:[#allocation29_spill] sm:$0xff] %v9247_v38  ;;  %3656 = vmax.xlane.f32.xlu1 %v3655_v63  ;;  %v9265_v63 = vpop.xlane.xlu0 %2248 }
 0x453   : > { %v9249_v9 = vpop.f32.mrf.mxu1 }
 0x454   : > { %10334 = vst [vmem:[#allocation30_spill] sm:$0xff] %v9249_v9  ;;  %v3658_v43 = vmax.f32 %v9247_v38, %v9249_v9 }
 0x455   : > { %v9257_v24 = vpop.f32.mrf.mxu1 }
 0x456   : > { %10335 = vst [vmem:[#allocation56_spill] sm:$0xff] %v9257_v24  ;;  %3659 = vmax.xlane.f32.xlu0 %v3658_v43  ;;  %v9277_v42 = vpop.xlane.xlu0 %2254 }
 0x457   : > { %v9259_v50 = vpop.f32.mrf.mxu1 }
 0x458   : > { %10336 = vst [vmem:[#allocation59_spill] sm:$0xff] %v9259_v50  ;;  %v3661_v60 = vmax.f32 %v9257_v24, %v9259_v50  ;;  %v9281_v24 = vpop.xlane.xlu1 %2263 }
 0x459   : > { %v9263_v14 = vpop.f32.mrf.mxu1 }
 0x45a   : > { %10337 = vst [vmem:[#allocation58_spill] sm:$0xff] %v9263_v14  ;;  %3662 = vmax.xlane.f32.xlu1 %v3661_v60 }
 0x45b   : > { %v9269_v59 = vpop.f32.mrf.mxu1 }
 0x45c   : > { %10338 = vst [vmem:[#allocation62_spill] sm:$0xff] %v9269_v59  ;;  %v3664_v38 = vmax.f32 %v9263_v14, %v9269_v59  ;;  %v9293_v11 = vpop.xlane.xlu1 %2269 }
 0x45d   : > { %v9273_v9 = vpop.f32.mrf.mxu1 }
 0x45e   : > { %10339 = vst [vmem:[#allocation61_spill] sm:$0xff] %v9273_v9  ;;  %3665 = vmax.xlane.f32.xlu0 %v3664_v38  ;;  %v9291_v38 = vpop.xlane.xlu0 %2260 }
 0x45f   : > { %v9275_v43 = vpop.f32.mrf.mxu1 }
 0x460   : > { %10340 = vst [vmem:[#allocation64_spill] sm:$0xff] %v9275_v43  ;;  %v3667_v50 = vmax.f32 %v9273_v9, %v9275_v43 }
 0x461   : > { %v9283_v60 = vpop.f32.mrf.mxu1 }
 0x462   : > { %10341 = vst [vmem:[#allocation35_spill] sm:$0xff] %v9283_v60  ;;  %3668 = vmax.xlane.f32.xlu1 %v3667_v50  ;;  %v9303_v54 = vpop.xlane.xlu0 %2266 }
 0x463   : > { %v9285_v56 = vpop.f32.mrf.mxu1 }
 0x464   : > { %10342 = vst [vmem:[#allocation32_spill] sm:$0xff] %v9285_v56  ;;  %v3670_v14 = vmax.f32 %v9283_v60, %v9285_v56  ;;  %v9307_v56 = vpop.xlane.xlu1 %2275 }
 0x465   : > { %v9289_v59 = vpop.f32.mrf.mxu1 }
 0x466   : > { %10343 = vst [vmem:[#allocation37_spill] sm:$0xff] %v9289_v59  ;;  %3671 = vmax.xlane.f32.xlu0 %v3670_v14  ;;  %v9319_v21 = vpop.xlane.xlu0 %2272 }
 0x467   : > { %v9295_v31 = vpop.f32.mrf.mxu1 }
 0x468   : > { %10344 = vst [vmem:[#allocation33_spill] sm:$0xff] %v9295_v31  ;;  %v3673_v43 = vmax.f32 %v9289_v59, %v9295_v31  ;;  %v9315_v59 = vpop.permute.xlu1 %5136 }
 0x469   : > { %v9299_v9 = vpop.f32.mrf.mxu1  ;;  %10349 = vst [vmem:[#allocation9_spill] sm:$0xff] %v9315_v59 }
 0x46a   : > { %10345 = vst [vmem:[#allocation39_spill] sm:$0xff] %v9299_v9  ;;  %3674 = vmax.xlane.f32.xlu1 %v3673_v43 }
 0x46b   : > { %v9301_v50 = vpop.f32.mrf.mxu1 }
 0x46c   : > { %10346 = vst [vmem:[#allocation34_spill] sm:$0xff] %v9301_v50  ;;  %v3676_v60 = vmax.f32 %v9299_v9, %v9301_v50  ;;  %v9329_v47 = vpop.permute.xlu1 %5146 }
 0x46d   : > { %v9309_v14 = vpop.f32.mrf.mxu1  ;;  %10354 = vst [vmem:[#allocation8_spill] sm:$0xff] %v9329_v47 }
 0x46e   : > { %10347 = vst [vmem:[#allocation41_spill] sm:$0xff] %v9309_v14  ;;  %3677 = vmax.xlane.f32.xlu0 %v3676_v60  ;;  %v9327_v60 = vpop.permute.xlu0 %5141 }
 0x46f   : > { %v9311_v15 = vpop.f32.mrf.mxu1  ;;  %10353 = vst [vmem:[#allocation11_spill] sm:$0xff] %v9327_v60 }
 0x470   : > { %10348 = vst [vmem:[#allocation36_spill] sm:$0xff] %v9311_v15  ;;  %v3679_v31 = vmax.f32 %v9309_v14, %v9311_v15 }
 0x471   : > { %v9317_v43 = vpop.f32.mrf.mxu1 }
 0x472   : > { %10350 = vst [vmem:[#allocation68_spill] sm:$0xff] %v9317_v43  ;;  %3680 = vmax.xlane.f32.xlu1 %v3679_v31  ;;  %v9335_v14 = vpop.permute.xlu0 %5151  ;;  %v9337_v31 = vpop.permute.xlu1 %5156 }
 0x473   : > { %v9321_v18 = vpop.f32.mrf.mxu1  ;;  %10356 = vst [vmem:[#allocation73_spill] sm:$0xff] %v9335_v14  ;;  %10357 = vst [vmem:[#allocation74_spill] sm:$0xff] %v9337_v31 }
 0x474   : > { %10351 = vst [vmem:[#allocation10_spill] sm:$0xff] %v9321_v18  ;;  %v3682_v50 = vmax.f32 %v9317_v43, %v9321_v18 }
 0x475   : > { %v9325_v9 = vpop.f32.mrf.mxu1 }
 0x476   : > { %10352 = vst [vmem:[#allocation71_spill] sm:$0xff] %v9325_v9  ;;  %3683 = vmax.xlane.f32.xlu0 %v3682_v50  ;;  %v9339_v40 = vpop.permute.xlu0 %5161  ;;  %v9341_v18 = vpop.permute.xlu1 %5166 }
 0x477   : > { %v9331_v15 = vpop.f32.mrf.mxu1  ;;  %10358 = vst [vmem:[#allocation75_spill] sm:$0xff] %v9339_v40  ;;  %10359 = vst [vmem:[#allocation76_spill] sm:$0xff] %v9341_v18 }
 0x478   : > { %10355 = vst [vmem:[#allocation72_spill] sm:$0xff] %v9331_v15  ;;  %v3685_v59 = vmax.f32 %v9325_v9, %v9331_v15 }
 0x47a   : > { %3686 = vmax.xlane.f32.xlu1 %v3685_v59  ;;  %v9343_v43 = vpop.permute.xlu0 %5171 }
 0x47b   : > { %10360 = vst [vmem:[#allocation77_spill] sm:$0xff] %v9343_v43 }
 0x487   : > { %v3594_v60 = vpop.xlane.xlu1 %3593 }
 0x488   : > { %v3720_v50 = vsub.f32 -inf, %v3594_v60 }
 0x48a   : > { %v3752_v7 = vmul.f32 1.442695, %v3720_v50 }
 0x48b   : > { %v3597_v47 = vpop.xlane.xlu0 %3596 }
 0x48c   : > { %7223 = vpow2.f32 %v3752_v7  ;;  %v3721_v45 = vsub.f32 -inf, %v3597_v47  ;;  %3823 = vperm.xlu1 %6838, %v3597_v47   ;;  %3818 = vperm.xlu0 %6837, %v3594_v60  }
 0x48e   : > { %v3754_v15 = vmul.f32 1.442695, %v3721_v45 }
 0x48f   : > { %v3600_v59 = vpop.xlane.xlu0 %3599 }
 0x490   : > { %7225 = vpow2.f32 %v3754_v15  ;;  %v3722_v14 = vsub.f32 -inf, %v3600_v59  ;;  %3828 = vperm.xlu1 %6838, %v3600_v59  }
 0x492   : > { %v3756_v9 = vmul.f32 1.442695, %v3722_v14 }
 0x493   : > { %v3603_v31 = vpop.xlane.xlu1 %3602 }
 0x494   : > { %v3723_v40 = vsub.f32 -inf, %v3603_v31  ;;  %3833 = vperm.xlu0 %6837, %v3603_v31   ;;  %7227 = vpow2.f32 %v3756_v9 }
 0x496   : > { %v3758_v18 = vmul.f32 1.442695, %v3723_v40 }
 0x497   : > { %v3606_v62 = vpop.xlane.xlu0 %3605 }
 0x498   : > { %v3724_v43 = vsub.f32 -inf, %v3606_v62  ;;  %3838 = vperm.xlu1 %6838, %v3606_v62   ;;  %7229 = vpow2.f32 %v3758_v18 }
 0x499   : > { %v9345_v50 = vpop.eup %7223 }
 0x49a   : > { %10361 = vst [vmem:[#allocation78_spill] sm:$0xff] %v9345_v50  ;;  %4428 = vperm.xlu0 %6837, %v9345_v50   ;;  %v3760_v45 = vmul.f32 1.442695, %v3724_v43 }
 0x49b   : > { %v3609_v7 = vpop.xlane.xlu1 %3608 }
 0x49c   : > { %v3725_v47 = vsub.f32 -inf, %v3609_v7  ;;  %7231 = vpow2.f32 %v3760_v45 }
 0x49d   : > { %v9348_v15 = vpop.eup %7225 }
 0x49e   : > { %10362 = vst [vmem:[#allocation79_spill] sm:$0xff] %v9348_v15  ;;  %v3762_v60 = vmul.f32 1.442695, %v3725_v47  ;;  %4433 = vperm.xlu1 %6838, %v9348_v15   ;;  %3843 = vperm.xlu0 %6837, %v3609_v7   ;;  %v10394_v15 = vld [vmem:[#allocation51_spill] sm:$0xff] }
 0x49f   : > { %v3612_v14 = vpop.xlane.xlu0 %3611 }
 0x4a0   : > { %v3726_v40 = vsub.f32 -inf, %v3612_v14  ;;  %7233 = vpow2.f32 %v3762_v60 }
 0x4a1   : > { %v9351_v18 = vpop.eup %7227 }
 0x4a2   : > { %3848 = vperm.xlu1 %6838, %v3612_v14   ;;  %v3764_v9 = vmul.f32 1.442695, %v3726_v40  ;;  %10363 = vst [vmem:[#allocation80_spill] sm:$0xff] %v9351_v18 }
 0x4a3   : > { %v3615_v62 = vpop.xlane.xlu1 %3614 }
 0x4a4   : > { %v3727_v31 = vsub.f32 -inf, %v3615_v62  ;;  %3853 = vperm.xlu0 %6837, %v3615_v62   ;;  %7235 = vpow2.f32 %v3764_v9 }
 0x4a5   : > { %v9354_v43 = vpop.eup %7229 }
 0x4a6   : > { %v3766_v59 = vmul.f32 1.442695, %v3727_v31  ;;  %4438 = vperm.xlu1 %6838, %v9351_v18   ;;  %10364 = vst [vmem:[#allocation81_spill] sm:$0xff] %v9354_v43 }
 0x4a7   : > { %v3618_v47 = vpop.xlane.xlu0 %3617 }
 0x4a8   : > { %v3728_v50 = vsub.f32 -inf, %v3618_v47  ;;  %4443 = vperm.xlu0 %6837, %v9354_v43   ;;  %7237 = vpow2.f32 %v3766_v59 }
 0x4a9   : > { %v9357_v14 = vpop.eup %7231 }
 0x4aa   : > { %3858 = vperm.xlu1 %6838, %v3618_v47   ;;  %v3768_v45 = vmul.f32 1.442695, %v3728_v50  ;;  %10365 = vst [vmem:[#allocation82_spill] sm:$0xff] %v9357_v14 }
 0x4ab   : > { %v3621_v7 = vpop.xlane.xlu1 %3620 }
 0x4ac   : > { %v3729_v60 = vsub.f32 -inf, %v3621_v7  ;;  %3863 = vperm.xlu0 %6837, %v3621_v7   ;;  %7239 = vpow2.f32 %v3768_v45 }
 0x4ad   : > { %v9360_v62 = vpop.eup %7233 }
 0x4ae   : > { %v3770_v40 = vmul.f32 1.442695, %v3729_v60  ;;  %4448 = vperm.xlu1 %6838, %v9357_v14   ;;  %10366 = vst [vmem:[#allocation83_spill] sm:$0xff] %v9360_v62 }
 0x4af   : > { %v3624_v31 = vpop.xlane.xlu0 %3623 }
 0x4b0   : > { %v3730_v18 = vsub.f32 -inf, %v3624_v31  ;;  %4453 = vperm.xlu0 %6837, %v9360_v62   ;;  %7241 = vpow2.f32 %v3770_v40 }
 0x4b1   : > { %v9363_v50 = vpop.eup %7235 }
 0x4b2   : > { %3868 = vperm.xlu1 %6838, %v3624_v31   ;;  %v3772_v59 = vmul.f32 1.442695, %v3730_v18  ;;  %10367 = vst [vmem:[#allocation84_spill] sm:$0xff] %v9363_v50 }
 0x4b3   : > { %v3627_v9 = vpop.xlane.xlu1 %3626 }
 0x4b4   : > { %v3731_v47 = vsub.f32 -inf, %v3627_v9  ;;  %3873 = vperm.xlu0 %6837, %v3627_v9   ;;  %7243 = vpow2.f32 %v3772_v59 }
 0x4b5   : > { %v9366_v60 = vpop.eup %7237 }
 0x4b6   : > { %v3774_v7 = vmul.f32 1.442695, %v3731_v47  ;;  %4458 = vperm.xlu1 %6838, %v9363_v50   ;;  %10368 = vst [vmem:[#allocation85_spill] sm:$0xff] %v9366_v60 }
 0x4b7   : > { %v3630_v14 = vpop.xlane.xlu0 %3629 }
 0x4b8   : > { %v3732_v43 = vsub.f32 -inf, %v3630_v14  ;;  %4463 = vperm.xlu0 %6837, %v9366_v60   ;;  %7245 = vpow2.f32 %v3774_v7 }
 0x4b9   : > { %v9369_v18 = vpop.eup %7239 }
 0x4ba   : > { %3878 = vperm.xlu1 %6838, %v3630_v14   ;;  %v3776_v40 = vmul.f32 1.442695, %v3732_v43  ;;  %10369 = vst [vmem:[#allocation86_spill] sm:$0xff] %v9369_v18 }
 0x4bb   : > { %v3633_v45 = vpop.xlane.xlu1 %3632 }
 0x4bc   : > { %v3733_v31 = vsub.f32 -inf, %v3633_v45  ;;  %3883 = vperm.xlu0 %6837, %v3633_v45   ;;  %7247 = vpow2.f32 %v3776_v40 }
 0x4bd   : > { %v9372_v47 = vpop.eup %7241 }
 0x4be   : > { %v3778_v9 = vmul.f32 1.442695, %v3733_v31  ;;  %4468 = vperm.xlu1 %6838, %v9369_v18   ;;  %10370 = vst [vmem:[#allocation87_spill] sm:$0xff] %v9372_v47 }
 0x4bf   : > { %v3636_v50 = vpop.xlane.xlu0 %3635 }
 0x4c0   : > { %v3734_v62 = vsub.f32 -inf, %v3636_v50  ;;  %4473 = vperm.xlu0 %6837, %v9372_v47   ;;  %7249 = vpow2.f32 %v3778_v9 }
 0x4c1   : > { %v9375_v43 = vpop.eup %7243 }
 0x4c2   : > { %3888 = vperm.xlu1 %6838, %v3636_v50   ;;  %v3780_v14 = vmul.f32 1.442695, %v3734_v62  ;;  %10371 = vst [vmem:[#allocation88_spill] sm:$0xff] %v9375_v43 }
 0x4c3   : > { %v3639_v59 = vpop.xlane.xlu1 %3638 }
 0x4c4   : > { %v3735_v7 = vsub.f32 -inf, %v3639_v59  ;;  %3893 = vperm.xlu0 %6837, %v3639_v59   ;;  %7251 = vpow2.f32 %v3780_v14 }
 0x4c5   : > { %v9378_v31 = vpop.eup %7245 }
 0x4c6   : > { %v3782_v45 = vmul.f32 1.442695, %v3735_v7  ;;  %4478 = vperm.xlu1 %6838, %v9375_v43   ;;  %10372 = vst [vmem:[#allocation89_spill] sm:$0xff] %v9378_v31 }
 0x4c7   : > { %v3642_v18 = vpop.xlane.xlu0 %3641 }
 0x4c8   : > { %v3736_v60 = vsub.f32 -inf, %v3642_v18  ;;  %4483 = vperm.xlu0 %6837, %v9378_v31   ;;  %7253 = vpow2.f32 %v3782_v45 }
 0x4c9   : > { %v9381_v62 = vpop.eup %7247 }
 0x4ca   : > { %3898 = vperm.xlu1 %6838, %v3642_v18   ;;  %v3784_v50 = vmul.f32 1.442695, %v3736_v60  ;;  %10373 = vst [vmem:[#allocation90_spill] sm:$0xff] %v9381_v62 }
 0x4cb   : > { %v3645_v40 = vpop.xlane.xlu1 %3644 }
 0x4cc   : > { %v3737_v9 = vsub.f32 -inf, %v3645_v40  ;;  %3903 = vperm.xlu0 %6837, %v3645_v40   ;;  %7255 = vpow2.f32 %v3784_v50 }
 0x4cd   : > { %v9384_v7 = vpop.eup %7249 }
 0x4ce   : > { %v3786_v59 = vmul.f32 1.442695, %v3737_v9  ;;  %4488 = vperm.xlu1 %6838, %v9381_v62   ;;  %10374 = vst [vmem:[#allocation91_spill] sm:$0xff] %v9384_v7 }
 0x4cf   : > { %v3648_v43 = vpop.xlane.xlu0 %3647 }
 0x4d0   : > { %v3738_v47 = vsub.f32 -inf, %v3648_v43  ;;  %4493 = vperm.xlu0 %6837, %v9384_v7   ;;  %7257 = vpow2.f32 %v3786_v59 }
 0x4d1   : > { %v9387_v60 = vpop.eup %7251 }
 0x4d2   : > { %3908 = vperm.xlu1 %6838, %v3648_v43   ;;  %v3788_v18 = vmul.f32 1.442695, %v3738_v47  ;;  %10375 = vst [vmem:[#allocation92_spill] sm:$0xff] %v9387_v60 }
 0x4d3   : > { %v3651_v14 = vpop.xlane.xlu1 %3650 }
 0x4d4   : > { %v3739_v45 = vsub.f32 -inf, %v3651_v14  ;;  %3913 = vperm.xlu0 %6837, %v3651_v14   ;;  %7259 = vpow2.f32 %v3788_v18 }
 0x4d5   : > { %v9390_v9 = vpop.eup %7253 }
 0x4d6   : > { %v3790_v40 = vmul.f32 1.442695, %v3739_v45  ;;  %4498 = vperm.xlu1 %6838, %v9387_v60   ;;  %10376 = vst [vmem:[#allocation93_spill] sm:$0xff] %v9390_v9 }
 0x4d7   : > { %v3654_v62 = vpop.xlane.xlu0 %3653 }
 0x4d8   : > { %v3740_v31 = vsub.f32 -inf, %v3654_v62  ;;  %4503 = vperm.xlu0 %6837, %v9390_v9   ;;  %7261 = vpow2.f32 %v3790_v40 }
 0x4d9   : > { %v9393_v47 = vpop.eup %7255 }
 0x4da   : > { %3918 = vperm.xlu1 %6838, %v3654_v62   ;;  %v3792_v43 = vmul.f32 1.442695, %v3740_v31  ;;  %10377 = vst [vmem:[#allocation94_spill] sm:$0xff] %v9393_v47 }
 0x4db   : > { %v3657_v50 = vpop.xlane.xlu1 %3656 }
 0x4dc   : > { %v3741_v59 = vsub.f32 -inf, %v3657_v50  ;;  %3923 = vperm.xlu0 %6837, %v3657_v50   ;;  %7263 = vpow2.f32 %v3792_v43 }
 0x4dd   : > { %v9396_v45 = vpop.eup %7257 }
 0x4de   : > { %v3794_v14 = vmul.f32 1.442695, %v3741_v59  ;;  %4508 = vperm.xlu1 %6838, %v9393_v47   ;;  %10378 = vst [vmem:[#allocation95_spill] sm:$0xff] %v9396_v45 }
 0x4df   : > { %v3660_v60 = vpop.xlane.xlu0 %3659 }
 0x4e0   : > { %v3742_v7 = vsub.f32 -inf, %v3660_v60  ;;  %4513 = vperm.xlu0 %6837, %v9396_v45   ;;  %7265 = vpow2.f32 %v3794_v14 }
 0x4e1   : > { %v9399_v31 = vpop.eup %7259 }
 0x4e2   : > { %3928 = vperm.xlu1 %6838, %v3660_v60   ;;  %v3796_v62 = vmul.f32 1.442695, %v3742_v7  ;;  %10379 = vst [vmem:[#allocation96_spill] sm:$0xff] %v9399_v31 }
 0x4e3   : > { %v3663_v18 = vpop.xlane.xlu1 %3662 }
 0x4e4   : > { %v3743_v40 = vsub.f32 -inf, %v3663_v18  ;;  %3933 = vperm.xlu0 %6837, %v3663_v18   ;;  %7267 = vpow2.f32 %v3796_v62 }
 0x4e5   : > { %v9402_v59 = vpop.eup %7261 }
 0x4e6   : > { %v3798_v50 = vmul.f32 1.442695, %v3743_v40  ;;  %4518 = vperm.xlu1 %6838, %v9399_v31   ;;  %10380 = vst [vmem:[#allocation97_spill] sm:$0xff] %v9402_v59  ;;  %v10383_v31 = vld [vmem:[#allocation43_spill] sm:$0xff] }
 0x4e7   : > { %v3666_v47 = vpop.xlane.xlu0 %3665  ;;  %v2157_v45 = vmul.f32 0.0, %v10383_v31  ;;  %v10387_v31 = vld [vmem:[#allocation40_spill] sm:$0xff] }
 0x4e8   : > { %v3744_v9 = vsub.f32 -inf, %v3666_v47  ;;  %4523 = vperm.xlu0 %6837, %v9402_v59   ;;  %7269 = vpow2.f32 %v3798_v50  ;;  %v10384_v50 = vld [vmem:[#allocation38_spill] sm:$0xff] }
 0x4e9   : > { %v9405_v7 = vpop.eup %7263 }
 0x4ea   : > { %3938 = vperm.xlu1 %6838, %v3666_v47   ;;  %v3800_v60 = vmul.f32 1.442695, %v3744_v9  ;;  %10381 = vst [vmem:[#allocation98_spill] sm:$0xff] %v9405_v7  ;;  %v2285_v9 = vadd.f32 %v9173_v44, %v2157_v45  ;;  %v10388_v45 = vld [vmem:[#allocation45_spill] sm:$0xff] }
 0x4eb   : > { %v3669_v43 = vpop.xlane.xlu1 %3668 }
 0x4ec   : > { %v3745_v14 = vsub.f32 -inf, %v3669_v43  ;;  %3943 = vperm.xlu0 %6837, %v3669_v43   ;;  %7271 = vpow2.f32 %v3800_v60  ;;  %v2158_v43 = vmul.f32 0.0, %v10384_v50 }
 0x4ed   : > { %v9408_v40 = vpop.eup %7265 }
 0x4ee   : > { %v3802_v18 = vmul.f32 1.442695, %v3745_v14  ;;  %4528 = vperm.xlu1 %6838, %v9405_v7   ;;  %10382 = vst [vmem:[#allocation99_spill] sm:$0xff] %v9408_v40  ;;  %v2286_v60 = vadd.f32 %v9163_v30, %v2158_v43 }
 0x4ef   : > { %v3672_v62 = vpop.xlane.xlu0 %3671 }
 0x4f0   : > { %4533 = vperm.xlu0 %6837, %v9408_v40   ;;  %7273 = vpow2.f32 %v3802_v18  ;;  %v3746_v59 = vsub.f32 -inf, %v3672_v62  ;;  %v2160_v18 = vmul.f32 0.0, %v10387_v31  ;;  %v10391_v31 = vld [vmem:[#allocation47_spill] sm:$0xff] }
 0x4f1   : > { %v9417_v14 = vpop.eup %7267  ;;  %7275 = vrcp.f32 %v2285_v9 }
 0x4f2   : > { %3948 = vperm.xlu1 %6838, %v3672_v62   ;;  %10385 = vst [vmem:[#allocation43_spill] sm:$0xff] %v9417_v14  ;;  %v3804_v7 = vmul.f32 1.442695, %v3746_v59  ;;  %v2159_v62 = vmul.f32 0.0, %v10388_v45  ;;  %7277 = vrcp.f32 %v2286_v60  ;;  %v2288_v50 = vadd.f32 %v9177_v13, %v2160_v18  ;;  %v10392_v18 = vld [vmem:[#allocation49_spill] sm:$0xff] }
 0x4f3   : > { %v9412_v47 = vpop.xlane.xlu1 %3674  ;;  %v2163_v45 = vmul.f32 0.0, %v10392_v18 }
 0x4f4   : > { %3953 = vperm.xlu0 %6837, %v9412_v47   ;;  %v2287_v43 = vadd.f32 %v9187_v17, %v2159_v62  ;;  %7279 = vpow2.f32 %v3804_v7 }
 0x4f5   : > { %v9421_v40 = vpop.eup %7269  ;;  %7281 = vrcp.f32 %v2288_v50  ;;  %v2291_v62 = vadd.f32 %v9213_v8, %v2163_v45  ;;  %v10397_v45 = vld [vmem:[#allocation46_spill] sm:$0xff] }
 0x4f6   : > { %4538 = vperm.xlu1 %6838, %v9417_v14   ;;  %10386 = vst [vmem:[#allocation38_spill] sm:$0xff] %v9421_v40  ;;  %v10389_v14 = vld [vmem:[#allocation42_spill] sm:$0xff]  ;;  %7283 = vrcp.f32 %v2287_v43 }
 0x4f7   : > { %v9425_v44 = vpop.xlane.xlu0 %3677  ;;  %v2162_v9 = vmul.f32 0.0, %v10389_v14  ;;  %v10393_v14 = vld [vmem:[#allocation44_spill] sm:$0xff] }
 0x4f8   : > { %4543 = vperm.xlu0 %6837, %v9421_v40   ;;  %v2161_v40 = vmul.f32 0.0, %v10391_v31  ;;  %v2164_v7 = vmul.f32 0.0, %v10393_v14  ;;  %v2165_v31 = vmul.f32 0.0, %v10394_v15  ;;  %v2166_v15 = vmul.f32 0.0, %v10397_v45  ;;  %v10399_v45 = vld [vmem:[#allocation50_spill] sm:$0xff] }
 0x4f9   : > { %v9435_v59 = vpop.eup %7271  ;;  %v2290_v60 = vadd.f32 %v9189_v37, %v2162_v9  ;;  %v10395_v37 = vld [vmem:[#allocation53_spill] sm:$0xff] }
 0x4fa   : > { %3958 = vperm.xlu1 %6838, %v9425_v44   ;;  %10390 = vst [vmem:[#allocation40_spill] sm:$0xff] %v9435_v59  ;;  %v2289_v17 = vadd.f32 %v9199_v3, %v2161_v40  ;;  %v2167_v9 = vmul.f32 0.0, %v10395_v37  ;;  %v2293_v43 = vadd.f32 %v9225_v19, %v2165_v31  ;;  %v10396_v3 = vld [vmem:[#allocation55_spill] sm:$0xff]  ;;  %v2294_v19 = vadd.f32 %v9215_v48, %v2166_v15 }
 0x4fb   : > { %v9430_v30 = vpop.xlane.xlu1 %3680  ;;  %7285 = vrcp.f32 %v2290_v60  ;;  %v2169_v40 = vmul.f32 0.0, %v10396_v3 }
 0x4fc   : > { %3963 = vperm.xlu0 %6837, %v9430_v30   ;;  %7287 = vrcp.f32 %v2289_v17  ;;  %v2295_v8 = vadd.f32 %v9239_v0, %v2167_v9 }
 0x4fd   : > { %v9440_v13 = vpop.eup %7273  ;;  %7289 = vrcp.f32 %v2291_v62  ;;  %v2297_v60 = vadd.f32 %v9251_v25, %v2169_v40 }
 0x4fe   : > { %4548 = vperm.xlu1 %6838, %v9435_v59   ;;  %v2292_v59 = vadd.f32 %v9203_v2, %v2164_v7  ;;  %v7276_v14 = vpop.eup %7275  ;;  %v10398_v2 = vld [vmem:[#allocation48_spill] sm:$0xff] }
 0x4ff   : > { %v9448_v50 = vpop.xlane.xlu0 %3683  ;;  %v2168_v7 = vmul.f32 0.0, %v10398_v2  ;;  %v7278_v31 = vpop.eup %7277 }
 0x500   : > { %4553 = vperm.xlu0 %6837, %v9440_v13   ;;  %7291 = vrcp.f32 %v2292_v59 }
 0x501   : > { %7293 = vrcp.f32 %v2293_v43  ;;  %v2296_v17 = vadd.f32 %v9229_v55, %v2168_v7  ;;  %v9467_v25 = vpop.eup %7279 }
 0x502   : > { %3968 = vperm.xlu1 %6838, %v9448_v50   ;;  %7295 = vrcp.f32 %v2295_v8  ;;  %v7282_v55 = vpop.eup %7281 }
 0x503   : > { %v9455_v18 = vpop.xlane.xlu1 %3686  ;;  %7297 = vrcp.f32 %v2297_v60 }
 0x504   : > { %3973 = vperm.xlu0 %6837, %v9455_v18   ;;  %7299 = vrcp.f32 %v2294_v19 }
 0x505   : > { %7301 = vrcp.f32 %v2296_v17 }
 0x506   : > { %5176 = vperm.xlu1 %6838, %v7276_v14   ;;  %v7284_v14 = vpop.eup %7283 }
 0x507   : > { %v3819_v37 = vpop.permute.xlu0 %3818  ;;  %v3824_v0 = vpop.permute.xlu1 %3823 }
 0x508   : > { %v3976_v9 = vsub.f32 %v9089_v28, %v3819_v37  ;;  %v3977_v3 = vsub.f32 %v9091_v10, %v3819_v37  ;;  %v3978_v62 = vsub.f32 %v9095_v52, %v3824_v0  ;;  %5181 = vperm.xlu0 %6837, %v7278_v31   ;;  %v3979_v48 = vsub.f32 %v9097_v39, %v3824_v0  ;;  %v10400_v39 = vld [vmem:[#allocation57_spill] sm:$0xff]  ;;  %v7286_v31 = vpop.eup %7285  ;;  %v10401_v0 = vld [vmem:[#allocation52_spill] sm:$0xff] }
 0x509   : > { %v2170_v10 = vmul.f32 0.0, %v10399_v45  ;;  %v2171_v60 = vmul.f32 0.0, %v10400_v39 }
 0x50a   : > { %v4040_v59 = vmul.f32 1.442695, %v3976_v9  ;;  %v4042_v43 = vmul.f32 1.442695, %v3977_v3  ;;  %v4044_v40 = vmul.f32 1.442695, %v3978_v62  ;;  %4558 = vperm.xlu1 %6838, %v9467_v25   ;;  %v7288_v3 = vpop.eup %7287 }
 0x50b   : > { %v4046_v8 = vmul.f32 1.442695, %v3979_v48  ;;  %v3829_v28 = vpop.permute.xlu1 %3828  ;;  %v2298_v2 = vadd.f32 %v9241_v57, %v2170_v10  ;;  %v2299_v17 = vadd.f32 %v9265_v63, %v2171_v60  ;;  %v10402_v62 = vld [vmem:[#allocation60_spill] sm:$0xff]  ;;  %v7290_v48 = vpop.eup %7289 }
 0x50c   : > { %7303 = vpow2.f32 %v4040_v59  ;;  %v3980_v52 = vsub.f32 %v9101_v32, %v3829_v28  ;;  %v3981_v15 = vsub.f32 %v9103_v20, %v3829_v28  ;;  %5191 = vperm.xlu0 %6837, %v7282_v55   ;;  %v2172_v32 = vmul.f32 0.0, %v10401_v0  ;;  %v10403_v28 = vld [vmem:[#allocation54_spill] sm:$0xff] }
 0x50d   : > { %7305 = vpow2.f32 %v4042_v43  ;;  %v2173_v57 = vmul.f32 0.0, %v10402_v62 }
 0x50e   : > { %7307 = vpow2.f32 %v4044_v40  ;;  %v4048_v7 = vmul.f32 1.442695, %v3980_v52  ;;  %v4050_v19 = vmul.f32 1.442695, %v3981_v15  ;;  %5186 = vperm.xlu1 %6838, %v7284_v14   ;;  %v2300_v59 = vadd.f32 %v9255_v34, %v2172_v32  ;;  %v7292_v40 = vpop.eup %7291  ;;  %v10404_v15 = vld [vmem:[#allocation63_spill] sm:$0xff]  ;;  %v10405_v14 = vld [vmem:[#allocation69_spill] sm:$0xff] }
 0x50f   : > { %7309 = vpow2.f32 %v4046_v8  ;;  %v3834_v37 = vpop.permute.xlu0 %3833  ;;  %v2301_v55 = vadd.f32 %v9277_v42, %v2173_v57  ;;  %v2175_v34 = vmul.f32 0.0, %v10404_v15  ;;  %v2177_v39 = vmul.f32 0.0, %v10405_v14  ;;  %v10408_v15 = vld [vmem:[#allocation70_spill] sm:$0xff]  ;;  %v10409_v14 = vld [vmem:[#allocation67_spill] sm:$0xff] }
 0x510   : > { %7311 = vpow2.f32 %v4048_v7  ;;  %v3982_v20 = vsub.f32 %v9107_v61, %v3834_v37  ;;  %v3983_v9 = vsub.f32 %v9109_v4, %v3834_v37  ;;  %5201 = vperm.xlu0 %6837, %v7286_v31   ;;  %v7294_v61 = vpop.eup %7293  ;;  %v2174_v4 = vmul.f32 0.0, %v10403_v28  ;;  %v10406_v31 = vld [vmem:[#allocation65_spill] sm:$0xff] }
 0x511   : > { %7313 = vpow2.f32 %v4050_v19  ;;  %v7296_v52 = vpop.eup %7295  ;;  %v2305_v0 = vadd.f32 %v9303_v54, %v2177_v39  ;;  %v2180_v39 = vmul.f32 0.0, %v10409_v14 }
 0x512   : > { %7315 = vrcp.f32 %v2298_v2  ;;  %v4052_v43 = vmul.f32 1.442695, %v3982_v20  ;;  %v4054_v63 = vmul.f32 1.442695, %v3983_v9  ;;  %5196 = vperm.xlu1 %6838, %v7288_v3   ;;  %v9490_v2 = vpop.eup %7297  ;;  %v2302_v42 = vadd.f32 %v9267_v58, %v2174_v4 }
 0x513   : > { %7317 = vrcp.f32 %v2299_v17  ;;  %v3839_v8 = vpop.permute.xlu1 %3838  ;;  %v2176_v17 = vmul.f32 0.0, %v10406_v31  ;;  %v2308_v31 = vadd.f32 %v9307_v56, %v2180_v39 }
 0x514   : > { %7319 = vpow2.f32 %v4052_v43  ;;  %v3984_v45 = vsub.f32 %v9113_v29, %v3839_v8  ;;  %v3985_v10 = vsub.f32 %v9115_v33, %v3839_v8  ;;  %5211 = vperm.xlu0 %6837, %v7292_v40   ;;  %v7300_v29 = vpop.eup %7299  ;;  %v2303_v33 = vadd.f32 %v9291_v38, %v2175_v34 }
 0x515   : > { %7321 = vpow2.f32 %v4054_v63  ;;  %v9488_v60 = vpop.permute.xlu0 %4428  ;;  %v7302_v37 = vpop.eup %7301  ;;  %v2304_v20 = vadd.f32 %v9281_v24, %v2176_v17  ;;  %v2179_v34 = vmul.f32 0.0, %v10408_v15  ;;  %v3747_v17 = vsub.f32 -inf, %v9412_v47 }
 0x516   : > { %7323 = vrcp.f32 %v2300_v59  ;;  %v4056_v7 = vmul.f32 1.442695, %v3984_v45  ;;  %v4058_v19 = vmul.f32 1.442695, %v3985_v10  ;;  %5206 = vperm.xlu1 %6838, %v7290_v48   ;;  %v10407_v48 = vld [vmem:[#allocation66_spill] sm:$0xff] }
 0x517   : > { %7325 = vrcp.f32 %v2301_v55  ;;  %v2178_v54 = vmul.f32 0.0, %v10407_v48 }
 0x518   : > { %7327 = vpow2.f32 %v4056_v7  ;;  %5221 = vperm.xlu0 %6837, %v7300_v29  }
 0x519   : > { %v7304_v32 = vpop.eup %7303  ;;  %7329 = vpow2.f32 %v4058_v19  ;;  %v3844_v9 = vpop.permute.xlu0 %3843 }
 0x51a   : > { %v9497_v58 = vpop.permute.xlu1 %4433  ;;  %v7306_v3 = vpop.eup %7305  ;;  %7331 = vrcp.f32 %v2302_v42  ;;  %v3986_v62 = vsub.f32 %v9119_v23, %v3844_v9  ;;  %v3987_v38 = vsub.f32 %v9121_v1, %v3844_v9  ;;  %5216 = vperm.xlu1 %6838, %v7294_v61   ;;  %v2306_v23 = vadd.f32 %v9293_v11, %v2178_v54 }
 0x51b   : > { %v7308_v57 = vpop.eup %7307  ;;  %7333 = vrcp.f32 %v2303_v33  ;;  %v9502_v59 = vadd.f32 %v7306_v3, %v7304_v32  ;;  %v2307_v33 = vadd.f32 %v9319_v21, %v2179_v34 }
 0x51c   : > { %v7310_v43 = vpop.eup %7309  ;;  %7335 = vrcp.f32 %v2305_v0  ;;  %v4060_v24 = vmul.f32 1.442695, %v3986_v62  ;;  %v4062_v63 = vmul.f32 1.442695, %v3987_v38  ;;  %5231 = vperm.xlu0 %6837, %v7302_v37   ;;  %v4618_v40 = vpack.c.bf16 %v7308_v57, %v7304_v32 }
 0x51d   : > { %v9504_v55 = vpop.eup %7311  ;;  %7337 = vrcp.f32 %v2304_v20  ;;  %v4619_v8 = vpack.c.bf16 %v7310_v43, %v7306_v3  ;;  %v9507_v61 = vadd.f32 %v7310_v43, %v7308_v57  ;;  %v3748_v32 = vsub.f32 -inf, %v9425_v44 }
 0x51e   : > { %v3849_v1 = vpop.permute.xlu1 %3848  ;;  %v7314_v28 = vpop.eup %7313  ;;  %7339 = vpow2.f32 %v4060_v24  ;;  %5226 = vperm.xlu1 %6838, %v7296_v52   ;;  %v3806_v38 = vmul.f32 1.442695, %v3747_v17  ;;  %v3750_v24 = vsub.f32 -inf, %v9448_v50  ;;  %v3751_v50 = vsub.f32 -inf, %v9455_v18 }
 0x51f   : > { %v3988_v4 = vsub.f32 %v9125_v6, %v3849_v1  ;;  %v3989_v45 = vsub.f32 %v9127_v26, %v3849_v1  ;;  %v7316_v10 = vpop.eup %7315  ;;  %7341 = vpow2.f32 %v4062_v63  ;;  %4810 = vmatprep.mubr.bf16.mxu0 %v4619_v8  ;;  %v3854_v42 = vpop.permute.xlu0 %3853  ;;  %v9514_v11 = vadd.f32 %v7314_v28, %v9504_v55 }
 0x520   : > { %v7318_v7 = vpop.eup %7317  ;;  %4811 = vmatmul.mubr.bf16.vlgmr.msra.gmra.mxu0 %v4618_v40  ;;  %v3990_v6 = vsub.f32 %v9131_v35, %v3854_v42  ;;  %v3991_v26 = vsub.f32 %v9133_v51, %v3854_v42  ;;  %5241 = vperm.xlu0 %6837, %v7316_v10   ;;  %7343 = vrcp.f32 %v2306_v23  ;;  %v3749_v51 = vsub.f32 -inf, %v9430_v30 }
 0x521   : > { %v4064_v19 = vmul.f32 1.442695, %v3988_v4  ;;  %v4066_v29 = vmul.f32 1.442695, %v3989_v45  ;;  %v7320_v52 = vpop.eup %7319  ;;  %v3808_v48 = vmul.f32 1.442695, %v3748_v32 }
 0x522   : > { %v9521_v37 = vpop.permute.xlu1 %4438  ;;  %v7322_v0 = vpop.eup %7321  ;;  %v4068_v20 = vmul.f32 1.442695, %v3990_v6  ;;  %v4070_v9 = vmul.f32 1.442695, %v3991_v26  ;;  %5236 = vperm.xlu1 %6838, %v9490_v2   ;;  %v4620_v62 = vpack.c.bf16 %v7320_v52, %v9504_v55  ;;  %v3810_v43 = vmul.f32 1.442695, %v3749_v51 }
 0x523   : > { %7345 = vpow2.f32 %v4064_v19  ;;  %v7324_v35 = vpop.eup %7323  ;;  %v9526_v21 = vpop.permute.xlu0 %4443  ;;  %v4621_v3 = vpack.c.bf16 %v7322_v0, %v7314_v28  ;;  %v9528_v56 = vadd.f32 %v7322_v0, %v7320_v52  ;;  %v3814_v18 = vmul.f32 1.442695, %v3751_v50 }
 0x524   : > { %7347 = vpow2.f32 %v4066_v29  ;;  %v7326_v47 = vpop.eup %7325  ;;  %5251 = vperm.xlu0 %6837, %v7324_v35  }
 0x525   : > { %7349 = vpow2.f32 %v4068_v20  ;;  %v7328_v44 = vpop.eup %7327  ;;  %4818 = vmatprep.mubr.bf16.mxu0 %v4621_v3 }
 0x526   : > { %7351 = vpow2.f32 %v4070_v9  ;;  %v3859_v57 = vpop.permute.xlu1 %3858  ;;  %v7330_v2 = vpop.eup %7329  ;;  %5246 = vperm.xlu1 %6838, %v7318_v7  }
 0x527   : > { %7353 = vrcp.f32 %v2308_v31  ;;  %v3993_v30 = vsub.f32 %v9139_v36, %v3859_v57  ;;  %v7332_v54 = vpop.eup %7331  ;;  %v3864_v63 = vpop.permute.xlu0 %3863  ;;  %v9533_v40 = vadd.f32 %v7330_v2, %v7328_v44  ;;  %v3992_v23 = vsub.f32 %v9137_v22, %v3859_v57 }
 0x528   : > { %7355 = vrcp.f32 %v2307_v33  ;;  %v7334_v55 = vpop.eup %7333  ;;  %4819 = vmatmul.mubr.bf16.gmra.mxu0 %v4620_v62  ;;  %v3994_v1 = vsub.f32 %v9143_v5, %v3864_v63  ;;  %v3995_v28 = vsub.f32 %v9145_v49, %v3864_v63  ;;  %5261 = vperm.xlu0 %6837, %v7332_v54   ;;  %v3812_v22 = vmul.f32 1.442695, %v3750_v24 }
 0x529   : > { %v4074_v8 = vmul.f32 1.442695, %v3993_v30  ;;  %v7336_v36 = vpop.eup %7335  ;;  %7357 = vpow2.f32 %v3806_v38  ;;  %v4072_v39 = vmul.f32 1.442695, %v3992_v23 }
 0x52a   : > { %v9538_v4 = vpop.permute.xlu1 %4448  ;;  %v7338_v45 = vpop.eup %7337  ;;  %7359 = vpow2.f32 %v3808_v48  ;;  %v4076_v10 = vmul.f32 1.442695, %v3994_v1  ;;  %v4078_v15 = vmul.f32 1.442695, %v3995_v28  ;;  %5256 = vperm.xlu1 %6838, %v7326_v47  }
 0x52b   : > { %v7340_v34 = vpop.eup %7339  ;;  %7361 = vpow2.f32 %v3810_v43  ;;  %v9541_v14 = vpop.permute.xlu0 %4453 }
 0x52c   : > { %v7342_v5 = vpop.eup %7341  ;;  %7363 = vpow2.f32 %v4074_v8  ;;  %5271 = vperm.xlu0 %6837, %v7338_v45   ;;  %v4622_v49 = vpack.c.bf16 %v7340_v34, %v7328_v44  ;;  %v10413_v8 = vld [vmem:[#allocation12_spill] sm:$0xff] }
 0x52d   : > { %7365 = vpow2.f32 %v4078_v15  ;;  %v4623_v7 = vpack.c.bf16 %v7342_v5, %v7330_v2  ;;  %v9543_v19 = vadd.f32 %v7342_v5, %v7340_v34  ;;  %v7344_v29 = vpop.eup %7343 }
 0x52e   : > { %v3869_v42 = vpop.permute.xlu1 %3868  ;;  %7367 = vpow2.f32 %v4076_v10  ;;  %5266 = vperm.xlu1 %6838, %v7334_v55   ;;  %v10412_v55 = vld [vmem:[#allocation15_spill] sm:$0xff] }
 0x52f   : > { %v3997_v6 = vsub.f32 %v9151_v16, %v3869_v42  ;;  %7369 = vpow2.f32 %v3812_v22  ;;  %v3996_v52 = vsub.f32 %v9149_v41, %v3869_v42  ;;  %4826 = vmatprep.mubr.bf16.mxu0 %v4623_v7  ;;  %v3874_v33 = vpop.permute.xlu0 %3873 }
 0x530   : > { %v7346_v26 = vpop.eup %7345  ;;  %7371 = vpow2.f32 %v4072_v39  ;;  %v3998_v0 = vsub.f32 %v9155_v53, %v3874_v33  ;;  %v3999_v32 = vsub.f32 %v9157_v12, %v3874_v33  ;;  %4827 = vmatmul.mubr.bf16.gmra.mxu0 %v4622_v49  ;;  %5281 = vperm.xlu0 %6837, %v7344_v29   ;;  %v10415_v49 = vld [vmem:[#allocation14_spill] sm:$0xff]  ;;  %v10418_v33 = vld [vmem:[#allocation19_spill] sm:$0xff] }
 0x531   : > { %v7348_v31 = vpop.eup %7347  ;;  %v4082_v17 = vmul.f32 1.442695, %v3997_v6  ;;  %7373 = vpow2.f32 %v3814_v18  ;;  %v4080_v47 = vmul.f32 1.442695, %v3996_v52  ;;  %v10417_v18 = vld [vmem:[#allocation13_spill] sm:$0xff] }
 0x532   : > { %v7350_v20 = vpop.eup %7349  ;;  %v9549_v9 = vpop.permute.xlu1 %4458  ;;  %v9551_v16 = vadd.f32 %v7348_v31, %v7346_v26  ;;  %v4084_v51 = vmul.f32 1.442695, %v3998_v0  ;;  %v4086_v41 = vmul.f32 1.442695, %v3999_v32  ;;  %5276 = vperm.xlu1 %6838, %v7336_v36  }
 0x533   : > { %v7352_v35 = vpop.eup %7351  ;;  %v9553_v62 = vpop.permute.xlu0 %4463  ;;  %7375 = vpow2.f32 %v4082_v17  ;;  %v4624_v48 = vpack.c.bf16 %v7350_v20, %v7346_v26  ;;  %v10419_v17 = vld [vmem:[#allocation16_spill] sm:$0xff] }
 0x534   : > { %v7354_v3 = vpop.eup %7353  ;;  %v4625_v44 = vpack.c.bf16 %v7352_v35, %v7348_v31  ;;  %v9555_v53 = vadd.f32 %v7352_v35, %v7350_v20  ;;  %7377 = vpow2.f32 %v4086_v41 }
 0x535   : > { %v7356_v12 = vpop.eup %7355  ;;  %5291 = vperm.xlu0 %6837, %v7354_v3   ;;  %7379 = vpow2.f32 %v4084_v51 }
 0x536   : > { %4834 = vmatprep.mubr.bf16.mxu0 %v4625_v44  ;;  %v3879_v38 = vpop.permute.xlu1 %3878  ;;  %v9557_v57 = vpop.eup %7357  ;;  %5286 = vperm.xlu1 %6838, %v7356_v12   ;;  %7381 = vpow2.f32 %v4080_v47 }
 0x537   : > { %v4001_v2 = vsub.f32 %v9165_v27, %v3879_v38  ;;  %v9560_v30 = vpop.eup %7359  ;;  %v3884_v54 = vpop.permute.xlu0 %3883  ;;  %v4000_v24 = vsub.f32 %v9161_v46, %v3879_v38 }
 0x538   : > { %10410 = vst [vmem:[#allocation45_spill] sm:$0xff] %v9560_v30  ;;  %v9562_v43 = vpop.eup %7361  ;;  %v4002_v23 = vsub.f32 %v10412_v55, %v3884_v54  ;;  %v4003_v1 = vsub.f32 %v10413_v8, %v3884_v54  ;;  %4835 = vmatmul.mubr.bf16.gmra.mxu0 %v4624_v48  ;;  %v10420_v48 = vld [vmem:[#allocation18_spill] sm:$0xff]  ;;  %v10421_v55 = vld [vmem:[#allocation17_spill] sm:$0xff] }
 0x539   : > { %10411 = vst [vmem:[#allocation42_spill] sm:$0xff] %v9562_v43  ;;  %v4090_v63 = vmul.f32 1.442695, %v4001_v2  ;;  %4563 = vperm.xlu0 %6837, %v9557_v57   ;;  %v9568_v28 = vpop.eup %7363  ;;  %v4088_v22 = vmul.f32 1.442695, %v4000_v24 }
 0x53a   : > { %v9570_v27 = vpop.permute.xlu1 %4468  ;;  %v9572_v36 = vpop.eup %7365  ;;  %v4092_v45 = vmul.f32 1.442695, %v4002_v23  ;;  %v4094_v50 = vmul.f32 1.442695, %v4003_v1  ;;  %4568 = vperm.xlu1 %6838, %v9560_v30   ;;  %v10422_v1 = vld [vmem:[#allocation23_spill] sm:$0xff] }
 0x53b   : > { %v9575_v10 = vpop.eup %7367  ;;  %v9577_v46 = vpop.permute.xlu0 %4473  ;;  %v4627_v15 = vpack.c.bf16 %v9572_v36, %v9568_v28  ;;  %7383 = vpow2.f32 %v4090_v63 }
 0x53c   : > { %v9581_v34 = vpop.eup %7369  ;;  %7385 = vpow2.f32 %v4094_v50  ;;  %v10423_v50 = vld [vmem:[#allocation20_spill] sm:$0xff] }
 0x53d   : > { %10414 = vst [vmem:[#allocation47_spill] sm:$0xff] %v9581_v34  ;;  %4573 = vperm.xlu0 %6837, %v9562_v43   ;;  %v9584_v5 = vpop.eup %7371  ;;  %4842 = vmatprep.mubr.bf16.mxu0 %v4627_v15  ;;  %7387 = vpow2.f32 %v4092_v45 }
 0x53e   : > { %v3889_v39 = vpop.permute.xlu1 %3888  ;;  %4578 = vperm.xlu1 %6838, %v9581_v34   ;;  %v4626_v7 = vpack.c.bf16 %v9575_v10, %v9584_v5  ;;  %v9590_v29 = vpop.eup %7373  ;;  %7389 = vpow2.f32 %v4088_v22 }
 0x53f   : > { %v4005_v42 = vsub.f32 %v10415_v49, %v3889_v39  ;;  %10416 = vst [vmem:[#allocation49_spill] sm:$0xff] %v9590_v29  ;;  %v4004_v6 = vsub.f32 %v10417_v18, %v3889_v39  ;;  %v3894_v26 = vpop.permute.xlu0 %3893 }
 0x540   : > { %v4006_v31 = vsub.f32 %v10418_v33, %v3894_v26  ;;  %v4007_v0 = vsub.f32 %v10419_v17, %v3894_v26  ;;  %4843 = vmatmul.mubr.bf16.gmra.mxu0 %v4626_v7  ;;  %v9596_v32 = vpop.eup %7375  ;;  %v10424_v17 = vld [vmem:[#allocation22_spill] sm:$0xff] }
 0x541   : > { %v4098_v52 = vmul.f32 1.442695, %v4005_v42  ;;  %4583 = vperm.xlu0 %6837, %v9590_v29   ;;  %v9600_v35 = vpop.eup %7377  ;;  %v4096_v47 = vmul.f32 1.442695, %v4004_v6 }
 0x542   : > { %v9598_v20 = vpop.permute.xlu1 %4478  ;;  %v4100_v51 = vmul.f32 1.442695, %v4006_v31  ;;  %v4102_v41 = vmul.f32 1.442695, %v4007_v0  ;;  %v9602_v3 = vpop.eup %7379  ;;  %v4629_v12 = vpack.c.bf16 %v9600_v35, %v9596_v32 }
 0x543   : > { %v9604_v44 = vpop.permute.xlu0 %4483  ;;  %v9608_v38 = vpop.eup %7381  ;;  %7391 = vpow2.f32 %v4098_v52 }
 0x544   : > { %7393 = vpow2.f32 %v4102_v41  ;;  %4850 = vmatprep.mubr.bf16.mxu0 %v4629_v12  ;;  %v4628_v24 = vpack.c.bf16 %v9602_v3, %v9608_v38  ;;  %v10425_v41 = vld [vmem:[#allocation21_spill] sm:$0xff] }
 0x545   : > { %7395 = vpow2.f32 %v4100_v51 }
 0x546   : > { %v3899_v2 = vpop.permute.xlu1 %3898  ;;  %7397 = vpow2.f32 %v4096_v47 }
 0x547   : > { %v4009_v54 = vsub.f32 %v10420_v48, %v3899_v2  ;;  %v3904_v63 = vpop.permute.xlu0 %3903  ;;  %v4008_v23 = vsub.f32 %v10421_v55, %v3899_v2  ;;  %v10426_v48 = vld [vmem:[#allocation27_spill] sm:$0xff] }
 0x548   : > { %v4010_v45 = vsub.f32 %v10422_v1, %v3904_v63  ;;  %v4011_v15 = vsub.f32 %v10423_v50, %v3904_v63  ;;  %4851 = vmatmul.mubr.bf16.gmra.mxu0 %v4628_v24  ;;  %v9616_v22 = vpop.eup %7383  ;;  %v10427_v24 = vld [vmem:[#allocation24_spill] sm:$0xff] }
 0x549   : > { %v4106_v8 = vmul.f32 1.442695, %v4009_v54  ;;  %v9620_v49 = vpop.eup %7385  ;;  %v4104_v52 = vmul.f32 1.442695, %v4008_v23 }
 0x54a   : > { %v9618_v39 = vpop.permute.xlu1 %4488  ;;  %v4108_v42 = vmul.f32 1.442695, %v4010_v45  ;;  %v4110_v7 = vmul.f32 1.442695, %v4011_v15  ;;  %v9622_v18 = vpop.eup %7387  ;;  %v4631_v26 = vpack.c.bf16 %v9620_v49, %v9616_v22 }
 0x54b   : > { %v9624_v6 = vpop.permute.xlu0 %4493  ;;  %7399 = vpow2.f32 %v4106_v8  ;;  %v9628_v33 = vpop.eup %7389 }
 0x54c   : > { %7401 = vpow2.f32 %v4110_v7  ;;  %4858 = vmatprep.mubr.bf16.mxu0 %v4631_v26  ;;  %v4630_v51 = vpack.c.bf16 %v9622_v18, %v9628_v33 }
 0x54d   : > { %7403 = vpow2.f32 %v4108_v42 }
 0x54e   : > { %v3909_v31 = vpop.permute.xlu1 %3908  ;;  %7405 = vpow2.f32 %v4104_v52 }
 0x54f   : > { %v4013_v0 = vsub.f32 %v10424_v17, %v3909_v31  ;;  %v4012_v47 = vsub.f32 %v10425_v41, %v3909_v31  ;;  %v3914_v12 = vpop.permute.xlu0 %3913  ;;  %v10428_v31 = vld [vmem:[#allocation26_spill] sm:$0xff]  ;;  %v10429_v41 = vld [vmem:[#allocation25_spill] sm:$0xff] }
 0x550   : > { %v4014_v54 = vsub.f32 %v10426_v48, %v3914_v12  ;;  %v4015_v63 = vsub.f32 %v10427_v24, %v3914_v12  ;;  %4859 = vmatmul.mubr.bf16.gmra.mxu0 %v4630_v51  ;;  %v9636_v55 = vpop.eup %7391  ;;  %v10430_v48 = vld [vmem:[#allocation31_spill] sm:$0xff]  ;;  %v10431_v24 = vld [vmem:[#allocation28_spill] sm:$0xff] }
 0x551   : > { %v4114_v2 = vmul.f32 1.442695, %v4013_v0  ;;  %v9640_v8 = vpop.eup %7393  ;;  %v4112_v15 = vmul.f32 1.442695, %v4012_v47 }
 0x552   : > { %v9638_v23 = vpop.permute.xlu1 %4498  ;;  %v4116_v1 = vmul.f32 1.442695, %v4014_v54  ;;  %v4118_v45 = vmul.f32 1.442695, %v4015_v63  ;;  %v9642_v50 = vpop.eup %7395  ;;  %v4633_v7 = vpack.c.bf16 %v9640_v8, %v9636_v55 }
 0x553   : > { %v9644_v42 = vpop.permute.xlu0 %4503  ;;  %v9648_v26 = vpop.eup %7397  ;;  %7407 = vpow2.f32 %v4114_v2 }
 0x554   : > { %7409 = vpow2.f32 %v4118_v45  ;;  %4866 = vmatprep.mubr.bf16.mxu0 %v4633_v7  ;;  %v4632_v0 = vpack.c.bf16 %v9642_v50, %v9648_v26 }
 0x555   : > { %7411 = vpow2.f32 %v4116_v1 }
 0x556   : > { %v3919_v52 = vpop.permute.xlu1 %3918  ;;  %7413 = vpow2.f32 %v4112_v15 }
 0x557   : > { %v4017_v17 = vsub.f32 %v10428_v31, %v3919_v52  ;;  %v3924_v51 = vpop.permute.xlu0 %3923  ;;  %v4016_v47 = vsub.f32 %v10429_v41, %v3919_v52 }
 0x558   : > { %v4018_v54 = vsub.f32 %v10430_v48, %v3924_v51  ;;  %v4019_v63 = vsub.f32 %v10431_v24, %v3924_v51  ;;  %4867 = vmatmul.mubr.bf16.gmra.mxu0 %v4632_v0  ;;  %v9656_v2 = vpop.eup %7399  ;;  %v10434_v51 = vld [vmem:[#allocation30_spill] sm:$0xff]  ;;  %v10435_v24 = vld [vmem:[#allocation29_spill] sm:$0xff] }
 0x559   : > { %v4122_v12 = vmul.f32 1.442695, %v4017_v17  ;;  %v9660_v1 = vpop.eup %7401  ;;  %v4120_v17 = vmul.f32 1.442695, %v4016_v47  ;;  %v10436_v47 = vld [vmem:[#allocation56_spill] sm:$0xff] }
 0x55a   : > { %v9658_v45 = vpop.permute.xlu1 %4508  ;;  %v4124_v7 = vmul.f32 1.442695, %v4018_v54  ;;  %v4126_v31 = vmul.f32 1.442695, %v4019_v63  ;;  %v9662_v29 = vpop.eup %7403  ;;  %v4635_v52 = vpack.c.bf16 %v9660_v1, %v9656_v2 }
 0x55b   : > { %10432 = vst [vmem:[#allocation44_spill] sm:$0xff] %v9658_v45  ;;  %v9664_v15 = vpop.permute.xlu0 %4513  ;;  %7415 = vpow2.f32 %v4122_v12  ;;  %v9668_v41 = vpop.eup %7405  ;;  %v10437_v45 = vld [vmem:[#allocation59_spill] sm:$0xff] }
 0x55c   : > { %10433 = vst [vmem:[#allocation51_spill] sm:$0xff] %v9664_v15  ;;  %7417 = vpow2.f32 %v4126_v31  ;;  %4874 = vmatprep.mubr.bf16.mxu0 %v4635_v52  ;;  %v4634_v54 = vpack.c.bf16 %v9662_v29, %v9668_v41 }
 0x55d   : > { %7419 = vpow2.f32 %v4124_v7 }
 0x55e   : > { %v3929_v0 = vpop.permute.xlu1 %3928  ;;  %7421 = vpow2.f32 %v4120_v17 }
 0x55f   : > { %v4021_v48 = vsub.f32 %v10434_v51, %v3929_v0  ;;  %v4020_v63 = vsub.f32 %v10435_v24, %v3929_v0  ;;  %v3934_v34 = vpop.permute.xlu0 %3933 }
 0x560   : > { %4237 = vadd.xlane.f32.xlu0 %v9507_v61  ;;  %v4022_v12 = vsub.f32 %v10436_v47, %v3934_v34  ;;  %v4023_v43 = vsub.f32 %v10437_v45, %v3934_v34  ;;  %4875 = vmatmul.mubr.bf16.gmra.mxu0 %v4634_v54  ;;  %v9677_v31 = vpop.eup %7407 }
 0x561   : > { %v4130_v15 = vmul.f32 1.442695, %v4021_v48  ;;  %v9681_v52 = vpop.eup %7409  ;;  %v4128_v61 = vmul.f32 1.442695, %v4020_v63 }
 0x562   : > { %v9679_v7 = vpop.permute.xlu1 %4518  ;;  %v4132_v51 = vmul.f32 1.442695, %v4022_v12  ;;  %v4134_v30 = vmul.f32 1.442695, %v4023_v43  ;;  %4234 = vadd.xlane.f32.xlu1 %v9502_v59  ;;  %v9684_v0 = vpop.eup %7411  ;;  %v4637_v34 = vpack.c.bf16 %v9681_v52, %v9677_v31  ;;  %v10440_v43 = vld [vmem:[#allocation62_spill] sm:$0xff]  ;;  %v10442_v12 = vld [vmem:[#allocation61_spill] sm:$0xff] }
 0x563   : > { %10438 = vst [vmem:[#allocation53_spill] sm:$0xff] %v9679_v7  ;;  %v9686_v17 = vpop.permute.xlu0 %4523  ;;  %v9691_v45 = vpop.eup %7413  ;;  %7423 = vpow2.f32 %v4130_v15 }
 0x564   : > { %10439 = vst [vmem:[#allocation55_spill] sm:$0xff] %v9686_v17  ;;  %4240 = vadd.xlane.f32.xlu0 %v9514_v11  ;;  %7425 = vpow2.f32 %v4134_v30  ;;  %4882 = vmatprep.mubr.bf16.mxu0 %v4637_v34  ;;  %v4636_v59 = vpack.c.bf16 %v9684_v0, %v9691_v45  ;;  %v10441_v11 = vld [vmem:[#allocation58_spill] sm:$0xff]  ;;  %v10443_v30 = vld [vmem:[#allocation64_spill] sm:$0xff] }
 0x565   : > { %7427 = vpow2.f32 %v4132_v51 }
 0x566   : > { %v3939_v48 = vpop.permute.xlu1 %3938  ;;  %4243 = vadd.xlane.f32.xlu1 %v9528_v56  ;;  %7429 = vpow2.f32 %v4128_v61 }
 0x567   : > { %v4025_v54 = vsub.f32 %v10440_v43, %v3939_v48  ;;  %v3944_v24 = vpop.permute.xlu0 %3943  ;;  %v4024_v63 = vsub.f32 %v10441_v11, %v3939_v48  ;;  %v4257_v11 = vadd.f32 %v9584_v5, %v9568_v28  ;;  %v10447_v28 = vld [vmem:[#allocation33_spill] sm:$0xff] }
 0x568   : > { %4246 = vadd.xlane.f32.xlu0 %v9533_v40  ;;  %v4026_v15 = vsub.f32 %v10442_v12, %v3944_v24  ;;  %v4027_v34 = vsub.f32 %v10443_v30, %v3944_v24  ;;  %4883 = vmatmul.mubr.bf16.gmra.mxu0 %v4636_v59  ;;  %v9701_v51 = vpop.eup %7415 }
 0x569   : > { %v4138_v47 = vmul.f32 1.442695, %v4025_v54  ;;  %v9705_v56 = vpop.eup %7417  ;;  %v4136_v54 = vmul.f32 1.442695, %v4024_v63 }
 0x56a   : > { %v9703_v43 = vpop.permute.xlu1 %4528  ;;  %v4140_v17 = vmul.f32 1.442695, %v4026_v15  ;;  %v4142_v7 = vmul.f32 1.442695, %v4027_v34  ;;  %4249 = vadd.xlane.f32.xlu1 %v9543_v19  ;;  %v9708_v61 = vpop.eup %7419  ;;  %v4639_v48 = vpack.c.bf16 %v9705_v56, %v9701_v51  ;;  %v10444_v19 = vld [vmem:[#allocation32_spill] sm:$0xff]  ;;  %v10445_v15 = vld [vmem:[#allocation35_spill] sm:$0xff] }
 0x56b   : > { %v9710_v40 = vpop.permute.xlu0 %4533  ;;  %7431 = vpow2.f32 %v4138_v47  ;;  %v9715_v59 = vpop.eup %7421  ;;  %v10446_v34 = vld [vmem:[#allocation37_spill] sm:$0xff] }
 0x56c   : > { %4252 = vadd.xlane.f32.xlu0 %v9551_v16  ;;  %7433 = vpow2.f32 %v4142_v7  ;;  %4890 = vmatprep.mubr.bf16.mxu0 %v4639_v48  ;;  %v4638_v16 = vpack.c.bf16 %v9708_v61, %v9715_v59  ;;  %v4260_v7 = vadd.f32 %v9575_v10, %v9572_v36 }
 0x56d   : > { %7435 = vpow2.f32 %v4140_v17 }
 0x56e   : > { %v3949_v24 = vpop.permute.xlu1 %3948  ;;  %4255 = vadd.xlane.f32.xlu1 %v9555_v53  ;;  %7437 = vpow2.f32 %v4136_v54 }
 0x56f   : > { %v4029_v12 = vsub.f32 %v10444_v19, %v3949_v24  ;;  %v4028_v30 = vsub.f32 %v10445_v15, %v3949_v24  ;;  %v3954_v63 = vpop.permute.xlu0 %3953  ;;  %v4263_v19 = vadd.f32 %v9608_v38, %v9596_v32  ;;  %v4266_v32 = vadd.f32 %v9602_v3, %v9600_v35 }
 0x570   : > { %4258 = vadd.xlane.f32.xlu0 %v4257_v11  ;;  %v4030_v48 = vsub.f32 %v10446_v34, %v3954_v63  ;;  %v4031_v5 = vsub.f32 %v10447_v28, %v3954_v63  ;;  %4891 = vmatmul.mubr.bf16.gmra.mxu0 %v4638_v16  ;;  %v9728_v17 = vpop.eup %7423  ;;  %v4269_v63 = vadd.f32 %v9628_v33, %v9616_v22  ;;  %v10449_v34 = vld [vmem:[#allocation34_spill] sm:$0xff]  ;;  %v10451_v22 = vld [vmem:[#allocation36_spill] sm:$0xff] }
 0x571   : > { %v4146_v47 = vmul.f32 1.442695, %v4029_v12  ;;  %v9734_v24 = vpop.eup %7425  ;;  %v4144_v10 = vmul.f32 1.442695, %v4028_v30  ;;  %v10448_v30 = vld [vmem:[#allocation39_spill] sm:$0xff]  ;;  %v4272_v35 = vadd.f32 %v9622_v18, %v9620_v49 }
 0x572   : > { %v9730_v53 = vpop.permute.xlu1 %4538  ;;  %v4148_v11 = vmul.f32 1.442695, %v4030_v48  ;;  %v4150_v15 = vmul.f32 1.442695, %v4031_v5  ;;  %4261 = vadd.xlane.f32.xlu1 %v4260_v7  ;;  %v9736_v36 = vpop.eup %7427  ;;  %v4641_v12 = vpack.c.bf16 %v9734_v24, %v9728_v17 }
 0x573   : > { %v9738_v54 = vpop.permute.xlu0 %4543  ;;  %v9742_v16 = vpop.eup %7429  ;;  %7439 = vpow2.f32 %v4146_v47 }
 0x574   : > { %4264 = vadd.xlane.f32.xlu0 %v4263_v19  ;;  %7441 = vpow2.f32 %v4150_v15  ;;  %4898 = vmatprep.mubr.bf16.mxu0 %v4641_v12  ;;  %v4640_v28 = vpack.c.bf16 %v9736_v36, %v9742_v16  ;;  %v10450_v19 = vld [vmem:[#allocation41_spill] sm:$0xff] }
 0x575   : > { %7443 = vpow2.f32 %v4148_v11 }
 0x576   : > { %v3959_v38 = vpop.permute.xlu1 %3958  ;;  %4267 = vadd.xlane.f32.xlu1 %v4266_v32  ;;  %7445 = vpow2.f32 %v4144_v10  ;;  %v4275_v32 = vadd.f32 %v9648_v26, %v9636_v55 }
 0x577   : > { %v4032_v7 = vsub.f32 %v10448_v30, %v3959_v38  ;;  %v4033_v48 = vsub.f32 %v10449_v34, %v3959_v38  ;;  %v3964_v47 = vpop.permute.xlu0 %3963  ;;  %v4281_v34 = vadd.f32 %v9668_v41, %v9656_v2  ;;  %v4287_v41 = vadd.f32 %v9691_v45, %v9677_v31 }
 0x578   : > { %4270 = vadd.xlane.f32.xlu0 %v4269_v63  ;;  %v4034_v15 = vsub.f32 %v10450_v19, %v3964_v47  ;;  %v4035_v33 = vsub.f32 %v10451_v22, %v3964_v47  ;;  %4899 = vmatmul.mubr.bf16.gmra.mxu0 %v4640_v28  ;;  %v9756_v11 = vpop.eup %7431  ;;  %v10453_v47 = vld [vmem:[#allocation10_spill] sm:$0xff]  ;;  %v4284_v19 = vadd.f32 %v9662_v29, %v9660_v1 }
 0x579   : > { %v4152_v3 = vmul.f32 1.442695, %v4032_v7  ;;  %v4154_v5 = vmul.f32 1.442695, %v4033_v48  ;;  %v9762_v10 = vpop.eup %7433  ;;  %v4278_v7 = vadd.f32 %v9642_v50, %v9640_v8  ;;  %v10452_v48 = vld [vmem:[#allocation68_spill] sm:$0xff] }
 0x57a   : > { %v9758_v12 = vpop.permute.xlu1 %4548  ;;  %v4156_v38 = vmul.f32 1.442695, %v4034_v15  ;;  %v4158_v63 = vmul.f32 1.442695, %v4035_v33  ;;  %4273 = vadd.xlane.f32.xlu1 %v4272_v35  ;;  %v9764_v49 = vpop.eup %7435  ;;  %v4643_v30 = vpack.c.bf16 %v9762_v10, %v9756_v11  ;;  %v10454_v15 = vld [vmem:[#allocation71_spill] sm:$0xff]  ;;  %v10455_v33 = vld [vmem:[#allocation72_spill] sm:$0xff] }
 0x57b   : > { %7447 = vpow2.f32 %v4152_v3  ;;  %v9766_v18 = vpop.permute.xlu0 %4553  ;;  %v7438_v55 = vpop.eup %7437 }
 0x57c   : > { %7449 = vpow2.f32 %v4154_v5  ;;  %4276 = vadd.xlane.f32.xlu0 %v4275_v32  ;;  %4906 = vmatprep.mubr.bf16.mxu0 %v4643_v30  ;;  %v4642_v3 = vpack.c.bf16 %v9764_v49, %v7438_v55 }
 0x57d   : > { %7451 = vpow2.f32 %v4156_v38 }
 0x57e   : > { %7453 = vpow2.f32 %v4158_v63  ;;  %v3969_v26 = vpop.permute.xlu1 %3968  ;;  %4279 = vadd.xlane.f32.xlu1 %v4278_v7 }
 0x57f   : > { %v4036_v28 = vsub.f32 %v10452_v48, %v3969_v26  ;;  %v4037_v35 = vsub.f32 %v10453_v47, %v3969_v26  ;;  %v3974_v5 = vpop.permute.xlu0 %3973  ;;  %v4290_v26 = vadd.f32 %v9684_v0, %v9681_v52 }
 0x580   : > { %4282 = vadd.xlane.f32.xlu0 %v4281_v34  ;;  %v4038_v22 = vsub.f32 %v10454_v15, %v3974_v5  ;;  %v4039_v32 = vsub.f32 %v10455_v33, %v3974_v5  ;;  %4907 = vmatmul.mubr.bf16.gmra.mxu0 %v4642_v3  ;;  %v7440_v2 = vpop.eup %7439  ;;  %v4293_v34 = vadd.f32 %v9715_v59, %v9701_v51 }
 0x581   : > { %v4160_v8 = vmul.f32 1.442695, %v4036_v28  ;;  %v4162_v50 = vmul.f32 1.442695, %v4037_v35  ;;  %v7442_v38 = vpop.eup %7441  ;;  %v4296_v28 = vadd.f32 %v9708_v61, %v9705_v56  ;;  %v4299_v35 = vadd.f32 %v9742_v16, %v9728_v17 }
 0x582   : > { %v4164_v63 = vmul.f32 1.442695, %v4038_v22  ;;  %v4166_v30 = vmul.f32 1.442695, %v4039_v32  ;;  %4285 = vadd.xlane.f32.xlu1 %v4284_v19  ;;  %v7444_v7 = vpop.eup %7443  ;;  %v4645_v29 = vpack.c.bf16 %v7442_v38, %v7440_v2  ;;  %v4302_v51 = vadd.f32 %v9736_v36, %v9734_v24  ;;  %v9798_v15 = vpop.permute.xlu1 %5176 }
 0x583   : > { %7455 = vpow2.f32 %v4160_v8  ;;  %v7446_v1 = vpop.eup %7445  ;;  %v4305_v59 = vadd.f32 %v7438_v55, %v9756_v11  ;;  %v9794_v61 = vpop.permute.xlu0 %5181  ;;  %v4308_v17 = vadd.f32 %v9764_v49, %v9762_v10  ;;  %v4314_v36 = vadd.f32 %v7444_v7, %v7442_v38 }
 0x584   : > { %7457 = vpow2.f32 %v4162_v50  ;;  %4288 = vadd.xlane.f32.xlu0 %v4287_v41  ;;  %4914 = vmatprep.mubr.bf16.mxu0 %v4645_v29  ;;  %v4644_v31 = vpack.c.bf16 %v7444_v7, %v7446_v1  ;;  %v4311_v19 = vadd.f32 %v7446_v1, %v7440_v2 }
 0x585   : > { %7459 = vpow2.f32 %v4164_v63 }
 0x586   : > { %7461 = vpow2.f32 %v4166_v30  ;;  %4291 = vadd.xlane.f32.xlu1 %v4290_v26  ;;  %v9802_v33 = vpop.permute.xlu1 %4558 }
 0x587   : > { %v9800_v55 = vpop.permute.xlu0 %5191 }
 0x588   : > { %v7448_v45 = vpop.eup %7447  ;;  %4294 = vadd.xlane.f32.xlu0 %v4293_v34  ;;  %4915 = vmatmul.mubr.bf16.gmra.mxu0 %v4644_v31 }
 0x589   : > { %v7450_v48 = vpop.eup %7449 }
 0x58a   : > { %v7452_v47 = vpop.eup %7451  ;;  %4297 = vadd.xlane.f32.xlu1 %v4296_v28  ;;  %v4317_v11 = vadd.f32 %v7450_v48, %v7448_v45  ;;  %v9806_v2 = vpop.permute.xlu1 %5186 }
 0x58b   : > { %v7454_v3 = vpop.eup %7453  ;;  %v4646_v52 = vpack.c.bf16 %v7452_v47, %v7448_v45  ;;  %v9804_v49 = vpop.permute.xlu0 %5201 }
 0x58c   : > { %4300 = vadd.xlane.f32.xlu0 %v4299_v35  ;;  %v4647_v0 = vpack.c.bf16 %v7454_v3, %v7450_v48  ;;  %v4320_v22 = vadd.f32 %v7454_v3, %v7452_v47 }
 0x58e   : > { %4922 = vmatprep.mubr.bf16.mxu1 %v4647_v0  ;;  %4303 = vadd.xlane.f32.xlu1 %v4302_v51  ;;  %v9810_v38 = vpop.permute.xlu1 %5196 }
 0x58f   : > { %4923 = vmatmul.mubr.bf16.vlgmr.msra.gmra.mxu1 %v4646_v52  ;;  %v9808_v41 = vpop.permute.xlu0 %5211 }
 0x590   : > { %v7456_v5 = vpop.eup %7455  ;;  %4306 = vadd.xlane.f32.xlu0 %v4305_v59 }
 0x591   : > { %v7458_v56 = vpop.eup %7457 }
 0x592   : > { %v7460_v16 = vpop.eup %7459  ;;  %4309 = vadd.xlane.f32.xlu1 %v4308_v17  ;;  %v4323_v10 = vadd.f32 %v7458_v56, %v7456_v5  ;;  %v9814_v30 = vpop.permute.xlu1 %5206 }
 0x593   : > { %v7462_v8 = vpop.eup %7461  ;;  %v4648_v50 = vpack.c.bf16 %v7460_v16, %v7456_v5  ;;  %v9812_v63 = vpop.permute.xlu0 %5221 }
 0x594   : > { %4312 = vadd.xlane.f32.xlu0 %v4311_v19  ;;  %v4649_v24 = vpack.c.bf16 %v7462_v8, %v7458_v56  ;;  %v4326_v32 = vadd.f32 %v7462_v8, %v7460_v16  ;;  %v4394_v56 = vld [vmem:[#allocation4 + $0x100] sm:$0xff] }
 0x595   : > { %v4586_v8 = vmul.f32 %v9488_v60, %v4394_v56 }
 0x596   : > { %4930 = vmatprep.mubr.bf16.mxu1 %v4649_v24  ;;  %4315 = vadd.xlane.f32.xlu1 %v4314_v36  ;;  %v9818_v29 = vpop.permute.xlu1 %5216  ;;  %v4395_v24 = vld [vmem:[#allocation4 + $0x108] sm:$0xff] }
 0x597   : > { %4931 = vmatmul.mubr.bf16.gmra.mxu1 %v4648_v50  ;;  %v9816_v7 = vpop.permute.xlu0 %5231 }
 0x598   : > { %4318 = vadd.xlane.f32.xlu0 %v4317_v11 }
 0x59a   : > { %4321 = vadd.xlane.f32.xlu1 %v4320_v22  ;;  %v9822_v26 = vpop.permute.xlu1 %5226 }
 0x59b   : > { %v9820_v1 = vpop.permute.xlu0 %5241 }
 0x59c   : > { %4324 = vadd.xlane.f32.xlu0 %v4323_v10 }
 0x59e   : > { %4327 = vadd.xlane.f32.xlu1 %v4326_v32  ;;  %v9826_v31 = vpop.permute.xlu1 %5236  ;;  %v4587_v32 = vmul.f32 %v9497_v58, %v4395_v24  ;;  %v10469_v24 = vld [vmem:[#allocation80_spill] sm:$0xff] }
 0x59f   : > { %v9824_v34 = vpop.permute.xlu0 %5251  ;;  %10457 = vst [vmem:[#allocation48_spill] sm:$0xff] %v9826_v31 }
 0x5a0   : > { %10456 = vst [vmem:[#allocation46_spill] sm:$0xff] %v9824_v34 }
 0x5a2   : > { %v9830_v48 = vpop.permute.xlu1 %5246 }
 0x5a3   : > { %v9828_v45 = vpop.permute.xlu0 %5261  ;;  %10459 = vst [vmem:[#allocation57_spill] sm:$0xff] %v9830_v48 }
 0x5a4   : > { %10458 = vst [vmem:[#allocation50_spill] sm:$0xff] %v9828_v45 }
 0x5a6   : > { %v9834_v47 = vpop.permute.xlu1 %5256 }
 0x5a7   : > { %v9832_v28 = vpop.permute.xlu0 %5271  ;;  %10461 = vst [vmem:[#allocation60_spill] sm:$0xff] %v9834_v47 }
 0x5a8   : > { %10460 = vst [vmem:[#allocation52_spill] sm:$0xff] %v9832_v28 }
 0x5aa   : > { %v9838_v3 = vpop.permute.xlu1 %5266 }
 0x5ab   : > { %v9836_v35 = vpop.permute.xlu0 %5281  ;;  %10463 = vst [vmem:[#allocation63_spill] sm:$0xff] %v9838_v3  ;;  %v4396_v3 = vld [vmem:[#allocation4 + $0x110] sm:$0xff] }
 0x5ac   : > { %10462 = vst [vmem:[#allocation54_spill] sm:$0xff] %v9836_v35 }
 0x5ae   : > { %v9842_v0 = vpop.permute.xlu1 %5276 }
 0x5af   : > { %10465 = vst [vmem:[#allocation65_spill] sm:$0xff] %v9842_v0  ;;  %v10467_v0 = vld [vmem:[#allocation79_spill] sm:$0xff] }
 0x5b0   : > { %v9840_v52 = vpop.permute.xlu0 %5291  ;;  %v4202_v35 = vmul.f32 0.0, %v10467_v0 }
 0x5b1   : > { %10464 = vst [vmem:[#allocation69_spill] sm:$0xff] %v9840_v52 }
 0x5b2   : > { %v9846_v59 = vpop.permute.xlu1 %5286 }
 0x5b3   : > { %10466 = vst [vmem:[#allocation66_spill] sm:$0xff] %v9846_v59 }
 0x5b4   : > { %v9844_v51 = vpop.permute.xlu0 %4563 }
 0x5b6   : > { %v9850_v16 = vpop.permute.xlu1 %4568 }
 0x5b8   : > { %v9848_v5 = vpop.permute.xlu0 %4573 }
 0x5ba   : > { %v9856_v52 = vpop.permute.xlu1 %4578 }
 0x5bc   : > { %v9853_v36 = vpop.permute.xlu0 %4583 }
 0x5e0   : > { %v6665_v17 = vpop.f32.mrf.mxu0 }
 0x5e2   : > { %v6666_v19 = vpop.f32.mrf.mxu0 }
 0x5e3   : > { %v6667_v50 = vadd.f32 %v6666_v19, %v6665_v17  ;;  %v10468_v19 = vld [vmem:[#allocation78_spill] sm:$0xff] }
 0x5e4   : > { %v6668_v11 = vpop.f32.mrf.mxu0  ;;  %v4201_v45 = vmul.f32 0.0, %v10468_v19 }
 0x5e5   : > { %v4939_v22 = vadd.f32 %v6667_v50, %v4586_v8  ;;  %v4588_v8 = vmul.f32 %v9521_v37, %v4396_v3  ;;  %v10471_v3 = vld [vmem:[#allocation82_spill] sm:$0xff] }
 0x5e6   : > { %v6669_v10 = vpop.f32.mrf.mxu0 }
 0x5e7   : > { %4971 = vst.msk [vmem:[#allocation4 + $0x100] sm:$0xff] %vm898_vm0, %v4939_v22  ;;  %v6670_v59 = vadd.f32 %v6669_v10, %v6668_v11  ;;  %v4203_v22 = vmul.f32 0.0, %v10469_v24  ;;  %v4397_v11 = vld [vmem:[#allocation4 + $0x118] sm:$0xff] }
 0x5e8   : > { %v6671_v28 = vpop.f32.mrf.mxu0 }
 0x5e9   : > { %v4238_v47 = vpop.xlane.xlu0 %4237  ;;  %v4940_v60 = vadd.f32 %v6670_v59, %v4587_v32  ;;  %v4589_v32 = vmul.f32 %v9526_v21, %v4397_v11  ;;  %v10473_v11 = vld [vmem:[#allocation84_spill] sm:$0xff] }
 0x5ea   : > { %v4330_v56 = vadd.f32 %v4238_v47, %v4202_v35  ;;  %v6672_v17 = vpop.f32.mrf.mxu0  ;;  %v10470_v47 = vld [vmem:[#allocation81_spill] sm:$0xff] }
 0x5eb   : > { %4972 = vst.msk [vmem:[#allocation4 + $0x108] sm:$0xff] %vm898_vm0, %v4940_v60  ;;  %v6673_v58 = vadd.f32 %v6672_v17, %v6671_v28  ;;  %v4235_v50 = vpop.xlane.xlu1 %4234  ;;  %v4204_v35 = vmul.f32 0.0, %v10470_v47  ;;  %v4205_v60 = vmul.f32 0.0, %v10471_v3 }
 0x5ec   : > { %7463 = vrcp.f32 %v4330_v56  ;;  %v6674_v10 = vpop.f32.mrf.mxu0  ;;  %v4329_v0 = vadd.f32 %v4235_v50, %v4201_v45  ;;  %v4398_v56 = vld [vmem:[#allocation4 + $0x120] sm:$0xff] }
 0x5ed   : > { %v4241_v48 = vpop.xlane.xlu0 %4240  ;;  %v4941_v34 = vadd.f32 %v6673_v58, %v4588_v8  ;;  %v10472_v58 = vld [vmem:[#allocation83_spill] sm:$0xff] }
 0x5ee   : > { %v4331_v31 = vadd.f32 %v4241_v48, %v4203_v22  ;;  %v6675_v59 = vpop.f32.mrf.mxu0  ;;  %7465 = vrcp.f32 %v4329_v0  ;;  %v4206_v50 = vmul.f32 0.0, %v10472_v58  ;;  %v4590_v22 = vmul.f32 %v9538_v4, %v4398_v56  ;;  %v4399_v0 = vld [vmem:[#allocation4 + $0x128] sm:$0xff] }
 0x5ef   : > { %4973 = vst.msk [vmem:[#allocation4 + $0x110] sm:$0xff] %vm898_vm0, %v4941_v34  ;;  %v6676_v37 = vadd.f32 %v6675_v59, %v6674_v10  ;;  %v4244_v28 = vpop.xlane.xlu1 %4243  ;;  %v4207_v10 = vmul.f32 0.0, %v10473_v11 }
 0x5f0   : > { %v6677_v17 = vpop.f32.mrf.mxu0  ;;  %v4332_v19 = vadd.f32 %v4244_v28, %v4204_v35  ;;  %7467 = vrcp.f32 %v4331_v31  ;;  %v10474_v28 = vld [vmem:[#allocation85_spill] sm:$0xff] }
 0x5f1   : > { %v4247_v24 = vpop.xlane.xlu0 %4246  ;;  %v4942_v45 = vadd.f32 %v6676_v37, %v4589_v32  ;;  %v4208_v3 = vmul.f32 0.0, %v10474_v28 }
 0x5f2   : > { %v4333_v8 = vadd.f32 %v4247_v24, %v4205_v60  ;;  %7469 = vrcp.f32 %v4332_v19  ;;  %v6678_v48 = vpop.f32.mrf.mxu0  ;;  %v4591_v60 = vmul.f32 %v9541_v14, %v4399_v0 }
 0x5f3   : > { %4974 = vst.msk [vmem:[#allocation4 + $0x118] sm:$0xff] %vm898_vm0, %v4942_v45  ;;  %v6679_v21 = vadd.f32 %v6678_v48, %v6677_v17  ;;  %v4250_v34 = vpop.xlane.xlu1 %4249  ;;  %v10475_v17 = vld [vmem:[#allocation86_spill] sm:$0xff] }
 0x5f4   : > { %v6680_v59 = vpop.f32.mrf.mxu0  ;;  %v4334_v47 = vadd.f32 %v4250_v34, %v4206_v50  ;;  %7471 = vrcp.f32 %v4333_v8  ;;  %v4209_v19 = vmul.f32 0.0, %v10475_v17  ;;  %v4400_v45 = vld [vmem:[#allocation4 + $0x130] sm:$0xff]  ;;  %v10476_v34 = vld [vmem:[#allocation87_spill] sm:$0xff]  ;;  %v10478_v17 = vld [vmem:[#allocation89_spill] sm:$0xff] }
 0x5f5   : > { %v4253_v35 = vpop.xlane.xlu0 %4252  ;;  %v4943_v32 = vadd.f32 %v6679_v21, %v4590_v22  ;;  %v4210_v11 = vmul.f32 0.0, %v10476_v34 }
 0x5f6   : > { %v4335_v31 = vadd.f32 %v4253_v35, %v4207_v10  ;;  %7473 = vrcp.f32 %v4334_v47  ;;  %v6681_v37 = vpop.f32.mrf.mxu0  ;;  %v4592_v10 = vmul.f32 %v9549_v9, %v4400_v45  ;;  %v10477_v47 = vld [vmem:[#allocation88_spill] sm:$0xff] }
 0x5f7   : > { %4975 = vst.msk [vmem:[#allocation4 + $0x120] sm:$0xff] %vm898_vm0, %v4943_v32  ;;  %v6682_v4 = vadd.f32 %v6681_v37, %v6680_v59  ;;  %v4256_v56 = vpop.xlane.xlu1 %4255  ;;  %v4211_v35 = vmul.f32 0.0, %v10477_v47  ;;  %v4401_v32 = vld [vmem:[#allocation4 + $0x138] sm:$0xff] }
 0x5f8   : > { %v6683_v48 = vpop.f32.mrf.mxu0  ;;  %v4336_v58 = vadd.f32 %v4256_v56, %v4208_v3  ;;  %7475 = vrcp.f32 %v4335_v31 }
 0x5f9   : > { %v7464_v24 = vpop.eup %7463  ;;  %v4259_v50 = vpop.xlane.xlu0 %4258  ;;  %v4944_v8 = vadd.f32 %v6682_v4, %v4591_v60 }
 0x5fa   : > { %v4337_v22 = vadd.f32 %v4259_v50, %v4209_v19  ;;  %5429 = vperm.xlu0 %6837, %v7464_v24   ;;  %7477 = vrcp.f32 %v4336_v58  ;;  %v6684_v21 = vpop.f32.mrf.mxu0  ;;  %v4212_v19 = vmul.f32 0.0, %v10478_v17  ;;  %v4593_v24 = vmul.f32 %v9553_v62, %v4401_v32  ;;  %v10479_v58 = vld [vmem:[#allocation90_spill] sm:$0xff] }
 0x5fb   : > { %v7466_v14 = vpop.eup %7465  ;;  %4976 = vst.msk [vmem:[#allocation4 + $0x128] sm:$0xff] %vm898_vm0, %v4944_v8  ;;  %v6685_v0 = vadd.f32 %v6684_v21, %v6683_v48  ;;  %v4262_v59 = vpop.xlane.xlu1 %4261  ;;  %v4213_v50 = vmul.f32 0.0, %v10479_v58  ;;  %v4402_v8 = vld [vmem:[#allocation4 + $0x140] sm:$0xff] }
 0x5fc   : > { %v6686_v37 = vpop.f32.mrf.mxu0  ;;  %v4338_v28 = vadd.f32 %v4262_v59, %v4210_v11  ;;  %5424 = vperm.xlu1 %6838, %v7466_v14   ;;  %7479 = vrcp.f32 %v4337_v22  ;;  %v10480_v59 = vld [vmem:[#allocation91_spill] sm:$0xff] }
 0x5fd   : > { %v4265_v31 = vpop.xlane.xlu0 %4264  ;;  %v4945_v3 = vadd.f32 %v6685_v0, %v4592_v10  ;;  %v7468_v4 = vpop.eup %7467  ;;  %v4214_v62 = vmul.f32 0.0, %v10480_v59 }
 0x5fe   : > { %v4339_v60 = vadd.f32 %v4265_v31, %v4211_v35  ;;  %7481 = vrcp.f32 %v4338_v28  ;;  %v6687_v56 = vpop.f32.mrf.mxu0  ;;  %v4594_v35 = vmul.f32 %v9570_v27, %v4402_v8  ;;  %v10481_v28 = vld [vmem:[#allocation92_spill] sm:$0xff] }
 0x5ff   : > { %v7470_v9 = vpop.eup %7469  ;;  %4977 = vst.msk [vmem:[#allocation4 + $0x130] sm:$0xff] %vm898_vm0, %v4945_v3  ;;  %v6688_v45 = vadd.f32 %v6687_v56, %v6686_v37  ;;  %v4268_v48 = vpop.xlane.xlu1 %4267  ;;  %v4215_v31 = vmul.f32 0.0, %v10481_v28  ;;  %v4403_v3 = vld [vmem:[#allocation4 + $0x148] sm:$0xff] }
 0x600   : > { %v6689_v21 = vpop.f32.mrf.mxu0  ;;  %v4340_v34 = vadd.f32 %v4268_v48, %v4212_v19  ;;  %5434 = vperm.xlu1 %6838, %v7468_v4   ;;  %5439 = vperm.xlu0 %6837, %v7470_v9   ;;  %7483 = vrcp.f32 %v4339_v60  ;;  %v4595_v58 = vmul.f32 %v9577_v46, %v4403_v3  ;;  %v10485_v3 = vld [vmem:[#allocation96_spill] sm:$0xff] }
 0x601   : > { %v4271_v22 = vpop.xlane.xlu0 %4270  ;;  %v4946_v11 = vadd.f32 %v6688_v45, %v4593_v24  ;;  %v7472_v10 = vpop.eup %7471  ;;  %v10482_v45 = vld [vmem:[#allocation93_spill] sm:$0xff] }
 0x602   : > { %v4341_v14 = vadd.f32 %v4271_v22, %v4213_v50  ;;  %7485 = vrcp.f32 %v4340_v34  ;;  %v6690_v0 = vpop.f32.mrf.mxu0  ;;  %v4216_v27 = vmul.f32 0.0, %v10482_v45  ;;  %v4404_v22 = vld [vmem:[#allocation4 + $0x150] sm:$0xff] }
 0x603   : > { %v7474_v47 = vpop.eup %7473  ;;  %4978 = vst.msk [vmem:[#allocation4 + $0x138] sm:$0xff] %vm898_vm0, %v4946_v11  ;;  %v6691_v32 = vadd.f32 %v6690_v0, %v6689_v21  ;;  %v4274_v37 = vpop.xlane.xlu1 %4273  ;;  %v10483_v21 = vld [vmem:[#allocation94_spill] sm:$0xff] }
 0x604   : > { %v6692_v4 = vpop.f32.mrf.mxu0  ;;  %v4342_v56 = vadd.f32 %v4274_v37, %v4214_v62  ;;  %5444 = vperm.xlu1 %6838, %v7472_v10   ;;  %5449 = vperm.xlu0 %6837, %v7474_v47   ;;  %7487 = vrcp.f32 %v4341_v14  ;;  %v4217_v34 = vmul.f32 0.0, %v10483_v21  ;;  %v4596_v37 = vmul.f32 %v9598_v20, %v4404_v22 }
 0x605   : > { %v4277_v60 = vpop.xlane.xlu0 %4276  ;;  %v4947_v17 = vadd.f32 %v6691_v32, %v4594_v35  ;;  %v7476_v9 = vpop.eup %7475  ;;  %v10484_v35 = vld [vmem:[#allocation95_spill] sm:$0xff] }
 0x606   : > { %v4343_v19 = vadd.f32 %v4277_v60, %v4215_v31  ;;  %7489 = vrcp.f32 %v4342_v56  ;;  %v6693_v24 = vpop.f32.mrf.mxu0  ;;  %v4218_v46 = vmul.f32 0.0, %v10484_v35  ;;  %v4405_v56 = vld [vmem:[#allocation4 + $0x158] sm:$0xff] }
 0x607   : > { %v7478_v48 = vpop.eup %7477  ;;  %4979 = vst.msk [vmem:[#allocation4 + $0x140] sm:$0xff] %vm898_vm0, %v4947_v17  ;;  %v6694_v50 = vadd.f32 %v6693_v24, %v6692_v4  ;;  %v4280_v8 = vpop.xlane.xlu1 %4279  ;;  %v4219_v4 = vmul.f32 0.0, %v10485_v3  ;;  %v10489_v3 = vld [vmem:[#allocation43_spill] sm:$0xff] }
 0x608   : > { %v6695_v11 = vpop.f32.mrf.mxu0  ;;  %v4344_v10 = vadd.f32 %v4280_v8, %v4216_v27  ;;  %5454 = vperm.xlu1 %6838, %v7476_v9   ;;  %5459 = vperm.xlu0 %6837, %v7478_v48   ;;  %7491 = vrcp.f32 %v4343_v19  ;;  %v10486_v48 = vld [vmem:[#allocation97_spill] sm:$0xff] }
 0x609   : > { %v4283_v14 = vpop.xlane.xlu0 %4282  ;;  %v4948_v0 = vadd.f32 %v6694_v50, %v4595_v58  ;;  %v7480_v62 = vpop.eup %7479  ;;  %v4220_v20 = vmul.f32 0.0, %v10486_v48  ;;  %v4597_v50 = vmul.f32 %v9604_v44, %v4405_v56  ;;  %v4407_v56 = vld [vmem:[#allocation4 + $0x168] sm:$0xff]  ;;  %v10490_v48 = vld [vmem:[#allocation38_spill] sm:$0xff] }
 0x60a   : > { %v4345_v59 = vadd.f32 %v4283_v14, %v4217_v34  ;;  %7493 = vrcp.f32 %v4344_v10  ;;  %v6696_v47 = vpop.f32.mrf.mxu0  ;;  %v10487_v34 = vld [vmem:[#allocation98_spill] sm:$0xff] }
 0x60b   : > { %v7482_v32 = vpop.eup %7481  ;;  %4980 = vst.msk [vmem:[#allocation4 + $0x148] sm:$0xff] %vm898_vm0, %v4948_v0  ;;  %v6697_v28 = vadd.f32 %v6696_v47, %v6695_v11  ;;  %v4286_v31 = vpop.xlane.xlu1 %4285  ;;  %v4221_v22 = vmul.f32 0.0, %v10487_v34  ;;  %v4406_v11 = vld [vmem:[#allocation4 + $0x160] sm:$0xff] }
 0x60c   : > { %v6698_v60 = vpop.f32.mrf.mxu0  ;;  %v4346_v17 = vadd.f32 %v4286_v31, %v4218_v46  ;;  %5464 = vperm.xlu1 %6838, %v7480_v62   ;;  %5469 = vperm.xlu0 %6837, %v7482_v32   ;;  %7495 = vrcp.f32 %v4345_v59  ;;  %v10488_v46 = vld [vmem:[#allocation99_spill] sm:$0xff] }
 0x60d   : > { %v4289_v19 = vpop.xlane.xlu0 %4288  ;;  %v4949_v9 = vadd.f32 %v6697_v28, %v4596_v37  ;;  %v7484_v45 = vpop.eup %7483  ;;  %v4222_v44 = vmul.f32 0.0, %v10488_v46  ;;  %v4598_v37 = vmul.f32 %v9618_v39, %v4406_v11  ;;  %v4224_v39 = vmul.f32 0.0, %v10490_v48  ;;  %v4410_v48 = vld [vmem:[#allocation4 + $0x180] sm:$0xff] }
 0x60e   : > { %v4347_v24 = vadd.f32 %v4289_v19, %v4219_v4  ;;  %7497 = vrcp.f32 %v4346_v17  ;;  %v6699_v27 = vpop.f32.mrf.mxu0  ;;  %v4223_v4 = vmul.f32 0.0, %v10489_v3 }
 0x60f   : > { %v7486_v58 = vpop.eup %7485  ;;  %4981 = vst.msk [vmem:[#allocation4 + $0x150] sm:$0xff] %vm898_vm0, %v4949_v9  ;;  %v6700_v8 = vadd.f32 %v6699_v27, %v6698_v60  ;;  %v4292_v21 = vpop.xlane.xlu1 %4291 }
 0x610   : > { %v6701_v10 = vpop.f32.mrf.mxu0  ;;  %v4348_v14 = vadd.f32 %v4292_v21, %v4220_v20  ;;  %5474 = vperm.xlu1 %6838, %v7484_v45   ;;  %5479 = vperm.xlu0 %6837, %v7486_v58   ;;  %7499 = vrcp.f32 %v4347_v24  ;;  %v4599_v58 = vmul.f32 %v9624_v6, %v4407_v56  ;;  %v10491_v21 = vld [vmem:[#allocation40_spill] sm:$0xff]  ;;  %v4226_v6 = vmul.f32 0.0, %v9440_v13 }
 0x611   : > { %v4295_v0 = vpop.xlane.xlu0 %4294  ;;  %v4950_v59 = vadd.f32 %v6700_v8, %v4597_v50  ;;  %v7488_v47 = vpop.eup %7487  ;;  %v4225_v34 = vmul.f32 0.0, %v10491_v21 }
 0x612   : > { %v4349_v62 = vadd.f32 %v4295_v0, %v4221_v22  ;;  %7501 = vrcp.f32 %v4348_v14  ;;  %v6702_v35 = vpop.f32.mrf.mxu0  ;;  %v4408_v22 = vld [vmem:[#allocation4 + $0x170] sm:$0xff] }
 0x613   : > { %v7490_v32 = vpop.eup %7489  ;;  %4982 = vst.msk [vmem:[#allocation4 + $0x158] sm:$0xff] %vm898_vm0, %v4950_v59  ;;  %v6703_v28 = vadd.f32 %v6702_v35, %v6701_v10  ;;  %v4298_v31 = vpop.xlane.xlu1 %4297  ;;  %v4600_v46 = vmul.f32 %v9638_v23, %v4408_v22  ;;  %v4228_v23 = vmul.f32 0.0, %v9557_v57 }
 0x614   : > { %v6704_v60 = vpop.f32.mrf.mxu0  ;;  %v4350_v17 = vadd.f32 %v4298_v31, %v4222_v44  ;;  %5484 = vperm.xlu1 %6838, %v7488_v47   ;;  %5489 = vperm.xlu0 %6837, %v7490_v32   ;;  %7503 = vrcp.f32 %v4349_v62 }
 0x615   : > { %v4301_v19 = vpop.xlane.xlu0 %4300  ;;  %v4951_v9 = vadd.f32 %v6703_v28, %v4598_v37  ;;  %v7492_v45 = vpop.eup %7491  ;;  %v4227_v37 = vmul.f32 0.0, %v9467_v25  ;;  %v4409_v28 = vld [vmem:[#allocation4 + $0x178] sm:$0xff] }
 0x616   : > { %v4351_v24 = vadd.f32 %v4301_v19, %v4223_v4  ;;  %7505 = vrcp.f32 %v4350_v17  ;;  %v6705_v27 = vpop.f32.mrf.mxu0 }
 0x617   : > { %v7494_v20 = vpop.eup %7493  ;;  %4983 = vst.msk [vmem:[#allocation4 + $0x160] sm:$0xff] %vm898_vm0, %v4951_v9  ;;  %v6706_v50 = vadd.f32 %v6705_v27, %v6704_v60  ;;  %v4304_v8 = vpop.xlane.xlu1 %4303  ;;  %v4601_v9 = vmul.f32 %v9644_v42, %v4409_v28 }
 0x618   : > { %v6707_v11 = vpop.f32.mrf.mxu0  ;;  %v4352_v10 = vadd.f32 %v4304_v8, %v4224_v39  ;;  %5494 = vperm.xlu1 %6838, %v7492_v45   ;;  %5499 = vperm.xlu0 %6837, %v7494_v20   ;;  %7507 = vrcp.f32 %v4351_v24  ;;  %v10492_v45 = vld [vmem:[#allocation45_spill] sm:$0xff] }
 0x619   : > { %v4307_v14 = vpop.xlane.xlu0 %4306  ;;  %v4952_v0 = vadd.f32 %v6706_v50, %v4599_v58  ;;  %v7496_v62 = vpop.eup %7495  ;;  %v4229_v27 = vmul.f32 0.0, %v10492_v45 }
 0x61a   : > { %v4353_v59 = vadd.f32 %v4307_v14, %v4225_v34  ;;  %7509 = vrcp.f32 %v4352_v10  ;;  %v6708_v47 = vpop.f32.mrf.mxu0  ;;  %v10493_v34 = vld [vmem:[#allocation42_spill] sm:$0xff] }
 0x61b   : > { %v7498_v35 = vpop.eup %7497  ;;  %4984 = vst.msk [vmem:[#allocation4 + $0x168] sm:$0xff] %vm898_vm0, %v4952_v0  ;;  %v6709_v44 = vadd.f32 %v6708_v47, %v6707_v11  ;;  %v4310_v32 = vpop.xlane.xlu1 %4309  ;;  %v4230_v42 = vmul.f32 0.0, %v10493_v34  ;;  %v10494_v11 = vld [vmem:[#allocation44_spill] sm:$0xff]  ;;  %v4411_v47 = vld [vmem:[#allocation4 + $0x188] sm:$0xff] }
 0x61c   : > { %v6710_v31 = vpop.f32.mrf.mxu0  ;;  %v4354_v3 = vadd.f32 %v4310_v32, %v4226_v6  ;;  %5504 = vperm.xlu1 %6838, %v7496_v62   ;;  %5509 = vperm.xlu0 %6837, %v7498_v35   ;;  %7511 = vrcp.f32 %v4353_v59  ;;  %v4602_v10 = vmul.f32 %v10494_v11, %v4410_v48  ;;  %v10495_v59 = vld [vmem:[#allocation47_spill] sm:$0xff]  ;;  %v10498_v48 = vld [vmem:[#allocation53_spill] sm:$0xff] }
 0x61d   : > { %v4313_v4 = vpop.xlane.xlu0 %4312  ;;  %v4953_v56 = vadd.f32 %v6709_v44, %v4600_v46  ;;  %v7500_v17 = vpop.eup %7499  ;;  %v4231_v62 = vmul.f32 0.0, %v10495_v59 }
 0x61e   : > { %v4355_v60 = vadd.f32 %v4313_v4, %v4227_v37  ;;  %7513 = vrcp.f32 %v4354_v3  ;;  %v6711_v13 = vpop.f32.mrf.mxu0 }
 0x61f   : > { %v7502_v19 = vpop.eup %7501  ;;  %4985 = vst.msk [vmem:[#allocation4 + $0x170] sm:$0xff] %vm898_vm0, %v4953_v56  ;;  %v6712_v25 = vadd.f32 %v6711_v13, %v6710_v31  ;;  %v4316_v24 = vpop.xlane.xlu1 %4315  ;;  %v10496_v31 = vld [vmem:[#allocation49_spill] sm:$0xff]  ;;  %v10497_v56 = vld [vmem:[#allocation51_spill] sm:$0xff] }
 0x620   : > { %v6713_v39 = vpop.f32.mrf.mxu0  ;;  %v4356_v20 = vadd.f32 %v4316_v24, %v4228_v23  ;;  %5514 = vperm.xlu1 %6838, %v7500_v17   ;;  %5519 = vperm.xlu0 %6837, %v7502_v19   ;;  %7515 = vrcp.f32 %v4355_v60  ;;  %v4232_v3 = vmul.f32 0.0, %v10496_v31  ;;  %v4603_v60 = vmul.f32 %v10497_v56, %v4411_v47  ;;  %v4412_v23 = vld [vmem:[#allocation4 + $0x190] sm:$0xff] }
 0x621   : > { %v4319_v58 = vpop.xlane.xlu0 %4318  ;;  %v4954_v50 = vadd.f32 %v6712_v25, %v4601_v9  ;;  %v7504_v21 = vpop.eup %7503  ;;  %v4416_v56 = vld [vmem:[#allocation4 + $0x1b0] sm:$0xff] }
 0x622   : > { %v4357_v8 = vadd.f32 %v4319_v58, %v4229_v27  ;;  %7517 = vrcp.f32 %v4356_v20  ;;  %v6714_v57 = vpop.f32.mrf.mxu0  ;;  %v4413_v58 = vld [vmem:[#allocation4 + $0x198] sm:$0xff] }
 0x623   : > { %v7506_v22 = vpop.eup %7505  ;;  %4986 = vst.msk [vmem:[#allocation4 + $0x178] sm:$0xff] %vm898_vm0, %v4954_v50  ;;  %v6715_v14 = vadd.f32 %v6714_v57, %v6713_v39  ;;  %v4322_v0 = vpop.xlane.xlu1 %4321  ;;  %v4604_v39 = vmul.f32 %v10498_v48, %v4412_v23 }
 0x624   : > { %v6716_v6 = vpop.f32.mrf.mxu0  ;;  %v4358_v35 = vadd.f32 %v4322_v0, %v4230_v42  ;;  %5524 = vperm.xlu1 %6838, %v7504_v21   ;;  %5529 = vperm.xlu0 %6837, %v7506_v22   ;;  %7519 = vrcp.f32 %v4357_v8  ;;  %v10499_v42 = vld [vmem:[#allocation55_spill] sm:$0xff] }
 0x625   : > { %v4325_v46 = vpop.xlane.xlu0 %4324  ;;  %v4955_v44 = vadd.f32 %v6715_v14, %v4602_v10  ;;  %v7508_v37 = vpop.eup %7507  ;;  %v4605_v22 = vmul.f32 %v10499_v42, %v4413_v58  ;;  %v4414_v10 = vld [vmem:[#allocation4 + $0x1a0] sm:$0xff]  ;;  %v4420_v42 = vld [vmem:[#allocation4 + $0x1d0] sm:$0xff] }
 0x626   : > { %v4359_v32 = vadd.f32 %v4325_v46, %v4231_v62  ;;  %7521 = vrcp.f32 %v4358_v35  ;;  %v6717_v28 = vpop.f32.mrf.mxu0  ;;  %v4415_v46 = vld [vmem:[#allocation4 + $0x1a8] sm:$0xff] }
 0x627   : > { %v7510_v4 = vpop.eup %7509  ;;  %4987 = vst.msk [vmem:[#allocation4 + $0x180] sm:$0xff] %vm898_vm0, %v4955_v44  ;;  %v6718_v17 = vadd.f32 %v6717_v28, %v6716_v6  ;;  %v4328_v13 = vpop.xlane.xlu1 %4327  ;;  %v4606_v6 = vmul.f32 %v9703_v43, %v4414_v10 }
 0x628   : > { %v6719_v19 = vpop.f32.mrf.mxu0  ;;  %v4360_v9 = vadd.f32 %v4328_v13, %v4232_v3  ;;  %5534 = vperm.xlu1 %6838, %v7508_v37   ;;  %5539 = vperm.xlu0 %6837, %v7510_v4   ;;  %7523 = vrcp.f32 %v4359_v32  ;;  %v4607_v3 = vmul.f32 %v9710_v40, %v4415_v46  ;;  %v4608_v13 = vmul.f32 %v9730_v53, %v4416_v56 }
 0x629   : > { %v4956_v25 = vadd.f32 %v6718_v17, %v4603_v60  ;;  %v7512_v24 = vpop.eup %7511 }
 0x62a   : > { %7525 = vrcp.f32 %v4360_v9  ;;  %v6720_v45 = vpop.f32.mrf.mxu0 }
 0x62b   : > { %v7514_v27 = vpop.eup %7513  ;;  %4988 = vst.msk [vmem:[#allocation4 + $0x188] sm:$0xff] %vm898_vm0, %v4956_v25  ;;  %v6721_v20 = vadd.f32 %v6720_v45, %v6719_v19  ;;  %v4417_v19 = vld [vmem:[#allocation4 + $0x1b8] sm:$0xff] }
 0x62c   : > { %v6722_v50 = vpop.f32.mrf.mxu0  ;;  %5544 = vperm.xlu1 %6838, %v7512_v24   ;;  %5549 = vperm.xlu0 %6837, %v7514_v27   ;;  %v4609_v40 = vmul.f32 %v9738_v54, %v4417_v19  ;;  %v4418_v27 = vld [vmem:[#allocation4 + $0x1c0] sm:$0xff]  ;;  %v4425_v19 = vld [vmem:[#allocation4 + $0x1f8] sm:$0xff] }
 0x62d   : > { %v4957_v8 = vadd.f32 %v6721_v20, %v4604_v39  ;;  %v7516_v21 = vpop.eup %7515  ;;  %v4610_v58 = vmul.f32 %v9758_v12, %v4418_v27 }
 0x62e   : > { %v6723_v57 = vpop.f32.mrf.mxu0 }
 0x62f   : > { %v7518_v34 = vpop.eup %7517  ;;  %4989 = vst.msk [vmem:[#allocation4 + $0x190] sm:$0xff] %vm898_vm0, %v4957_v8  ;;  %v6724_v11 = vadd.f32 %v6723_v57, %v6722_v50  ;;  %v4419_v50 = vld [vmem:[#allocation4 + $0x1c8] sm:$0xff] }
 0x630   : > { %v6725_v14 = vpop.f32.mrf.mxu0  ;;  %5554 = vperm.xlu1 %6838, %v7516_v21   ;;  %5559 = vperm.xlu0 %6837, %v7518_v34   ;;  %v4611_v34 = vmul.f32 %v9766_v18, %v4419_v50  ;;  %v5393_v50 = vld [vmem:[#allocation4 + $0x118] sm:$0xff] }
 0x631   : > { %v4958_v0 = vadd.f32 %v6724_v11, %v4605_v22  ;;  %v7520_v59 = vpop.eup %7519 }
 0x632   : > { %v6726_v62 = vpop.f32.mrf.mxu0 }
 0x633   : > { %v7522_v47 = vpop.eup %7521  ;;  %4990 = vst.msk [vmem:[#allocation4 + $0x198] sm:$0xff] %vm898_vm0, %v4958_v0  ;;  %v6727_v35 = vadd.f32 %v6726_v62, %v6725_v14  ;;  %v4612_v14 = vmul.f32 %v9802_v33, %v4420_v42  ;;  %v4421_v0 = vld [vmem:[#allocation4 + $0x1d8] sm:$0xff]  ;;  %v4423_v33 = vld [vmem:[#allocation4 + $0x1e8] sm:$0xff] }
 0x634   : > { %v6728_v44 = vpop.f32.mrf.mxu0  ;;  %5564 = vperm.xlu1 %6838, %v7520_v59   ;;  %5569 = vperm.xlu0 %6837, %v7522_v47   ;;  %v4422_v47 = vld [vmem:[#allocation4 + $0x1e0] sm:$0xff]  ;;  %v4613_v18 = vmul.f32 %v9844_v51, %v4421_v0  ;;  %v4615_v56 = vmul.f32 %v9848_v5, %v4423_v33  ;;  %v4424_v51 = vld [vmem:[#allocation4 + $0x1f0] sm:$0xff]  ;;  %v5395_v42 = vld [vmem:[#allocation4 + $0x128] sm:$0xff] }
 0x635   : > { %v4959_v32 = vadd.f32 %v6727_v35, %v4606_v6  ;;  %v7524_v37 = vpop.eup %7523 }
 0x636   : > { %v6729_v28 = vpop.f32.mrf.mxu0 }
 0x637   : > { %v7526_v31 = vpop.eup %7525  ;;  %4991 = vst.msk [vmem:[#allocation4 + $0x1a0] sm:$0xff] %vm898_vm0, %v4959_v32  ;;  %v6730_v4 = vadd.f32 %v6729_v28, %v6728_v44  ;;  %v4614_v32 = vmul.f32 %v9850_v16, %v4422_v47  ;;  %v5396_v47 = vld [vmem:[#allocation4 + $0x130] sm:$0xff] }
 0x638   : > { %v6731_v60 = vpop.f32.mrf.mxu0  ;;  %5574 = vperm.xlu1 %6838, %v7524_v37   ;;  %5579 = vperm.xlu0 %6837, %v7526_v31  }
 0x639   : > { %v4960_v43 = vadd.f32 %v6730_v4, %v4607_v3 }
 0x63a   : > { %v6732_v17 = vpop.f32.mrf.mxu0 }
 0x63b   : > { %4992 = vst.msk [vmem:[#allocation4 + $0x1a8] sm:$0xff] %vm898_vm0, %v4960_v43  ;;  %v6733_v23 = vadd.f32 %v6732_v17, %v6731_v60 }
 0x63c   : > { %v6734_v9 = vpop.f32.mrf.mxu0 }
 0x63d   : > { %v4961_v25 = vadd.f32 %v6733_v23, %v4608_v13  ;;  %v4616_v23 = vmul.f32 %v9856_v52, %v4424_v51 }
 0x63e   : > { %v6735_v24 = vpop.f32.mrf.mxu0 }
 0x63f   : > { %4993 = vst.msk [vmem:[#allocation4 + $0x1b0] sm:$0xff] %vm898_vm0, %v4961_v25  ;;  %v6736_v45 = vadd.f32 %v6735_v24, %v6734_v9 }
 0x640   : > { %v6737_v48 = vpop.f32.mrf.mxu0 }
 0x641   : > { %v4962_v39 = vadd.f32 %v6736_v45, %v4609_v40  ;;  %v4617_v40 = vmul.f32 %v9853_v36, %v4425_v19  ;;  %v5402_v19 = vld [vmem:[#allocation4 + $0x160] sm:$0xff] }
 0x642   : > { %v6738_v20 = vpop.f32.mrf.mxu0 }
 0x643   : > { %4994 = vst.msk [vmem:[#allocation4 + $0x1b8] sm:$0xff] %vm898_vm0, %v4962_v39  ;;  %v6739_v53 = vadd.f32 %v6738_v20, %v6737_v48  ;;  %v5391_v48 = vld [vmem:[#allocation4 + $0x108] sm:$0xff]  ;;  %v5390_v39 = vld [vmem:[#allocation4 + $0x100] sm:$0xff] }
 0x644   : > { %v6740_v8 = vpop.f32.mrf.mxu0 }
 0x645   : > { %v4963_v21 = vadd.f32 %v6739_v53, %v4610_v58 }
 0x646   : > { %v6741_v57 = vpop.f32.mrf.mxu0 }
 0x647   : > { %4995 = vst.msk [vmem:[#allocation4 + $0x1c0] sm:$0xff] %vm898_vm0, %v4963_v21  ;;  %v6742_v54 = vadd.f32 %v6741_v57, %v6740_v8  ;;  %v5392_v21 = vld [vmem:[#allocation4 + $0x110] sm:$0xff] }
 0x648   : > { %v6743_v22 = vpop.f32.mrf.mxu0 }
 0x649   : > { %v4964_v11 = vadd.f32 %v6742_v54, %v4611_v34 }
 0x64a   : > { %v6744_v10 = vpop.f32.mrf.mxu0 }
 0x64b   : > { %4996 = vst.msk [vmem:[#allocation4 + $0x1c8] sm:$0xff] %vm898_vm0, %v4964_v11  ;;  %v6745_v12 = vadd.f32 %v6744_v10, %v6743_v22  ;;  %v5394_v11 = vld [vmem:[#allocation4 + $0x120] sm:$0xff] }
 0x64c   : > { %v6746_v59 = vpop.f32.mrf.mxu0 }
 0x64d   : > { %v4965_v62 = vadd.f32 %v6745_v12, %v4612_v14 }
 0x64e   : > { %v6747_v6 = vpop.f32.mrf.mxu0 }
 0x64f   : > { %v6749_v35 = vpop.f32.mrf.mxu1  ;;  %4997 = vst.msk [vmem:[#allocation4 + $0x1d0] sm:$0xff] %vm898_vm0, %v4965_v62  ;;  %v6748_v46 = vadd.f32 %v6747_v6, %v6746_v59  ;;  %v5397_v59 = vld [vmem:[#allocation4 + $0x138] sm:$0xff] }
 0x651   : > { %v6750_v44 = vpop.f32.mrf.mxu1  ;;  %v4966_v37 = vadd.f32 %v6748_v46, %v4613_v18 }
 0x652   : > { %v6751_v28 = vadd.f32 %v6750_v44, %v6749_v35  ;;  %v5399_v44 = vld [vmem:[#allocation4 + $0x148] sm:$0xff] }
 0x653   : > { %v6752_v31 = vpop.f32.mrf.mxu1  ;;  %4998 = vst.msk [vmem:[#allocation4 + $0x1d8] sm:$0xff] %vm898_vm0, %v4966_v37  ;;  %v5398_v37 = vld [vmem:[#allocation4 + $0x140] sm:$0xff] }
 0x654   : > { %v4967_v3 = vadd.f32 %v6751_v28, %v4614_v32 }
 0x655   : > { %v6753_v4 = vpop.f32.mrf.mxu1 }
 0x656   : > { %4999 = vst.msk [vmem:[#allocation4 + $0x1e0] sm:$0xff] %vm898_vm0, %v4967_v3  ;;  %v6754_v60 = vadd.f32 %v6753_v4, %v6752_v31  ;;  %v5401_v4 = vld [vmem:[#allocation4 + $0x158] sm:$0xff] }
 0x657   : > { %v6755_v43 = vpop.f32.mrf.mxu1 }
 0x658   : > { %v4968_v17 = vadd.f32 %v6754_v60, %v4615_v56  ;;  %v5400_v60 = vld [vmem:[#allocation4 + $0x150] sm:$0xff] }
 0x659   : > { %v6756_v13 = vpop.f32.mrf.mxu1 }
 0x65a   : > { %5000 = vst.msk [vmem:[#allocation4 + $0x1e8] sm:$0xff] %vm898_vm0, %v4968_v17  ;;  %v6757_v16 = vadd.f32 %v6756_v13, %v6755_v43 }
 0x65b   : > { %v6758_v9 = vpop.f32.mrf.mxu1 }
 0x65c   : > { %v4969_v25 = vadd.f32 %v6757_v16, %v4616_v23  ;;  %v5403_v23 = vld [vmem:[#allocation4 + $0x168] sm:$0xff] }
 0x65d   : > { %v6759_v24 = vpop.f32.mrf.mxu1 }
 0x65e   : > { %5001 = vst.msk [vmem:[#allocation4 + $0x1f0] sm:$0xff] %vm898_vm0, %v4969_v25  ;;  %v6760_v5 = vadd.f32 %v6759_v24, %v6758_v9 }
 0x660   : > { %v4970_v45 = vadd.f32 %v6760_v5, %v4617_v40  ;;  %v5405_v5 = vld [vmem:[#allocation4 + $0x178] sm:$0xff] }
 0x662   : > { %5002 = vst.msk [vmem:[#allocation4 + $0x1f8] sm:$0xff] %vm898_vm0, %v4970_v45 }
 0x675   : > { %v5430_v27 = vpop.permute.xlu0 %5429 }
 0x676   : > { %v5583_v52 = vmul.f32 %v5430_v27, %v5391_v48  ;;  %v5404_v27 = vld [vmem:[#allocation4 + $0x170] sm:$0xff] }
 0x677   : > { %v5425_v20 = vpop.permute.xlu1 %5424 }
 0x678   : > { %v5582_v58 = vmul.f32 %v5425_v20, %v5390_v39 }
 0x67a   : > { %v6839_v53 = vpack.i.bf16 %v5583_v52, %v5582_v58  ;;  %v5407_v58 = vld [vmem:[#allocation4 + $0x188] sm:$0xff] }
 0x67b   : > { %v5440_v8 = vpop.permute.xlu0 %5439  ;;  %v5435_v57 = vpop.permute.xlu1 %5434 }
 0x67c   : > { %v5585_v34 = vmul.f32 %v5440_v8, %v5393_v50  ;;  %v5584_v54 = vmul.f32 %v5435_v57, %v5392_v21  ;;  %6840 = vrot.lane.b32.xlu1 %v6839_v53, %s7567_s26  ;;  %v5406_v50 = vld [vmem:[#allocation4 + $0x180] sm:$0xff] }
 0x67e   : > { %v6844_v36 = vpack.i.bf16 %v5585_v34, %v5584_v54  ;;  %v5409_v54 = vld [vmem:[#allocation4 + $0x198] sm:$0xff] }
 0x67f   : > { %v5450_v22 = vpop.permute.xlu0 %5449  ;;  %v5445_v10 = vpop.permute.xlu1 %5444 }
 0x680   : > { %v5587_v14 = vmul.f32 %v5450_v22, %v5395_v42  ;;  %v5586_v12 = vmul.f32 %v5445_v10, %v5394_v11  ;;  %6845 = vrot.lane.b32.xlu0 %v6844_v36, %s7567_s26  ;;  %v5408_v42 = vld [vmem:[#allocation4 + $0x190] sm:$0xff] }
 0x682   : > { %v6849_v0 = vpack.i.bf16 %v5587_v14, %v5586_v12  ;;  %v5411_v12 = vld [vmem:[#allocation4 + $0x1a8] sm:$0xff] }
 0x683   : > { %v5460_v62 = vpop.permute.xlu0 %5459  ;;  %v5455_v6 = vpop.permute.xlu1 %5454 }
 0x684   : > { %v5589_v35 = vmul.f32 %v5460_v62, %v5397_v59  ;;  %v5588_v18 = vmul.f32 %v5455_v6, %v5396_v47  ;;  %6850 = vrot.lane.b32.xlu1 %v6849_v0, %s7567_s26  ;;  %v5410_v59 = vld [vmem:[#allocation4 + $0x1a0] sm:$0xff] }
 0x686   : > { %v6854_v46 = vpack.i.bf16 %v5589_v35, %v5588_v18  ;;  %v5413_v18 = vld [vmem:[#allocation4 + $0x1b8] sm:$0xff] }
 0x687   : > { %v5470_v32 = vpop.permute.xlu0 %5469  ;;  %v5465_v28 = vpop.permute.xlu1 %5464 }
 0x688   : > { %v5591_v33 = vmul.f32 %v5470_v32, %v5399_v44  ;;  %v5590_v31 = vmul.f32 %v5465_v28, %v5398_v37  ;;  %6855 = vrot.lane.b32.xlu0 %v6854_v46, %s7567_s26  ;;  %v5412_v44 = vld [vmem:[#allocation4 + $0x1b0] sm:$0xff] }
 0x68a   : > { %v6859_v3 = vpack.i.bf16 %v5591_v33, %v5590_v31  ;;  %v5415_v31 = vld [vmem:[#allocation4 + $0x1c8] sm:$0xff] }
 0x68b   : > { %v5480_v56 = vpop.permute.xlu0 %5479  ;;  %v5475_v51 = vpop.permute.xlu1 %5474 }
 0x68c   : > { %v5593_v43 = vmul.f32 %v5480_v56, %v5401_v4  ;;  %v5592_v17 = vmul.f32 %v5475_v51, %v5400_v60  ;;  %6860 = vrot.lane.b32.xlu1 %v6859_v3, %s7567_s26  ;;  %v5414_v4 = vld [vmem:[#allocation4 + $0x1c0] sm:$0xff] }
 0x68e   : > { %v6864_v13 = vpack.i.bf16 %v5593_v43, %v5592_v17  ;;  %v5417_v17 = vld [vmem:[#allocation4 + $0x1d8] sm:$0xff] }
 0x68f   : > { %v5490_v16 = vpop.permute.xlu0 %5489  ;;  %v5485_v9 = vpop.permute.xlu1 %5484 }
 0x690   : > { %v5595_v25 = vmul.f32 %v5490_v16, %v5403_v23  ;;  %v5594_v24 = vmul.f32 %v5485_v9, %v5402_v19  ;;  %6865 = vrot.lane.b32.xlu0 %v6864_v13, %s7567_s26  ;;  %v5416_v23 = vld [vmem:[#allocation4 + $0x1d0] sm:$0xff] }
 0x692   : > { %v6869_v40 = vpack.i.bf16 %v5595_v25, %v5594_v24  ;;  %v5419_v24 = vld [vmem:[#allocation4 + $0x1e8] sm:$0xff] }
 0x693   : > { %v5500_v45 = vpop.permute.xlu0 %5499  ;;  %v5495_v48 = vpop.permute.xlu1 %5494 }
 0x694   : > { %v5597_v39 = vmul.f32 %v5500_v45, %v5405_v5  ;;  %v5596_v20 = vmul.f32 %v5495_v48, %v5404_v27  ;;  %6870 = vrot.lane.b32.xlu1 %v6869_v40, %s7567_s26  ;;  %v5418_v5 = vld [vmem:[#allocation4 + $0x1e0] sm:$0xff] }
 0x696   : > { %v6874_v52 = vpack.i.bf16 %v5597_v39, %v5596_v20  ;;  %v5421_v20 = vld [vmem:[#allocation4 + $0x1f8] sm:$0xff] }
 0x697   : > { %v5510_v53 = vpop.permute.xlu0 %5509  ;;  %v5505_v8 = vpop.permute.xlu1 %5504 }
 0x698   : > { %v5599_v21 = vmul.f32 %v5510_v53, %v5407_v58  ;;  %v5598_v57 = vmul.f32 %v5505_v8, %v5406_v50  ;;  %6875 = vrot.lane.b32.xlu0 %v6874_v52, %s7567_s26  ;;  %v5420_v58 = vld [vmem:[#allocation4 + $0x1f0] sm:$0xff] }
 0x69a   : > { %v6879_v34 = vpack.i.bf16 %v5599_v21, %v5598_v57  ;;  %v5103_v57 = vld [vmem:[#allocation4 + $0x8] sm:$0xff] }
 0x69b   : > { %v5520_v36 = vpop.permute.xlu0 %5519  ;;  %v5515_v22 = vpop.permute.xlu1 %5514 }
 0x69c   : > { %v5601_v11 = vmul.f32 %v5520_v36, %v5409_v54  ;;  %v5600_v10 = vmul.f32 %v5515_v22, %v5408_v42  ;;  %6880 = vrot.lane.b32.xlu1 %v6879_v34, %s7567_s26  ;;  %v5102_v34 = vld [vmem:[#allocation4] sm:$0xff]  ;;  %v10500_v36 = vld [vmem:[#allocation11_spill] sm:$0xff]  ;;  %v10501_v22 = vld [vmem:[#allocation9_spill] sm:$0xff] }
 0x69d   : > { %v5295_v42 = vmul.f32 %v10500_v36, %v5103_v57 }
 0x69e   : > { %v6884_v14 = vpack.i.bf16 %v5601_v11, %v5600_v10  ;;  %v5294_v11 = vmul.f32 %v10501_v22, %v5102_v34 }
 0x69f   : > { %v5530_v0 = vpop.permute.xlu0 %5529  ;;  %v5525_v62 = vpop.permute.xlu1 %5524 }
 0x6a0   : > { %v5603_v47 = vmul.f32 %v5530_v0, %v5411_v12  ;;  %v5602_v6 = vmul.f32 %v5525_v62, %v5410_v59  ;;  %6885 = vrot.lane.b32.xlu0 %v6884_v14, %s7567_s26  ;;  %v5105_v59 = vld [vmem:[#allocation4 + $0x18] sm:$0xff]  ;;  %v5104_v62 = vld [vmem:[#allocation4 + $0x10] sm:$0xff] }
 0x6a2   : > { %v6889_v35 = vpack.i.bf16 %v5603_v47, %v5602_v6 }
 0x6a3   : > { %v5540_v46 = vpop.permute.xlu0 %5539  ;;  %v5535_v32 = vpop.permute.xlu1 %5534 }
 0x6a4   : > { %v5605_v37 = vmul.f32 %v5540_v46, %v5413_v18  ;;  %v5604_v28 = vmul.f32 %v5535_v32, %v5412_v44  ;;  %6890 = vrot.lane.b32.xlu1 %v6889_v35, %s7567_s26  ;;  %v10502_v35 = vld [vmem:[#allocation73_spill] sm:$0xff]  ;;  %v10503_v46 = vld [vmem:[#allocation8_spill] sm:$0xff] }
 0x6a5   : > { %v5297_v18 = vmul.f32 %v10502_v35, %v5105_v59  ;;  %v5296_v44 = vmul.f32 %v10503_v46, %v5104_v62  ;;  %v5114_v35 = vld [vmem:[#allocation4 + $0x60] sm:$0xff] }
 0x6a6   : > { %v6894_v33 = vpack.i.bf16 %v5605_v37, %v5604_v28 }
 0x6a7   : > { %v5550_v3 = vpop.permute.xlu0 %5549  ;;  %v5545_v56 = vpop.permute.xlu1 %5544 }
 0x6a8   : > { %v5607_v60 = vmul.f32 %v5550_v3, %v5415_v31  ;;  %v5606_v51 = vmul.f32 %v5545_v56, %v5414_v4  ;;  %6895 = vrot.lane.b32.xlu0 %v6894_v33, %s7567_s26  ;;  %v5107_v31 = vld [vmem:[#allocation4 + $0x28] sm:$0xff]  ;;  %v5106_v3 = vld [vmem:[#allocation4 + $0x20] sm:$0xff] }
 0x6aa   : > { %v6899_v43 = vpack.i.bf16 %v5607_v60, %v5606_v51  ;;  %v10504_v60 = vld [vmem:[#allocation75_spill] sm:$0xff] }
 0x6ab   : > { %v5560_v13 = vpop.permute.xlu0 %5559  ;;  %v5555_v16 = vpop.permute.xlu1 %5554  ;;  %v5299_v51 = vmul.f32 %v10504_v60, %v5107_v31  ;;  %v5116_v31 = vld [vmem:[#allocation4 + $0x70] sm:$0xff] }
 0x6ac   : > { %v5609_v19 = vmul.f32 %v5560_v13, %v5417_v17  ;;  %v5608_v9 = vmul.f32 %v5555_v16, %v5416_v23  ;;  %6900 = vrot.lane.b32.xlu1 %v6899_v43, %s7567_s26  ;;  %v10505_v43 = vld [vmem:[#allocation74_spill] sm:$0xff]  ;;  %v5308_v60 = vmul.f32 %v9814_v30, %v5116_v31  ;;  %v5129_v31 = vld [vmem:[#allocation4 + $0xd8] sm:$0xff] }
 0x6ad   : > { %v5298_v17 = vmul.f32 %v10505_v43, %v5106_v3 }
 0x6ae   : > { %v6904_v25 = vpack.i.bf16 %v5609_v19, %v5608_v9  ;;  %v5109_v9 = vld [vmem:[#allocation4 + $0x38] sm:$0xff] }
 0x6af   : > { %v5570_v40 = vpop.permute.xlu0 %5569  ;;  %v5565_v45 = vpop.permute.xlu1 %5564 }
 0x6b0   : > { %v5611_v27 = vmul.f32 %v5570_v40, %v5419_v24  ;;  %v5610_v48 = vmul.f32 %v5565_v45, %v5418_v5  ;;  %6905 = vrot.lane.b32.xlu0 %v6904_v25, %s7567_s26  ;;  %v5108_v25 = vld [vmem:[#allocation4 + $0x30] sm:$0xff]  ;;  %v10506_v5 = vld [vmem:[#allocation77_spill] sm:$0xff] }
 0x6b1   : > { %v5301_v45 = vmul.f32 %v10506_v5, %v5109_v9  ;;  %v5120_v5 = vld [vmem:[#allocation4 + $0x90] sm:$0xff] }
 0x6b2   : > { %v6909_v39 = vpack.i.bf16 %v5611_v27, %v5610_v48  ;;  %v10507_v27 = vld [vmem:[#allocation76_spill] sm:$0xff] }
 0x6b3   : > { %v5580_v52 = vpop.permute.xlu0 %5579  ;;  %v5575_v53 = vpop.permute.xlu1 %5574  ;;  %v5300_v48 = vmul.f32 %v10507_v27, %v5108_v25 }
 0x6b4   : > { %v5613_v50 = vmul.f32 %v5580_v52, %v5421_v20  ;;  %v5612_v8 = vmul.f32 %v5575_v53, %v5420_v58  ;;  %6910 = vrot.lane.b32.xlu1 %v6909_v39, %s7567_s26  ;;  %v5110_v53 = vld [vmem:[#allocation4 + $0x40] sm:$0xff] }
 0x6b5   : > { %v5302_v57 = vmul.f32 %v9798_v15, %v5110_v53  ;;  %v5122_v53 = vld [vmem:[#allocation4 + $0xa0] sm:$0xff] }
 0x6b6   : > { %v6914_v21 = vpack.i.bf16 %v5613_v50, %v5612_v8  ;;  %v5111_v50 = vld [vmem:[#allocation4 + $0x48] sm:$0xff] }
 0x6b7   : > { %v5303_v34 = vmul.f32 %v9794_v61, %v5111_v50 }
 0x6b8   : > { %6915 = vrot.lane.b32.xlu0 %v6914_v21, %s7567_s26 }
 0x6ee   : > { %v6841_v54 = vpop.permute.xlu1 %6840 }
 0x6ef   : > { %v6843_v10 = vunpack.i.h.bf16 %v6841_v54  ;;  %v6842_v14 = vunpack.i.l.bf16 %v6841_v54 }
 0x6f1   : > { %v5743_v12 = vsel %vm898_vm0, %v5295_v42, %v6843_v10  ;;  %v5742_v0 = vsel %vm898_vm0, %v5294_v11, %v6842_v14  ;;  %v5113_v11 = vld [vmem:[#allocation4 + $0x58] sm:$0xff]  ;;  %v5112_v10 = vld [vmem:[#allocation4 + $0x50] sm:$0xff] }
 0x6f2   : > { %v6349_v47 = vpack.c.bf16 %v5743_v12, %v5742_v0  ;;  %v6846_v6 = vpop.permute.xlu0 %6845  ;;  %v5305_v0 = vmul.f32 %v9800_v55, %v5113_v11  ;;  %v5304_v59 = vmul.f32 %v9806_v2, %v5112_v10 }
 0x6f3   : > { %v6848_v32 = vunpack.i.h.bf16 %v6846_v6  ;;  %v6847_v37 = vunpack.i.l.bf16 %v6846_v6  ;;  %v5115_v6 = vld [vmem:[#allocation4 + $0x68] sm:$0xff] }
 0x6f4   : > { %6350 = vst [vmem:[%s9975_s4] sm:$0xff] %v6349_v47  }
 0x6f5   : > { %v5745_v28 = vsel %vm898_vm0, %v5297_v18, %v6848_v32  ;;  %v5744_v33 = vsel %vm898_vm0, %v5296_v44, %v6847_v37  ;;  %v5307_v44 = vmul.f32 %v9804_v49, %v5115_v6  ;;  %v5306_v32 = vmul.f32 %v9810_v38, %v5114_v35  ;;  %v5126_v6 = vld [vmem:[#allocation4 + $0xc0] sm:$0xff] }
 0x6f6   : > { %v6354_v4 = vpack.c.bf16 %v5745_v28, %v5744_v33  ;;  %v6851_v56 = vpop.permute.xlu1 %6850  ;;  %v5117_v33 = vld [vmem:[#allocation4 + $0x78] sm:$0xff] }
 0x6f7   : > { %v6853_v13 = vunpack.i.h.bf16 %v6851_v56  ;;  %v6852_v23 = vunpack.i.l.bf16 %v6851_v56  ;;  %v5309_v56 = vmul.f32 %v9808_v41, %v5117_v33 }
 0x6f8   : > { %6426 = vst [vmem:[%s9975_s4 + $0x8] sm:$0xff] %v6354_v4  }
 0x6f9   : > { %v5747_v16 = vsel %vm898_vm0, %v5299_v51, %v6853_v13  ;;  %v5746_v19 = vsel %vm898_vm0, %v5298_v17, %v6852_v23  ;;  %v5119_v17 = vld [vmem:[#allocation4 + $0x88] sm:$0xff]  ;;  %v5118_v13 = vld [vmem:[#allocation4 + $0x80] sm:$0xff] }
 0x6fa   : > { %v6359_v24 = vpack.c.bf16 %v5747_v16, %v5746_v19  ;;  %v6856_v40 = vpop.permute.xlu0 %6855  ;;  %v5311_v19 = vmul.f32 %v9812_v63, %v5119_v17  ;;  %v5310_v9 = vmul.f32 %v9818_v29, %v5118_v13 }
 0x6fb   : > { %v6858_v39 = vunpack.i.h.bf16 %v6856_v40  ;;  %v6857_v20 = vunpack.i.l.bf16 %v6856_v40  ;;  %v5121_v40 = vld [vmem:[#allocation4 + $0x98] sm:$0xff] }
 0x6fc   : > { %6427 = vst [vmem:[%s9975_s4 + $0x10] sm:$0xff] %v6359_v24  }
 0x6fd   : > { %v5749_v52 = vsel %vm898_vm0, %v5301_v45, %v6858_v39  ;;  %v5748_v58 = vsel %vm898_vm0, %v5300_v48, %v6857_v20  ;;  %v5313_v48 = vmul.f32 %v9816_v7, %v5121_v40  ;;  %v5312_v39 = vmul.f32 %v9822_v26, %v5120_v5 }
 0x6fe   : > { %v6364_v8 = vpack.c.bf16 %v5749_v52, %v5748_v58  ;;  %v6861_v21 = vpop.permute.xlu1 %6860  ;;  %v5123_v58 = vld [vmem:[#allocation4 + $0xa8] sm:$0xff] }
 0x6ff   : > { %v6863_v54 = vunpack.i.h.bf16 %v6861_v21  ;;  %v6862_v36 = vunpack.i.l.bf16 %v6861_v21  ;;  %v5315_v21 = vmul.f32 %v9820_v1, %v5123_v58 }
 0x700   : > { %6428 = vst [vmem:[%s9975_s4 + $0x18] sm:$0xff] %v6364_v8  }
 0x701   : > { %v5751_v42 = vsel %vm898_vm0, %v5303_v34, %v6863_v54  ;;  %v5750_v22 = vsel %vm898_vm0, %v5302_v57, %v6862_v36  ;;  %v10508_v57 = vld [vmem:[#allocation48_spill] sm:$0xff] }
 0x702   : > { %v6369_v14 = vpack.c.bf16 %v5751_v42, %v5750_v22  ;;  %v6866_v12 = vpop.permute.xlu0 %6865  ;;  %v5314_v34 = vmul.f32 %v10508_v57, %v5122_v53  ;;  %v5125_v42 = vld [vmem:[#allocation4 + $0xb8] sm:$0xff]  ;;  %v5124_v22 = vld [vmem:[#allocation4 + $0xb0] sm:$0xff] }
 0x703   : > { %v6868_v62 = vunpack.i.h.bf16 %v6866_v12  ;;  %v6867_v15 = vunpack.i.l.bf16 %v6866_v12  ;;  %v10518_v53 = vld [vmem:[#allocation66_spill] sm:$0xff] }
 0x704   : > { %6429 = vst [vmem:[%s9975_s4 + $0x20] sm:$0xff] %v6369_v14   ;;  %v10509_v14 = vld [vmem:[#allocation46_spill] sm:$0xff] }
 0x705   : > { %v5753_v61 = vsel %vm898_vm0, %v5305_v0, %v6868_v62  ;;  %v5752_v47 = vsel %vm898_vm0, %v5304_v59, %v6867_v15  ;;  %v5317_v12 = vmul.f32 %v10509_v14, %v5125_v42  ;;  %v10510_v0 = vld [vmem:[#allocation57_spill] sm:$0xff] }
 0x706   : > { %v6374_v18 = vpack.c.bf16 %v5753_v61, %v5752_v47  ;;  %v6871_v46 = vpop.permute.xlu1 %6870  ;;  %v5316_v59 = vmul.f32 %v10510_v0, %v5124_v22  ;;  %v5127_v47 = vld [vmem:[#allocation4 + $0xc8] sm:$0xff] }
 0x707   : > { %v6873_v37 = vunpack.i.h.bf16 %v6871_v46  ;;  %v6872_v55 = vunpack.i.l.bf16 %v6871_v46  ;;  %v10511_v46 = vld [vmem:[#allocation50_spill] sm:$0xff] }
 0x708   : > { %6430 = vst [vmem:[%s9975_s4 + $0x28] sm:$0xff] %v6374_v18  }
 0x709   : > { %v5755_v2 = vsel %vm898_vm0, %v5307_v44, %v6873_v37  ;;  %v5754_v28 = vsel %vm898_vm0, %v5306_v32, %v6872_v55  ;;  %v5319_v44 = vmul.f32 %v10511_v46, %v5127_v47  ;;  %v10512_v32 = vld [vmem:[#allocation60_spill] sm:$0xff] }
 0x70a   : > { %v6379_v3 = vpack.c.bf16 %v5755_v2, %v5754_v28  ;;  %v6876_v4 = vpop.permute.xlu0 %6875  ;;  %v5318_v37 = vmul.f32 %v10512_v32, %v5126_v6 }
 0x70b   : > { %v6878_v51 = vunpack.i.h.bf16 %v6876_v4  ;;  %v6877_v49 = vunpack.i.l.bf16 %v6876_v4 }
 0x70c   : > { %6431 = vst [vmem:[%s9975_s4 + $0x30] sm:$0xff] %v6379_v3   ;;  %v5128_v3 = vld [vmem:[#allocation4 + $0xd0] sm:$0xff] }
 0x70d   : > { %v5757_v38 = vsel %vm898_vm0, %v5309_v56, %v6878_v51  ;;  %v5756_v43 = vsel %vm898_vm0, %v5308_v60, %v6877_v49  ;;  %v10513_v60 = vld [vmem:[#allocation52_spill] sm:$0xff]  ;;  %v10514_v49 = vld [vmem:[#allocation63_spill] sm:$0xff] }
 0x70e   : > { %v6384_v23 = vpack.c.bf16 %v5757_v38, %v5756_v43  ;;  %v6881_v16 = vpop.permute.xlu1 %6880  ;;  %v5321_v51 = vmul.f32 %v10513_v60, %v5129_v31  ;;  %v5320_v38 = vmul.f32 %v10514_v49, %v5128_v3 }
 0x70f   : > { %v6883_v25 = vunpack.i.h.bf16 %v6881_v16  ;;  %v6882_v41 = vunpack.i.l.bf16 %v6881_v16  ;;  %v5131_v16 = vld [vmem:[#allocation4 + $0xe8] sm:$0xff] }
 0x710   : > { %6432 = vst [vmem:[%s9975_s4 + $0x38] sm:$0xff] %v6384_v23  }
 0x711   : > { %v5759_v30 = vsel %vm898_vm0, %v5311_v19, %v6883_v25  ;;  %v5758_v24 = vsel %vm898_vm0, %v5310_v9, %v6882_v41  ;;  %v5130_v19 = vld [vmem:[#allocation4 + $0xe0] sm:$0xff]  ;;  %v10515_v41 = vld [vmem:[#allocation54_spill] sm:$0xff] }
 0x712   : > { %v6389_v45 = vpack.c.bf16 %v5759_v30, %v5758_v24  ;;  %v6886_v27 = vpop.permute.xlu0 %6885  ;;  %v5323_v30 = vmul.f32 %v10515_v41, %v5131_v16  ;;  %v10516_v24 = vld [vmem:[#allocation65_spill] sm:$0xff] }
 0x713   : > { %v6888_v20 = vunpack.i.h.bf16 %v6886_v27  ;;  %v6887_v63 = vunpack.i.l.bf16 %v6886_v27  ;;  %v5322_v40 = vmul.f32 %v10516_v24, %v5130_v19 }
 0x714   : > { %6433 = vst [vmem:[%s9975_s4 + $0x40] sm:$0xff] %v6389_v45  }
 0x715   : > { %v5761_v29 = vsel %vm898_vm0, %v5313_v48, %v6888_v20  ;;  %v5760_v52 = vsel %vm898_vm0, %v5312_v39, %v6887_v63  ;;  %v5133_v39 = vld [vmem:[#allocation4 + $0xf8] sm:$0xff]  ;;  %v5132_v20 = vld [vmem:[#allocation4 + $0xf0] sm:$0xff] }
 0x716   : > { %v6394_v50 = vpack.c.bf16 %v5761_v29, %v5760_v52  ;;  %v6891_v8 = vpop.permute.xlu1 %6890  ;;  %v10517_v52 = vld [vmem:[#allocation69_spill] sm:$0xff] }
 0x717   : > { %v6893_v54 = vunpack.i.h.bf16 %v6891_v8  ;;  %v6892_v7 = vunpack.i.l.bf16 %v6891_v8  ;;  %v5325_v58 = vmul.f32 %v10517_v52, %v5133_v39 }
 0x718   : > { %6434 = vst [vmem:[%s9975_s4 + $0x48] sm:$0xff] %v6394_v50   ;;  %v5324_v50 = vmul.f32 %v10518_v53, %v5132_v20 }
 0x719   : > { %v5763_v26 = vsel %vm898_vm0, %v5315_v21, %v6893_v54  ;;  %v5762_v36 = vsel %vm898_vm0, %v5314_v34, %v6892_v7 }
 0x71a   : > { %v6399_v11 = vpack.c.bf16 %v5763_v26, %v5762_v36  ;;  %v6896_v10 = vpop.permute.xlu0 %6895 }
 0x71b   : > { %v6898_v62 = vunpack.i.h.bf16 %v6896_v10  ;;  %v6897_v1 = vunpack.i.l.bf16 %v6896_v10 }
 0x71c   : > { %6435 = vst [vmem:[%s9975_s4 + $0x50] sm:$0xff] %v6399_v11  }
 0x71d   : > { %v5765_v15 = vsel %vm898_vm0, %v5317_v12, %v6898_v62  ;;  %v5764_v61 = vsel %vm898_vm0, %v5316_v59, %v6897_v1 }
 0x71e   : > { %v6404_v35 = vpack.c.bf16 %v5765_v15, %v5764_v61  ;;  %v6901_v18 = vpop.permute.xlu1 %6900 }
 0x71f   : > { %v6903_v55 = vunpack.i.h.bf16 %v6901_v18  ;;  %v6902_v2 = vunpack.i.l.bf16 %v6901_v18 }
 0x720   : > { %6436 = vst [vmem:[%s9975_s4 + $0x58] sm:$0xff] %v6404_v35  }
 0x721   : > { %v5767_v28 = vsel %vm898_vm0, %v5319_v44, %v6903_v55  ;;  %v5766_v33 = vsel %vm898_vm0, %v5318_v37, %v6902_v2 }
 0x722   : > { %v6409_v4 = vpack.c.bf16 %v5767_v28, %v5766_v33  ;;  %v6906_v56 = vpop.permute.xlu0 %6905 }
 0x723   : > { %v6908_v43 = vunpack.i.h.bf16 %v6906_v56  ;;  %v6907_v17 = vunpack.i.l.bf16 %v6906_v56 }
 0x724   : > { %6437 = vst [vmem:[%s9975_s4 + $0x60] sm:$0xff] %v6409_v4  }
 0x725   : > { %v5769_v13 = vsel %vm898_vm0, %v5321_v51, %v6908_v43  ;;  %v5768_v23 = vsel %vm898_vm0, %v5320_v38, %v6907_v17 }
 0x726   : > { %v6414_v9 = vpack.c.bf16 %v5769_v13, %v5768_v23  ;;  %v6911_v25 = vpop.permute.xlu1 %6910 }
 0x727   : > { %v6913_v5 = vunpack.i.h.bf16 %v6911_v25  ;;  %v6912_v45 = vunpack.i.l.bf16 %v6911_v25 }
 0x728   : > { %6438 = vst [vmem:[%s9975_s4 + $0x68] sm:$0xff] %v6414_v9  }
 0x729   : > { %v5771_v27 = vsel %vm898_vm0, %v5323_v30, %v6913_v5  ;;  %v5770_v48 = vsel %vm898_vm0, %v5322_v40, %v6912_v45 }
 0x72a   : > { %v6419_v63 = vpack.c.bf16 %v5771_v27, %v5770_v48  ;;  %v6916_v29 = vpop.permute.xlu0 %6915 }
 0x72b   : > { %v6918_v8 = vunpack.i.h.bf16 %v6916_v29  ;;  %v6917_v21 = vunpack.i.l.bf16 %v6916_v29 }
 0x72c   : > { %6439 = vst [vmem:[%s9975_s4 + $0x70] sm:$0xff] %v6419_v63  }
 0x72d   : > { %v5773_v57 = vsel %vm898_vm0, %v5325_v58, %v6918_v8  ;;  %v5772_v34 = vsel %vm898_vm0, %v5324_v50, %v6917_v21 }
 0x72e   : > { %v6424_v54 = vpack.c.bf16 %v5773_v57, %v5772_v34 }
 0x730   : > { %6440 = vst [vmem:[%s9975_s4 + $0x78] sm:$0xff] %v6424_v54  }
 0x731 PF: > { %s13_s16 = sadd.s32 1, %s7565_s16   ;;  %s10519_s12 = smov %s7553_s13 }
 0x732   : > { %p10_p10 = scmp.ge.s32.totalorder %s13_s16, 4   ;;  %s10520_s13 = smov %s7629_s21 }
 0x733   : > { %s10521_s14 = smov %s7561_s15  ;;  %s10522_s15 = smov %s10524_s17 }
 0x734   :  { %12 = sbr.rel (!%p10_p10) target bundleno = 3 (0x3), region = 217 }

</bundles_post_ra>
